<compile_context>
chip_gen: v6e
topology: v6e:2x2x1
jax: 0.10.0
libtpu: 0.0.40
codegen_flags: <defaults>
</compile_context>

<pallas_src>
import math
import functools

import jax
import jax.numpy as jnp
from jax import lax
from jax.experimental import pallas as pl
from jax.experimental.pallas import tpu as pltpu

PADDING = 15                      # matches FNO3d.self.padding
_VMEM_LIMIT = 32 * 1024 * 1024    # explicit scoped-VMEM budget (safe on v5e/v6e/v7x)


# ----------------------------------------------------------------------------
# helpers
# ----------------------------------------------------------------------------
def _round_up(x, m):
    return ((x + m - 1) // m) * m


def _lane_tile(n_lanes, bytes_per_lane, target_bytes=4 << 20, max_lanes=16384):
    """Pick a lane (last-dim) tile: multiple of 128, sized so each grid step
    streams ~target_bytes (amortizes per-step overhead) without blowing VMEM."""
    t = max(128, min(max_lanes, target_bytes // max(int(bytes_per_lane), 1)))
    t = (t // 128) * 128
    t = min(t, _round_up(max(int(n_lanes), 1), 128))
    return int(max(t, 128))


def _pad_lanes(a, n_to):
    n = a.shape[-1]
    if n == n_to:
        return a
    pad = [(0, 0)] * (a.ndim - 1) + [(0, n_to - n)]
    return jnp.pad(a, pad)


# ----------------------------------------------------------------------------
# In-kernel exact GELU (erf-based, matches torch.nn.functional.gelu default).
# Abramowitz & Stegun 7.1.26 rational approximation (~1.5e-7 abs err).  The
# divide is routed to the EUP via pl.reciprocal.
# ----------------------------------------------------------------------------
def _erf(x):
    a1, a2, a3, a4, a5 = (0.254829592, -0.284496736, 1.421413741,
                          -1.453152027, 1.061405429)
    p = 0.3275911
    sgn = jnp.where(x >= 0.0, 1.0, -1.0)
    ax = jnp.abs(x)
    t = pl.reciprocal(1.0 + p * ax, approx=False)
    poly = ((((a5 * t + a4) * t + a3) * t + a2) * t + a1) * t
    return sgn * (1.0 - poly * jnp.exp(-ax * ax))


def _gelu(x):
    return 0.5 * x * (1.0 + _erf(x * 0.7071067811865476))


# ----------------------------------------------------------------------------
# Kernel 1: fc0 with in-kernel grid generation.
#   out[co, n] = W[co,0]*u[n] + W[co,1]*gx[n] + W[co,2]*gy[n] + W[co,3]*gz[n] + b[co]
# gx/gy/gz are computed from a lane iota (no HBM grid tensor, no concat copy).
# ----------------------------------------------------------------------------
def _fc0_kernel(x_ref, w_ref, b_ref, o_ref, *, X, Y, Z, tn):
    j = pl.program_id(1)
    lane = lax.broadcasted_iota(jnp.int32, (1, tn), 1).astype(jnp.float32)
    n = lane + (j * tn).astype(jnp.float32)           # flat voxel index (< 2^24)
    yz = float(Y * Z)
    ix = jnp.floor((n + 0.5) * (1.0 / yz))            # n // (Y*Z), float-safe
    rem = n - ix * yz
    iy = jnp.floor((rem + 0.5) * (1.0 / float(Z)))    # rem // Z
    iz = rem - iy * float(Z)
    sx = 1.0 / (X - 1) if X > 1 else 0.0
    sy = 1.0 / (Y - 1) if Y > 1 else 0.0
    sz = 1.0 / (Z - 1) if Z > 1 else 0.0
    gx, gy, gz = ix * sx, iy * sy, iz * sz            # (1, tn) coords in [0, 1]

    w = w_ref[...]                                    # (W, 4)
    u = x_ref[0, :, :]                                # (1, tn) input field
    y = (w[:, 0:1] * u + w[:, 1:2] * gx + w[:, 2:3] * gy + w[:, 3:4] * gz
         + b_ref[...])
    o_ref[0, :, :] = y.astype(o_ref.dtype)


def fc0_with_grid(x, w, b, X, Y, Z):
    """x: (B, X, Y, Z, 1) -> (B, width, X*Y*Z) channels-first."""
    B = x.shape[0]
    Wd = w.shape[0]
    n = X * Y * Z
    tn = _lane_tile(n, 4 * (1 + Wd))
    npad = _round_up(n, tn)
    xf = _pad_lanes(x.reshape(B, 1, n), npad)

    kernel = functools.partial(_fc0_kernel, X=X, Y=Y, Z=Z, tn=tn)
    out = pl.pallas_call(
        kernel,
        out_shape=jax.ShapeDtypeStruct((B, Wd, npad), jnp.float32),
        grid=(B, npad // tn),
        in_specs=[
            pl.BlockSpec((1, 1, tn), lambda bb, jj: (bb, 0, jj)),
            pl.BlockSpec((Wd, 4), lambda bb, jj: (0, 0)),
            pl.BlockSpec((Wd, 1), lambda bb, jj: (0, 0)),
        ],
        out_specs=pl.BlockSpec((1, Wd, tn), lambda bb, jj: (bb, 0, jj)),
        compiler_params=pltpu.CompilerParams(
            dimension_semantics=("parallel", "parallel"),
            vmem_limit_bytes=_VMEM_LIMIT),
    )(xf, w, b.reshape(Wd, 1))
    return out[:, :, :n]


# ----------------------------------------------------------------------------
# Kernel 2: channels-first 1x1 conv (W branch), fused with the spectral-branch
# add and the layer GELU.  out = [gelu]( W @ x + b [+ add] ),  lanes = voxels.
# ----------------------------------------------------------------------------
def _make_pointwise_kernel(apply_gelu, has_add):
    def kernel(x_ref, w_ref, b_ref, *rest):
        if has_add:
            add_ref, o_ref = rest
        else:
            (o_ref,) = rest
        y = jnp.dot(w_ref[...], x_ref[0, :, :],
                    preferred_element_type=jnp.float32)   # (Co, tn) on the MXU
        y = y + b_ref[...]
        if has_add:
            y = y + add_ref[0, :, :]
        if apply_gelu:
            y = _gelu(y)
        o_ref[0, :, :] = y.astype(o_ref.dtype)
    return kernel


def pointwise_conv(x, w, b, *, add=None, apply_gelu=False):
    """x: (B, Ci, N) -> (B, Co, N).  Lane-dense loads/stores."""
    B, Ci, N = x.shape
    Co = w.shape[0]
    bpl = 4 * (Ci + Co + (Co if add is not None else 0))
    tn = _lane_tile(N, bpl)
    npad = _round_up(N, tn)
    xp = _pad_lanes(x, npad)
    args = [xp, w, b.reshape(Co, 1)]
    in_specs = [
        pl.BlockSpec((1, Ci, tn), lambda bb, jj: (bb, 0, jj)),
        pl.BlockSpec((Co, Ci), lambda bb, jj: (0, 0)),
        pl.BlockSpec((Co, 1), lambda bb, jj: (0, 0)),
    ]
    if add is not None:
        args.append(_pad_lanes(add, npad))
        in_specs.append(pl.BlockSpec((1, Co, tn), lambda bb, jj: (bb, 0, jj)))

    out = pl.pallas_call(
        _make_pointwise_kernel(apply_gelu, add is not None),
        out_shape=jax.ShapeDtypeStruct((B, Co, npad), jnp.float32),
        grid=(B, npad // tn),
        in_specs=in_specs,
        out_specs=pl.BlockSpec((1, Co, tn), lambda bb, jj: (bb, 0, jj)),
        compiler_params=pltpu.CompilerParams(
            dimension_semantics=("parallel", "parallel"),
            vmem_limit_bytes=_VMEM_LIMIT),
    )(*args)
    return out[:, :, :N]


# ----------------------------------------------------------------------------
# Kernel 3: fused fc1 -> GELU -> fc2 tail.  The (128, tn) fc1 activation stays
# in VMEM; only the (1, tn) projection is written to HBM.
# ----------------------------------------------------------------------------
def _fc_tail_kernel(x_ref, w1_ref, b1_ref, w2_ref, b2_ref, o_ref):
    h = jnp.dot(w1_ref[...], x_ref[0, :, :],
                preferred_element_type=jnp.float32) + b1_ref[...]
    h = _gelu(h)
    y = jnp.dot(w2_ref[...], h,
                preferred_element_type=jnp.float32) + b2_ref[...]
    o_ref[0, :, :] = y.astype(o_ref.dtype)


def fc_tail(x, w1, b1, w2, b2):
    """x: (B, Ci, N) -> (B, 1, N)."""
    B, Ci, N = x.shape
    H = w1.shape[0]
    Co = w2.shape[0]
    tn = _lane_tile(N, 4 * (Ci + Co + H))   # include VMEM-resident intermediate
    npad = _round_up(N, tn)
    xp = _pad_lanes(x, npad)
    out = pl.pallas_call(
        _fc_tail_kernel,
        out_shape=jax.ShapeDtypeStruct((B, Co, npad), jnp.float32),
        grid=(B, npad // tn),
        in_specs=[
            pl.BlockSpec((1, Ci, tn), lambda bb, jj: (bb, 0, jj)),
            pl.BlockSpec((H, Ci), lambda bb, jj: (0, 0)),
            pl.BlockSpec((H, 1), lambda bb, jj: (0, 0)),
            pl.BlockSpec((Co, H), lambda bb, jj: (0, 0)),
            pl.BlockSpec((Co, 1), lambda bb, jj: (0, 0)),
        ],
        out_specs=pl.BlockSpec((1, Co, tn), lambda bb, jj: (bb, 0, jj)),
        compiler_params=pltpu.CompilerParams(
            dimension_semantics=("parallel", "parallel"),
            vmem_limit_bytes=_VMEM_LIMIT),
    )(xp, w1, b1.reshape(H, 1), w2, b2.reshape(Co, 1))
    return out[:, :, :N]


# ----------------------------------------------------------------------------
# Kernel 4: SpectralConv3d per-mode complex channel mixing.
#   out[b, o, m] = sum_i x[b, i, m] * w[i, o, m]   (complex)
# Modes sit on the lane axis (lane-dense, hundreds-to-thousands of lanes per
# block), the contraction over Ci is a VPU broadcast-MAC (no 2-row MXU pushes),
# and the complex product uses the 3-multiply Karatsuba form.
# ----------------------------------------------------------------------------
def _make_spectral_kernel(B, Ci, Co):
    def kernel(xr_ref, xi_ref, wr_ref, wi_ref, or_ref, oi_ref):
        mL = wr_ref.shape[-1]
        k1 = [jnp.zeros((Co, mL), jnp.float32) for _ in range(B)]
        k2 = [jnp.zeros((Co, mL), jnp.float32) for _ in range(B)]
        k3 = [jnp.zeros((Co, mL), jnp.float32) for _ in range(B)]
        for i in range(Ci):
            wr_i = wr_ref[i]                      # (Co, mL)
            wi_i = wi_ref[i]
            ws_i = wr_i + wi_i                    # Karatsuba weight combos
            wd_i = wi_i - wr_i
            for b in range(B):
                xr_bi = xr_ref[b, i:i + 1, :]     # (1, mL) -> broadcast over Co
                xi_bi = xi_ref[b, i:i + 1, :]
                k1[b] = k1[b] + (xr_bi + xi_bi) * wr_i
                k2[b] = k2[b] + xr_bi * wd_i
                k3[b] = k3[b] + xi_bi * ws_i
        for b in range(B):
            or_ref[b] = k1[b] - k3[b]             # real part
            oi_ref[b] = k1[b] + k2[b]             # imag part
    return kernel


def _spectral_pack_width(Mtot, Ci, Co):
    """Lane tile / padded width for packed spectral weights (deterministic,
    shared by init-time packing and the forward pass)."""
    mL = _lane_tile(Mtot, 8 * Ci * Co)
    return mL, _round_up(Mtot, mL)


def spectral_mode_mul(xr, xi, wr, wi, mL):
    """xr/xi: (B, Ci, Mpad) f32.  wr/wi: (Ci, Co, Mpad) f32 (packed at init).
    Returns (out_r, out_i) of shape (B, Co, Mpad)."""
    B, Ci, Mpad = xr.shape
    Co = wr.shape[1]
    x_spec = pl.BlockSpec((B, Ci, mL), lambda m: (0, 0, m))
    w_spec = pl.BlockSpec((Ci, Co, mL), lambda m: (0, 0, m))
    o_spec = pl.BlockSpec((B, Co, mL), lambda m: (0, 0, m))
    outr, outi = pl.pallas_call(
        _make_spectral_kernel(B, Ci, Co),
        out_shape=(jax.ShapeDtypeStruct((B, Co, Mpad), jnp.float32),
                   jax.ShapeDtypeStruct((B, Co, Mpad), jnp.float32)),
        grid=(Mpad // mL,),
        in_specs=[x_spec, x_spec, w_spec, w_spec],
        out_specs=(o_spec, o_spec),
        compiler_params=pltpu.CompilerParams(
            dimension_semantics=("parallel",),
            vmem_limit_bytes=_VMEM_LIMIT),
    )(xr, xi, wr, wi)
    return outr, outi


def spectral_conv3d(h, wr, wi, modes):
    """h: (B, Ci, X, Y, Zp) f32.  wr/wi: (Ci, Co, Mpad) packed spectral weights.
    Returns (B, Co, X, Y, Zp) f32."""
    B, Ci, X, Y, Zp = h.shape
    m1, m2, m3 = modes
    Co = wr.shape[1]
    Zf = Zp // 2 + 1
    M1 = m1 * m2 * m3
    mL, Mpad = _spectral_pack_width(4 * M1, Ci, Co)

    # TODO(synk): rfftn/irfftn stay in XLA -- no Pallas TPU FFT primitive.
    x_ft = jnp.fft.rfftn(h, axes=(2, 3, 4))              # (B, Ci, X, Y, Zf) c64

    lo1, hi1 = slice(0, m1), slice(X - m1, X)
    lo2, hi2 = slice(0, m2), slice(Y - m2, Y)
    corners = [x_ft[:, :, lo1, lo2, :m3], x_ft[:, :, hi1, lo2, :m3],
               x_ft[:, :, lo1, hi2, :m3], x_ft[:, :, hi1, hi2, :m3]]
    xm = jnp.concatenate([c.reshape(B, Ci, M1) for c in corners], axis=-1)
    xr = _pad_lanes(jnp.real(xm).astype(jnp.float32), Mpad)
    xi = _pad_lanes(jnp.imag(xm).astype(jnp.float32), Mpad)

    outr, outi = spectral_mode_mul(xr, xi, wr, wi, mL)
    om = (outr[:, :, :4 * M1] + 1j * outi[:, :, :4 * M1]).astype(jnp.complex64)

    out_ft = jnp.zeros((B, Co, X, Y, Zf), jnp.complex64)
    blocks = [om[:, :, k * M1:(k + 1) * M1].reshape(B, Co, m1, m2, m3)
              for k in range(4)]
    out_ft = out_ft.at[:, :, lo1, lo2, :m3].set(blocks[0])
    out_ft = out_ft.at[:, :, hi1, lo2, :m3].set(blocks[1])
    out_ft = out_ft.at[:, :, lo1, hi2, :m3].set(blocks[2])
    out_ft = out_ft.at[:, :, hi1, hi2, :m3].set(blocks[3])

    y = jnp.fft.irfftn(out_ft, s=(X, Y, Zp), axes=(2, 3, 4))
    return y.astype(jnp.float32)


# ----------------------------------------------------------------------------
# FNO3d forward
# ----------------------------------------------------------------------------
def fno3d_forward(x, params, modes):
    """x: (B, X, Y, T, 1) float32 -> (B, X, Y, T, 1) float32."""
    B, X, Y, Z, _ = x.shape

    # fc0 with fused in-kernel grid generation (no get_grid()/concat in HBM).
    w0, b0 = params['fc0']
    h = fc0_with_grid(x, w0, b0, X, Y, Z)                  # (B, W, X*Y*Z)
    Wd = h.shape[1]

    # F.pad(x, [0, padding]) on the time axis.
    h = h.reshape(B, Wd, X, Y, Z)
    h = jnp.pad(h, ((0, 0), (0, 0), (0, 0), (0, 0), (0, PADDING)))
    Zp = Z + PADDING
    Nsp = X * Y * Zp

    # NB: bn0..bn3 exist in __init__ but are unused in forward() -> skipped.
    for layer in range(4):
        wr, wi = params[f'conv{layer}']
        spec = spectral_conv3d(h, wr, wi, modes)           # K(u): (B, W, X, Y, Zp)
        w, b = params[f'w{layer}']
        hflat = pointwise_conv(h.reshape(B, Wd, Nsp), w, b,
                               add=spec.reshape(B, Wd, Nsp),
                               apply_gelu=(layer != 3))    # last layer: no gelu
        h = hflat.reshape(B, Wd, X, Y, Zp)

    h = h[..., :Z]                                         # drop time padding
    h = h.reshape(B, Wd, X * Y * Z)
    w1, b1 = params['fc1']
    w2, b2 = params['fc2']
    out = fc_tail(h, w1, b1, w2, b2)                       # fused fc1+gelu+fc2
    return out.reshape(B, X, Y, Z, 1)


# ----------------------------------------------------------------------------
# Deterministic parameter init (same parameter shapes as the PyTorch module;
# synthetic values).  Spectral weights are split into real/imag f32 and packed
# (4 corner blocks concatenated on the mode axis, lane-padded) ONCE here.
# ----------------------------------------------------------------------------
def init_params(key, modes, width):
    m1, m2, m3 = modes
    M1 = m1 * m2 * m3
    keys = iter(jax.random.split(key, 64))

    def linear(cin, cout):
        bound = 1.0 / math.sqrt(cin)
        w = jax.random.uniform(next(keys), (cout, cin), jnp.float32, -bound, bound)
        b = jax.random.uniform(next(keys), (cout,), jnp.float32, -bound, bound)
        return w, b

    params = {
        'fc0': linear(4, width),
        'fc1': linear(width, 128),
        'fc2': linear(128, 1),
    }
    scale = 1.0 / (width * width)
    _, Mpad = _spectral_pack_width(4 * M1, width, width)
    for layer in range(4):
        params[f'w{layer}'] = linear(width, width)   # 1x1 Conv3d as (Co, Ci) + bias
        wr_parts, wi_parts = [], []
        for _ in range(4):                           # weights1..weights4
            re = scale * jax.random.uniform(next(keys), (width, width, m1, m2, m3),
                                            jnp.float32)
            im = scale * jax.random.uniform(next(keys), (width, width, m1, m2, m3),
                                            jnp.float32)
            wr_parts.append(re.reshape(width, width, M1))
            wi_parts.append(im.reshape(width, width, M1))
        wr = _pad_lanes(jnp.concatenate(wr_parts, axis=-1), Mpad)
        wi = _pad_lanes(jnp.concatenate(wi_parts, axis=-1), Mpad)
        params[f'conv{layer}'] = (wr, wi)
    return params


if __name__ == "__main__":
    key = jax.random.PRNGKey(0)
    k_params, k_x = jax.random.split(key)

    B, X, Y, T = 2, 8, 8, 8
    modes = (4, 4, 3)
    width = 8

    params = init_params(k_params, modes, width)
    x = jax.random.normal(k_x, (B, X, Y, T, 1), jnp.float32)

    fwd = jax.jit(functools.partial(fno3d_forward, modes=modes))
    out = jax.block_until_ready(fwd(x, params))

    assert out.shape == (B, X, Y, T, 1), out.shape
    assert bool(jnp.all(jnp.isfinite(out)))
    print("KERNEL_OK")
</pallas_src>

<mosaic_0001>
module attributes {stable_mosaic.version = 11 : i64} {
  func.func @_fc0_kernel(%arg0: i32, %arg1: i32, %arg2: memref<1x1x512xf32, #tpu.memory_space<vmem>>, %arg3: memref<8x4xf32, #tpu.memory_space<vmem>>, %arg4: memref<8x1xf32, #tpu.memory_space<vmem>>, %arg5: memref<1x8x512xf32, #tpu.memory_space<vmem>>) attributes {dimension_semantics = [#tpu.dimension_semantics<parallel>, #tpu.dimension_semantics<parallel>], iteration_bounds = array<i64: 2, 1>, scalar_prefetch = 0 : i64, scratch_operands = 0 : i64, tpu.core_type = #tpu.core_type<tc>, window_params = [{transform_indices = @transform_0, window_bounds = array<i64: 1, 1, 512>}, {pipeline_mode = #tpu.pipeline_mode<synchronous>, transform_indices = @transform_1, window_bounds = array<i64: 8, 4>}, {pipeline_mode = #tpu.pipeline_mode<synchronous>, transform_indices = @transform_2, window_bounds = array<i64: 8, 1>}, {transform_indices = @transform_3, window_bounds = array<i64: 1, 8, 512>}]} {
    %0 = tpu.iota {dimensions = array<i32: 1>} : vector<1x512xi32>
    %1 = arith.sitofp %0 : vector<1x512xi32> to vector<1x512xf32>
    %c512_i32 = arith.constant 512 : i32
    %2 = arith.muli %arg1, %c512_i32 : i32
    %3 = arith.sitofp %2 : i32 to f32
    %4 = vector.broadcast %3 : f32 to vector<1x512xf32>
    %5 = arith.addf %1, %4 : vector<1x512xf32>
    %cst = arith.constant 5.000000e-01 : f32
    %6 = vector.broadcast %cst : f32 to vector<1x512xf32>
    %7 = arith.addf %5, %6 : vector<1x512xf32>
    %cst_0 = arith.constant 1.562500e-02 : f32
    %8 = vector.broadcast %cst_0 : f32 to vector<1x512xf32>
    %9 = arith.mulf %7, %8 : vector<1x512xf32>
    %10 = math.floor %9 : vector<1x512xf32>
    %cst_1 = arith.constant 6.400000e+01 : f32
    %11 = vector.broadcast %cst_1 : f32 to vector<1x512xf32>
    %12 = arith.mulf %10, %11 : vector<1x512xf32>
    %13 = arith.subf %5, %12 : vector<1x512xf32>
    %cst_2 = arith.constant 5.000000e-01 : f32
    %14 = vector.broadcast %cst_2 : f32 to vector<1x512xf32>
    %15 = arith.addf %13, %14 : vector<1x512xf32>
    %cst_3 = arith.constant 1.250000e-01 : f32
    %16 = vector.broadcast %cst_3 : f32 to vector<1x512xf32>
    %17 = arith.mulf %15, %16 : vector<1x512xf32>
    %18 = math.floor %17 : vector<1x512xf32>
    %cst_4 = arith.constant 8.000000e+00 : f32
    %19 = vector.broadcast %cst_4 : f32 to vector<1x512xf32>
    %20 = arith.mulf %18, %19 : vector<1x512xf32>
    %21 = arith.subf %13, %20 : vector<1x512xf32>
    %cst_5 = arith.constant 0.142857149 : f32
    %22 = vector.broadcast %cst_5 : f32 to vector<1x512xf32>
    %23 = arith.mulf %10, %22 : vector<1x512xf32>
    %cst_6 = arith.constant 0.142857149 : f32
    %24 = vector.broadcast %cst_6 : f32 to vector<1x512xf32>
    %25 = arith.mulf %18, %24 : vector<1x512xf32>
    %cst_7 = arith.constant 0.142857149 : f32
    %26 = vector.broadcast %cst_7 : f32 to vector<1x512xf32>
    %27 = arith.mulf %21, %26 : vector<1x512xf32>
    %c0 = arith.constant 0 : index
    %c0_8 = arith.constant 0 : index
    %28 = vector.load %arg3[%c0, %c0_8] : memref<8x4xf32, #tpu.memory_space<vmem>>, vector<8x4xf32>
    %c0_9 = arith.constant 0 : index
    %c0_10 = arith.constant 0 : index
    %c0_11 = arith.constant 0 : index
    %29 = vector.load %arg2[%c0_9, %c0_10, %c0_11] : memref<1x1x512xf32, #tpu.memory_space<vmem>>, vector<1x1x512xf32>
    %30 = vector.shape_cast %29 : vector<1x1x512xf32> to vector<1x512xf32>
    %31 = vector.extract_strided_slice %28 {offsets = [0, 0], sizes = [8, 1], strides = [1, 1]} : vector<8x4xf32> to vector<8x1xf32>
    %32 = vector.broadcast %31 : vector<8x1xf32> to vector<8x512xf32>
    %33 = vector.broadcast %30 : vector<1x512xf32> to vector<8x512xf32>
    %34 = arith.mulf %32, %33 : vector<8x512xf32>
    %35 = vector.extract_strided_slice %28 {offsets = [0, 1], sizes = [8, 1], strides = [1, 1]} : vector<8x4xf32> to vector<8x1xf32>
    %36 = vector.broadcast %35 : vector<8x1xf32> to vector<8x512xf32>
    %37 = vector.broadcast %23 : vector<1x512xf32> to vector<8x512xf32>
    %38 = arith.mulf %36, %37 : vector<8x512xf32>
    %39 = arith.addf %34, %38 : vector<8x512xf32>
    %40 = vector.extract_strided_slice %28 {offsets = [0, 2], sizes = [8, 1], strides = [1, 1]} : vector<8x4xf32> to vector<8x1xf32>
    %41 = vector.broadcast %40 : vector<8x1xf32> to vector<8x512xf32>
    %42 = vector.broadcast %25 : vector<1x512xf32> to vector<8x512xf32>
    %43 = arith.mulf %41, %42 : vector<8x512xf32>
    %44 = arith.addf %39, %43 : vector<8x512xf32>
    %45 = vector.extract_strided_slice %28 {offsets = [0, 3], sizes = [8, 1], strides = [1, 1]} : vector<8x4xf32> to vector<8x1xf32>
    %46 = vector.broadcast %45 : vector<8x1xf32> to vector<8x512xf32>
    %47 = vector.broadcast %27 : vector<1x512xf32> to vector<8x512xf32>
    %48 = arith.mulf %46, %47 : vector<8x512xf32>
    %49 = arith.addf %44, %48 : vector<8x512xf32>
    %c0_12 = arith.constant 0 : index
    %c0_13 = arith.constant 0 : index
    %50 = vector.load %arg4[%c0_12, %c0_13] : memref<8x1xf32, #tpu.memory_space<vmem>>, vector<8x1xf32>
    %51 = vector.broadcast %50 : vector<8x1xf32> to vector<8x512xf32>
    %52 = arith.addf %49, %51 : vector<8x512xf32>
    %c0_14 = arith.constant 0 : index
    %c0_15 = arith.constant 0 : index
    %c0_16 = arith.constant 0 : index
    %53 = vector.load %arg5[%c0_14, %c0_15, %c0_16] : memref<1x8x512xf32, #tpu.memory_space<vmem>>, vector<1x8x512xf32>
    %54 = vector.shape_cast %53 : vector<1x8x512xf32> to vector<8x512xf32>
    %55 = vector.shape_cast %52 : vector<8x512xf32> to vector<1x8x512xf32>
    tpu.vector_store %arg5[%c0_14, %c0_15, %c0_16], %55 {strides = array<i32>} : memref<1x8x512xf32, #tpu.memory_space<vmem>>, vector<1x8x512xf32>,
    return
  }
  func.func @transform_0(%arg0: i32, %arg1: i32) -> (i32, i32, i32) {
    %c0_i32 = arith.constant 0 : i32
    %c0_i32_0 = arith.constant 0 : i32
    return %arg0, %c0_i32, %arg1 : i32, i32, i32
  }
  func.func @transform_1(%arg0: i32, %arg1: i32) -> (i32, i32) {
    %c0_i32 = arith.constant 0 : i32
    %c0_i32_0 = arith.constant 0 : i32
    %c0_i32_1 = arith.constant 0 : i32
    return %c0_i32, %c0_i32_0 : i32, i32
  }
  func.func @transform_2(%arg0: i32, %arg1: i32) -> (i32, i32) {
    %c0_i32 = arith.constant 0 : i32
    %c0_i32_0 = arith.constant 0 : i32
    %c0_i32_1 = arith.constant 0 : i32
    return %c0_i32, %c0_i32_0 : i32, i32
  }
  func.func @transform_3(%arg0: i32, %arg1: i32) -> (i32, i32, i32) {
    %c0_i32 = arith.constant 0 : i32
    %c0_i32_0 = arith.constant 0 : i32
    return %arg0, %c0_i32, %arg1 : i32, i32, i32
  }
}

module attributes {stable_mosaic.version = 11 : i64} {
  func.func @kernel(%arg0: i32, %arg1: memref<2x8x256xf32, #tpu.memory_space<vmem>>, %arg2: memref<2x8x256xf32, #tpu.memory_space<vmem>>, %arg3: memref<8x8x256xf32, #tpu.memory_space<vmem>>, %arg4: memref<8x8x256xf32, #tpu.memory_space<vmem>>, %arg5: memref<2x8x256xf32, #tpu.memory_space<vmem>>, %arg6: memref<2x8x256xf32, #tpu.memory_space<vmem>>) attributes {dimension_semantics = [#tpu.dimension_semantics<parallel>], iteration_bounds = array<i64: 1>, scalar_prefetch = 0 : i64, scratch_operands = 0 : i64, tpu.core_type = #tpu.core_type<tc>, window_params = [{transform_indices = @transform_0, window_bounds = array<i64: 2, 8, 256>}, {transform_indices = @transform_1, window_bounds = array<i64: 2, 8, 256>}, {transform_indices = @transform_2, window_bounds = array<i64: 8, 8, 256>}, {transform_indices = @transform_3, window_bounds = array<i64: 8, 8, 256>}, {transform_indices = @transform_4, window_bounds = array<i64: 2, 8, 256>}, {transform_indices = @transform_5, window_bounds = array<i64: 2, 8, 256>}]} {
    %cst = arith.constant 0.000000e+00 : f32
    %0 = vector.broadcast %cst : f32 to vector<8x256xf32>
    %cst_0 = arith.constant 0.000000e+00 : f32
    %1 = vector.broadcast %cst_0 : f32 to vector<8x256xf32>
    %cst_1 = arith.constant 0.000000e+00 : f32
    %2 = vector.broadcast %cst_1 : f32 to vector<8x256xf32>
    %cst_2 = arith.constant 0.000000e+00 : f32
    %3 = vector.broadcast %cst_2 : f32 to vector<8x256xf32>
    %cst_3 = arith.constant 0.000000e+00 : f32
    %4 = vector.broadcast %cst_3 : f32 to vector<8x256xf32>
    %cst_4 = arith.constant 0.000000e+00 : f32
    %5 = vector.broadcast %cst_4 : f32 to vector<8x256xf32>
    %c0 = arith.constant 0 : index
    %c0_5 = arith.constant 0 : index
    %c0_6 = arith.constant 0 : index
    %6 = vector.load %arg3[%c0, %c0_5, %c0_6] : memref<8x8x256xf32, #tpu.memory_space<vmem>>, vector<1x8x256xf32>
    %7 = vector.shape_cast %6 : vector<1x8x256xf32> to vector<8x256xf32>
    %c0_7 = arith.constant 0 : index
    %c0_8 = arith.constant 0 : index
    %c0_9 = arith.constant 0 : index
    %8 = vector.load %arg4[%c0_7, %c0_8, %c0_9] : memref<8x8x256xf32, #tpu.memory_space<vmem>>, vector<1x8x256xf32>
    %9 = vector.shape_cast %8 : vector<1x8x256xf32> to vector<8x256xf32>
    %10 = arith.addf %7, %9 : vector<8x256xf32>
    %11 = arith.subf %9, %7 : vector<8x256xf32>
    %c0_10 = arith.constant 0 : index
    %c0_11 = arith.constant 0 : index
    %c0_12 = arith.constant 0 : index
    %12 = vector.load %arg1[%c0_10, %c0_11, %c0_12] : memref<2x8x256xf32, #tpu.memory_space<vmem>>, vector<1x1x256xf32>
    %13 = vector.shape_cast %12 : vector<1x1x256xf32> to vector<1x256xf32>
    %c0_13 = arith.constant 0 : index
    %c0_14 = arith.constant 0 : index
    %c0_15 = arith.constant 0 : index
    %14 = vector.load %arg2[%c0_13, %c0_14, %c0_15] : memref<2x8x256xf32, #tpu.memory_space<vmem>>, vector<1x1x256xf32>
    %15 = vector.shape_cast %14 : vector<1x1x256xf32> to vector<1x256xf32>
    %16 = arith.addf %13, %15 : vector<1x256xf32>
    %17 = vector.broadcast %16 : vector<1x256xf32> to vector<8x256xf32>
    %18 = arith.mulf %17, %7 : vector<8x256xf32>
    %19 = arith.addf %0, %18 : vector<8x256xf32>
    %20 = vector.broadcast %13 : vector<1x256xf32> to vector<8x256xf32>
    %21 = arith.mulf %20, %11 : vector<8x256xf32>
    %22 = arith.addf %2, %21 : vector<8x256xf32>
    %23 = vector.broadcast %15 : vector<1x256xf32> to vector<8x256xf32>
    %24 = arith.mulf %23, %10 : vector<8x256xf32>
    %25 = arith.addf %4, %24 : vector<8x256xf32>
    %c1 = arith.constant 1 : index
    %c0_16 = arith.constant 0 : index
    %c0_17 = arith.constant 0 : index
    %26 = vector.load %arg1[%c1, %c0_16, %c0_17] : memref<2x8x256xf32, #tpu.memory_space<vmem>>, vector<1x1x256xf32>
    %27 = vector.shape_cast %26 : vector<1x1x256xf32> to vector<1x256xf32>
    %c1_18 = arith.constant 1 : index
    %c0_19 = arith.constant 0 : index
    %c0_20 = arith.constant 0 : index
    %28 = vector.load %arg2[%c1_18, %c0_19, %c0_20] : memref<2x8x256xf32, #tpu.memory_space<vmem>>, vector<1x1x256xf32>
    %29 = vector.shape_cast %28 : vector<1x1x256xf32> to vector<1x256xf32>
    %30 = arith.addf %27, %29 : vector<1x256xf32>
    %31 = vector.broadcast %30 : vector<1x256xf32> to vector<8x256xf32>
    %32 = arith.mulf %31, %7 : vector<8x256xf32>
    %33 = arith.addf %1, %32 : vector<8x256xf32>
    %34 = vector.broadcast %27 : vector<1x256xf32> to vector<8x256xf32>
    %35 = arith.mulf %34, %11 : vector<8x256xf32>
    %36 = arith.addf %3, %35 : vector<8x256xf32>
    %37 = vector.broadcast %29 : vector<1x256xf32> to vector<8x256xf32>
    %38 = arith.mulf %37, %10 : vector<8x256xf32>
    %39 = arith.addf %5, %38 : vector<8x256xf32>
    %c1_21 = arith.constant 1 : index
    %c0_22 = arith.constant 0 : index
    %c0_23 = arith.constant 0 : index
    %40 = vector.load %arg3[%c1_21, %c0_22, %c0_23] : memref<8x8x256xf32, #tpu.memory_space<vmem>>, vector<1x8x256xf32>
    %41 = vector.shape_cast %40 : vector<1x8x256xf32> to vector<8x256xf32>
    %c1_24 = arith.constant 1 : index
    %c0_25 = arith.constant 0 : index
    %c0_26 = arith.constant 0 : index
    %42 = vector.load %arg4[%c1_24, %c0_25, %c0_26] : memref<8x8x256xf32, #tpu.memory_space<vmem>>, vector<1x8x256xf32>
    %43 = vector.shape_cast %42 : vector<1x8x256xf32> to vector<8x256xf32>
    %44 = arith.addf %41, %43 : vector<8x256xf32>
    %45 = arith.subf %43, %41 : vector<8x256xf32>
    %c0_27 = arith.constant 0 : index
    %c1_28 = arith.constant 1 : index
    %c0_29 = arith.constant 0 : index
    %46 = vector.load %arg1[%c0_27, %c1_28, %c0_29] : memref<2x8x256xf32, #tpu.memory_space<vmem>>, vector<1x1x256xf32>
    %47 = vector.shape_cast %46 : vector<1x1x256xf32> to vector<1x256xf32>
    %c0_30 = arith.constant 0 : index
    %c1_31 = arith.constant 1 : index
    %c0_32 = arith.constant 0 : index
    %48 = vector.load %arg2[%c0_30, %c1_31, %c0_32] : memref<2x8x256xf32, #tpu.memory_space<vmem>>, vector<1x1x256xf32>
    %49 = vector.shape_cast %48 : vector<1x1x256xf32> to vector<1x256xf32>
    %50 = arith.addf %47, %49 : vector<1x256xf32>
    %51 = vector.broadcast %50 : vector<1x256xf32> to vector<8x256xf32>
    %52 = arith.mulf %51, %41 : vector<8x256xf32>
    %53 = arith.addf %19, %52 : vector<8x256xf32>
    %54 = vector.broadcast %47 : vector<1x256xf32> to vector<8x256xf32>
    %55 = arith.mulf %54, %45 : vector<8x256xf32>
    %56 = arith.addf %22, %55 : vector<8x256xf32>
    %57 = vector.broadcast %49 : vector<1x256xf32> to vector<8x256xf32>
    %58 = arith.mulf %57, %44 : vector<8x256xf32>
    %59 = arith.addf %25, %58 : vector<8x256xf32>
    %c1_33 = arith.constant 1 : index
    %c1_34 = arith.constant 1 : index
    %c0_35 = arith.constant 0 : index
    %60 = vector.load %arg1[%c1_33, %c1_34, %c0_35] : memref<2x8x256xf32, #tpu.memory_space<vmem>>, vector<1x1x256xf32>
    %61 = vector.shape_cast %60 : vector<1x1x256xf32> to vector<1x256xf32>
    %c1_36 = arith.constant 1 : index
    %c1_37 = arith.constant 1 : index
    %c0_38 = arith.constant 0 : index
    %62 = vector.load %arg2[%c1_36, %c1_37, %c0_38] : memref<2x8x256xf32, #tpu.memory_space<vmem>>, vector<1x1x256xf32>
    %63 = vector.shape_cast %62 : vector<1x1x256xf32> to vector<1x256xf32>
    %64 = arith.addf %61, %63 : vector<1x256xf32>
    %65 = vector.broadcast %64 : vector<1x256xf32> to vector<8x256xf32>
    %66 = arith.mulf %65, %41 : vector<8x256xf32>
    %67 = arith.addf %33, %66 : vector<8x256xf32>
    %68 = vector.broadcast %61 : vector<1x256xf32> to vector<8x256xf32>
    %69 = arith.mulf %68, %45 : vector<8x256xf32>
    %70 = arith.addf %36, %69 : vector<8x256xf32>
    %71 = vector.broadcast %63 : vector<1x256xf32> to vector<8x256xf32>
    %72 = arith.mulf %71, %44 : vector<8x256xf32>
    %73 = arith.addf %39, %72 : vector<8x256xf32>
    %c2 = arith.constant 2 : index
    %c0_39 = arith.constant 0 : index
    %c0_40 = arith.constant 0 : index
    %74 = vector.load %arg3[%c2, %c0_39, %c0_40] : memref<8x8x256xf32, #tpu.memory_space<vmem>>, vector<1x8x256xf32>
    %75 = vector.shape_cast %74 : vector<1x8x256xf32> to vector<8x256xf32>
    %c2_41 = arith.constant 2 : index
    %c0_42 = arith.constant 0 : index
    %c0_43 = arith.constant 0 : index
    %76 = vector.load %arg4[%c2_41, %c0_42, %c0_43] : memref<8x8x256xf32, #tpu.memory_space<vmem>>, vector<1x8x256xf32>
    %77 = vector.shape_cast %76 : vector<1x8x256xf32> to vector<8x256xf32>
    %78 = arith.addf %75, %77 : vector<8x256xf32>
    %79 = arith.subf %77, %75 : vector<8x256xf32>
    %c0_44 = arith.constant 0 : index
    %c2_45 = arith.constant 2 : index
    %c0_46 = arith.constant 0 : index
    %80 = vector.load %arg1[%c0_44, %c2_45, %c0_46] : memref<2x8x256xf32, #tpu.memory_space<vmem>>, vector<1x1x256xf32>
    %81 = vector.shape_cast %80 : vector<1x1x256xf32> to vector<1x256xf32>
    %c0_47 = arith.constant 0 : index
    %c2_48 = arith.constant 2 : index
    %c0_49 = arith.constant 0 : index
    %82 = vector.load %arg2[%c0_47, %c2_48, %c0_49] : memref<2x8x256xf32, #tpu.memory_space<vmem>>, vector<1x1x256xf32>
    %83 = vector.shape_cast %82 : vector<1x1x256xf32> to vector<1x256xf32>
    %84 = arith.addf %81, %83 : vector<1x256xf32>
    %85 = vector.broadcast %84 : vector<1x256xf32> to vector<8x256xf32>
    %86 = arith.mulf %85, %75 : vector<8x256xf32>
    %87 = arith.addf %53, %86 : vector<8x256xf32>
    %88 = vector.broadcast %81 : vector<1x256xf32> to vector<8x256xf32>
    %89 = arith.mulf %88, %79 : vector<8x256xf32>
    %90 = arith.addf %56, %89 : vector<8x256xf32>
    %91 = vector.broadcast %83 : vector<1x256xf32> to vector<8x256xf32>
    %92 = arith.mulf %91, %78 : vector<8x256xf32>
    %93 = arith.addf %59, %92 : vector<8x256xf32>
    %c1_50 = arith.constant 1 : index
    %c2_51 = arith.constant 2 : index
    %c0_52 = arith.constant 0 : index
    %94 = vector.load %arg1[%c1_50, %c2_51, %c0_52] : memref<2x8x256xf32, #tpu.memory_space<vmem>>, vector<1x1x256xf32>
    %95 = vector.shape_cast %94 : vector<1x1x256xf32> to vector<1x256xf32>
    %c1_53 = arith.constant 1 : index
    %c2_54 = arith.constant 2 : index
    %c0_55 = arith.constant 0 : index
    %96 = vector.load %arg2[%c1_53, %c2_54, %c0_55] : memref<2x8x256xf32, #tpu.memory_space<vmem>>, vector<1x1x256xf32>
    %97 = vector.shape_cast %96 : vector<1x1x256xf32> to vector<1x256xf32>
    %98 = arith.addf %95, %97 : vector<1x256xf32>
    %99 = vector.broadcast %98 : vector<1x256xf32> to vector<8x256xf32>
    %100 = arith.mulf %99, %75 : vector<8x256xf32>
    %101 = arith.addf %67, %100 : vector<8x256xf32>
    %102 = vector.broadcast %95 : vector<1x256xf32> to vector<8x256xf32>
    %103 = arith.mulf %102, %79 : vector<8x256xf32>
    %104 = arith.addf %70, %103 : vector<8x256xf32>
    %105 = vector.broadcast %97 : vector<1x256xf32> to vector<8x256xf32>
    %106 = arith.mulf %105, %78 : vector<8x256xf32>
    %107 = arith.addf %73, %106 : vector<8x256xf32>
    %c3 = arith.constant 3 : index
    %c0_56 = arith.constant 0 : index
    %c0_57 = arith.constant 0 : index
    %108 = vector.load %arg3[%c3, %c0_56, %c0_57] : memref<8x8x256xf32, #tpu.memory_space<vmem>>, vector<1x8x256xf32>
    %109 = vector.shape_cast %108 : vector<1x8x256xf32> to vector<8x256xf32>
    %c3_58 = arith.constant 3 : index
    %c0_59 = arith.constant 0 : index
    %c0_60 = arith.constant 0 : index
    %110 = vector.load %arg4[%c3_58, %c0_59, %c0_60] : memref<8x8x256xf32, #tpu.memory_space<vmem>>, vector<1x8x256xf32>
    %111 = vector.shape_cast %110 : vector<1x8x256xf32> to vector<8x256xf32>
    %112 = arith.addf %109, %111 : vector<8x256xf32>
    %113 = arith.subf %111, %109 : vector<8x256xf32>
    %c0_61 = arith.constant 0 : index
    %c3_62 = arith.constant 3 : index
    %c0_63 = arith.constant 0 : index
    %114 = vector.load %arg1[%c0_61, %c3_62, %c0_63] : memref<2x8x256xf32, #tpu.memory_space<vmem>>, vector<1x1x256xf32>
    %115 = vector.shape_cast %114 : vector<1x1x256xf32> to vector<1x256xf32>
    %c0_64 = arith.constant 0 : index
    %c3_65 = arith.constant 3 : index
    %c0_66 = arith.constant 0 : index
    %116 = vector.load %arg2[%c0_64, %c3_65, %c0_66] : memref<2x8x256xf32, #tpu.memory_space<vmem>>, vector<1x1x256xf32>
    %117 = vector.shape_cast %116 : vector<1x1x256xf32> to vector<1x256xf32>
    %118 = arith.addf %115, %117 : vector<1x256xf32>
    %119 = vector.broadcast %118 : vector<1x256xf32> to vector<8x256xf32>
    %120 = arith.mulf %119, %109 : vector<8x256xf32>
    %121 = arith.addf %87, %120 : vector<8x256xf32>
    %122 = vector.broadcast %115 : vector<1x256xf32> to vector<8x256xf32>
    %123 = arith.mulf %122, %113 : vector<8x256xf32>
    %124 = arith.addf %90, %123 : vector<8x256xf32>
    %125 = vector.broadcast %117 : vector<1x256xf32> to vector<8x256xf32>
    %126 = arith.mulf %125, %112 : vector<8x256xf32>
    %127 = arith.addf %93, %126 : vector<8x256xf32>
    %c1_67 = arith.constant 1 : index
    %c3_68 = arith.constant 3 : index
    %c0_69 = arith.constant 0 : index
    %128 = vector.load %arg1[%c1_67, %c3_68, %c0_69] : memref<2x8x256xf32, #tpu.memory_space<vmem>>, vector<1x1x256xf32>
    %129 = vector.shape_cast %128 : vector<1x1x256xf32> to vector<1x256xf32>
    %c1_70 = arith.constant 1 : index
    %c3_71 = arith.constant 3 : index
    %c0_72 = arith.constant 0 : index
    %130 = vector.load %arg2[%c1_70, %c3_71, %c0_72] : memref<2x8x256xf32, #tpu.memory_space<vmem>>, vector<1x1x256xf32>
    %131 = vector.shape_cast %130 : vector<1x1x256xf32> to vector<1x256xf32>
    %132 = arith.addf %129, %131 : vector<1x256xf32>
    %133 = vector.broadcast %132 : vector<1x256xf32> to vector<8x256xf32>
    %134 = arith.mulf %133, %109 : vector<8x256xf32>
    %135 = arith.addf %101, %134 : vector<8x256xf32>
    %136 = vector.broadcast %129 : vector<1x256xf32> to vector<8x256xf32>
    %137 = arith.mulf %136, %113 : vector<8x256xf32>
    %138 = arith.addf %104, %137 : vector<8x256xf32>
    %139 = vector.broadcast %131 : vector<1x256xf32> to vector<8x256xf32>
    %140 = arith.mulf %139, %112 : vector<8x256xf32>
    %141 = arith.addf %107, %140 : vector<8x256xf32>
    %c4 = arith.constant 4 : index
    %c0_73 = arith.constant 0 : index
    %c0_74 = arith.constant 0 : index
    %142 = vector.load %arg3[%c4, %c0_73, %c0_74] : memref<8x8x256xf32, #tpu.memory_space<vmem>>, vector<1x8x256xf32>
    %143 = vector.shape_cast %142 : vector<1x8x256xf32> to vector<8x256xf32>
    %c4_75 = arith.constant 4 : index
    %c0_76 = arith.constant 0 : index
    %c0_77 = arith.constant 0 : index
    %144 = vector.load %arg4[%c4_75, %c0_76, %c0_77] : memref<8x8x256xf32, #tpu.memory_space<vmem>>, vector<1x8x256xf32>
    %145 = vector.shape_cast %144 : vector<1x8x256xf32> to vector<8x256xf32>
    %146 = arith.addf %143, %145 : vector<8x256xf32>
    %147 = arith.subf %145, %143 : vector<8x256xf32>
    %c0_78 = arith.constant 0 : index
    %c4_79 = arith.constant 4 : index
    %c0_80 = arith.constant 0 : index
    %148 = vector.load %arg1[%c0_78, %c4_79, %c0_80] : memref<2x8x256xf32, #tpu.memory_space<vmem>>, vector<1x1x256xf32>
    %149 = vector.shape_cast %148 : vector<1x1x256xf32> to vector<1x256xf32>
    %c0_81 = arith.constant 0 : index
    %c4_82 = arith.constant 4 : index
    %c0_83 = arith.constant 0 : index
    %150 = vector.load %arg2[%c0_81, %c4_82, %c0_83] : memref<2x8x256xf32, #tpu.memory_space<vmem>>, vector<1x1x256xf32>
    %151 = vector.shape_cast %150 : vector<1x1x256xf32> to vector<1x256xf32>
    %152 = arith.addf %149, %151 : vector<1x256xf32>
    %153 = vector.broadcast %152 : vector<1x256xf32> to vector<8x256xf32>
    %154 = arith.mulf %153, %143 : vector<8x256xf32>
    %155 = arith.addf %121, %154 : vector<8x256xf32>
    %156 = vector.broadcast %149 : vector<1x256xf32> to vector<8x256xf32>
    %157 = arith.mulf %156, %147 : vector<8x256xf32>
    %158 = arith.addf %124, %157 : vector<8x256xf32>
    %159 = vector.broadcast %151 : vector<1x256xf32> to vector<8x256xf32>
    %160 = arith.mulf %159, %146 : vector<8x256xf32>
    %161 = arith.addf %127, %160 : vector<8x256xf32>
    %c1_84 = arith.constant 1 : index
    %c4_85 = arith.constant 4 : index
    %c0_86 = arith.constant 0 : index
    %162 = vector.load %arg1[%c1_84, %c4_85, %c0_86] : memref<2x8x256xf32, #tpu.memory_space<vmem>>, vector<1x1x256xf32>
    %163 = vector.shape_cast %162 : vector<1x1x256xf32> to vector<1x256xf32>
    %c1_87 = arith.constant 1 : index
    %c4_88 = arith.constant 4 : index
    %c0_89 = arith.constant 0 : index
    %164 = vector.load %arg2[%c1_87, %c4_88, %c0_89] : memref<2x8x256xf32, #tpu.memory_space<vmem>>, vector<1x1x256xf32>
    %165 = vector.shape_cast %164 : vector<1x1x256xf32> to vector<1x256xf32>
    %166 = arith.addf %163, %165 : vector<1x256xf32>
    %167 = vector.broadcast %166 : vector<1x256xf32> to vector<8x256xf32>
    %168 = arith.mulf %167, %143 : vector<8x256xf32>
    %169 = arith.addf %135, %168 : vector<8x256xf32>
    %170 = vector.broadcast %163 : vector<1x256xf32> to vector<8x256xf32>
    %171 = arith.mulf %170, %147 : vector<8x256xf32>
    %172 = arith.addf %138, %171 : vector<8x256xf32>
    %173 = vector.broadcast %165 : vector<1x256xf32> to vector<8x256xf32>
    %174 = arith.mulf %173, %146 : vector<8x256xf32>
    %175 = arith.addf %141, %174 : vector<8x256xf32>
    %c5 = arith.constant 5 : index
    %c0_90 = arith.constant 0 : index
    %c0_91 = arith.constant 0 : index
    %176 = vector.load %arg3[%c5, %c0_90, %c0_91] : memref<8x8x256xf32, #tpu.memory_space<vmem>>, vector<1x8x256xf32>
    %177 = vector.shape_cast %176 : vector<1x8x256xf32> to vector<8x256xf32>
    %c5_92 = arith.constant 5 : index
    %c0_93 = arith.constant 0 : index
    %c0_94 = arith.constant 0 : index
    %178 = vector.load %arg4[%c5_92, %c0_93, %c0_94] : memref<8x8x256xf32, #tpu.memory_space<vmem>>, vector<1x8x256xf32>
    %179 = vector.shape_cast %178 : vector<1x8x256xf32> to vector<8x256xf32>
    %180 = arith.addf %177, %179 : vector<8x256xf32>
    %181 = arith.subf %179, %177 : vector<8x256xf32>
    %c0_95 = arith.constant 0 : index
    %c5_96 = arith.constant 5 : index
    %c0_97 = arith.constant 0 : index
    %182 = vector.load %arg1[%c0_95, %c5_96, %c0_97] : memref<2x8x256xf32, #tpu.memory_space<vmem>>, vector<1x1x256xf32>
    %183 = vector.shape_cast %182 : vector<1x1x256xf32> to vector<1x256xf32>
    %c0_98 = arith.constant 0 : index
    %c5_99 = arith.constant 5 : index
    %c0_100 = arith.constant 0 : index
    %184 = vector.load %arg2[%c0_98, %c5_99, %c0_100] : memref<2x8x256xf32, #tpu.memory_space<vmem>>, vector<1x1x256xf32>
    %185 = vector.shape_cast %184 : vector<1x1x256xf32> to vector<1x256xf32>
    %186 = arith.addf %183, %185 : vector<1x256xf32>
    %187 = vector.broadcast %186 : vector<1x256xf32> to vector<8x256xf32>
    %188 = arith.mulf %187, %177 : vector<8x256xf32>
    %189 = arith.addf %155, %188 : vector<8x256xf32>
    %190 = vector.broadcast %183 : vector<1x256xf32> to vector<8x256xf32>
    %191 = arith.mulf %190, %181 : vector<8x256xf32>
    %192 = arith.addf %158, %191 : vector<8x256xf32>
    %193 = vector.broadcast %185 : vector<1x256xf32> to vector<8x256xf32>
    %194 = arith.mulf %193, %180 : vector<8x256xf32>
    %195 = arith.addf %161, %194 : vector<8x256xf32>
    %c1_101 = arith.constant 1 : index
    %c5_102 = arith.constant 5 : index
    %c0_103 = arith.constant 0 : index
    %196 = vector.load %arg1[%c1_101, %c5_102, %c0_103] : memref<2x8x256xf32, #tpu.memory_space<vmem>>, vector<1x1x256xf32>
    %197 = vector.shape_cast %196 : vector<1x1x256xf32> to vector<1x256xf32>
    %c1_104 = arith.constant 1 : index
    %c5_105 = arith.constant 5 : index
    %c0_106 = arith.constant 0 : index
    %198 = vector.load %arg2[%c1_104, %c5_105, %c0_106] : memref<2x8x256xf32, #tpu.memory_space<vmem>>, vector<1x1x256xf32>
    %199 = vector.shape_cast %198 : vector<1x1x256xf32> to vector<1x256xf32>
    %200 = arith.addf %197, %199 : vector<1x256xf32>
    %201 = vector.broadcast %200 : vector<1x256xf32> to vector<8x256xf32>
    %202 = arith.mulf %201, %177 : vector<8x256xf32>
    %203 = arith.addf %169, %202 : vector<8x256xf32>
    %204 = vector.broadcast %197 : vector<1x256xf32> to vector<8x256xf32>
    %205 = arith.mulf %204, %181 : vector<8x256xf32>
    %206 = arith.addf %172, %205 : vector<8x256xf32>
    %207 = vector.broadcast %199 : vector<1x256xf32> to vector<8x256xf32>
    %208 = arith.mulf %207, %180 : vector<8x256xf32>
    %209 = arith.addf %175, %208 : vector<8x256xf32>
    %c6 = arith.constant 6 : index
    %c0_107 = arith.constant 0 : index
    %c0_108 = arith.constant 0 : index
    %210 = vector.load %arg3[%c6, %c0_107, %c0_108] : memref<8x8x256xf32, #tpu.memory_space<vmem>>, vector<1x8x256xf32>
    %211 = vector.shape_cast %210 : vector<1x8x256xf32> to vector<8x256xf32>
    %c6_109 = arith.constant 6 : index
    %c0_110 = arith.constant 0 : index
    %c0_111 = arith.constant 0 : index
    %212 = vector.load %arg4[%c6_109, %c0_110, %c0_111] : memref<8x8x256xf32, #tpu.memory_space<vmem>>, vector<1x8x256xf32>
    %213 = vector.shape_cast %212 : vector<1x8x256xf32> to vector<8x256xf32>
    %214 = arith.addf %211, %213 : vector<8x256xf32>
    %215 = arith.subf %213, %211 : vector<8x256xf32>
    %c0_112 = arith.constant 0 : index
    %c6_113 = arith.constant 6 : index
    %c0_114 = arith.constant 0 : index
    %216 = vector.load %arg1[%c0_112, %c6_113, %c0_114] : memref<2x8x256xf32, #tpu.memory_space<vmem>>, vector<1x1x256xf32>
    %217 = vector.shape_cast %216 : vector<1x1x256xf32> to vector<1x256xf32>
    %c0_115 = arith.constant 0 : index
    %c6_116 = arith.constant 6 : index
    %c0_117 = arith.constant 0 : index
    %218 = vector.load %arg2[%c0_115, %c6_116, %c0_117] : memref<2x8x256xf32, #tpu.memory_space<vmem>>, vector<1x1x256xf32>
    %219 = vector.shape_cast %218 : vector<1x1x256xf32> to vector<1x256xf32>
    %220 = arith.addf %217, %219 : vector<1x256xf32>
    %221 = vector.broadcast %220 : vector<1x256xf32> to vector<8x256xf32>
    %222 = arith.mulf %221, %211 : vector<8x256xf32>
    %223 = arith.addf %189, %222 : vector<8x256xf32>
    %224 = vector.broadcast %217 : vector<1x256xf32> to vector<8x256xf32>
    %225 = arith.mulf %224, %215 : vector<8x256xf32>
    %226 = arith.addf %192, %225 : vector<8x256xf32>
    %227 = vector.broadcast %219 : vector<1x256xf32> to vector<8x256xf32>
    %228 = arith.mulf %227, %214 : vector<8x256xf32>
    %229 = arith.addf %195, %228 : vector<8x256xf32>
    %c1_118 = arith.constant 1 : index
    %c6_119 = arith.constant 6 : index
    %c0_120 = arith.constant 0 : index
    %230 = vector.load %arg1[%c1_118, %c6_119, %c0_120] : memref<2x8x256xf32, #tpu.memory_space<vmem>>, vector<1x1x256xf32>
    %231 = vector.shape_cast %230 : vector<1x1x256xf32> to vector<1x256xf32>
    %c1_121 = arith.constant 1 : index
    %c6_122 = arith.constant 6 : index
    %c0_123 = arith.constant 0 : index
    %232 = vector.load %arg2[%c1_121, %c6_122, %c0_123] : memref<2x8x256xf32, #tpu.memory_space<vmem>>, vector<1x1x256xf32>
    %233 = vector.shape_cast %232 : vector<1x1x256xf32> to vector<1x256xf32>
    %234 = arith.addf %231, %233 : vector<1x256xf32>
    %235 = vector.broadcast %234 : vector<1x256xf32> to vector<8x256xf32>
    %236 = arith.mulf %235, %211 : vector<8x256xf32>
    %237 = arith.addf %203, %236 : vector<8x256xf32>
    %238 = vector.broadcast %231 : vector<1x256xf32> to vector<8x256xf32>
    %239 = arith.mulf %238, %215 : vector<8x256xf32>
    %240 = arith.addf %206, %239 : vector<8x256xf32>
    %241 = vector.broadcast %233 : vector<1x256xf32> to vector<8x256xf32>
    %242 = arith.mulf %241, %214 : vector<8x256xf32>
    %243 = arith.addf %209, %242 : vector<8x256xf32>
    %c7 = arith.constant 7 : index
    %c0_124 = arith.constant 0 : index
    %c0_125 = arith.constant 0 : index
    %244 = vector.load %arg3[%c7, %c0_124, %c0_125] : memref<8x8x256xf32, #tpu.memory_space<vmem>>, vector<1x8x256xf32>
    %245 = vector.shape_cast %244 : vector<1x8x256xf32> to vector<8x256xf32>
    %c7_126 = arith.constant 7 : index
    %c0_127 = arith.constant 0 : index
    %c0_128 = arith.constant 0 : index
    %246 = vector.load %arg4[%c7_126, %c0_127, %c0_128] : memref<8x8x256xf32, #tpu.memory_space<vmem>>, vector<1x8x256xf32>
    %247 = vector.shape_cast %246 : vector<1x8x256xf32> to vector<8x256xf32>
    %248 = arith.addf %245, %247 : vector<8x256xf32>
    %249 = arith.subf %247, %245 : vector<8x256xf32>
    %c0_129 = arith.constant 0 : index
    %c7_130 = arith.constant 7 : index
    %c0_131 = arith.constant 0 : index
    %250 = vector.load %arg1[%c0_129, %c7_130, %c0_131] : memref<2x8x256xf32, #tpu.memory_space<vmem>>, vector<1x1x256xf32>
    %251 = vector.shape_cast %250 : vector<1x1x256xf32> to vector<1x256xf32>
    %c0_132 = arith.constant 0 : index
    %c7_133 = arith.constant 7 : index
    %c0_134 = arith.constant 0 : index
    %252 = vector.load %arg2[%c0_132, %c7_133, %c0_134] : memref<2x8x256xf32, #tpu.memory_space<vmem>>, vector<1x1x256xf32>
    %253 = vector.shape_cast %252 : vector<1x1x256xf32> to vector<1x256xf32>
    %254 = arith.addf %251, %253 : vector<1x256xf32>
    %255 = vector.broadcast %254 : vector<1x256xf32> to vector<8x256xf32>
    %256 = arith.mulf %255, %245 : vector<8x256xf32>
    %257 = arith.addf %223, %256 : vector<8x256xf32>
    %258 = vector.broadcast %251 : vector<1x256xf32> to vector<8x256xf32>
    %259 = arith.mulf %258, %249 : vector<8x256xf32>
    %260 = arith.addf %226, %259 : vector<8x256xf32>
    %261 = vector.broadcast %253 : vector<1x256xf32> to vector<8x256xf32>
    %262 = arith.mulf %261, %248 : vector<8x256xf32>
    %263 = arith.addf %229, %262 : vector<8x256xf32>
    %c1_135 = arith.constant 1 : index
    %c7_136 = arith.constant 7 : index
    %c0_137 = arith.constant 0 : index
    %264 = vector.load %arg1[%c1_135, %c7_136, %c0_137] : memref<2x8x256xf32, #tpu.memory_space<vmem>>, vector<1x1x256xf32>
    %265 = vector.shape_cast %264 : vector<1x1x256xf32> to vector<1x256xf32>
    %c1_138 = arith.constant 1 : index
    %c7_139 = arith.constant 7 : index
    %c0_140 = arith.constant 0 : index
    %266 = vector.load %arg2[%c1_138, %c7_139, %c0_140] : memref<2x8x256xf32, #tpu.memory_space<vmem>>, vector<1x1x256xf32>
    %267 = vector.shape_cast %266 : vector<1x1x256xf32> to vector<1x256xf32>
    %268 = arith.addf %265, %267 : vector<1x256xf32>
    %269 = vector.broadcast %268 : vector<1x256xf32> to vector<8x256xf32>
    %270 = arith.mulf %269, %245 : vector<8x256xf32>
    %271 = arith.addf %237, %270 : vector<8x256xf32>
    %272 = vector.broadcast %265 : vector<1x256xf32> to vector<8x256xf32>
    %273 = arith.mulf %272, %249 : vector<8x256xf32>
    %274 = arith.addf %240, %273 : vector<8x256xf32>
    %275 = vector.broadcast %267 : vector<1x256xf32> to vector<8x256xf32>
    %276 = arith.mulf %275, %248 : vector<8x256xf32>
    %277 = arith.addf %243, %276 : vector<8x256xf32>
    %278 = arith.subf %257, %263 : vector<8x256xf32>
    %c0_141 = arith.constant 0 : index
    %c0_142 = arith.constant 0 : index
    %c0_143 = arith.constant 0 : index
    %279 = vector.load %arg5[%c0_141, %c0_142, %c0_143] : memref<2x8x256xf32, #tpu.memory_space<vmem>>, vector<1x8x256xf32>
    %280 = vector.shape_cast %279 : vector<1x8x256xf32> to vector<8x256xf32>
    %281 = vector.shape_cast %278 : vector<8x256xf32> to vector<1x8x256xf32>
    tpu.vector_store %arg5[%c0_141, %c0_142, %c0_143], %281 {strides = array<i32>} : memref<2x8x256xf32, #tpu.memory_space<vmem>>, vector<1x8x256xf32>,
    %282 = arith.addf %257, %260 : vector<8x256xf32>
    %c0_144 = arith.constant 0 : index
    %c0_145 = arith.constant 0 : index
    %c0_146 = arith.constant 0 : index
    %283 = vector.load %arg6[%c0_144, %c0_145, %c0_146] : memref<2x8x256xf32, #tpu.memory_space<vmem>>, vector<1x8x256xf32>
    %284 = vector.shape_cast %283 : vector<1x8x256xf32> to vector<8x256xf32>
    %285 = vector.shape_cast %282 : vector<8x256xf32> to vector<1x8x256xf32>
    tpu.vector_store %arg6[%c0_144, %c0_145, %c0_146], %285 {strides = array<i32>} : memref<2x8x256xf32, #tpu.memory_space<vmem>>, vector<1x8x256xf32>,
    %286 = arith.subf %271, %277 : vector<8x256xf32>
    %c1_147 = arith.constant 1 : index
    %c0_148 = arith.constant 0 : index
    %c0_149 = arith.constant 0 : index
    %287 = vector.load %arg5[%c1_147, %c0_148, %c0_149] : memref<2x8x256xf32, #tpu.memory_space<vmem>>, vector<1x8x256xf32>
    %288 = vector.shape_cast %287 : vector<1x8x256xf32> to vector<8x256xf32>
    %289 = vector.shape_cast %286 : vector<8x256xf32> to vector<1x8x256xf32>
    tpu.vector_store %arg5[%c1_147, %c0_148, %c0_149], %289 {strides = array<i32>} : memref<2x8x256xf32, #tpu.memory_space<vmem>>, vector<1x8x256xf32>,
    %290 = arith.addf %271, %274 : vector<8x256xf32>
    %c1_150 = arith.constant 1 : index
    %c0_151 = arith.constant 0 : index
    %c0_152 = arith.constant 0 : index
    %291 = vector.load %arg6[%c1_150, %c0_151, %c0_152] : memref<2x8x256xf32, #tpu.memory_space<vmem>>, vector<1x8x256xf32>
    %292 = vector.shape_cast %291 : vector<1x8x256xf32> to vector<8x256xf32>
    %293 = vector.shape_cast %290 : vector<8x256xf32> to vector<1x8x256xf32>
    tpu.vector_store %arg6[%c1_150, %c0_151, %c0_152], %293 {strides = array<i32>} : memref<2x8x256xf32, #tpu.memory_space<vmem>>, vector<1x8x256xf32>,
    return
  }
  func.func @transform_0(%arg0: i32) -> (i32, i32, i32) {
    %c0_i32 = arith.constant 0 : i32
    %c0_i32_0 = arith.constant 0 : i32
    %c0_i32_1 = arith.constant 0 : i32
    return %c0_i32, %c0_i32_0, %arg0 : i32, i32, i32
  }
  func.func @transform_1(%arg0: i32) -> (i32, i32, i32) {
    %c0_i32 = arith.constant 0 : i32
    %c0_i32_0 = arith.constant 0 : i32
    %c0_i32_1 = arith.constant 0 : i32
    return %c0_i32, %c0_i32_0, %arg0 : i32, i32, i32
  }
  func.func @transform_2(%arg0: i32) -> (i32, i32, i32) {
    %c0_i32 = arith.constant 0 : i32
    %c0_i32_0 = arith.constant 0 : i32
    %c0_i32_1 = arith.constant 0 : i32
    return %c0_i32, %c0_i32_0, %arg0 : i32, i32, i32
  }
  func.func @transform_3(%arg0: i32) -> (i32, i32, i32) {
    %c0_i32 = arith.constant 0 : i32
    %c0_i32_0 = arith.constant 0 : i32
    %c0_i32_1 = arith.constant 0 : i32
    return %c0_i32, %c0_i32_0, %arg0 : i32, i32, i32
  }
  func.func @transform_4(%arg0: i32) -> (i32, i32, i32) {
    %c0_i32 = arith.constant 0 : i32
    %c0_i32_0 = arith.constant 0 : i32
    %c0_i32_1 = arith.constant 0 : i32
    return %c0_i32, %c0_i32_0, %arg0 : i32, i32, i32
  }
  func.func @transform_5(%arg0: i32) -> (i32, i32, i32) {
    %c0_i32 = arith.constant 0 : i32
    %c0_i32_0 = arith.constant 0 : i32
    %c0_i32_1 = arith.constant 0 : i32
    return %c0_i32, %c0_i32_0, %arg0 : i32, i32, i32
  }
}

module attributes {stable_mosaic.version = 11 : i64} {
  func.func @kernel(%arg0: i32, %arg1: i32, %arg2: memref<1x8x1536xf32, #tpu.memory_space<vmem>>, %arg3: memref<8x8xf32, #tpu.memory_space<vmem>>, %arg4: memref<8x1xf32, #tpu.memory_space<vmem>>, %arg5: memref<1x8x1536xf32, #tpu.memory_space<vmem>>, %arg6: memref<1x8x1536xf32, #tpu.memory_space<vmem>>) attributes {dimension_semantics = [#tpu.dimension_semantics<parallel>, #tpu.dimension_semantics<parallel>], iteration_bounds = array<i64: 2, 1>, scalar_prefetch = 0 : i64, scratch_operands = 0 : i64, tpu.core_type = #tpu.core_type<tc>, window_params = [{transform_indices = @transform_0, window_bounds = array<i64: 1, 8, 1536>}, {pipeline_mode = #tpu.pipeline_mode<synchronous>, transform_indices = @transform_1, window_bounds = array<i64: 8, 8>}, {pipeline_mode = #tpu.pipeline_mode<synchronous>, transform_indices = @transform_2, window_bounds = array<i64: 8, 1>}, {transform_indices = @transform_3, window_bounds = array<i64: 1, 8, 1536>}, {transform_indices = @transform_4, window_bounds = array<i64: 1, 8, 1536>}]} {
    %c0 = arith.constant 0 : index
    %c0_0 = arith.constant 0 : index
    %0 = vector.load %arg3[%c0, %c0_0] : memref<8x8xf32, #tpu.memory_space<vmem>>, vector<8x8xf32>
    %c0_1 = arith.constant 0 : index
    %c0_2 = arith.constant 0 : index
    %c0_3 = arith.constant 0 : index
    %1 = vector.load %arg2[%c0_1, %c0_2, %c0_3] : memref<1x8x1536xf32, #tpu.memory_space<vmem>>, vector<1x8x1536xf32>
    %2 = vector.shape_cast %1 : vector<1x8x1536xf32> to vector<8x1536xf32>
    %cst = arith.constant dense<0.000000e+00> : vector<8x1536xf32>
    %3 = tpu.matmul %0, %2, %cst {dimension_numbers = #tpu.dot_dimension_numbers<[1], [0], [0], [1], [0, 0, 1, 1], [], []>} : vector<8x8xf32>, vector<8x1536xf32>, vector<8x1536xf32> -> vector<8x1536xf32>
    %c0_4 = arith.constant 0 : index
    %c0_5 = arith.constant 0 : index
    %4 = vector.load %arg4[%c0_4, %c0_5] : memref<8x1xf32, #tpu.memory_space<vmem>>, vector<8x1xf32>
    %5 = vector.broadcast %4 : vector<8x1xf32> to vector<8x1536xf32>
    %6 = arith.addf %3, %5 : vector<8x1536xf32>
    %c0_6 = arith.constant 0 : index
    %c0_7 = arith.constant 0 : index
    %c0_8 = arith.constant 0 : index
    %7 = vector.load %arg5[%c0_6, %c0_7, %c0_8] : memref<1x8x1536xf32, #tpu.memory_space<vmem>>, vector<1x8x1536xf32>
    %8 = vector.shape_cast %7 : vector<1x8x1536xf32> to vector<8x1536xf32>
    %9 = arith.addf %6, %8 : vector<8x1536xf32>
    %cst_9 = arith.constant 5.000000e-01 : f32
    %10 = vector.broadcast %cst_9 : f32 to vector<8x1536xf32>
    %11 = arith.mulf %10, %9 : vector<8x1536xf32>
    %cst_10 = arith.constant 0.707106769 : f32
    %12 = vector.broadcast %cst_10 : f32 to vector<8x1536xf32>
    %13 = arith.mulf %9, %12 : vector<8x1536xf32>
    %cst_11 = arith.constant 0.000000e+00 : f32
    %14 = vector.broadcast %cst_11 : f32 to vector<8x1536xf32>
    %15 = arith.cmpf oge, %13, %14 : vector<8x1536xf32>
    %cst_12 = arith.constant 1.000000e+00 : f32
    %cst_13 = arith.constant -1.000000e+00 : f32
    %16 = vector.broadcast %cst_12 : f32 to vector<8x1536xf32>
    %17 = vector.broadcast %cst_13 : f32 to vector<8x1536xf32>
    %18 = arith.select %15, %16, %17 : vector<8x1536xi1>, vector<8x1536xf32>
    %19 = math.absf %13 : vector<8x1536xf32>
    %cst_14 = arith.constant 0.327591091 : f32
    %20 = vector.broadcast %cst_14 : f32 to vector<8x1536xf32>
    %21 = arith.mulf %20, %19 : vector<8x1536xf32>
    %cst_15 = arith.constant 1.000000e+00 : f32
    %22 = vector.broadcast %cst_15 : f32 to vector<8x1536xf32>
    %23 = arith.addf %22, %21 : vector<8x1536xf32>
    %24 = tpu.reciprocal %23 : vector<8x1536xf32> -> vector<8x1536xf32>
    %cst_16 = arith.constant 1.06140542 : f32
    %25 = vector.broadcast %cst_16 : f32 to vector<8x1536xf32>
    %26 = arith.mulf %25, %24 : vector<8x1536xf32>
    %cst_17 = arith.constant -1.45315206 : f32
    %27 = vector.broadcast %cst_17 : f32 to vector<8x1536xf32>
    %28 = arith.addf %26, %27 : vector<8x1536xf32>
    %29 = arith.mulf %28, %24 : vector<8x1536xf32>
    %cst_18 = arith.constant 1.42141378 : f32
    %30 = vector.broadcast %cst_18 : f32 to vector<8x1536xf32>
    %31 = arith.addf %29, %30 : vector<8x1536xf32>
    %32 = arith.mulf %31, %24 : vector<8x1536xf32>
    %cst_19 = arith.constant -0.284496725 : f32
    %33 = vector.broadcast %cst_19 : f32 to vector<8x1536xf32>
    %34 = arith.addf %32, %33 : vector<8x1536xf32>
    %35 = arith.mulf %34, %24 : vector<8x1536xf32>
    %cst_20 = arith.constant 0.254829586 : f32
    %36 = vector.broadcast %cst_20 : f32 to vector<8x1536xf32>
    %37 = arith.addf %35, %36 : vector<8x1536xf32>
    %38 = arith.mulf %37, %24 : vector<8x1536xf32>
    %cst_21 = arith.constant 0.000000e+00 : f32
    %39 = vector.broadcast %cst_21 : f32 to vector<8x1536xf32>
    %40 = arith.subf %39, %19 : vector<8x1536xf32>
    %41 = arith.mulf %40, %19 : vector<8x1536xf32>
    %42 = math.exp %41 : vector<8x1536xf32>
    %43 = arith.mulf %38, %42 : vector<8x1536xf32>
    %cst_22 = arith.constant 1.000000e+00 : f32
    %44 = vector.broadcast %cst_22 : f32 to vector<8x1536xf32>
    %45 = arith.subf %44, %43 : vector<8x1536xf32>
    %46 = arith.mulf %18, %45 : vector<8x1536xf32>
    %cst_23 = arith.constant 1.000000e+00 : f32
    %47 = vector.broadcast %cst_23 : f32 to vector<8x1536xf32>
    %48 = arith.addf %47, %46 : vector<8x1536xf32>
    %49 = arith.mulf %11, %48 : vector<8x1536xf32>
    %c0_24 = arith.constant 0 : index
    %c0_25 = arith.constant 0 : index
    %c0_26 = arith.constant 0 : index
    %50 = vector.load %arg6[%c0_24, %c0_25, %c0_26] : memref<1x8x1536xf32, #tpu.memory_space<vmem>>, vector<1x8x1536xf32>
    %51 = vector.shape_cast %50 : vector<1x8x1536xf32> to vector<8x1536xf32>
    %52 = vector.shape_cast %49 : vector<8x1536xf32> to vector<1x8x1536xf32>
    tpu.vector_store %arg6[%c0_24, %c0_25, %c0_26], %52 {strides = array<i32>} : memref<1x8x1536xf32, #tpu.memory_space<vmem>>, vector<1x8x1536xf32>,
    return
  }
  func.func @transform_0(%arg0: i32, %arg1: i32) -> (i32, i32, i32) {
    %c0_i32 = arith.constant 0 : i32
    %c0_i32_0 = arith.constant 0 : i32
    return %arg0, %c0_i32, %arg1 : i32, i32, i32
  }
  func.func @transform_1(%arg0: i32, %arg1: i32) -> (i32, i32) {
    %c0_i32 = arith.constant 0 : i32
    %c0_i32_0 = arith.constant 0 : i32
    %c0_i32_1 = arith.constant 0 : i32
    return %c0_i32, %c0_i32_0 : i32, i32
  }
  func.func @transform_2(%arg0: i32, %arg1: i32) -> (i32, i32) {
    %c0_i32 = arith.constant 0 : i32
    %c0_i32_0 = arith.constant 0 : i32
    %c0_i32_1 = arith.constant 0 : i32
    return %c0_i32, %c0_i32_0 : i32, i32
  }
  func.func @transform_3(%arg0: i32, %arg1: i32) -> (i32, i32, i32) {
    %c0_i32 = arith.constant 0 : i32
    %c0_i32_0 = arith.constant 0 : i32
    return %arg0, %c0_i32, %arg1 : i32, i32, i32
  }
  func.func @transform_4(%arg0: i32, %arg1: i32) -> (i32, i32, i32) {
    %c0_i32 = arith.constant 0 : i32
    %c0_i32_0 = arith.constant 0 : i32
    return %arg0, %c0_i32, %arg1 : i32, i32, i32
  }
}

module attributes {stable_mosaic.version = 11 : i64} {
  func.func @kernel(%arg0: i32, %arg1: i32, %arg2: memref<1x8x1536xf32, #tpu.memory_space<vmem>>, %arg3: memref<8x8xf32, #tpu.memory_space<vmem>>, %arg4: memref<8x1xf32, #tpu.memory_space<vmem>>, %arg5: memref<1x8x1536xf32, #tpu.memory_space<vmem>>, %arg6: memref<1x8x1536xf32, #tpu.memory_space<vmem>>) attributes {dimension_semantics = [#tpu.dimension_semantics<parallel>, #tpu.dimension_semantics<parallel>], iteration_bounds = array<i64: 2, 1>, scalar_prefetch = 0 : i64, scratch_operands = 0 : i64, tpu.core_type = #tpu.core_type<tc>, window_params = [{transform_indices = @transform_0, window_bounds = array<i64: 1, 8, 1536>}, {pipeline_mode = #tpu.pipeline_mode<synchronous>, transform_indices = @transform_1, window_bounds = array<i64: 8, 8>}, {pipeline_mode = #tpu.pipeline_mode<synchronous>, transform_indices = @transform_2, window_bounds = array<i64: 8, 1>}, {transform_indices = @transform_3, window_bounds = array<i64: 1, 8, 1536>}, {transform_indices = @transform_4, window_bounds = array<i64: 1, 8, 1536>}]} {
    %c0 = arith.constant 0 : index
    %c0_0 = arith.constant 0 : index
    %0 = vector.load %arg3[%c0, %c0_0] : memref<8x8xf32, #tpu.memory_space<vmem>>, vector<8x8xf32>
    %c0_1 = arith.constant 0 : index
    %c0_2 = arith.constant 0 : index
    %c0_3 = arith.constant 0 : index
    %1 = vector.load %arg2[%c0_1, %c0_2, %c0_3] : memref<1x8x1536xf32, #tpu.memory_space<vmem>>, vector<1x8x1536xf32>
    %2 = vector.shape_cast %1 : vector<1x8x1536xf32> to vector<8x1536xf32>
    %cst = arith.constant dense<0.000000e+00> : vector<8x1536xf32>
    %3 = tpu.matmul %0, %2, %cst {dimension_numbers = #tpu.dot_dimension_numbers<[1], [0], [0], [1], [0, 0, 1, 1], [], []>} : vector<8x8xf32>, vector<8x1536xf32>, vector<8x1536xf32> -> vector<8x1536xf32>
    %c0_4 = arith.constant 0 : index
    %c0_5 = arith.constant 0 : index
    %4 = vector.load %arg4[%c0_4, %c0_5] : memref<8x1xf32, #tpu.memory_space<vmem>>, vector<8x1xf32>
    %5 = vector.broadcast %4 : vector<8x1xf32> to vector<8x1536xf32>
    %6 = arith.addf %3, %5 : vector<8x1536xf32>
    %c0_6 = arith.constant 0 : index
    %c0_7 = arith.constant 0 : index
    %c0_8 = arith.constant 0 : index
    %7 = vector.load %arg5[%c0_6, %c0_7, %c0_8] : memref<1x8x1536xf32, #tpu.memory_space<vmem>>, vector<1x8x1536xf32>
    %8 = vector.shape_cast %7 : vector<1x8x1536xf32> to vector<8x1536xf32>
    %9 = arith.addf %6, %8 : vector<8x1536xf32>
    %c0_9 = arith.constant 0 : index
    %c0_10 = arith.constant 0 : index
    %c0_11 = arith.constant 0 : index
    %10 = vector.load %arg6[%c0_9, %c0_10, %c0_11] : memref<1x8x1536xf32, #tpu.memory_space<vmem>>, vector<1x8x1536xf32>
    %11 = vector.shape_cast %10 : vector<1x8x1536xf32> to vector<8x1536xf32>
    %12 = vector.shape_cast %9 : vector<8x1536xf32> to vector<1x8x1536xf32>
    tpu.vector_store %arg6[%c0_9, %c0_10, %c0_11], %12 {strides = array<i32>} : memref<1x8x1536xf32, #tpu.memory_space<vmem>>, vector<1x8x1536xf32>,
    return
  }
  func.func @transform_0(%arg0: i32, %arg1: i32) -> (i32, i32, i32) {
    %c0_i32 = arith.constant 0 : i32
    %c0_i32_0 = arith.constant 0 : i32
    return %arg0, %c0_i32, %arg1 : i32, i32, i32
  }
  func.func @transform_1(%arg0: i32, %arg1: i32) -> (i32, i32) {
    %c0_i32 = arith.constant 0 : i32
    %c0_i32_0 = arith.constant 0 : i32
    %c0_i32_1 = arith.constant 0 : i32
    return %c0_i32, %c0_i32_0 : i32, i32
  }
  func.func @transform_2(%arg0: i32, %arg1: i32) -> (i32, i32) {
    %c0_i32 = arith.constant 0 : i32
    %c0_i32_0 = arith.constant 0 : i32
    %c0_i32_1 = arith.constant 0 : i32
    return %c0_i32, %c0_i32_0 : i32, i32
  }
  func.func @transform_3(%arg0: i32, %arg1: i32) -> (i32, i32, i32) {
    %c0_i32 = arith.constant 0 : i32
    %c0_i32_0 = arith.constant 0 : i32
    return %arg0, %c0_i32, %arg1 : i32, i32, i32
  }
  func.func @transform_4(%arg0: i32, %arg1: i32) -> (i32, i32, i32) {
    %c0_i32 = arith.constant 0 : i32
    %c0_i32_0 = arith.constant 0 : i32
    return %arg0, %c0_i32, %arg1 : i32, i32, i32
  }
}

module attributes {stable_mosaic.version = 11 : i64} {
  func.func @_fc_tail_kernel(%arg0: i32, %arg1: i32, %arg2: memref<1x8x512xf32, #tpu.memory_space<vmem>>, %arg3: memref<128x8xf32, #tpu.memory_space<vmem>>, %arg4: memref<128x1xf32, #tpu.memory_space<vmem>>, %arg5: memref<1x128xf32, #tpu.memory_space<vmem>>, %arg6: memref<1x1xf32, #tpu.memory_space<vmem>>, %arg7: memref<1x1x512xf32, #tpu.memory_space<vmem>>) attributes {dimension_semantics = [#tpu.dimension_semantics<parallel>, #tpu.dimension_semantics<parallel>], iteration_bounds = array<i64: 2, 1>, scalar_prefetch = 0 : i64, scratch_operands = 0 : i64, tpu.core_type = #tpu.core_type<tc>, window_params = [{transform_indices = @transform_0, window_bounds = array<i64: 1, 8, 512>}, {pipeline_mode = #tpu.pipeline_mode<synchronous>, transform_indices = @transform_1, window_bounds = array<i64: 128, 8>}, {pipeline_mode = #tpu.pipeline_mode<synchronous>, transform_indices = @transform_2, window_bounds = array<i64: 128, 1>}, {pipeline_mode = #tpu.pipeline_mode<synchronous>, transform_indices = @transform_3, window_bounds = array<i64: 1, 128>}, {pipeline_mode = #tpu.pipeline_mode<synchronous>, transform_indices = @transform_4, window_bounds = array<i64: 1, 1>}, {transform_indices = @transform_5, window_bounds = array<i64: 1, 1, 512>}]} {
    %c0 = arith.constant 0 : index
    %c0_0 = arith.constant 0 : index
    %0 = vector.load %arg3[%c0, %c0_0] : memref<128x8xf32, #tpu.memory_space<vmem>>, vector<128x8xf32>
    %c0_1 = arith.constant 0 : index
    %c0_2 = arith.constant 0 : index
    %c0_3 = arith.constant 0 : index
    %1 = vector.load %arg2[%c0_1, %c0_2, %c0_3] : memref<1x8x512xf32, #tpu.memory_space<vmem>>, vector<1x8x512xf32>
    %2 = vector.shape_cast %1 : vector<1x8x512xf32> to vector<8x512xf32>
    %cst = arith.constant dense<0.000000e+00> : vector<128x512xf32>
    %3 = tpu.matmul %0, %2, %cst {dimension_numbers = #tpu.dot_dimension_numbers<[1], [0], [0], [1], [0, 0, 1, 1], [], []>} : vector<128x8xf32>, vector<8x512xf32>, vector<128x512xf32> -> vector<128x512xf32>
    %c0_4 = arith.constant 0 : index
    %c0_5 = arith.constant 0 : index
    %4 = vector.load %arg4[%c0_4, %c0_5] : memref<128x1xf32, #tpu.memory_space<vmem>>, vector<128x1xf32>
    %5 = vector.broadcast %4 : vector<128x1xf32> to vector<128x512xf32>
    %6 = arith.addf %3, %5 : vector<128x512xf32>
    %cst_6 = arith.constant 5.000000e-01 : f32
    %7 = vector.broadcast %cst_6 : f32 to vector<128x512xf32>
    %8 = arith.mulf %7, %6 : vector<128x512xf32>
    %cst_7 = arith.constant 0.707106769 : f32
    %9 = vector.broadcast %cst_7 : f32 to vector<128x512xf32>
    %10 = arith.mulf %6, %9 : vector<128x512xf32>
    %cst_8 = arith.constant 0.000000e+00 : f32
    %11 = vector.broadcast %cst_8 : f32 to vector<128x512xf32>
    %12 = arith.cmpf oge, %10, %11 : vector<128x512xf32>
    %cst_9 = arith.constant 1.000000e+00 : f32
    %cst_10 = arith.constant -1.000000e+00 : f32
    %13 = vector.broadcast %cst_9 : f32 to vector<128x512xf32>
    %14 = vector.broadcast %cst_10 : f32 to vector<128x512xf32>
    %15 = arith.select %12, %13, %14 : vector<128x512xi1>, vector<128x512xf32>
    %16 = math.absf %10 : vector<128x512xf32>
    %cst_11 = arith.constant 0.327591091 : f32
    %17 = vector.broadcast %cst_11 : f32 to vector<128x512xf32>
    %18 = arith.mulf %17, %16 : vector<128x512xf32>
    %cst_12 = arith.constant 1.000000e+00 : f32
    %19 = vector.broadcast %cst_12 : f32 to vector<128x512xf32>
    %20 = arith.addf %19, %18 : vector<128x512xf32>
    %21 = tpu.reciprocal %20 : vector<128x512xf32> -> vector<128x512xf32>
    %cst_13 = arith.constant 1.06140542 : f32
    %22 = vector.broadcast %cst_13 : f32 to vector<128x512xf32>
    %23 = arith.mulf %22, %21 : vector<128x512xf32>
    %cst_14 = arith.constant -1.45315206 : f32
    %24 = vector.broadcast %cst_14 : f32 to vector<128x512xf32>
    %25 = arith.addf %23, %24 : vector<128x512xf32>
    %26 = arith.mulf %25, %21 : vector<128x512xf32>
    %cst_15 = arith.constant 1.42141378 : f32
    %27 = vector.broadcast %cst_15 : f32 to vector<128x512xf32>
    %28 = arith.addf %26, %27 : vector<128x512xf32>
    %29 = arith.mulf %28, %21 : vector<128x512xf32>
    %cst_16 = arith.constant -0.284496725 : f32
    %30 = vector.broadcast %cst_16 : f32 to vector<128x512xf32>
    %31 = arith.addf %29, %30 : vector<128x512xf32>
    %32 = arith.mulf %31, %21 : vector<128x512xf32>
    %cst_17 = arith.constant 0.254829586 : f32
    %33 = vector.broadcast %cst_17 : f32 to vector<128x512xf32>
    %34 = arith.addf %32, %33 : vector<128x512xf32>
    %35 = arith.mulf %34, %21 : vector<128x512xf32>
    %cst_18 = arith.constant 0.000000e+00 : f32
    %36 = vector.broadcast %cst_18 : f32 to vector<128x512xf32>
    %37 = arith.subf %36, %16 : vector<128x512xf32>
    %38 = arith.mulf %37, %16 : vector<128x512xf32>
    %39 = math.exp %38 : vector<128x512xf32>
    %40 = arith.mulf %35, %39 : vector<128x512xf32>
    %cst_19 = arith.constant 1.000000e+00 : f32
    %41 = vector.broadcast %cst_19 : f32 to vector<128x512xf32>
    %42 = arith.subf %41, %40 : vector<128x512xf32>
    %43 = arith.mulf %15, %42 : vector<128x512xf32>
    %cst_20 = arith.constant 1.000000e+00 : f32
    %44 = vector.broadcast %cst_20 : f32 to vector<128x512xf32>
    %45 = arith.addf %44, %43 : vector<128x512xf32>
    %46 = arith.mulf %8, %45 : vector<128x512xf32>
    %c0_21 = arith.constant 0 : index
    %c0_22 = arith.constant 0 : index
    %47 = vector.load %arg5[%c0_21, %c0_22] : memref<1x128xf32, #tpu.memory_space<vmem>>, vector<1x128xf32>
    %cst_23 = arith.constant dense<0.000000e+00> : vector<1x512xf32>
    %48 = tpu.matmul %47, %46, %cst_23 {dimension_numbers = #tpu.dot_dimension_numbers<[1], [0], [0], [1], [0, 0, 1, 1], [], []>} : vector<1x128xf32>, vector<128x512xf32>, vector<1x512xf32> -> vector<1x512xf32>
    %c0_24 = arith.constant 0 : index
    %c0_25 = arith.constant 0 : index
    %49 = vector.load %arg6[%c0_24, %c0_25] : memref<1x1xf32, #tpu.memory_space<vmem>>, vector<1x1xf32>
    %50 = vector.broadcast %49 : vector<1x1xf32> to vector<1x512xf32>
    %51 = arith.addf %48, %50 : vector<1x512xf32>
    %c0_26 = arith.constant 0 : index
    %c0_27 = arith.constant 0 : index
    %c0_28 = arith.constant 0 : index
    %52 = vector.load %arg7[%c0_26, %c0_27, %c0_28] : memref<1x1x512xf32, #tpu.memory_space<vmem>>, vector<1x1x512xf32>
    %53 = vector.shape_cast %52 : vector<1x1x512xf32> to vector<1x512xf32>
    %54 = vector.shape_cast %51 : vector<1x512xf32> to vector<1x1x512xf32>
    tpu.vector_store %arg7[%c0_26, %c0_27, %c0_28], %54 {strides = array<i32>} : memref<1x1x512xf32, #tpu.memory_space<vmem>>, vector<1x1x512xf32>,
    return
  }
  func.func @transform_0(%arg0: i32, %arg1: i32) -> (i32, i32, i32) {
    %c0_i32 = arith.constant 0 : i32
    %c0_i32_0 = arith.constant 0 : i32
    return %arg0, %c0_i32, %arg1 : i32, i32, i32
  }
  func.func @transform_1(%arg0: i32, %arg1: i32) -> (i32, i32) {
    %c0_i32 = arith.constant 0 : i32
    %c0_i32_0 = arith.constant 0 : i32
    %c0_i32_1 = arith.constant 0 : i32
    return %c0_i32, %c0_i32_0 : i32, i32
  }
  func.func @transform_2(%arg0: i32, %arg1: i32) -> (i32, i32) {
    %c0_i32 = arith.constant 0 : i32
    %c0_i32_0 = arith.constant 0 : i32
    %c0_i32_1 = arith.constant 0 : i32
    return %c0_i32, %c0_i32_0 : i32, i32
  }
  func.func @transform_3(%arg0: i32, %arg1: i32) -> (i32, i32) {
    %c0_i32 = arith.constant 0 : i32
    %c0_i32_0 = arith.constant 0 : i32
    %c0_i32_1 = arith.constant 0 : i32
    return %c0_i32, %c0_i32_0 : i32, i32
  }
  func.func @transform_4(%arg0: i32, %arg1: i32) -> (i32, i32) {
    %c0_i32 = arith.constant 0 : i32
    %c0_i32_0 = arith.constant 0 : i32
    %c0_i32_1 = arith.constant 0 : i32
    return %c0_i32, %c0_i32_0 : i32, i32
  }
  func.func @transform_5(%arg0: i32, %arg1: i32) -> (i32, i32, i32) {
    %c0_i32 = arith.constant 0 : i32
    %c0_i32_0 = arith.constant 0 : i32
    return %arg0, %c0_i32, %arg1 : i32, i32, i32
  }
}

</mosaic_0001>

<bundles_post_ra>
// kernel: fno3d_forward.10
= control target key start
LH: loop header
LB: loop body
LE: loop exit
PB: predicated region body
PF: predicated region fallthrough
CT: control target
= control target key end

     0   :  { %s534_s12 = smov 0   ;;  %s536_s13 = smov 0   ;;  %s581_s0 = inlined_call_operand.vmem [shape: f32[2,1,512], index: 0, kind: input, shape index: {}]   ;;  %s582_s1 = inlined_call_operand.vmem [shape: f32[8,4], index: 1, kind: input, shape index: {}]   ;;  %s583_s2 = inlined_call_operand.vmem [shape: f32[8,1], index: 2, kind: input, shape index: {}]   ;;  %s584_s3 = inlined_call_operand.vmem [shape: f32[2,8,512], index: 3, kind: output, shape index: {}]  }
   0x1   :  { %s538_s14 = smov 0  }
   0x2 LB: > { %s25_s15 = sadd.s32 1, %s504_s13  ;;  %p445_p0 = scmp.ge.s32.totalorder %s508_s14, 1  ;;  %s508_s14 = sphi %s538_s14, %s13_s14   ;;  %s504_s13 = sphi %s536_s13, %s586_s13   ;;  %s500_s12 = sphi %s534_s12, %s585_s12  }
   0x3   : > { %p27_p1 = scmp.ge.s32.totalorder %s25_s15, 2  ;;  %p157_p2 = scmp.lt.s32.totalorder %s508_s14, 3 }
   0x5   : > { %s588_s15 = smov (%p27_p1, %s25_s15), 0  ;;  %p158_p3 = pnand %p445_p0, %p157_p2 }
   0x6   : > { %p189_p4 = scmp.lt.s32.totalorder (!%p158_p3), %s500_s12, 1 }
   0x7   : > { %161 = sbr.rel (%p158_p3) target bundleno = 155 (0x9b), region = 32 }
   0xc   : > { %v275_v0 = vld [vmem:[%s582_s1] sm:$0xff]  ;;  %v510_v1 = vmov 0   ;;  %v511_v2 = vmov 2   ;;  %v512_v3 = vmov 1   ;;  %v513_v4 = vmov 3   ;;  %s590_s12 = smov (!%p189_p4, %s500_s12), 1 }
   0xd   : > { %480 = vset.pattern.permute.xlu0 %v510_v1  ;;  %482 = vset.pattern.permute.xlu1 %v511_v2  ;;  %v343_v5 = vld [vmem:[%s583_s2] sm:$0xff]  ;;  %v207_v6 = vlaneseq  ;;  %s446_s20 = sshll.u32 %s590_s12, 2  ;;  %s451_s24 = sshll.u32 %s590_s12, 5 }
   0xe   : > { %279 = vperm.xlu0 %480, %v275_v0   ;;  %320 = vperm.xlu1 %482, %v275_v0   ;;  %s195_s23 = scalar_lea.vmem %s581_s0, %s446_s20  ;;  %s205_s27 = scalar_lea.vmem %s584_s3, %s451_s24 }
   0xf   : > { %v208_v7 = vand.u32 127, %v207_v6  ;;  %v284_v43 = vshrl.u32 %v207_v6, 7  ;;  %v276_v51 = vld [vmem:[%s195_s23] sm:$0xf] }
  0x11   : > { %v209_v8 = vadd.s32 128, %v208_v7  ;;  %v210_v9 = vadd.s32 256, %v208_v7  ;;  %v211_v10 = vadd.s32 384, %v208_v7  ;;  %v212_v11 = vcvt.s32.f32 %v208_v7 }
  0x12   : > { %481 = vset.pattern.permute.xlu0 %v512_v3  ;;  %483 = vset.pattern.permute.xlu1 %v513_v4  ;;  %v285_v48 = vsub.s32 0, %v284_v43  ;;  %v289_v49 = vsub.s32 1, %v284_v43  ;;  %v293_v52 = vsub.s32 2, %v284_v43  ;;  %v297_v56 = vsub.s32 3, %v284_v43 }
  0x13   : > { %308 = vperm.xlu0 %481, %v275_v0   ;;  %332 = vperm.xlu1 %483, %v275_v0   ;;  %v213_v12 = vcvt.s32.f32 %v209_v8  ;;  %v214_v13 = vcvt.s32.f32 %v210_v9  ;;  %v215_v14 = vcvt.s32.f32 %v211_v10  ;;  %v223_v15 = vadd.f32 0.5, %v212_v11 }
  0x14   : > { %v286_v57 = vrot.slane %v276_v51, %v285_v48  ;;  %v290_v58 = vrot.slane %v276_v51, %v289_v49  ;;  %v294_v60 = vrot.slane %v276_v51, %v293_v52 }
  0x15   : > { %v224_v16 = vadd.f32 0.5, %v213_v12  ;;  %v225_v17 = vadd.f32 0.5, %v214_v13  ;;  %v226_v18 = vadd.f32 0.5, %v215_v14  ;;  %v227_v19 = vmul.f32 0.015625, %v223_v15 }
  0x17   : > { %484 = vset.pattern.permute.xlu1 %v510_v1  ;;  %485 = vset.pattern.permute.xlu0 %v510_v1  ;;  %v228_v20 = vmul.f32 0.015625, %v224_v16  ;;  %v229_v21 = vmul.f32 0.015625, %v225_v17  ;;  %v230_v22 = vmul.f32 0.015625, %v226_v18  ;;  %v231_v23 = vfloor.f32 %v227_v19 }
  0x18   : > { %346 = vperm.xlu1 %484, %v343_v5   ;;  %v298_v1 = vrot.slane %v276_v51, %v297_v56 }
  0x19   : > { %v232_v24 = vfloor.f32 %v228_v20  ;;  %v233_v25 = vfloor.f32 %v229_v21  ;;  %v234_v26 = vfloor.f32 %v230_v22  ;;  %v235_v27 = vmul.f32 64.0, %v231_v23 }
  0x1a   : > { %v263_v4 = vmul.f32 0.14285715, %v231_v23 }
  0x1b   : > { %v236_v28 = vmul.f32 64.0, %v232_v24  ;;  %v237_v29 = vmul.f32 64.0, %v233_v25  ;;  %v238_v30 = vmul.f32 64.0, %v234_v26  ;;  %v239_v31 = vsub.f32 %v212_v11, %v235_v27 }
  0x1c   : > { %v264_v5 = vmul.f32 0.14285715, %v232_v24  ;;  %v265_v9 = vmul.f32 0.14285715, %v233_v25  ;;  %v266_v10 = vmul.f32 0.14285715, %v234_v26 }
  0x1d   : > { %v240_v32 = vsub.f32 %v213_v12, %v236_v28  ;;  %v241_v33 = vsub.f32 %v214_v13, %v237_v29  ;;  %v242_v34 = vsub.f32 %v215_v14, %v238_v30  ;;  %v243_v35 = vadd.f32 0.5, %v239_v31 }
  0x1f   : > { %v244_v36 = vadd.f32 0.5, %v240_v32  ;;  %v245_v37 = vadd.f32 0.5, %v241_v33  ;;  %v246_v38 = vadd.f32 0.5, %v242_v34  ;;  %v247_v39 = vmul.f32 0.125, %v243_v35 }
  0x21   : > { %v248_v40 = vmul.f32 0.125, %v244_v36  ;;  %v249_v41 = vmul.f32 0.125, %v245_v37  ;;  %v250_v42 = vmul.f32 0.125, %v246_v38  ;;  %v251_v44 = vfloor.f32 %v247_v39 }
  0x23   : > { %v252_v45 = vfloor.f32 %v248_v40  ;;  %v253_v46 = vfloor.f32 %v249_v41  ;;  %v254_v47 = vfloor.f32 %v250_v42  ;;  %v255_v50 = vmul.f32 8.0, %v251_v44 }
  0x24   : > { %v267_v3 = vmul.f32 0.14285715, %v251_v44 }
  0x25   : > { %v256_v53 = vmul.f32 8.0, %v252_v45  ;;  %v257_v54 = vmul.f32 8.0, %v253_v46  ;;  %v258_v55 = vmul.f32 8.0, %v254_v47  ;;  %v259_v59 = vsub.f32 %v239_v31, %v255_v50 }
  0x26   : > { %v268_v6 = vmul.f32 0.14285715, %v252_v45  ;;  %v269_v7 = vmul.f32 0.14285715, %v253_v46  ;;  %v270_v8 = vmul.f32 0.14285715, %v254_v47 }
  0x27   : > { %v260_v61 = vsub.f32 %v240_v32, %v256_v53  ;;  %v261_v62 = vsub.f32 %v241_v33, %v257_v54  ;;  %v262_v63 = vsub.f32 %v242_v34, %v258_v55  ;;  %v271_v11 = vmul.f32 0.14285715, %v259_v59 }
  0x29   : > { %v272_v12 = vmul.f32 0.14285715, %v260_v61  ;;  %v273_v13 = vmul.f32 0.14285715, %v261_v62  ;;  %v274_v14 = vmul.f32 0.14285715, %v262_v63 }
  0x89   : > { %v280_v0 = vpop.permute.xlu0 %279  ;;  %v321_v2 = vpop.permute.xlu1 %320 }
  0x8a   : > { %v303_v15 = vmul.f32 %v286_v57, %v280_v0  ;;  %v304_v16 = vmul.f32 %v290_v58, %v280_v0  ;;  %v305_v17 = vmul.f32 %v294_v60, %v280_v0  ;;  %v306_v18 = vmul.f32 %v298_v1, %v280_v0 }
  0x8b   : > { %v323_v19 = vmul.f32 %v321_v2, %v267_v3  ;;  %v324_v20 = vmul.f32 %v321_v2, %v268_v6  ;;  %v325_v21 = vmul.f32 %v321_v2, %v269_v7  ;;  %v326_v22 = vmul.f32 %v321_v2, %v270_v8 }
  0x8e   : > { %v309_v23 = vpop.permute.xlu0 %308  ;;  %v333_v24 = vpop.permute.xlu1 %332 }
  0x8f   : > { %v311_v27 = vmul.f32 %v309_v23, %v263_v4  ;;  %v312_v28 = vmul.f32 %v309_v23, %v264_v5  ;;  %v313_v29 = vmul.f32 %v309_v23, %v265_v9  ;;  %v314_v25 = vmul.f32 %v309_v23, %v266_v10 }
  0x90   : > { %v335_v26 = vmul.f32 %v333_v24, %v271_v11  ;;  %v336_v30 = vmul.f32 %v333_v24, %v272_v12  ;;  %v337_v31 = vmul.f32 %v333_v24, %v273_v13  ;;  %v338_v32 = vmul.f32 %v333_v24, %v274_v14 }
  0x91   : > { %v315_v33 = vadd.f32 %v311_v27, %v303_v15  ;;  %v316_v34 = vadd.f32 %v312_v28, %v304_v16  ;;  %v317_v35 = vadd.f32 %v313_v29, %v305_v17  ;;  %v318_v36 = vadd.f32 %v314_v25, %v306_v18 }
  0x93   : > { %v327_v37 = vadd.f32 %v323_v19, %v315_v33  ;;  %v328_v38 = vadd.f32 %v324_v20, %v316_v34  ;;  %v329_v39 = vadd.f32 %v325_v21, %v317_v35  ;;  %v330_v40 = vadd.f32 %v326_v22, %v318_v36  ;;  %v347_v41 = vpop.permute.xlu1 %346 }
  0x95   : > { %v339_v42 = vadd.f32 %v335_v26, %v327_v37  ;;  %v340_v43 = vadd.f32 %v336_v30, %v328_v38  ;;  %v341_v44 = vadd.f32 %v337_v31, %v329_v39  ;;  %v342_v45 = vadd.f32 %v338_v32, %v330_v40 }
  0x97   : > { %v349_v46 = vadd.f32 %v347_v41, %v339_v42  ;;  %v350_v47 = vadd.f32 %v347_v41, %v340_v43  ;;  %v351_v48 = vadd.f32 %v347_v41, %v341_v44  ;;  %v352_v49 = vadd.f32 %v347_v41, %v342_v45 }
  0x99   : > { %353 = vst [vmem:[%s205_s27] sm:$0xff] %v349_v46  ;;  %354 = vst [vmem:[%s205_s27 + $0x8] sm:$0xff] %v350_v47 }
  0x9a   : > { %355 = vst [vmem:[%s205_s27 + $0x10] sm:$0xff] %v351_v48  ;;  %356 = vst [vmem:[%s205_s27 + $0x18] sm:$0xff] %v352_v49 }
  0x9b PF: > { %s13_s14 = sadd.s32 1, %s508_s14   ;;  %s585_s12 = smov %s504_s13 }
  0x9c   : > { %p10_p5 = scmp.ge.s32.totalorder %s13_s14, 4   ;;  %s586_s13 = smov %s588_s15 }
  0x9e   :  { %12 = sbr.rel (!%p10_p5) target bundleno = 2 (0x2), region = 62 }

// kernel: fno3d_forward.11
= control target key start
LH: loop header
LB: loop body
LE: loop exit
PB: predicated region body
PF: predicated region fallthrough
CT: control target
= control target key end

     0   :  { %v31_v0 = vlaneseq  ;;  %s1851_s0 = inlined_call_operand.vmem [shape: f32[2,8,256], index: 0, kind: input, shape index: {}]   ;;  %s1852_s1 = inlined_call_operand.vmem [shape: f32[2,8,256], index: 1, kind: input, shape index: {}]   ;;  %s1853_s2 = inlined_call_operand.vmem [shape: f32[8,8,256], index: 2, kind: input, shape index: {}]   ;;  %s1854_s3 = inlined_call_operand.vmem [shape: f32[8,8,256], index: 3, kind: input, shape index: {}]   ;;  %s1855_s4 = inlined_call_operand.vmem [shape: f32[2,8,256], index: 4, kind: output, shape index: {0}]   ;;  %s1856_s5 = inlined_call_operand.vmem [shape: f32[2,8,256], index: 5, kind: output, shape index: {1}]  }
   0x1   :  { %v1030_v1 = vld [vmem:[%s1853_s2] sm:$0xff]  ;;  %v1048_v6 = vld [vmem:[%s1853_s2 + $0x10] sm:$0xff] }
   0x2   :  { %1885 = vst [vmem:[#allocation2_spill] sm:$0xff] %v1030_v1  ;;  %v21_v2 = vld [vmem:[%s1854_s3] sm:$0xff]  ;;  %v32_v5 = vshrl.u32 %v31_v0, 7  ;;  %1886 = vst [vmem:[#allocation3_spill] sm:$0xff] %v1048_v6  ;;  %v939_v7 = vld [vmem:[%s1854_s3 + $0x10] sm:$0xff] }
   0x3   :  { %v1038_v3 = vld [vmem:[%s1851_s0] ss:$8 sm:$0x3]  ;;  %v1054_v8 = vadd.f32 %v21_v2, %v1030_v1  ;;  %v1063_v10 = vld [vmem:[%s1851_s0 + $0x1] ss:$8 sm:$0x3]  ;;  %v1073_v13 = vadd.f32 %v939_v7, %v1048_v6  ;;  %v1093_v18 = vsub.f32 %v21_v2, %v1030_v1  ;;  %v1116_v24 = vsub.f32 %v939_v7, %v1048_v6 }
   0x4   :  { %v1043_v4 = vld [vmem:[%s1852_s1] ss:$8 sm:$0x3]  ;;  %v1068_v11 = vld [vmem:[%s1852_s1 + $0x1] ss:$8 sm:$0x3] }
   0x5   :  { %v1058_v9 = vadd.f32 %v1043_v4, %v1038_v3  ;;  %v1070_v12 = vsub.s32 0, %v32_v5  ;;  %1887 = vst [vmem:[#allocation4_spill] sm:$0xff] %v1073_v13  ;;  %v1077_v14 = vadd.f32 %v1068_v11, %v1063_v10  ;;  %v1082_v15 = vld [vmem:[%s1853_s2 + $0x20] sm:$0xff]  ;;  %v1106_v21 = vld [vmem:[%s1853_s2 + $0x30] sm:$0xff]  ;;  %v1113_v23 = vsub.s32 1, %v32_v5 }
   0x6   :  { %1888 = vst [vmem:[#allocation5_spill] sm:$0xff] %v1082_v15  ;;  %v947_v16 = vld [vmem:[%s1854_s3 + $0x20] sm:$0xff]  ;;  %v1111_v22 = vld [vmem:[%s1854_s3 + $0x30] sm:$0xff] }
   0x7   :  { %v1090_v17 = vld [vmem:[%s1851_s0 + $0x2] ss:$8 sm:$0x3]  ;;  %v1096_v19 = vadd.f32 %v947_v16, %v1082_v15  ;;  %v1119_v25 = vsub.f32 %v947_v16, %v1082_v15  ;;  %v34_v26 = vrot.slane %v1058_v9, %v1070_v12  ;;  %v64_v27 = vrot.slane %v1043_v4, %v1070_v12  ;;  %v1132_v30 = vld [vmem:[%s1851_s0 + $0x3] ss:$8 sm:$0x3] }
   0x8   :  { %v1101_v20 = vld [vmem:[%s1852_s1 + $0x2] ss:$8 sm:$0x3]  ;;  %v144_v28 = vrot.slane %v1077_v14, %v1070_v12  ;;  %v174_v29 = vrot.slane %v1068_v11, %v1070_v12  ;;  %v1137_v31 = vld [vmem:[%s1852_s1 + $0x3] ss:$8 sm:$0x3]  ;;  %v1147_v34 = vadd.f32 %v1111_v22, %v1106_v21 }
   0x9   :  { %1889 = vst [vmem:[#allocation6_spill] sm:$0xff] %v1096_v19  ;;  %v1141_v32 = vadd.f32 %v1101_v20, %v1090_v17  ;;  %v284_v33 = vrot.slane %v1101_v20, %v1070_v12  ;;  %v1151_v35 = vadd.f32 %v1137_v31, %v1132_v30  ;;  %v1156_v36 = vld [vmem:[%s1853_s2 + $0x40] sm:$0xff]  ;;  %v41_v39 = vmul.f32 %v34_v26, %v1030_v1  ;;  %v1180_v44 = vld [vmem:[%s1853_s2 + $0x50] sm:$0xff] }
   0xa   :  { %1890 = vst [vmem:[#allocation7_spill] sm:$0xff] %v1147_v34  ;;  %v1161_v37 = vld [vmem:[%s1854_s3 + $0x40] sm:$0xff]  ;;  %v71_v40 = vmul.f32 %v64_v27, %v1054_v8  ;;  %v151_v41 = vmul.f32 %v1048_v6, %v144_v28  ;;  %v181_v42 = vmul.f32 %v174_v29, %v1073_v13  ;;  %v1185_v45 = vld [vmem:[%s1854_s3 + $0x50] sm:$0xff]  ;;  %v394_v49 = vrot.slane %v1137_v31, %v1070_v12 }
   0xb   :  { %v1166_v38 = vld [vmem:[%s1851_s0 + $0x4] ss:$8 sm:$0x3]  ;;  %v254_v46 = vrot.slane %v1141_v32, %v1070_v12  ;;  %v291_v47 = vmul.f32 %v284_v33, %v1096_v19  ;;  %v364_v48 = vrot.slane %v1151_v35, %v1070_v12  ;;  %v1197_v50 = vld [vmem:[%s1851_s0 + $0x5] ss:$8 sm:$0x3]  ;;  %v1206_v54 = vadd.f32 %v1161_v37, %v1156_v36 }
   0xc   :  { %v1175_v43 = vld [vmem:[%s1852_s1 + $0x4] ss:$8 sm:$0x3]  ;;  %v1202_v51 = vld [vmem:[%s1852_s1 + $0x5] ss:$8 sm:$0x3]  ;;  %v153_v52 = vadd.f32 %v151_v41, %v41_v39  ;;  %v183_v53 = vadd.f32 %v181_v42, %v71_v40  ;;  %v401_v60 = vmul.f32 %v394_v49, %v1147_v34  ;;  %v1241_v5 = vadd.f32 %v1185_v45, %v1180_v44 }
   0xd   :  { %1891 = vst [vmem:[#allocation8_spill] sm:$0xff] %v1206_v54  ;;  %v1210_v55 = vadd.f32 %v1175_v43, %v1166_v38  ;;  %v1215_v56 = vld [vmem:[%s1853_s2 + $0x60] sm:$0xff]  ;;  %v261_v58 = vmul.f32 %v1082_v15, %v254_v46  ;;  %v371_v59 = vmul.f32 %v1106_v21, %v364_v48  ;;  %v504_v61 = vrot.slane %v1175_v43, %v1070_v12  ;;  %v1250_v16 = vld [vmem:[%s1853_s2 + $0x70] sm:$0xff]  ;;  %v1284_v48 = vld [vmem:[%s1853_s2 + $0x8] sm:$0xff] }
   0xe   :  { %v1220_v57 = vld [vmem:[%s1854_s3 + $0x60] sm:$0xff]  ;;  %v293_v0 = vadd.f32 %v291_v47, %v183_v53  ;;  %1892 = vst [vmem:[#allocation9_spill] sm:$0xff] %v1241_v5  ;;  %v1245_v7 = vadd.f32 %v1202_v51, %v1197_v50  ;;  %v1255_v26 = vld [vmem:[%s1854_s3 + $0x70] sm:$0xff]  ;;  %v614_v29 = vrot.slane %v1202_v51, %v1070_v12  ;;  %v1289_v49 = vld [vmem:[%s1854_s3 + $0x8] sm:$0xff]  ;;  %v38_v19 = vrot.slane %v1058_v9, %v1113_v23 }
   0xf   :  { %v1230_v62 = vld [vmem:[%s1851_s0 + $0x6] ss:$8 sm:$0x3]  ;;  %v474_v2 = vrot.slane %v1210_v55, %v1070_v12  ;;  %v263_v27 = vadd.f32 %v261_v58, %v153_v52  ;;  %v511_v28 = vmul.f32 %v504_v61, %v1206_v54  ;;  %v1262_v33 = vadd.f32 %v1220_v57, %v1215_v56  ;;  %v1267_v39 = vld [vmem:[%s1851_s0 + $0x7] ss:$8 sm:$0x3] }
  0x10   :  { %v1235_v63 = vld [vmem:[%s1852_s1 + $0x6] ss:$8 sm:$0x3]  ;;  %v1272_v40 = vld [vmem:[%s1852_s1 + $0x7] ss:$8 sm:$0x3]  ;;  %v403_v41 = vadd.f32 %v401_v60, %v293_v0  ;;  %v584_v46 = vrot.slane %v1245_v7, %v1070_v12  ;;  %v621_v53 = vmul.f32 %v614_v29, %v1241_v5  ;;  %v1296_v60 = vadd.f32 %v1255_v26, %v1250_v16 }
  0x11   :  { %1893 = vst [vmem:[#allocation10_spill] sm:$0xff] %v1262_v33  ;;  %v481_v42 = vmul.f32 %v1156_v36, %v474_v2  ;;  %v1279_v47 = vadd.f32 %v1235_v63, %v1230_v62  ;;  %v373_v52 = vadd.f32 %v371_v59, %v263_v27  ;;  %v724_v58 = vrot.slane %v1235_v63, %v1070_v12  ;;  %v1308_v59 = vld [vmem:[%s1853_s2 + $0x18] sm:$0xff] }
  0x12   :  { %1894 = vst [vmem:[#allocation11_spill] sm:$0xff] %v1296_v60  ;;  %v513_v61 = vadd.f32 %v511_v28, %v403_v41  ;;  %v591_v0 = vmul.f32 %v1180_v44, %v584_v46  ;;  %v1303_v54 = vadd.f32 %v1272_v40, %v1267_v39  ;;  %v1313_v27 = vld [vmem:[%s1854_s3 + $0x18] sm:$0xff]  ;;  %v834_v41 = vrot.slane %v1272_v40, %v1070_v12 }
  0x13   :  { %v694_v2 = vrot.slane %v1279_v47, %v1070_v12  ;;  %v483_v28 = vadd.f32 %v481_v42, %v373_v52  ;;  %v731_v29 = vmul.f32 %v724_v58, %v1262_v33  ;;  %v1320_v46 = vadd.f32 %v1289_v49, %v1284_v48  ;;  %v1330_v42 = vld [vmem:[%s1853_s2 + $0x28] sm:$0xff] }
  0x14   :  { %v623_v5 = vadd.f32 %v621_v53, %v513_v61  ;;  %v804_v15 = vrot.slane %v1303_v54, %v1070_v12  ;;  %v1335_v52 = vld [vmem:[%s1854_s3 + $0x28] sm:$0xff]  ;;  %v841_v53 = vmul.f32 %v834_v41, %v1296_v60  ;;  %v68_v61 = vrot.slane %v1043_v4, %v1113_v23  ;;  %v1356_v4 = vld [vmem:[%s1854_s3 + $0x38] sm:$0xff] }
  0x15   :  { %1895 = vst [vmem:[#allocation12_spill] sm:$0xff] %v1320_v46  ;;  %v701_v34 = vmul.f32 %v1215_v56, %v694_v2  ;;  %v593_v58 = vadd.f32 %v591_v0, %v483_v28  ;;  %v1342_v2 = vadd.f32 %v1313_v27, %v1308_v59  ;;  %v42_v6 = vmul.f32 %v38_v19, %v1284_v48  ;;  %v1351_v0 = vld [vmem:[%s1853_s2 + $0x38] sm:$0xff] }
  0x16   :  { %v733_v9 = vadd.f32 %v731_v29, %v623_v5  ;;  %v811_v33 = vmul.f32 %v1250_v16, %v804_v15  ;;  %v148_v13 = vrot.slane %v1077_v14, %v1113_v23  ;;  %v72_v5 = vmul.f32 %v68_v61, %v1320_v46 }
  0x17   :  { %1896 = vst [vmem:[#allocation13_spill] sm:$0xff] %v1342_v2  ;;  %v703_v28 = vadd.f32 %v701_v34, %v593_v58  ;;  %v178_v15 = vrot.slane %v1068_v11, %v1113_v23  ;;  %v1363_v19 = vadd.f32 %v1335_v52, %v1330_v42  ;;  %v258_v41 = vrot.slane %v1141_v32, %v1113_v23  ;;  %v1373_v34 = vld [vmem:[%s1853_s2 + $0x48] sm:$0xff] }
  0x18   :  { %v843_v14 = vadd.f32 %v841_v53, %v733_v9  ;;  %v152_v29 = vmul.f32 %v1308_v59, %v148_v13  ;;  %v288_v60 = vrot.slane %v1101_v20, %v1113_v23  ;;  %v1378_v11 = vld [vmem:[%s1854_s3 + $0x48] sm:$0xff]  ;;  %v1385_v32 = vadd.f32 %v1356_v4, %v1351_v0 }
  0x19   :  { %1897 = vst [vmem:[#allocation14_spill] sm:$0xff] %v1363_v19  ;;  %v1380_v58 = vadd.f32 %v811_v33, %v703_v28  ;;  %v182_v13 = vmul.f32 %v178_v15, %v1342_v2  ;;  %v368_v20 = vrot.slane %v1151_v35, %v1113_v23  ;;  %v262_v61 = vmul.f32 %v1330_v42, %v258_v41  ;;  %v1396_v33 = vld [vmem:[%s1853_s2 + $0x58] sm:$0xff] }
  0x1a   :  { %1898 = vst [vmem:[#allocation15_spill] sm:$0xff] %v1385_v32  ;;  %v154_v53 = vadd.f32 %v152_v29, %v42_v6  ;;  %v292_v9 = vmul.f32 %v288_v60, %v1363_v19  ;;  %v398_v46 = vrot.slane %v1137_v31, %v1113_v23  ;;  %v1401_v28 = vld [vmem:[%s1854_s3 + $0x58] sm:$0xff]  ;;  %v1407_v60 = vadd.f32 %v1378_v11, %v1373_v34  ;;  %v1412_v31 = vld [vmem:[%s1853_s2 + $0x68] sm:$0xff] }
  0x1b   :  { %v895_v35 = vsub.f32 %v1380_v58, %v843_v14  ;;  %v184_v6 = vadd.f32 %v182_v13, %v72_v5  ;;  %v372_v15 = vmul.f32 %v1351_v0, %v368_v20  ;;  %v1417_v29 = vld [vmem:[%s1854_s3 + $0x68] sm:$0xff]  ;;  %v478_v5 = vrot.slane %v1210_v55, %v1113_v23  ;;  %v1438_v55 = vld [vmem:[%s1853_s2 + $0x78] sm:$0xff] }
  0x1c   :  { %v264_v41 = vadd.f32 %v262_v61, %v154_v53  ;;  %v402_v14 = vmul.f32 %v398_v46, %v1385_v32  ;;  %v508_v13 = vrot.slane %v1175_v43, %v1113_v23  ;;  %v1429_v19 = vadd.f32 %v1401_v28, %v1396_v33  ;;  %v1443_v43 = vld [vmem:[%s1854_s3 + $0x78] sm:$0xff] }
  0x1d   :  { %897 = vst [vmem:[%s1855_s4] sm:$0xff] %v895_v35  ;;  %v294_v20 = vadd.f32 %v292_v9, %v184_v6  ;;  %v588_v53 = vrot.slane %v1245_v7, %v1113_v23  ;;  %v618_v46 = vrot.slane %v1202_v51, %v1113_v23  ;;  %v482_v9 = vmul.f32 %v1373_v34, %v478_v5 }
  0x1e   :  { %v374_v61 = vadd.f32 %v372_v15, %v264_v41  ;;  %v512_v35 = vmul.f32 %v508_v13, %v1407_v60  ;;  %v1449_v7 = vadd.f32 %v1417_v29, %v1412_v31  ;;  %v698_v2 = vrot.slane %v1279_v47, %v1113_v23 }
  0x1f   :  { %v404_v51 = vadd.f32 %v402_v14, %v294_v20  ;;  %v592_v6 = vmul.f32 %v1396_v33, %v588_v53  ;;  %v622_v32 = vmul.f32 %v618_v46, %v1429_v19  ;;  %v728_v15 = vrot.slane %v1235_v63, %v1113_v23 }
  0x20   :  { %v484_v1 = vadd.f32 %v482_v9, %v374_v61  ;;  %v1459_v41 = vadd.f32 %v1443_v43, %v1438_v55  ;;  %v808_v5 = vrot.slane %v1303_v54, %v1113_v23  ;;  %v702_v14 = vmul.f32 %v1412_v31, %v698_v2 }
  0x21   :  { %v514_v13 = vadd.f32 %v512_v35, %v404_v51  ;;  %v838_v20 = vrot.slane %v1272_v40, %v1113_v23  ;;  %v49_v47 = vrot.slane %v1038_v3, %v1070_v12  ;;  %v732_v46 = vmul.f32 %v728_v15, %v1449_v7 }
  0x22   :  { %v594_v53 = vadd.f32 %v592_v6, %v484_v1  ;;  %v812_v63 = vmul.f32 %v1438_v55, %v808_v5  ;;  %v159_v61 = vrot.slane %v1063_v10, %v1070_v12  ;;  %v269_v2 = vrot.slane %v1090_v17, %v1070_v12 }
  0x23   :  { %v624_v9 = vadd.f32 %v622_v32, %v514_v13  ;;  %v842_v54 = vmul.f32 %v838_v20, %v1459_v41  ;;  %v56_v35 = vmul.f32 %v49_v47, %v1093_v18  ;;  %v1479_v1 = vsub.f32 %v1111_v22, %v1106_v21 }
  0x24   :  { %v704_v40 = vadd.f32 %v702_v14, %v594_v53  ;;  %v166_v51 = vmul.f32 %v159_v61, %v1116_v24  ;;  %v379_v6 = vrot.slane %v1132_v30, %v1070_v12  ;;  %v276_v32 = vmul.f32 %v269_v2, %v1119_v25 }
  0x25   :  { %v734_v15 = vadd.f32 %v732_v46, %v624_v9  ;;  %v1486_v5 = vsub.f32 %v1161_v37, %v1156_v36  ;;  %v489_v13 = vrot.slane %v1166_v38, %v1070_v12  ;;  %v1495_v22 = vsub.f32 %v1185_v45, %v1180_v44 }
  0x26   :  { %v1490_v14 = vadd.f32 %v812_v63, %v704_v40  ;;  %v168_v20 = vadd.f32 %v166_v51, %v56_v35  ;;  %v386_v47 = vmul.f32 %v379_v6, %v1479_v1  ;;  %v599_v61 = vrot.slane %v1197_v50, %v1070_v12 }
  0x27   :  { %1899 = vst [vmem:[#allocation16_spill] sm:$0xff] %v1486_v5  ;;  %1900 = vst [vmem:[#allocation17_spill] sm:$0xff] %v1495_v22  ;;  %v844_v53 = vadd.f32 %v842_v54, %v734_v15  ;;  %v496_v46 = vmul.f32 %v489_v13, %v1486_v5  ;;  %v1502_v37 = vsub.f32 %v1220_v57, %v1215_v56  ;;  %v1919_v5 = vld [vmem:[#allocation9_spill] sm:$0xff] }
  0x28   :  { %v278_v9 = vadd.f32 %v276_v32, %v168_v20  ;;  %v709_v63 = vrot.slane %v1230_v62, %v1070_v12  ;;  %v1508_v35 = vsub.f32 %v1255_v26, %v1250_v16  ;;  %v819_v45 = vrot.slane %v1267_v39, %v1070_v12 }
  0x29   :  { %1901 = vst [vmem:[#allocation18_spill] sm:$0xff] %v1502_v37  ;;  %v896_v54 = vsub.f32 %v1490_v14, %v844_v53  ;;  %v606_v2 = vmul.f32 %v599_v61, %v1495_v22  ;;  %v1516_v40 = vsub.f32 %v1289_v49, %v1284_v48  ;;  %v53_v57 = vrot.slane %v1038_v3, %v1113_v23 }
  0x2a   :  { %1902 = vst [vmem:[#allocation19_spill] sm:$0xff] %v1508_v35  ;;  %v388_v51 = vadd.f32 %v386_v47, %v278_v9  ;;  %v716_v6 = vmul.f32 %v709_v63, %v1502_v37  ;;  %v826_v26 = vmul.f32 %v819_v45, %v1508_v35  ;;  %v1524_v15 = vsub.f32 %v1313_v27, %v1308_v59  ;;  %v1576_v9 = vld [vmem:[%s1851_s0 + $0x11] ss:$8 sm:$0x3]  ;;  %v1913_v35 = vld [vmem:[#allocation3_spill] sm:$0xff] }
  0x2b   :  { %1903 = vst [vmem:[#allocation20_spill] sm:$0xff] %v1516_v40  ;;  %898 = vst [vmem:[%s1855_s4 + $0x8] sm:$0xff] %v896_v54  ;;  %v57_v32 = vmul.f32 %v53_v57, %v1516_v40  ;;  %v163_v49 = vrot.slane %v1063_v10, %v1113_v23  ;;  %v1534_v3 = vsub.f32 %v1335_v52, %v1330_v42  ;;  %v1581_v63 = vld [vmem:[%s1852_s1 + $0x11] ss:$8 sm:$0x3] }
  0x2c   :  { %1904 = vst [vmem:[#allocation21_spill] sm:$0xff] %v1524_v15  ;;  %v273_v13 = vrot.slane %v1090_v17, %v1113_v23  ;;  %v498_v20 = vadd.f32 %v496_v46, %v388_v51  ;;  %v1540_v27 = vsub.f32 %v1356_v4, %v1351_v0  ;;  %v383_v47 = vrot.slane %v1132_v30, %v1113_v23  ;;  %v1559_v4 = vld [vmem:[%s1851_s0 + $0x10] ss:$8 sm:$0x3] }
  0x2d   :  { %1905 = vst [vmem:[#allocation22_spill] sm:$0xff] %v1534_v3  ;;  %v1546_v53 = vsub.f32 %v1378_v11, %v1373_v34  ;;  %v167_v10 = vmul.f32 %v163_v49, %v1524_v15  ;;  %v493_v61 = vrot.slane %v1166_v38, %v1113_v23  ;;  %v1554_v17 = vsub.f32 %v1401_v28, %v1396_v33  ;;  %v1564_v30 = vld [vmem:[%s1852_s1 + $0x10] ss:$8 sm:$0x3] }
  0x2e   :  { %1906 = vst [vmem:[#allocation23_spill] sm:$0xff] %v1540_v27  ;;  %v277_v52 = vmul.f32 %v273_v13, %v1534_v3  ;;  %v608_v11 = vadd.f32 %v606_v2, %v498_v20  ;;  %v387_v46 = vmul.f32 %v383_v47, %v1540_v27  ;;  %v603_v38 = vrot.slane %v1197_v50, %v1113_v23  ;;  %v1689_v15 = vld [vmem:[%s1851_s0 + $0x16] ss:$8 sm:$0x3] }
  0x2f   :  { %1907 = vst [vmem:[#allocation24_spill] sm:$0xff] %v1546_v53  ;;  %1908 = vst [vmem:[#allocation25_spill] sm:$0xff] %v1554_v17  ;;  %v1571_v28 = vsub.f32 %v1417_v29, %v1412_v31  ;;  %v169_v45 = vadd.f32 %v167_v10, %v57_v32  ;;  %v497_v54 = vmul.f32 %v493_v61, %v1546_v53  ;;  %v1600_v32 = vld [vmem:[%s1851_s0 + $0x12] ss:$8 sm:$0x3] }
  0x30   :  { %v713_v50 = vrot.slane %v1230_v62, %v1113_v23  ;;  %v1588_v29 = vsub.f32 %v1443_v43, %v1438_v55  ;;  %v718_v2 = vadd.f32 %v716_v6, %v608_v11  ;;  %v607_v57 = vmul.f32 %v603_v38, %v1554_v17  ;;  %v1605_v62 = vld [vmem:[%s1852_s1 + $0x12] ss:$8 sm:$0x3]  ;;  %v1627_v11 = vld [vmem:[%s1852_s1 + $0x13] ss:$8 sm:$0x3] }
  0x31   :  { %1909 = vst [vmem:[#allocation26_spill] sm:$0xff] %v1571_v28  ;;  %v823_v51 = vrot.slane %v1267_v39, %v1113_v23  ;;  %v1595_v49 = vadd.f32 %v1564_v30, %v1559_v4  ;;  %v279_v43 = vadd.f32 %v277_v52, %v169_v45  ;;  %v114_v39 = vrot.slane %v1564_v30, %v1070_v12  ;;  %v1622_v52 = vld [vmem:[%s1851_s0 + $0x13] ss:$8 sm:$0x3] }
  0x32   :  { %1910 = vst [vmem:[#allocation27_spill] sm:$0xff] %v1588_v29  ;;  %v717_v6 = vmul.f32 %v713_v50, %v1571_v28  ;;  %v1612_v13 = vadd.f32 %v1581_v63, %v1576_v9  ;;  %v828_v20 = vadd.f32 %v826_v26, %v718_v2  ;;  %v224_v61 = vrot.slane %v1581_v63, %v1070_v12  ;;  %v1639_v2 = vld [vmem:[%s1851_s0 + $0x14] ss:$8 sm:$0x3] }
  0x33   :  { %v827_v47 = vmul.f32 %v823_v51, %v1588_v29  ;;  %v84_v10 = vrot.slane %v1595_v49, %v1070_v12  ;;  %v389_v38 = vadd.f32 %v387_v46, %v279_v43  ;;  %v121_v26 = vmul.f32 %v114_v39, %v1054_v8  ;;  %v1644_v51 = vld [vmem:[%s1852_s1 + $0x14] ss:$8 sm:$0x3]  ;;  %v1911_v8 = vld [vmem:[#allocation2_spill] sm:$0xff] }
  0x34   :  { %v194_v45 = vrot.slane %v1612_v13, %v1070_v12  ;;  %v1634_v50 = vadd.f32 %v1605_v62, %v1600_v32  ;;  %v899_v46 = vadd.f32 %v828_v20, %v1380_v58  ;;  %v1912_v39 = vld [vmem:[#allocation4_spill] sm:$0xff]  ;;  %v334_v28 = vrot.slane %v1605_v62, %v1070_v12  ;;  %v1914_v20 = vld [vmem:[#allocation6_spill] sm:$0xff] }
  0x35   :  { %v91_v43 = vmul.f32 %v84_v10, %v1911_v8  ;;  %v231_v29 = vmul.f32 %v224_v61, %v1912_v39  ;;  %v499_v17 = vadd.f32 %v497_v54, %v389_v38  ;;  %v1656_v27 = vadd.f32 %v1627_v11, %v1622_v52  ;;  %v1671_v54 = vld [vmem:[%s1851_s0 + $0x15] ss:$8 sm:$0x3]  ;;  %v1917_v39 = vld [vmem:[#allocation7_spill] sm:$0xff] }
  0x36   :  { %v201_v53 = vmul.f32 %v1913_v35, %v194_v45  ;;  %v304_v37 = vrot.slane %v1634_v50, %v1070_v12  ;;  %901 = vst [vmem:[%s1856_s5] sm:$0xff] %v899_v46  ;;  %v341_v10 = vmul.f32 %v334_v28, %v1914_v20  ;;  %v444_v61 = vrot.slane %v1627_v11, %v1070_v12  ;;  %v1676_v38 = vld [vmem:[%s1852_s1 + $0x15] ss:$8 sm:$0x3] }
  0x37   :  { %v233_v58 = vadd.f32 %v231_v29, %v121_v26  ;;  %v1666_v35 = vadd.f32 %v1644_v51, %v1639_v2  ;;  %1915 = vst [vmem:[#allocation2_spill] sm:$0xff] %v1671_v54  ;;  %v609_v29 = vadd.f32 %v607_v57, %v499_v17  ;;  %v1916_v28 = vld [vmem:[#allocation5_spill] sm:$0xff]  ;;  %v414_v46 = vrot.slane %v1656_v27, %v1070_v12 }
  0x38   :  { %v203_v26 = vadd.f32 %v201_v53, %v91_v43  ;;  %v311_v45 = vmul.f32 %v1916_v28, %v304_v37  ;;  %v451_v20 = vmul.f32 %v444_v61, %v1917_v39  ;;  %v554_v22 = vrot.slane %v1644_v51, %v1070_v12  ;;  %v1694_v37 = vld [vmem:[%s1852_s1 + $0x16] ss:$8 sm:$0x3] }
  0x39   :  { %v343_v8 = vadd.f32 %v341_v10, %v233_v58  ;;  %v524_v3 = vrot.slane %v1666_v35, %v1070_v12  ;;  %v719_v53 = vadd.f32 %v717_v6, %v609_v29  ;;  %v421_v57 = vmul.f32 %v1106_v21, %v414_v46  ;;  %v1704_v58 = vld [vmem:[%s1851_s0 + $0x17] ss:$8 sm:$0x3] }
  0x3a   :  { %v313_v17 = vadd.f32 %v311_v45, %v203_v26  ;;  %v1699_v43 = vadd.f32 %v1676_v38, %v1671_v54  ;;  %v1709_v10 = vld [vmem:[%s1852_s1 + $0x17] ss:$8 sm:$0x3]  ;;  %v664_v21 = vrot.slane %v1676_v38, %v1070_v12  ;;  %v739_v39 = vadd.f32 %v1694_v37, %v1689_v15 }
  0x3b   :  { %v453_v61 = vadd.f32 %v451_v20, %v343_v8  ;;  %v531_v6 = vmul.f32 %v1156_v36, %v524_v3  ;;  %v1918_v29 = vld [vmem:[#allocation8_spill] sm:$0xff]  ;;  %v829_v28 = vadd.f32 %v827_v47, %v719_v53  ;;  %v774_v8 = vrot.slane %v1694_v37, %v1070_v12 }
  0x3c   :  { %v561_v26 = vmul.f32 %v554_v22, %v1918_v29  ;;  %v423_v45 = vadd.f32 %v421_v57, %v313_v17  ;;  %v634_v46 = vrot.slane %v1699_v43, %v1070_v12  ;;  %v671_v54 = vmul.f32 %v664_v21, %v1919_v5  ;;  %v1920_v17 = vld [vmem:[#allocation10_spill] sm:$0xff] }
  0x3d   :  { %v1724_v36 = vadd.f32 %v1709_v10, %v1704_v58  ;;  %v900_v22 = vadd.f32 %v829_v28, %v1490_v14  ;;  %v744_v20 = vrot.slane %v739_v39, %v1070_v12  ;;  %v781_v57 = vmul.f32 %v774_v8, %v1920_v17  ;;  %v1922_v8 = vld [vmem:[#allocation12_spill] sm:$0xff] }
  0x3e   :  { %v563_v40 = vadd.f32 %v561_v26, %v453_v61  ;;  %v533_v3 = vadd.f32 %v531_v6, %v423_v45  ;;  %v641_v47 = vmul.f32 %v1180_v44, %v634_v46  ;;  %v884_v61 = vrot.slane %v1709_v10, %v1070_v12  ;;  %v1921_v26 = vld [vmem:[#allocation11_spill] sm:$0xff] }
  0x3f   :  { %v854_v5 = vrot.slane %v1724_v36, %v1070_v12  ;;  %902 = vst [vmem:[%s1856_s5 + $0x8] sm:$0xff] %v900_v22  ;;  %v751_v14 = vmul.f32 %v1215_v56, %v744_v20  ;;  %v88_v44 = vrot.slane %v1595_v49, %v1113_v23  ;;  %v198_v28 = vrot.slane %v1612_v13, %v1113_v23  ;;  %v1923_v13 = vld [vmem:[#allocation13_spill] sm:$0xff] }
  0x40   :  { %v673_v53 = vadd.f32 %v671_v54, %v563_v40  ;;  %v643_v29 = vadd.f32 %v641_v47, %v533_v3  ;;  %v118_v40 = vrot.slane %v1564_v30, %v1113_v23  ;;  %v891_v21 = vmul.f32 %v884_v61, %v1921_v26 }
  0x41   :  { %v861_v6 = vmul.f32 %v1250_v16, %v854_v5  ;;  %v92_v46 = vmul.f32 %v88_v44, %v1284_v48  ;;  %v228_v56 = vrot.slane %v1581_v63, %v1113_v23  ;;  %v202_v3 = vmul.f32 %v1308_v59, %v198_v28  ;;  %v1924_v59 = vld [vmem:[#allocation14_spill] sm:$0xff] }
  0x42   :  { %v783_v54 = vadd.f32 %v781_v57, %v673_v53  ;;  %v753_v45 = vadd.f32 %v751_v14, %v643_v29  ;;  %v122_v22 = vmul.f32 %v118_v40, %v1922_v8  ;;  %v308_v30 = vrot.slane %v1634_v50, %v1113_v23  ;;  %v1925_v29 = vld [vmem:[#allocation15_spill] sm:$0xff] }
  0x43   :  { %v338_v16 = vrot.slane %v1605_v62, %v1113_v23  ;;  %v232_v20 = vmul.f32 %v228_v56, %v1923_v13  ;;  %v418_v48 = vrot.slane %v1656_v27, %v1113_v23  ;;  %v448_v53 = vrot.slane %v1627_v11, %v1113_v23 }
  0x44   :  { %v893_v49 = vadd.f32 %v891_v21, %v783_v54  ;;  %v1755_v47 = vadd.f32 %v861_v6, %v753_v45  ;;  %v204_v63 = vadd.f32 %v202_v3, %v92_v46  ;;  %v312_v17 = vmul.f32 %v1330_v42, %v308_v30 }
  0x45   :  { %v342_v57 = vmul.f32 %v338_v16, %v1924_v59  ;;  %v528_v50 = vrot.slane %v1666_v35, %v1113_v23  ;;  %v234_v5 = vadd.f32 %v232_v20, %v122_v22  ;;  %v422_v61 = vmul.f32 %v1351_v0, %v418_v48  ;;  %v1926_v20 = vld [vmem:[#allocation2_spill] sm:$0xff] }
  0x46   :  { %v903_v62 = vsub.f32 %v1755_v47, %v893_v49  ;;  %v452_v14 = vmul.f32 %v448_v53, %v1925_v29  ;;  %v314_v44 = vadd.f32 %v312_v17, %v204_v63  ;;  %v558_v11 = vrot.slane %v1644_v51, %v1113_v23  ;;  %v1927_v53 = vld [vmem:[#allocation16_spill] sm:$0xff]  ;;  %v1930_v29 = vld [vmem:[#allocation17_spill] sm:$0xff] }
  0x47   :  { %v532_v27 = vmul.f32 %v1373_v34, %v528_v50  ;;  %v638_v42 = vrot.slane %v1699_v43, %v1113_v23  ;;  %v344_v35 = vadd.f32 %v342_v57, %v234_v5  ;;  %v668_v40 = vrot.slane %v1676_v38, %v1113_v23  ;;  %v1929_v57 = vld [vmem:[#allocation21_spill] sm:$0xff] }
  0x48   :  { %993 = vst [vmem:[%s1855_s4 + $0x10] sm:$0xff] %v903_v62  ;;  %v748_v0 = vrot.slane %v739_v39, %v1113_v23  ;;  %v778_v54 = vrot.slane %v1694_v37, %v1113_v23  ;;  %v424_v34 = vadd.f32 %v422_v61, %v314_v44  ;;  %v562_v6 = vmul.f32 %v558_v11, %v1407_v60  ;;  %v1931_v11 = vld [vmem:[#allocation22_spill] sm:$0xff] }
  0x49   :  { %v642_v51 = vmul.f32 %v1396_v33, %v638_v42  ;;  %v858_v43 = vrot.slane %v1724_v36, %v1113_v23  ;;  %v454_v26 = vadd.f32 %v452_v14, %v344_v35  ;;  %v672_v21 = vmul.f32 %v668_v40, %v1429_v19  ;;  %v1932_v35 = vld [vmem:[#allocation23_spill] sm:$0xff] }
  0x4a   :  { %v752_v28 = vmul.f32 %v1412_v31, %v748_v0  ;;  %v534_v45 = vadd.f32 %v532_v27, %v424_v34  ;;  %v782_v38 = vmul.f32 %v778_v54, %v1449_v7  ;;  %v888_v39 = vrot.slane %v1709_v10, %v1113_v23  ;;  %v1934_v34 = vld [vmem:[#allocation24_spill] sm:$0xff] }
  0x4b   :  { %v99_v37 = vrot.slane %v1559_v4, %v1070_v12  ;;  %v564_v60 = vadd.f32 %v562_v6, %v454_v26  ;;  %v209_v33 = vrot.slane %v1576_v9, %v1070_v12  ;;  %v319_v36 = vrot.slane %v1600_v32, %v1070_v12 }
  0x4c   :  { %v429_v19 = vrot.slane %v1622_v52, %v1070_v12  ;;  %v644_v31 = vadd.f32 %v642_v51, %v534_v45  ;;  %v862_v46 = vmul.f32 %v1438_v55, %v858_v43  ;;  %v539_v10 = vrot.slane %v1639_v2, %v1070_v12  ;;  %v1935_v43 = vld [vmem:[#allocation19_spill] sm:$0xff] }
  0x4d   :  { %v106_v7 = vmul.f32 %v99_v37, %v1093_v18  ;;  %v674_v8 = vadd.f32 %v672_v21, %v564_v60  ;;  %v892_v22 = vmul.f32 %v888_v39, %v1459_v41  ;;  %v216_v56 = vmul.f32 %v209_v33, %v1116_v24  ;;  %v1937_v60 = vld [vmem:[#allocation26_spill] sm:$0xff] }
  0x4e   :  { %v326_v49 = vmul.f32 %v319_v36, %v1119_v25  ;;  %v754_v3 = vadd.f32 %v752_v28, %v644_v31  ;;  %v436_v30 = vmul.f32 %v429_v19, %v1479_v1  ;;  %v649_v55 = vrot.slane %v1926_v20, %v1070_v12  ;;  %v1928_v1 = vld [vmem:[#allocation20_spill] sm:$0xff]  ;;  %v1936_v28 = vld [vmem:[#allocation25_spill] sm:$0xff]  ;;  %v1938_v31 = vld [vmem:[#allocation27_spill] sm:$0xff] }
  0x4f   :  { %v784_v16 = vadd.f32 %v782_v38, %v674_v8  ;;  %v218_v13 = vadd.f32 %v216_v56, %v106_v7  ;;  %v103_v18 = vrot.slane %v1559_v4, %v1113_v23  ;;  %v546_v63 = vmul.f32 %v539_v10, %v1927_v53 }
  0x50   :  { %v864_v48 = vadd.f32 %v862_v46, %v754_v3  ;;  %v213_v41 = vrot.slane %v1576_v9, %v1113_v23  ;;  %v759_v25 = vrot.slane %v1689_v15, %v1070_v12  ;;  %v323_v62 = vrot.slane %v1600_v32, %v1113_v23 }
  0x51   :  { %v894_v24 = vadd.f32 %v892_v22, %v784_v16  ;;  %v328_v17 = vadd.f32 %v326_v49, %v218_v13  ;;  %v107_v59 = vmul.f32 %v103_v18, %v1928_v1  ;;  %v433_v4 = vrot.slane %v1622_v52, %v1113_v23 }
  0x52   :  { %v217_v50 = vmul.f32 %v213_v41, %v1929_v57  ;;  %v543_v5 = vrot.slane %v1639_v2, %v1113_v23  ;;  %v656_v14 = vmul.f32 %v649_v55, %v1930_v29  ;;  %v869_v44 = vrot.slane %v1704_v58, %v1070_v12  ;;  %v1933_v2 = vld [vmem:[#allocation18_spill] sm:$0xff] }
  0x53   :  { %v904_v61 = vsub.f32 %v864_v48, %v894_v24  ;;  %v438_v9 = vadd.f32 %v436_v30, %v328_v17  ;;  %v327_v42 = vmul.f32 %v323_v62, %v1931_v11  ;;  %v437_v40 = vmul.f32 %v433_v4, %v1932_v35 }
  0x54   :  { %v219_v27 = vadd.f32 %v217_v50, %v107_v59  ;;  %v653_v32 = vrot.slane %v1926_v20, %v1113_v23  ;;  %v766_v0 = vmul.f32 %v759_v25, %v1933_v2  ;;  %v547_v6 = vmul.f32 %v543_v5, %v1934_v34 }
  0x55   :  { %994 = vst [vmem:[%s1855_s4 + $0x18] sm:$0xff] %v904_v61  ;;  %v548_v52 = vadd.f32 %v546_v63, %v438_v9  ;;  %v763_v12 = vrot.slane %v1689_v15, %v1113_v23  ;;  %v876_v26 = vmul.f32 %v869_v44, %v1935_v43  ;;  %v873_v38 = vrot.slane %v1704_v58, %v1113_v23 }
  0x56   :  { %v329_v54 = vadd.f32 %v327_v42, %v219_v27  ;;  %v657_v45 = vmul.f32 %v653_v32, %v1936_v28 }
  0x57   :  { %v658_v51 = vadd.f32 %v656_v14, %v548_v52  ;;  %v767_v33 = vmul.f32 %v763_v12, %v1937_v60  ;;  %v877_v46 = vmul.f32 %v873_v38, %v1938_v31 }
  0x58   :  { %v439_v21 = vadd.f32 %v437_v40, %v329_v54 }
  0x59   :  { %v768_v39 = vadd.f32 %v766_v0, %v658_v51 }
  0x5a   :  { %v549_v37 = vadd.f32 %v547_v6, %v439_v21 }
  0x5b   :  { %v878_v36 = vadd.f32 %v876_v26, %v768_v39 }
  0x5c   :  { %v659_v19 = vadd.f32 %v657_v45, %v549_v37 }
  0x5d   :  { %v908_v7 = vadd.f32 %v878_v36, %v1755_v47 }
  0x5e   :  { %v769_v15 = vadd.f32 %v767_v33, %v659_v19 }
  0x5f   :  { %995 = vst [vmem:[%s1856_s5 + $0x10] sm:$0xff] %v908_v7 }
  0x60   :  { %v879_v10 = vadd.f32 %v877_v46, %v769_v15 }
  0x62   :  { %v909_v8 = vadd.f32 %v879_v10, %v864_v48 }
  0x64   :  { %996 = vst [vmem:[%s1856_s5 + $0x18] sm:$0xff] %v909_v8 }

// kernel: reverse.9
= control target key start
LH: loop header
LB: loop body
LE: loop exit
PB: predicated region body
PF: predicated region fallthrough
CT: control target
= control target key end

     0   :  { %v2_v0 = vlaneseq  ;;  %s2640_s0 = inlined_call_operand.vmem [shape: f32[2,8,8,8,11], index: 0, kind: input, shape index: {}]   ;;  %s2641_s1 = inlined_call_operand.vmem [shape: f32[2,8,8,8,11], index: 1, kind: output, shape index: {}]  }
   0x1   :  { %v291_v2 = vld [vmem:[%s2640_s0 + $0x10] sm:$0xff]  ;;  %v287_v3 = vld [vmem:[%s2640_s0] sm:$0xff]  ;;  %v293_v4 = vld [vmem:[%s2640_s0 + $0x18] sm:$0xff] }
   0x2   :  { %v3_v1 = vsub.s32 10, %v2_v0  ;;  %v289_v5 = vld [vmem:[%s2640_s0 + $0x8] sm:$0xff]  ;;  %v295_v7 = vld [vmem:[%s2640_s0 + $0x20] sm:$0xff]  ;;  %v301_v8 = vld [vmem:[%s2640_s0 + $0x38] sm:$0xff] }
   0x3   :  { %v297_v6 = vld [vmem:[%s2640_s0 + $0x28] sm:$0xff]  ;;  %v299_v9 = vld [vmem:[%s2640_s0 + $0x30] sm:$0xff]  ;;  %v303_v11 = vld [vmem:[%s2640_s0 + $0x40] sm:$0xff] }
   0x4   :  { %4 = vset.pattern.permute.xlu0 %v3_v1  ;;  %1861 = vset.pattern.permute.xlu1 %v3_v1  ;;  %v305_v10 = vld [vmem:[%s2640_s0 + $0x48] sm:$0xff]  ;;  %v309_v12 = vld [vmem:[%s2640_s0 + $0x58] sm:$0xff]  ;;  %v307_v13 = vld [vmem:[%s2640_s0 + $0x50] sm:$0xff] }
   0x5   :  { %559 = vperm.xlu1 %1861, %v291_v2   ;;  %547 = vperm.xlu0 %4, %v287_v3   ;;  %v313_v14 = vld [vmem:[%s2640_s0 + $0x68] sm:$0xff]  ;;  %v311_v15 = vld [vmem:[%s2640_s0 + $0x60] sm:$0xff]  ;;  %v317_v16 = vld [vmem:[%s2640_s0 + $0x78] sm:$0xff] }
   0x6   :  { %v315_v17 = vld [vmem:[%s2640_s0 + $0x70] sm:$0xff]  ;;  %v321_v18 = vld [vmem:[%s2640_s0 + $0x88] sm:$0xff]  ;;  %v319_v19 = vld [vmem:[%s2640_s0 + $0x80] sm:$0xff] }
   0x7   :  { %v325_v20 = vld [vmem:[%s2640_s0 + $0x98] sm:$0xff]  ;;  %v323_v21 = vld [vmem:[%s2640_s0 + $0x90] sm:$0xff]  ;;  %v329_v22 = vld [vmem:[%s2640_s0 + $0xa8] sm:$0xff] }
   0x8   :  { %v327_v23 = vld [vmem:[%s2640_s0 + $0xa0] sm:$0xff]  ;;  %v333_v24 = vld [vmem:[%s2640_s0 + $0xb8] sm:$0xff]  ;;  %v331_v25 = vld [vmem:[%s2640_s0 + $0xb0] sm:$0xff] }
   0x9   :  { %565 = vperm.xlu1 %1861, %v293_v4   ;;  %553 = vperm.xlu0 %4, %v289_v5   ;;  %v337_v26 = vld [vmem:[%s2640_s0 + $0xc8] sm:$0xff]  ;;  %v335_v27 = vld [vmem:[%s2640_s0 + $0xc0] sm:$0xff]  ;;  %v341_v28 = vld [vmem:[%s2640_s0 + $0xd8] sm:$0xff] }
   0xa   :  { %v339_v29 = vld [vmem:[%s2640_s0 + $0xd0] sm:$0xff]  ;;  %v345_v30 = vld [vmem:[%s2640_s0 + $0xe8] sm:$0xff]  ;;  %v343_v31 = vld [vmem:[%s2640_s0 + $0xe0] sm:$0xff] }
   0xb   :  { %v349_v32 = vld [vmem:[%s2640_s0 + $0xf8] sm:$0xff]  ;;  %v347_v33 = vld [vmem:[%s2640_s0 + $0xf0] sm:$0xff]  ;;  %v353_v34 = vld [vmem:[%s2640_s0 + $0x108] sm:$0xff] }
   0xc   :  { %v351_v35 = vld [vmem:[%s2640_s0 + $0x100] sm:$0xff]  ;;  %v357_v36 = vld [vmem:[%s2640_s0 + $0x118] sm:$0xff]  ;;  %v355_v37 = vld [vmem:[%s2640_s0 + $0x110] sm:$0xff] }
   0xd   :  { %577 = vperm.xlu1 %1861, %v297_v6   ;;  %571 = vperm.xlu0 %4, %v295_v7   ;;  %v361_v38 = vld [vmem:[%s2640_s0 + $0x128] sm:$0xff]  ;;  %v359_v39 = vld [vmem:[%s2640_s0 + $0x120] sm:$0xff]  ;;  %v365_v40 = vld [vmem:[%s2640_s0 + $0x138] sm:$0xff] }
   0xe   :  { %v363_v41 = vld [vmem:[%s2640_s0 + $0x130] sm:$0xff]  ;;  %v369_v42 = vld [vmem:[%s2640_s0 + $0x148] sm:$0xff]  ;;  %v367_v43 = vld [vmem:[%s2640_s0 + $0x140] sm:$0xff] }
   0xf   :  { %v373_v44 = vld [vmem:[%s2640_s0 + $0x158] sm:$0xff]  ;;  %v371_v45 = vld [vmem:[%s2640_s0 + $0x150] sm:$0xff]  ;;  %v377_v46 = vld [vmem:[%s2640_s0 + $0x168] sm:$0xff] }
  0x10   :  { %v375_v47 = vld [vmem:[%s2640_s0 + $0x160] sm:$0xff]  ;;  %v381_v48 = vld [vmem:[%s2640_s0 + $0x178] sm:$0xff]  ;;  %v379_v49 = vld [vmem:[%s2640_s0 + $0x170] sm:$0xff] }
  0x11   :  { %589 = vperm.xlu1 %1861, %v301_v8   ;;  %583 = vperm.xlu0 %4, %v299_v9   ;;  %v385_v50 = vld [vmem:[%s2640_s0 + $0x188] sm:$0xff]  ;;  %v383_v51 = vld [vmem:[%s2640_s0 + $0x180] sm:$0xff]  ;;  %v389_v52 = vld [vmem:[%s2640_s0 + $0x198] sm:$0xff] }
  0x12   :  { %v387_v53 = vld [vmem:[%s2640_s0 + $0x190] sm:$0xff]  ;;  %v393_v54 = vld [vmem:[%s2640_s0 + $0x1a8] sm:$0xff]  ;;  %v391_v55 = vld [vmem:[%s2640_s0 + $0x1a0] sm:$0xff] }
  0x13   :  { %v397_v56 = vld [vmem:[%s2640_s0 + $0x1b8] sm:$0xff]  ;;  %v395_v57 = vld [vmem:[%s2640_s0 + $0x1b0] sm:$0xff]  ;;  %v401_v58 = vld [vmem:[%s2640_s0 + $0x1c8] sm:$0xff] }
  0x14   :  { %v399_v59 = vld [vmem:[%s2640_s0 + $0x1c0] sm:$0xff]  ;;  %v405_v60 = vld [vmem:[%s2640_s0 + $0x1d8] sm:$0xff]  ;;  %v403_v61 = vld [vmem:[%s2640_s0 + $0x1d0] sm:$0xff] }
  0x15   :  { %601 = vperm.xlu1 %1861, %v305_v10   ;;  %595 = vperm.xlu0 %4, %v303_v11   ;;  %v409_v62 = vld [vmem:[%s2640_s0 + $0x1e8] sm:$0xff]  ;;  %v407_v63 = vld [vmem:[%s2640_s0 + $0x1e0] sm:$0xff]  ;;  %v413_v0 = vld [vmem:[%s2640_s0 + $0x1f8] sm:$0xff] }
  0x16   :  { %v411_v1 = vld [vmem:[%s2640_s0 + $0x1f0] sm:$0xff]  ;;  %v417_v4 = vld [vmem:[%s2640_s0 + $0x208] sm:$0xff]  ;;  %v415_v5 = vld [vmem:[%s2640_s0 + $0x200] sm:$0xff] }
  0x17   :  { %v421_v8 = vld [vmem:[%s2640_s0 + $0x218] sm:$0xff]  ;;  %v419_v9 = vld [vmem:[%s2640_s0 + $0x210] sm:$0xff] }
  0x19   :  { %613 = vperm.xlu1 %1861, %v309_v12   ;;  %607 = vperm.xlu0 %4, %v307_v13   ;;  %v425_v12 = vld [vmem:[%s2640_s0 + $0x228] sm:$0xff]  ;;  %v423_v13 = vld [vmem:[%s2640_s0 + $0x220] sm:$0xff] }
  0x1d   :  { %625 = vperm.xlu1 %1861, %v313_v14   ;;  %619 = vperm.xlu0 %4, %v311_v15  }
  0x21   :  { %637 = vperm.xlu1 %1861, %v317_v16   ;;  %631 = vperm.xlu0 %4, %v315_v17   ;;  %v429_v16 = vld [vmem:[%s2640_s0 + $0x238] sm:$0xff]  ;;  %v427_v17 = vld [vmem:[%s2640_s0 + $0x230] sm:$0xff] }
  0x25   :  { %649 = vperm.xlu1 %1861, %v321_v18   ;;  %643 = vperm.xlu0 %4, %v319_v19  }
  0x29   :  { %661 = vperm.xlu1 %1861, %v325_v20   ;;  %655 = vperm.xlu0 %4, %v323_v21   ;;  %v433_v20 = vld [vmem:[%s2640_s0 + $0x248] sm:$0xff]  ;;  %v431_v21 = vld [vmem:[%s2640_s0 + $0x240] sm:$0xff] }
  0x2d   :  { %673 = vperm.xlu1 %1861, %v329_v22   ;;  %667 = vperm.xlu0 %4, %v327_v23  }
  0x31   :  { %685 = vperm.xlu1 %1861, %v333_v24   ;;  %679 = vperm.xlu0 %4, %v331_v25   ;;  %v437_v24 = vld [vmem:[%s2640_s0 + $0x258] sm:$0xff]  ;;  %v435_v25 = vld [vmem:[%s2640_s0 + $0x250] sm:$0xff] }
  0x35   :  { %697 = vperm.xlu1 %1861, %v337_v26   ;;  %691 = vperm.xlu0 %4, %v335_v27  }
  0x39   :  { %709 = vperm.xlu1 %1861, %v341_v28   ;;  %703 = vperm.xlu0 %4, %v339_v29   ;;  %v441_v28 = vld [vmem:[%s2640_s0 + $0x268] sm:$0xff]  ;;  %v439_v29 = vld [vmem:[%s2640_s0 + $0x260] sm:$0xff] }
  0x3d   :  { %721 = vperm.xlu1 %1861, %v345_v30   ;;  %715 = vperm.xlu0 %4, %v343_v31  }
  0x41   :  { %733 = vperm.xlu1 %1861, %v349_v32   ;;  %727 = vperm.xlu0 %4, %v347_v33   ;;  %v445_v32 = vld [vmem:[%s2640_s0 + $0x278] sm:$0xff]  ;;  %v443_v33 = vld [vmem:[%s2640_s0 + $0x270] sm:$0xff] }
  0x45   :  { %745 = vperm.xlu1 %1861, %v353_v34   ;;  %739 = vperm.xlu0 %4, %v351_v35  }
  0x49   :  { %757 = vperm.xlu1 %1861, %v357_v36   ;;  %751 = vperm.xlu0 %4, %v355_v37   ;;  %v449_v36 = vld [vmem:[%s2640_s0 + $0x288] sm:$0xff]  ;;  %v447_v37 = vld [vmem:[%s2640_s0 + $0x280] sm:$0xff] }
  0x4d   :  { %769 = vperm.xlu1 %1861, %v361_v38   ;;  %763 = vperm.xlu0 %4, %v359_v39  }
  0x51   :  { %781 = vperm.xlu1 %1861, %v365_v40   ;;  %775 = vperm.xlu0 %4, %v363_v41   ;;  %v453_v40 = vld [vmem:[%s2640_s0 + $0x298] sm:$0xff]  ;;  %v451_v41 = vld [vmem:[%s2640_s0 + $0x290] sm:$0xff] }
  0x55   :  { %793 = vperm.xlu1 %1861, %v369_v42   ;;  %787 = vperm.xlu0 %4, %v367_v43  }
  0x59   :  { %805 = vperm.xlu1 %1861, %v373_v44   ;;  %799 = vperm.xlu0 %4, %v371_v45   ;;  %v457_v44 = vld [vmem:[%s2640_s0 + $0x2a8] sm:$0xff]  ;;  %v455_v45 = vld [vmem:[%s2640_s0 + $0x2a0] sm:$0xff] }
  0x5d   :  { %817 = vperm.xlu1 %1861, %v377_v46   ;;  %811 = vperm.xlu0 %4, %v375_v47  }
  0x61   :  { %829 = vperm.xlu1 %1861, %v381_v48   ;;  %823 = vperm.xlu0 %4, %v379_v49   ;;  %v461_v48 = vld [vmem:[%s2640_s0 + $0x2b8] sm:$0xff]  ;;  %v459_v49 = vld [vmem:[%s2640_s0 + $0x2b0] sm:$0xff] }
  0x65   :  { %841 = vperm.xlu1 %1861, %v385_v50   ;;  %835 = vperm.xlu0 %4, %v383_v51  }
  0x69   :  { %853 = vperm.xlu1 %1861, %v389_v52   ;;  %847 = vperm.xlu0 %4, %v387_v53   ;;  %v465_v52 = vld [vmem:[%s2640_s0 + $0x2c8] sm:$0xff]  ;;  %v463_v53 = vld [vmem:[%s2640_s0 + $0x2c0] sm:$0xff] }
  0x6d   :  { %865 = vperm.xlu1 %1861, %v393_v54   ;;  %859 = vperm.xlu0 %4, %v391_v55  }
  0x71   :  { %877 = vperm.xlu1 %1861, %v397_v56   ;;  %871 = vperm.xlu0 %4, %v395_v57   ;;  %v469_v56 = vld [vmem:[%s2640_s0 + $0x2d8] sm:$0xff]  ;;  %v467_v57 = vld [vmem:[%s2640_s0 + $0x2d0] sm:$0xff] }
  0x75   :  { %889 = vperm.xlu1 %1861, %v401_v58   ;;  %883 = vperm.xlu0 %4, %v399_v59  }
  0x79   :  { %901 = vperm.xlu1 %1861, %v405_v60   ;;  %895 = vperm.xlu0 %4, %v403_v61   ;;  %v473_v60 = vld [vmem:[%s2640_s0 + $0x2e8] sm:$0xff]  ;;  %v471_v61 = vld [vmem:[%s2640_s0 + $0x2e0] sm:$0xff] }
  0x7d   :  { %913 = vperm.xlu1 %1861, %v409_v62   ;;  %907 = vperm.xlu0 %4, %v407_v63  }
  0x80   :  { %v560_v2 = vpop.permute.xlu1 %559  ;;  %v548_v3 = vpop.permute.xlu0 %547 }
  0x81   :  { %1599 = vst [vmem:[%s2641_s1 + $0x10] sm:$0xff] %v560_v2  ;;  %1595 = vst [vmem:[%s2641_s1] sm:$0xff] %v548_v3  ;;  %925 = vperm.xlu1 %1861, %v413_v0   ;;  %919 = vperm.xlu0 %4, %v411_v1   ;;  %v477_v0 = vld [vmem:[%s2640_s0 + $0x2f8] sm:$0xff]  ;;  %v475_v1 = vld [vmem:[%s2640_s0 + $0x2f0] sm:$0xff] }
  0x84   :  { %v566_v6 = vpop.permute.xlu1 %565  ;;  %v554_v7 = vpop.permute.xlu0 %553 }
  0x85   :  { %1601 = vst [vmem:[%s2641_s1 + $0x18] sm:$0xff] %v566_v6  ;;  %1597 = vst [vmem:[%s2641_s1 + $0x8] sm:$0xff] %v554_v7  ;;  %937 = vperm.xlu1 %1861, %v417_v4   ;;  %931 = vperm.xlu0 %4, %v415_v5   ;;  %v481_v4 = vld [vmem:[%s2640_s0 + $0x308] sm:$0xff]  ;;  %v479_v5 = vld [vmem:[%s2640_s0 + $0x300] sm:$0xff] }
  0x88   :  { %v578_v10 = vpop.permute.xlu1 %577  ;;  %v572_v11 = vpop.permute.xlu0 %571 }
  0x89   :  { %1605 = vst [vmem:[%s2641_s1 + $0x28] sm:$0xff] %v578_v10  ;;  %1603 = vst [vmem:[%s2641_s1 + $0x20] sm:$0xff] %v572_v11  ;;  %949 = vperm.xlu1 %1861, %v421_v8   ;;  %943 = vperm.xlu0 %4, %v419_v9   ;;  %v485_v8 = vld [vmem:[%s2640_s0 + $0x318] sm:$0xff]  ;;  %v483_v9 = vld [vmem:[%s2640_s0 + $0x310] sm:$0xff] }
  0x8c   :  { %v590_v14 = vpop.permute.xlu1 %589  ;;  %v584_v15 = vpop.permute.xlu0 %583 }
  0x8d   :  { %1609 = vst [vmem:[%s2641_s1 + $0x38] sm:$0xff] %v590_v14  ;;  %1607 = vst [vmem:[%s2641_s1 + $0x30] sm:$0xff] %v584_v15  ;;  %961 = vperm.xlu1 %1861, %v425_v12   ;;  %955 = vperm.xlu0 %4, %v423_v13   ;;  %v489_v12 = vld [vmem:[%s2640_s0 + $0x328] sm:$0xff]  ;;  %v487_v13 = vld [vmem:[%s2640_s0 + $0x320] sm:$0xff] }
  0x90   :  { %v602_v18 = vpop.permute.xlu1 %601  ;;  %v596_v19 = vpop.permute.xlu0 %595 }
  0x91   :  { %1613 = vst [vmem:[%s2641_s1 + $0x48] sm:$0xff] %v602_v18  ;;  %1611 = vst [vmem:[%s2641_s1 + $0x40] sm:$0xff] %v596_v19  ;;  %973 = vperm.xlu1 %1861, %v429_v16   ;;  %967 = vperm.xlu0 %4, %v427_v17   ;;  %v493_v16 = vld [vmem:[%s2640_s0 + $0x338] sm:$0xff]  ;;  %v491_v17 = vld [vmem:[%s2640_s0 + $0x330] sm:$0xff] }
  0x94   :  { %v614_v22 = vpop.permute.xlu1 %613  ;;  %v608_v23 = vpop.permute.xlu0 %607 }
  0x95   :  { %1617 = vst [vmem:[%s2641_s1 + $0x58] sm:$0xff] %v614_v22  ;;  %1615 = vst [vmem:[%s2641_s1 + $0x50] sm:$0xff] %v608_v23  ;;  %985 = vperm.xlu1 %1861, %v433_v20   ;;  %979 = vperm.xlu0 %4, %v431_v21   ;;  %v497_v20 = vld [vmem:[%s2640_s0 + $0x348] sm:$0xff]  ;;  %v495_v21 = vld [vmem:[%s2640_s0 + $0x340] sm:$0xff] }
  0x98   :  { %v626_v26 = vpop.permute.xlu1 %625  ;;  %v620_v27 = vpop.permute.xlu0 %619 }
  0x99   :  { %1621 = vst [vmem:[%s2641_s1 + $0x68] sm:$0xff] %v626_v26  ;;  %1619 = vst [vmem:[%s2641_s1 + $0x60] sm:$0xff] %v620_v27  ;;  %997 = vperm.xlu1 %1861, %v437_v24   ;;  %991 = vperm.xlu0 %4, %v435_v25   ;;  %v501_v24 = vld [vmem:[%s2640_s0 + $0x358] sm:$0xff]  ;;  %v499_v25 = vld [vmem:[%s2640_s0 + $0x350] sm:$0xff] }
  0x9c   :  { %v638_v30 = vpop.permute.xlu1 %637  ;;  %v632_v31 = vpop.permute.xlu0 %631 }
  0x9d   :  { %1625 = vst [vmem:[%s2641_s1 + $0x78] sm:$0xff] %v638_v30  ;;  %1623 = vst [vmem:[%s2641_s1 + $0x70] sm:$0xff] %v632_v31  ;;  %1009 = vperm.xlu1 %1861, %v441_v28   ;;  %1003 = vperm.xlu0 %4, %v439_v29   ;;  %v505_v28 = vld [vmem:[%s2640_s0 + $0x368] sm:$0xff]  ;;  %v503_v29 = vld [vmem:[%s2640_s0 + $0x360] sm:$0xff] }
  0xa0   :  { %v650_v34 = vpop.permute.xlu1 %649  ;;  %v644_v35 = vpop.permute.xlu0 %643 }
  0xa1   :  { %1629 = vst [vmem:[%s2641_s1 + $0x88] sm:$0xff] %v650_v34  ;;  %1627 = vst [vmem:[%s2641_s1 + $0x80] sm:$0xff] %v644_v35  ;;  %1021 = vperm.xlu1 %1861, %v445_v32   ;;  %1015 = vperm.xlu0 %4, %v443_v33   ;;  %v509_v32 = vld [vmem:[%s2640_s0 + $0x378] sm:$0xff]  ;;  %v507_v33 = vld [vmem:[%s2640_s0 + $0x370] sm:$0xff] }
  0xa4   :  { %v662_v38 = vpop.permute.xlu1 %661  ;;  %v656_v39 = vpop.permute.xlu0 %655 }
  0xa5   :  { %1633 = vst [vmem:[%s2641_s1 + $0x98] sm:$0xff] %v662_v38  ;;  %1631 = vst [vmem:[%s2641_s1 + $0x90] sm:$0xff] %v656_v39  ;;  %1033 = vperm.xlu1 %1861, %v449_v36   ;;  %1027 = vperm.xlu0 %4, %v447_v37   ;;  %v513_v36 = vld [vmem:[%s2640_s0 + $0x388] sm:$0xff]  ;;  %v511_v37 = vld [vmem:[%s2640_s0 + $0x380] sm:$0xff] }
  0xa8   :  { %v674_v42 = vpop.permute.xlu1 %673  ;;  %v668_v43 = vpop.permute.xlu0 %667 }
  0xa9   :  { %1637 = vst [vmem:[%s2641_s1 + $0xa8] sm:$0xff] %v674_v42  ;;  %1635 = vst [vmem:[%s2641_s1 + $0xa0] sm:$0xff] %v668_v43  ;;  %1045 = vperm.xlu1 %1861, %v453_v40   ;;  %1039 = vperm.xlu0 %4, %v451_v41   ;;  %v517_v40 = vld [vmem:[%s2640_s0 + $0x398] sm:$0xff]  ;;  %v515_v41 = vld [vmem:[%s2640_s0 + $0x390] sm:$0xff] }
  0xac   :  { %v686_v46 = vpop.permute.xlu1 %685  ;;  %v680_v47 = vpop.permute.xlu0 %679 }
  0xad   :  { %1641 = vst [vmem:[%s2641_s1 + $0xb8] sm:$0xff] %v686_v46  ;;  %1639 = vst [vmem:[%s2641_s1 + $0xb0] sm:$0xff] %v680_v47  ;;  %1057 = vperm.xlu1 %1861, %v457_v44   ;;  %1051 = vperm.xlu0 %4, %v455_v45   ;;  %v521_v44 = vld [vmem:[%s2640_s0 + $0x3a8] sm:$0xff]  ;;  %v519_v45 = vld [vmem:[%s2640_s0 + $0x3a0] sm:$0xff] }
  0xb0   :  { %v698_v50 = vpop.permute.xlu1 %697  ;;  %v692_v51 = vpop.permute.xlu0 %691 }
  0xb1   :  { %1645 = vst [vmem:[%s2641_s1 + $0xc8] sm:$0xff] %v698_v50  ;;  %1643 = vst [vmem:[%s2641_s1 + $0xc0] sm:$0xff] %v692_v51  ;;  %1069 = vperm.xlu1 %1861, %v461_v48   ;;  %1063 = vperm.xlu0 %4, %v459_v49   ;;  %v525_v48 = vld [vmem:[%s2640_s0 + $0x3b8] sm:$0xff]  ;;  %v523_v49 = vld [vmem:[%s2640_s0 + $0x3b0] sm:$0xff] }
  0xb4   :  { %v710_v54 = vpop.permute.xlu1 %709  ;;  %v704_v55 = vpop.permute.xlu0 %703 }
  0xb5   :  { %1649 = vst [vmem:[%s2641_s1 + $0xd8] sm:$0xff] %v710_v54  ;;  %1647 = vst [vmem:[%s2641_s1 + $0xd0] sm:$0xff] %v704_v55  ;;  %1081 = vperm.xlu1 %1861, %v465_v52   ;;  %1075 = vperm.xlu0 %4, %v463_v53   ;;  %v529_v52 = vld [vmem:[%s2640_s0 + $0x3c8] sm:$0xff]  ;;  %v527_v53 = vld [vmem:[%s2640_s0 + $0x3c0] sm:$0xff] }
  0xb8   :  { %v722_v58 = vpop.permute.xlu1 %721  ;;  %v716_v59 = vpop.permute.xlu0 %715 }
  0xb9   :  { %1653 = vst [vmem:[%s2641_s1 + $0xe8] sm:$0xff] %v722_v58  ;;  %1651 = vst [vmem:[%s2641_s1 + $0xe0] sm:$0xff] %v716_v59  ;;  %1093 = vperm.xlu1 %1861, %v469_v56   ;;  %1087 = vperm.xlu0 %4, %v467_v57   ;;  %v533_v56 = vld [vmem:[%s2640_s0 + $0x3d8] sm:$0xff]  ;;  %v531_v57 = vld [vmem:[%s2640_s0 + $0x3d0] sm:$0xff] }
  0xbc   :  { %v734_v62 = vpop.permute.xlu1 %733  ;;  %v728_v63 = vpop.permute.xlu0 %727 }
  0xbd   :  { %1657 = vst [vmem:[%s2641_s1 + $0xf8] sm:$0xff] %v734_v62  ;;  %1655 = vst [vmem:[%s2641_s1 + $0xf0] sm:$0xff] %v728_v63  ;;  %1105 = vperm.xlu1 %1861, %v473_v60   ;;  %1099 = vperm.xlu0 %4, %v471_v61   ;;  %v537_v60 = vld [vmem:[%s2640_s0 + $0x3e8] sm:$0xff]  ;;  %v535_v61 = vld [vmem:[%s2640_s0 + $0x3e0] sm:$0xff] }
  0xc0   :  { %v746_v2 = vpop.permute.xlu1 %745  ;;  %v740_v3 = vpop.permute.xlu0 %739 }
  0xc1   :  { %1661 = vst [vmem:[%s2641_s1 + $0x108] sm:$0xff] %v746_v2  ;;  %1659 = vst [vmem:[%s2641_s1 + $0x100] sm:$0xff] %v740_v3  ;;  %1117 = vperm.xlu1 %1861, %v477_v0   ;;  %1111 = vperm.xlu0 %4, %v475_v1   ;;  %v541_v0 = vld [vmem:[%s2640_s0 + $0x3f8] sm:$0xff]  ;;  %v539_v1 = vld [vmem:[%s2640_s0 + $0x3f0] sm:$0xff] }
  0xc4   :  { %v758_v6 = vpop.permute.xlu1 %757  ;;  %v752_v7 = vpop.permute.xlu0 %751 }
  0xc5   :  { %1665 = vst [vmem:[%s2641_s1 + $0x118] sm:$0xff] %v758_v6  ;;  %1663 = vst [vmem:[%s2641_s1 + $0x110] sm:$0xff] %v752_v7  ;;  %1129 = vperm.xlu1 %1861, %v481_v4   ;;  %1123 = vperm.xlu0 %4, %v479_v5  }
  0xc8   :  { %v770_v10 = vpop.permute.xlu1 %769  ;;  %v764_v11 = vpop.permute.xlu0 %763 }
  0xc9   :  { %1669 = vst [vmem:[%s2641_s1 + $0x128] sm:$0xff] %v770_v10  ;;  %1667 = vst [vmem:[%s2641_s1 + $0x120] sm:$0xff] %v764_v11  ;;  %1141 = vperm.xlu1 %1861, %v485_v8   ;;  %1135 = vperm.xlu0 %4, %v483_v9  }
  0xcc   :  { %v782_v14 = vpop.permute.xlu1 %781  ;;  %v776_v15 = vpop.permute.xlu0 %775 }
  0xcd   :  { %1673 = vst [vmem:[%s2641_s1 + $0x138] sm:$0xff] %v782_v14  ;;  %1671 = vst [vmem:[%s2641_s1 + $0x130] sm:$0xff] %v776_v15  ;;  %1153 = vperm.xlu1 %1861, %v489_v12   ;;  %1147 = vperm.xlu0 %4, %v487_v13  }
  0xd0   :  { %v794_v18 = vpop.permute.xlu1 %793  ;;  %v788_v19 = vpop.permute.xlu0 %787 }
  0xd1   :  { %1677 = vst [vmem:[%s2641_s1 + $0x148] sm:$0xff] %v794_v18  ;;  %1675 = vst [vmem:[%s2641_s1 + $0x140] sm:$0xff] %v788_v19  ;;  %1165 = vperm.xlu1 %1861, %v493_v16   ;;  %1159 = vperm.xlu0 %4, %v491_v17  }
  0xd4   :  { %v806_v22 = vpop.permute.xlu1 %805  ;;  %v800_v23 = vpop.permute.xlu0 %799 }
  0xd5   :  { %1681 = vst [vmem:[%s2641_s1 + $0x158] sm:$0xff] %v806_v22  ;;  %1679 = vst [vmem:[%s2641_s1 + $0x150] sm:$0xff] %v800_v23  ;;  %1177 = vperm.xlu1 %1861, %v497_v20   ;;  %1171 = vperm.xlu0 %4, %v495_v21  }
  0xd8   :  { %v818_v26 = vpop.permute.xlu1 %817  ;;  %v812_v27 = vpop.permute.xlu0 %811 }
  0xd9   :  { %1685 = vst [vmem:[%s2641_s1 + $0x168] sm:$0xff] %v818_v26  ;;  %1683 = vst [vmem:[%s2641_s1 + $0x160] sm:$0xff] %v812_v27  ;;  %1189 = vperm.xlu1 %1861, %v501_v24   ;;  %1183 = vperm.xlu0 %4, %v499_v25  }
  0xdc   :  { %v830_v30 = vpop.permute.xlu1 %829  ;;  %v824_v31 = vpop.permute.xlu0 %823 }
  0xdd   :  { %1689 = vst [vmem:[%s2641_s1 + $0x178] sm:$0xff] %v830_v30  ;;  %1687 = vst [vmem:[%s2641_s1 + $0x170] sm:$0xff] %v824_v31  ;;  %1201 = vperm.xlu1 %1861, %v505_v28   ;;  %1195 = vperm.xlu0 %4, %v503_v29  }
  0xe0   :  { %v842_v34 = vpop.permute.xlu1 %841  ;;  %v836_v35 = vpop.permute.xlu0 %835 }
  0xe1   :  { %1693 = vst [vmem:[%s2641_s1 + $0x188] sm:$0xff] %v842_v34  ;;  %1691 = vst [vmem:[%s2641_s1 + $0x180] sm:$0xff] %v836_v35  ;;  %1213 = vperm.xlu1 %1861, %v509_v32   ;;  %1207 = vperm.xlu0 %4, %v507_v33  }
  0xe4   :  { %v854_v38 = vpop.permute.xlu1 %853  ;;  %v848_v39 = vpop.permute.xlu0 %847 }
  0xe5   :  { %1697 = vst [vmem:[%s2641_s1 + $0x198] sm:$0xff] %v854_v38  ;;  %1695 = vst [vmem:[%s2641_s1 + $0x190] sm:$0xff] %v848_v39  ;;  %1225 = vperm.xlu1 %1861, %v513_v36   ;;  %1219 = vperm.xlu0 %4, %v511_v37  }
  0xe8   :  { %v866_v42 = vpop.permute.xlu1 %865  ;;  %v860_v43 = vpop.permute.xlu0 %859 }
  0xe9   :  { %1701 = vst [vmem:[%s2641_s1 + $0x1a8] sm:$0xff] %v866_v42  ;;  %1699 = vst [vmem:[%s2641_s1 + $0x1a0] sm:$0xff] %v860_v43  ;;  %1237 = vperm.xlu1 %1861, %v517_v40   ;;  %1231 = vperm.xlu0 %4, %v515_v41  }
  0xec   :  { %v878_v46 = vpop.permute.xlu1 %877  ;;  %v872_v47 = vpop.permute.xlu0 %871 }
  0xed   :  { %1705 = vst [vmem:[%s2641_s1 + $0x1b8] sm:$0xff] %v878_v46  ;;  %1703 = vst [vmem:[%s2641_s1 + $0x1b0] sm:$0xff] %v872_v47  ;;  %1249 = vperm.xlu1 %1861, %v521_v44   ;;  %1243 = vperm.xlu0 %4, %v519_v45  }
  0xf0   :  { %v890_v50 = vpop.permute.xlu1 %889  ;;  %v884_v51 = vpop.permute.xlu0 %883 }
  0xf1   :  { %1709 = vst [vmem:[%s2641_s1 + $0x1c8] sm:$0xff] %v890_v50  ;;  %1707 = vst [vmem:[%s2641_s1 + $0x1c0] sm:$0xff] %v884_v51  ;;  %1261 = vperm.xlu1 %1861, %v525_v48   ;;  %1255 = vperm.xlu0 %4, %v523_v49  }
  0xf4   :  { %v902_v54 = vpop.permute.xlu1 %901  ;;  %v896_v55 = vpop.permute.xlu0 %895 }
  0xf5   :  { %1713 = vst [vmem:[%s2641_s1 + $0x1d8] sm:$0xff] %v902_v54  ;;  %1711 = vst [vmem:[%s2641_s1 + $0x1d0] sm:$0xff] %v896_v55  ;;  %1273 = vperm.xlu1 %1861, %v529_v52   ;;  %1267 = vperm.xlu0 %4, %v527_v53  }
  0xf8   :  { %v914_v58 = vpop.permute.xlu1 %913  ;;  %v908_v59 = vpop.permute.xlu0 %907 }
  0xf9   :  { %1717 = vst [vmem:[%s2641_s1 + $0x1e8] sm:$0xff] %v914_v58  ;;  %1715 = vst [vmem:[%s2641_s1 + $0x1e0] sm:$0xff] %v908_v59  ;;  %1285 = vperm.xlu1 %1861, %v533_v56   ;;  %1279 = vperm.xlu0 %4, %v531_v57  }
  0xfc   :  { %v926_v62 = vpop.permute.xlu1 %925  ;;  %v920_v63 = vpop.permute.xlu0 %919 }
  0xfd   :  { %1721 = vst [vmem:[%s2641_s1 + $0x1f8] sm:$0xff] %v926_v62  ;;  %1719 = vst [vmem:[%s2641_s1 + $0x1f0] sm:$0xff] %v920_v63  ;;  %1297 = vperm.xlu1 %1861, %v537_v60   ;;  %1291 = vperm.xlu0 %4, %v535_v61  }
 0x100   :  { %v938_v2 = vpop.permute.xlu1 %937  ;;  %v932_v3 = vpop.permute.xlu0 %931 }
 0x101   :  { %1725 = vst [vmem:[%s2641_s1 + $0x208] sm:$0xff] %v938_v2  ;;  %1723 = vst [vmem:[%s2641_s1 + $0x200] sm:$0xff] %v932_v3  ;;  %1309 = vperm.xlu1 %1861, %v541_v0   ;;  %1303 = vperm.xlu0 %4, %v539_v1  }
 0x104   :  { %v950_v4 = vpop.permute.xlu1 %949  ;;  %v944_v5 = vpop.permute.xlu0 %943 }
 0x105   :  { %1729 = vst [vmem:[%s2641_s1 + $0x218] sm:$0xff] %v950_v4  ;;  %1727 = vst [vmem:[%s2641_s1 + $0x210] sm:$0xff] %v944_v5 }
 0x108   :  { %v962_v6 = vpop.permute.xlu1 %961  ;;  %v956_v7 = vpop.permute.xlu0 %955 }
 0x109   :  { %1733 = vst [vmem:[%s2641_s1 + $0x228] sm:$0xff] %v962_v6  ;;  %1731 = vst [vmem:[%s2641_s1 + $0x220] sm:$0xff] %v956_v7 }
 0x10c   :  { %v974_v8 = vpop.permute.xlu1 %973  ;;  %v968_v9 = vpop.permute.xlu0 %967 }
 0x10d   :  { %1737 = vst [vmem:[%s2641_s1 + $0x238] sm:$0xff] %v974_v8  ;;  %1735 = vst [vmem:[%s2641_s1 + $0x230] sm:$0xff] %v968_v9 }
 0x110   :  { %v986_v10 = vpop.permute.xlu1 %985  ;;  %v980_v11 = vpop.permute.xlu0 %979 }
 0x111   :  { %1741 = vst [vmem:[%s2641_s1 + $0x248] sm:$0xff] %v986_v10  ;;  %1739 = vst [vmem:[%s2641_s1 + $0x240] sm:$0xff] %v980_v11 }
 0x114   :  { %v998_v12 = vpop.permute.xlu1 %997  ;;  %v992_v13 = vpop.permute.xlu0 %991 }
 0x115   :  { %1745 = vst [vmem:[%s2641_s1 + $0x258] sm:$0xff] %v998_v12  ;;  %1743 = vst [vmem:[%s2641_s1 + $0x250] sm:$0xff] %v992_v13 }
 0x118   :  { %v1010_v14 = vpop.permute.xlu1 %1009  ;;  %v1004_v15 = vpop.permute.xlu0 %1003 }
 0x119   :  { %1749 = vst [vmem:[%s2641_s1 + $0x268] sm:$0xff] %v1010_v14  ;;  %1747 = vst [vmem:[%s2641_s1 + $0x260] sm:$0xff] %v1004_v15 }
 0x11c   :  { %v1022_v16 = vpop.permute.xlu1 %1021  ;;  %v1016_v17 = vpop.permute.xlu0 %1015 }
 0x11d   :  { %1753 = vst [vmem:[%s2641_s1 + $0x278] sm:$0xff] %v1022_v16  ;;  %1751 = vst [vmem:[%s2641_s1 + $0x270] sm:$0xff] %v1016_v17 }
 0x120   :  { %v1034_v18 = vpop.permute.xlu1 %1033  ;;  %v1028_v19 = vpop.permute.xlu0 %1027 }
 0x121   :  { %1757 = vst [vmem:[%s2641_s1 + $0x288] sm:$0xff] %v1034_v18  ;;  %1755 = vst [vmem:[%s2641_s1 + $0x280] sm:$0xff] %v1028_v19 }
 0x124   :  { %v1046_v20 = vpop.permute.xlu1 %1045  ;;  %v1040_v21 = vpop.permute.xlu0 %1039 }
 0x125   :  { %1761 = vst [vmem:[%s2641_s1 + $0x298] sm:$0xff] %v1046_v20  ;;  %1759 = vst [vmem:[%s2641_s1 + $0x290] sm:$0xff] %v1040_v21 }
 0x128   :  { %v1058_v22 = vpop.permute.xlu1 %1057  ;;  %v1052_v23 = vpop.permute.xlu0 %1051 }
 0x129   :  { %1765 = vst [vmem:[%s2641_s1 + $0x2a8] sm:$0xff] %v1058_v22  ;;  %1763 = vst [vmem:[%s2641_s1 + $0x2a0] sm:$0xff] %v1052_v23 }
 0x12c   :  { %v1070_v24 = vpop.permute.xlu1 %1069  ;;  %v1064_v25 = vpop.permute.xlu0 %1063 }
 0x12d   :  { %1769 = vst [vmem:[%s2641_s1 + $0x2b8] sm:$0xff] %v1070_v24  ;;  %1767 = vst [vmem:[%s2641_s1 + $0x2b0] sm:$0xff] %v1064_v25 }
 0x130   :  { %v1082_v26 = vpop.permute.xlu1 %1081  ;;  %v1076_v27 = vpop.permute.xlu0 %1075 }
 0x131   :  { %1773 = vst [vmem:[%s2641_s1 + $0x2c8] sm:$0xff] %v1082_v26  ;;  %1771 = vst [vmem:[%s2641_s1 + $0x2c0] sm:$0xff] %v1076_v27 }
 0x134   :  { %v1094_v28 = vpop.permute.xlu1 %1093  ;;  %v1088_v29 = vpop.permute.xlu0 %1087 }
 0x135   :  { %1777 = vst [vmem:[%s2641_s1 + $0x2d8] sm:$0xff] %v1094_v28  ;;  %1775 = vst [vmem:[%s2641_s1 + $0x2d0] sm:$0xff] %v1088_v29 }
 0x138   :  { %v1106_v30 = vpop.permute.xlu1 %1105  ;;  %v1100_v31 = vpop.permute.xlu0 %1099 }
 0x139   :  { %1781 = vst [vmem:[%s2641_s1 + $0x2e8] sm:$0xff] %v1106_v30  ;;  %1779 = vst [vmem:[%s2641_s1 + $0x2e0] sm:$0xff] %v1100_v31 }
 0x13c   :  { %v1118_v32 = vpop.permute.xlu1 %1117  ;;  %v1112_v33 = vpop.permute.xlu0 %1111 }
 0x13d   :  { %1785 = vst [vmem:[%s2641_s1 + $0x2f8] sm:$0xff] %v1118_v32  ;;  %1783 = vst [vmem:[%s2641_s1 + $0x2f0] sm:$0xff] %v1112_v33 }
 0x140   :  { %v1130_v34 = vpop.permute.xlu1 %1129  ;;  %v1124_v35 = vpop.permute.xlu0 %1123 }
 0x141   :  { %1789 = vst [vmem:[%s2641_s1 + $0x308] sm:$0xff] %v1130_v34  ;;  %1787 = vst [vmem:[%s2641_s1 + $0x300] sm:$0xff] %v1124_v35 }
 0x144   :  { %v1142_v36 = vpop.permute.xlu1 %1141  ;;  %v1136_v37 = vpop.permute.xlu0 %1135 }
 0x145   :  { %1793 = vst [vmem:[%s2641_s1 + $0x318] sm:$0xff] %v1142_v36  ;;  %1791 = vst [vmem:[%s2641_s1 + $0x310] sm:$0xff] %v1136_v37 }
 0x148   :  { %v1154_v38 = vpop.permute.xlu1 %1153  ;;  %v1148_v39 = vpop.permute.xlu0 %1147 }
 0x149   :  { %1797 = vst [vmem:[%s2641_s1 + $0x328] sm:$0xff] %v1154_v38  ;;  %1795 = vst [vmem:[%s2641_s1 + $0x320] sm:$0xff] %v1148_v39 }
 0x14c   :  { %v1166_v40 = vpop.permute.xlu1 %1165  ;;  %v1160_v41 = vpop.permute.xlu0 %1159 }
 0x14d   :  { %1801 = vst [vmem:[%s2641_s1 + $0x338] sm:$0xff] %v1166_v40  ;;  %1799 = vst [vmem:[%s2641_s1 + $0x330] sm:$0xff] %v1160_v41 }
 0x150   :  { %v1178_v42 = vpop.permute.xlu1 %1177  ;;  %v1172_v43 = vpop.permute.xlu0 %1171 }
 0x151   :  { %1805 = vst [vmem:[%s2641_s1 + $0x348] sm:$0xff] %v1178_v42  ;;  %1803 = vst [vmem:[%s2641_s1 + $0x340] sm:$0xff] %v1172_v43 }
 0x154   :  { %v1190_v44 = vpop.permute.xlu1 %1189  ;;  %v1184_v45 = vpop.permute.xlu0 %1183 }
 0x155   :  { %1809 = vst [vmem:[%s2641_s1 + $0x358] sm:$0xff] %v1190_v44  ;;  %1807 = vst [vmem:[%s2641_s1 + $0x350] sm:$0xff] %v1184_v45 }
 0x158   :  { %v1202_v46 = vpop.permute.xlu1 %1201  ;;  %v1196_v47 = vpop.permute.xlu0 %1195 }
 0x159   :  { %1813 = vst [vmem:[%s2641_s1 + $0x368] sm:$0xff] %v1202_v46  ;;  %1811 = vst [vmem:[%s2641_s1 + $0x360] sm:$0xff] %v1196_v47 }
 0x15c   :  { %v1214_v48 = vpop.permute.xlu1 %1213  ;;  %v1208_v49 = vpop.permute.xlu0 %1207 }
 0x15d   :  { %1817 = vst [vmem:[%s2641_s1 + $0x378] sm:$0xff] %v1214_v48  ;;  %1815 = vst [vmem:[%s2641_s1 + $0x370] sm:$0xff] %v1208_v49 }
 0x160   :  { %v1226_v50 = vpop.permute.xlu1 %1225  ;;  %v1220_v51 = vpop.permute.xlu0 %1219 }
 0x161   :  { %1821 = vst [vmem:[%s2641_s1 + $0x388] sm:$0xff] %v1226_v50  ;;  %1819 = vst [vmem:[%s2641_s1 + $0x380] sm:$0xff] %v1220_v51 }
 0x164   :  { %v1238_v52 = vpop.permute.xlu1 %1237  ;;  %v1232_v53 = vpop.permute.xlu0 %1231 }
 0x165   :  { %1825 = vst [vmem:[%s2641_s1 + $0x398] sm:$0xff] %v1238_v52  ;;  %1823 = vst [vmem:[%s2641_s1 + $0x390] sm:$0xff] %v1232_v53 }
 0x168   :  { %v1250_v54 = vpop.permute.xlu1 %1249  ;;  %v1244_v55 = vpop.permute.xlu0 %1243 }
 0x169   :  { %1829 = vst [vmem:[%s2641_s1 + $0x3a8] sm:$0xff] %v1250_v54  ;;  %1827 = vst [vmem:[%s2641_s1 + $0x3a0] sm:$0xff] %v1244_v55 }
 0x16c   :  { %v1262_v56 = vpop.permute.xlu1 %1261  ;;  %v1256_v57 = vpop.permute.xlu0 %1255 }
 0x16d   :  { %1833 = vst [vmem:[%s2641_s1 + $0x3b8] sm:$0xff] %v1262_v56  ;;  %1831 = vst [vmem:[%s2641_s1 + $0x3b0] sm:$0xff] %v1256_v57 }
 0x170   :  { %v1274_v58 = vpop.permute.xlu1 %1273  ;;  %v1268_v59 = vpop.permute.xlu0 %1267 }
 0x171   :  { %1837 = vst [vmem:[%s2641_s1 + $0x3c8] sm:$0xff] %v1274_v58  ;;  %1835 = vst [vmem:[%s2641_s1 + $0x3c0] sm:$0xff] %v1268_v59 }
 0x174   :  { %v1286_v60 = vpop.permute.xlu1 %1285  ;;  %v1280_v61 = vpop.permute.xlu0 %1279 }
 0x175   :  { %1841 = vst [vmem:[%s2641_s1 + $0x3d8] sm:$0xff] %v1286_v60  ;;  %1839 = vst [vmem:[%s2641_s1 + $0x3d0] sm:$0xff] %v1280_v61 }
 0x178   :  { %v1298_v62 = vpop.permute.xlu1 %1297  ;;  %v1292_v63 = vpop.permute.xlu0 %1291 }
 0x179   :  { %1845 = vst [vmem:[%s2641_s1 + $0x3e8] sm:$0xff] %v1298_v62  ;;  %1843 = vst [vmem:[%s2641_s1 + $0x3e0] sm:$0xff] %v1292_v63 }
 0x17c   :  { %v1310_v0 = vpop.permute.xlu1 %1309  ;;  %v1304_v1 = vpop.permute.xlu0 %1303 }
 0x17d   :  { %1849 = vst [vmem:[%s2641_s1 + $0x3f8] sm:$0xff] %v1310_v0  ;;  %1847 = vst [vmem:[%s2641_s1 + $0x3f0] sm:$0xff] %v1304_v1 }

// kernel: fno3d_forward.12
= control target key start
LH: loop header
LB: loop body
LE: loop exit
PB: predicated region body
PF: predicated region fallthrough
CT: control target
= control target key end

     0   :  { %s1320_s15 = smov 0   ;;  %s1322_s16 = smov 0   ;;  %s1594_s0 = inlined_call_operand.vmem [shape: f32[2,8,1536], index: 0, kind: input, shape index: {}]   ;;  %s1595_s1 = inlined_call_operand.vmem [shape: f32[8,8], index: 1, kind: input, shape index: {}]   ;;  %s1596_s2 = inlined_call_operand.vmem [shape: f32[8,1], index: 2, kind: input, shape index: {}]   ;;  %s1597_s3 = inlined_call_operand.vmem [shape: f32[2,8,1536], index: 3, kind: input, shape index: {}]   ;;  %s1598_s4 = inlined_call_operand.vmem [shape: f32[2,8,1536], index: 4, kind: output, shape index: {}]  }
   0x1   :  { %s1324_s17 = smov 0  }
   0x2 LB: > { %s26_s18 = sadd.s32 1, %s1286_s16  ;;  %p1179_p0 = scmp.ge.s32.totalorder %s1290_s17, 1  ;;  %s1290_s17 = sphi %s1324_s17, %s14_s17   ;;  %s1286_s16 = sphi %s1322_s16, %s1600_s16   ;;  %s1282_s15 = sphi %s1320_s15, %s1599_s15  }
   0x3   : > { %p28_p1 = scmp.ge.s32.totalorder %s26_s18, 2  ;;  %p200_p2 = scmp.lt.s32.totalorder %s1290_s17, 3 }
   0x5   : > { %s1602_s18 = smov (%p28_p1, %s26_s18), 0  ;;  %p201_p3 = pnand %p1179_p0, %p200_p2 }
   0x6   : > { %p244_p4 = scmp.lt.s32.totalorder (!%p201_p3), %s1282_s15, 1 }
   0x7   : > { %204 = sbr.rel (%p201_p3) target bundleno = 328 (0x148), region = 36 }
   0xc   : > { %v286_v0 = vld [vmem:[%s1596_s2] sm:$0xff]  ;;  %v1292_v1 = vmov 0.0   ;;  %s1604_s15 = smov (!%p244_p4, %s1282_s15), 1  ;;  %v1293_v2 = vmov 0   ;;  %vm292_vm0 = vcmask 64512   ;;  %v1294_v61 = vmov -1.0  }
   0xd   : > { %360 = vmatprep.mubr.f32.mxu0 %v1292_v1  ;;  %431 = vmatprep.mubr.f32.mxu1 %v1292_v1  ;;  %s1341_s21 = smul.u32 96, %s1604_s15  ;;  %v273_v3 = vld [vmem:[%s1595_s1] sm:$0xff] }
   0xe   : > { %1219 = vset.pattern.permute.xlu0 %v1293_v2 }
   0xf   : > { %289 = vperm.xlu0 %1219, %v286_v0   ;;  %s251_s24 = scalar_lea.vmem %s1594_s0, %s1341_s21  ;;  %s1360_s29 = scalar_lea.vmem %s1597_s3, %s1341_s21 }
  0x10   : > { %v275_v4 = vld [vmem:[%s251_s24 + $0x8] sm:$0xff]  ;;  %v277_v5 = vld [vmem:[%s251_s24 + $0x18] sm:$0xff]  ;;  %v274_v6 = vld [vmem:[%s251_s24] sm:$0xff]  ;;  %s1501_s6 = scalar_lea.vmem %s1598_s4, %s1341_s21 }
  0x11   : > { %326 = vmatprep.subr.mxu0 %v275_v4  ;;  %397 = vmatprep.subr.mxu1 %v277_v5  ;;  %v276_v7 = vld [vmem:[%s251_s24 + $0x10] sm:$0xff]  ;;  %v279_v8 = vld [vmem:[%s251_s24 + $0x28] sm:$0xff]  ;;  %v281_v9 = vld [vmem:[%s251_s24 + $0x38] sm:$0xff] }
  0x12   : > { %327 = vmatpush1.msra.mxu0 %v274_v6  ;;  %398 = vmatpush1.msra.mxu1 %v276_v7  ;;  %v278_v10 = vld [vmem:[%s251_s24 + $0x20] sm:$0xff]  ;;  %v280_v11 = vld [vmem:[%s251_s24 + $0x30] sm:$0xff]  ;;  %v283_v12 = vld [vmem:[%s251_s24 + $0x48] sm:$0xff] }
  0x13   : > { %1183 = vmatmul.mubr.msk.f32.vlgmr.msra.gmra.mxu0 %vm292_vm0, %v273_v3  ;;  %1184 = vmatmul.mubr.msk.f32.vlgmr.msra.gmra.mxu1 %vm292_vm0, %v273_v3  ;;  %v285_v13 = vld [vmem:[%s251_s24 + $0x58] sm:$0xff]  ;;  %v282_v14 = vld [vmem:[%s251_s24 + $0x40] sm:$0xff]  ;;  %v284_v15 = vld [vmem:[%s251_s24 + $0x50] sm:$0xff] }
  0x14   : > { %468 = vmatprep.subr.mxu0 %v279_v8  ;;  %539 = vmatprep.subr.mxu1 %v281_v9  ;;  %v722_v18 = vld [vmem:[%s1360_s29] sm:$0xff]  ;;  %v724_v20 = vld [vmem:[%s1360_s29 + $0x10] sm:$0xff]  ;;  %v723_v28 = vld [vmem:[%s1360_s29 + $0x8] sm:$0xff] }
  0x15   : > { %469 = vmatpush1.msra.mxu0 %v278_v10  ;;  %540 = vmatpush1.msra.mxu1 %v280_v11  ;;  %v725_v30 = vld [vmem:[%s1360_s29 + $0x18] sm:$0xff]  ;;  %v726_v50 = vld [vmem:[%s1360_s29 + $0x20] sm:$0xff]  ;;  %v728_v51 = vld [vmem:[%s1360_s29 + $0x30] sm:$0xff] }
  0x16   : > { %502 = vmatprep.mubr.f32.mxu0 %v1292_v1  ;;  %573 = vmatprep.mubr.f32.mxu1 %v1292_v1  ;;  %v727_v2 = vld [vmem:[%s1360_s29 + $0x28] sm:$0xff] }
  0x17   : > { %1185 = vmatmul.mubr.msk.f32.vlgmr.msra.gmra.mxu0 %vm292_vm0, %v273_v3  ;;  %1186 = vmatmul.mubr.msk.f32.vlgmr.msra.gmra.mxu1 %vm292_vm0, %v273_v3 }
  0x18   : > { %610 = vmatprep.subr.mxu0 %v283_v12  ;;  %681 = vmatprep.subr.mxu1 %v285_v13 }
  0x19   : > { %611 = vmatpush1.msra.mxu0 %v282_v14  ;;  %682 = vmatpush1.msra.mxu1 %v284_v15  ;;  %v729_v14 = vld [vmem:[%s1360_s29 + $0x38] sm:$0xff] }
  0x1a   : > { %644 = vmatprep.mubr.f32.mxu0 %v1292_v1  ;;  %715 = vmatprep.mubr.f32.mxu1 %v1292_v1 }
  0x1b   : > { %1187 = vmatmul.mubr.msk.f32.vlgmr.msra.gmra.mxu0 %vm292_vm0, %v273_v3  ;;  %1188 = vmatmul.mubr.msk.f32.vlgmr.msra.gmra.mxu1 %vm292_vm0, %v273_v3 }
  0x8a   : > { %v1362_v16 = vpop.permute.xlu0 %289 }
  0xd3   : > { %v362_v17 = vpop.f32.mrf.mxu0  ;;  %v433_v19 = vpop.f32.mrf.mxu1 }
  0xd4   : > { %v363_v21 = vadd.f32 %v362_v17, %v1362_v16  ;;  %v434_v22 = vadd.f32 %v433_v19, %v1362_v16 }
  0xd5   : > { %v364_v23 = vpop.f32.mrf.mxu0  ;;  %v435_v24 = vpop.f32.mrf.mxu1 }
  0xd6   : > { %v734_v25 = vadd.f32 %v722_v18, %v363_v21  ;;  %v736_v26 = vadd.f32 %v724_v20, %v434_v22  ;;  %v365_v27 = vadd.f32 %v364_v23, %v1362_v16  ;;  %v436_v29 = vadd.f32 %v435_v24, %v1362_v16 }
  0xd7   : > { %v504_v38 = vpop.f32.mrf.mxu0  ;;  %v575_v39 = vpop.f32.mrf.mxu1 }
  0xd8   : > { %v758_v31 = vmul.f32 0.70710677, %v734_v25  ;;  %v760_v32 = vmul.f32 0.70710677, %v736_v26  ;;  %v735_v33 = vadd.f32 %v723_v28, %v365_v27  ;;  %v737_v34 = vadd.f32 %v725_v30, %v436_v29 }
  0xd9   : > { %v505_v46 = vadd.f32 %v504_v38, %v1362_v16  ;;  %v576_v47 = vadd.f32 %v575_v39, %v1362_v16  ;;  %v506_v52 = vpop.f32.mrf.mxu0  ;;  %v1376_v57 = vmul.f32 0.5, %v734_v25  ;;  %v1384_v0 = vmul.f32 0.5, %v736_v26  ;;  %v577_v3 = vpop.f32.mrf.mxu1 }
  0xda   : > { %v794_v35 = vand.u32 2147483647, %v758_v31  ;;  %v796_v36 = vand.u32 2147483647, %v760_v32  ;;  %v759_v37 = vmul.f32 0.70710677, %v735_v33  ;;  %v507_v60 = vadd.f32 %v506_v52, %v1362_v16 }
  0xdb   : > { %v761_v43 = vmul.f32 0.70710677, %v737_v34  ;;  %vm770_vm1 = vcmp.ge.f32.partialorder %v758_v31, 0.0  ;;  %vm772_vm2 = vcmp.ge.f32.partialorder %v760_v32, 0.0  ;;  %v738_v58 = vadd.f32 %v726_v50, %v505_v46 }
  0xdc   : > { %v806_v40 = vmul.f32 0.3275911, %v794_v35  ;;  %v808_v41 = vmul.f32 0.3275911, %v796_v36  ;;  %v795_v42 = vand.u32 2147483647, %v759_v37  ;;  %v1378_v59 = vadd.f32 %v728_v51, %v576_v47 }
  0xdd   : > { %v950_v48 = vsub.f32 0.0, %v794_v35  ;;  %v952_v53 = vsub.f32 0.0, %v796_v36  ;;  %v797_v56 = vand.u32 2147483647, %v761_v43  ;;  %v1382_v62 = vsel %vm770_vm1, 1.0, %v1294_v61 }
  0xde   : > { %v818_v44 = vadd.f32 1.0, %v806_v40  ;;  %v820_v45 = vadd.f32 1.0, %v808_v41  ;;  %v807_v49 = vmul.f32 0.3275911, %v795_v42  ;;  %v951_v55 = vsub.f32 0.0, %v795_v42  ;;  %v646_v40 = vpop.f32.mrf.mxu0 }
  0xdf   : > { %v962_v63 = vmul.f32 %v950_v48, %v794_v35  ;;  %v809_v1 = vmul.f32 0.3275911, %v797_v56  ;;  %v1389_v4 = vsel %vm772_vm2, 1.0, %v1294_v61  ;;  %vm771_vm3 = vcmp.ge.f32.partialorder %v759_v37, 0.0  ;;  %v730_v48 = vld [vmem:[%s1360_s29 + $0x40] sm:$0xff] }
  0xe0   : > { %1220 = vrcp.f32 %v818_v44  ;;  %v819_v54 = vadd.f32 1.0, %v807_v49  ;;  %v1391_v5 = vmul.f32 0.70710677, %v738_v58  ;;  %v964_v6 = vmul.f32 %v952_v53, %v796_v36  ;;  %v717_v44 = vpop.f32.mrf.mxu1 }
  0xe1   : > { %1222 = vrcp.f32 %v820_v45  ;;  %v963_v7 = vmul.f32 %v951_v55, %v795_v42  ;;  %v821_v8 = vadd.f32 1.0, %v809_v1  ;;  %v1394_v9 = vmul.f32 0.70710677, %v1378_v59 }
  0xe2   : > { %1224 = vrcp.f32 %v819_v54  ;;  %v953_v10 = vsub.f32 0.0, %v797_v56  ;;  %v798_v11 = vand.u32 2147483647, %v1391_v5  ;;  %v1397_v12 = vadd.f32 %v727_v2, %v507_v60 }
  0xe3   : > { %v578_v13 = vadd.f32 %v577_v3, %v1362_v16  ;;  %v974_v15 = vmul.f32 1.442695, %v962_v63  ;;  %v1401_v17 = vmul.f32 0.5, %v735_v33  ;;  %v1403_v18 = vmul.f32 0.5, %v737_v34 }
  0xe4   : > { %1226 = vrcp.f32 %v821_v8  ;;  %vm773_vm4 = vcmp.ge.f32.partialorder %v761_v43, 0.0  ;;  %v810_v19 = vmul.f32 0.3275911, %v798_v11  ;;  %v954_v20 = vsub.f32 0.0, %v798_v11 }
  0xe5   : > { %v800_v21 = vand.u32 2147483647, %v1394_v9  ;;  %v978_v22 = vmul.f32 1.442695, %v964_v6  ;;  %v1408_v23 = vsel %vm771_vm3, 1.0, %v1294_v61  ;;  %v1413_v25 = vadd.f32 %v729_v14, %v578_v13 }
  0xe6   : > { %v1411_v24 = vmul.f32 0.70710677, %v1397_v12  ;;  %v976_v26 = vmul.f32 1.442695, %v963_v7  ;;  %v965_v27 = vmul.f32 %v953_v10, %v797_v56  ;;  %v822_v28 = vadd.f32 1.0, %v810_v19  ;;  %v732_v7 = vld [vmem:[%s1360_s29 + $0x50] sm:$0xff] }
  0xe7   : > { %v812_v29 = vmul.f32 0.3275911, %v800_v21  ;;  %1228 = vpow2.f32 %v974_v15  ;;  %v1416_v30 = vsel %vm773_vm4, 1.0, %v1294_v61  ;;  %v956_v31 = vsub.f32 0.0, %v800_v21 }
  0xe8   : > { %v799_v32 = vand.u32 2147483647, %v1411_v24  ;;  %1230 = vrcp.f32 %v822_v28  ;;  %v966_v33 = vmul.f32 %v954_v20, %v798_v11  ;;  %v1420_v35 = vmul.f32 0.70710677, %v1413_v25 }
  0xe9   : > { %v824_v34 = vadd.f32 1.0, %v812_v29  ;;  %1232 = vpow2.f32 %v978_v22  ;;  %v1424_v37 = vmul.f32 0.5, %v738_v58  ;;  %v980_v43 = vmul.f32 1.442695, %v965_v27 }
  0xea   : > { %v811_v38 = vmul.f32 0.3275911, %v799_v32  ;;  %v955_v39 = vsub.f32 0.0, %v799_v32  ;;  %1234 = vpow2.f32 %v976_v26  ;;  %vm774_vm5 = vcmp.ge.f32.partialorder %v1391_v5, 0.0 }
  0xeb   : > { %1236 = vrcp.f32 %v824_v34  ;;  %v968_v46 = vmul.f32 %v956_v31, %v800_v21  ;;  %v982_v50 = vmul.f32 1.442695, %v966_v33  ;;  %v801_v51 = vand.u32 2147483647, %v1420_v35 }
  0xec   : > { %v823_v47 = vadd.f32 1.0, %v811_v38  ;;  %v647_v52 = vadd.f32 %v646_v40, %v1362_v16  ;;  %v967_v55 = vmul.f32 %v955_v39, %v799_v32  ;;  %v718_v56 = vadd.f32 %v717_v44, %v1362_v16  ;;  %v648_v44 = vpop.f32.mrf.mxu0 }
  0xed   : > { %v1422_v36 = vpop.eup %1220  ;;  %v813_v63 = vmul.f32 0.3275911, %v801_v51  ;;  %v957_v1 = vsub.f32 0.0, %v801_v51  ;;  %v986_v3 = vmul.f32 1.442695, %v968_v46  ;;  %v1457_v38 = vsel %vm774_vm5, 1.0, %v1294_v61 }
  0xee   : > { %v1426_v41 = vpop.eup %1222  ;;  %v842_v42 = vmul.f32 1.0614054, %v1422_v36  ;;  %1238 = vrcp.f32 %v823_v47  ;;  %v1440_v6 = vadd.f32 %v730_v48, %v647_v52  ;;  %v984_v20 = vmul.f32 1.442695, %v967_v55 }
  0xef   : > { %v844_v45 = vmul.f32 1.0614054, %v1426_v41  ;;  %v1434_v53 = vpop.eup %1224  ;;  %1240 = vpow2.f32 %v980_v43  ;;  %v825_v13 = vadd.f32 1.0, %v813_v63  ;;  %v969_v14 = vmul.f32 %v957_v1, %v801_v51 }
  0xf0   : > { %v854_v49 = vadd.f32 -1.4531521, %v842_v42  ;;  %v843_v60 = vmul.f32 1.0614054, %v1434_v53  ;;  %1242 = vpow2.f32 %v982_v50  ;;  %v1448_v26 = vadd.f32 %v732_v7, %v718_v56 }
  0xf1   : > { %v856_v54 = vadd.f32 -1.4531521, %v844_v45  ;;  %v1443_v8 = vpop.eup %1226  ;;  %1244 = vrcp.f32 %v825_v13  ;;  %v988_v29 = vmul.f32 1.442695, %v969_v14  ;;  %v1452_v31 = vmul.f32 0.70710677, %v1440_v6 }
  0xf2   : > { %v866_v58 = vmul.f32 %v1422_v36, %v854_v49  ;;  %v855_v11 = vadd.f32 -1.4531521, %v843_v60  ;;  %v845_v19 = vmul.f32 1.0614054, %v1443_v8  ;;  %1246 = vpow2.f32 %v986_v3 }
  0xf3   : > { %v868_v2 = vmul.f32 %v1426_v41, %v856_v54  ;;  %1248 = vpow2.f32 %v984_v20  ;;  %v802_v43 = vand.u32 2147483647, %v1452_v31  ;;  %v1467_v5 = vmul.f32 0.70710677, %v1448_v26 }
  0xf4   : > { %v878_v10 = vadd.f32 1.4214138, %v866_v58  ;;  %v867_v22 = vmul.f32 %v1434_v53, %v855_v11  ;;  %v857_v28 = vadd.f32 -1.4531521, %v845_v19  ;;  %v1229_v32 = vpop.eup %1228  ;;  %1250 = vpow2.f32 %v988_v29 }
  0xf5   : > { %v880_v15 = vadd.f32 1.4214138, %v868_v2  ;;  %v1459_v39 = vpop.eup %1230  ;;  %v814_v52 = vmul.f32 0.3275911, %v802_v43  ;;  %v1473_v60 = vadd.f32 %v648_v44, %v1362_v16  ;;  %v958_v14 = vsub.f32 0.0, %v802_v43 }
  0xf6   : > { %v890_v21 = vmul.f32 %v1422_v36, %v878_v10  ;;  %v879_v34 = vadd.f32 1.4214138, %v867_v22  ;;  %v869_v42 = vmul.f32 %v1443_v8, %v857_v28  ;;  %v1233_v45 = vpop.eup %1232  ;;  %v846_v48 = vmul.f32 1.0614054, %v1459_v39 }
  0xf7   : > { %v892_v27 = vmul.f32 %v1426_v41, %v880_v15  ;;  %v1235_v49 = vpop.eup %1234  ;;  %v826_v3 = vadd.f32 1.0, %v814_v52  ;;  %vm776_vm6 = vcmp.ge.f32.partialorder %v1394_v9, 0.0  ;;  %vm775_vm7 = vcmp.ge.f32.partialorder %v1411_v24, 0.0 }
  0xf8   : > { %v902_v33 = vadd.f32 -0.28449672, %v890_v21  ;;  %v891_v47 = vmul.f32 %v1434_v53, %v879_v34  ;;  %v881_v51 = vadd.f32 1.4214138, %v869_v42  ;;  %v1470_v54 = vpop.eup %1236  ;;  %v858_v58 = vadd.f32 -1.4531521, %v846_v48 }
  0xf9   : > { %v904_v40 = vadd.f32 -0.28449672, %v892_v27  ;;  %v848_v2 = vmul.f32 1.0614054, %v1470_v54  ;;  %1252 = vrcp.f32 %v826_v3  ;;  %vm777_vm8 = vcmp.ge.f32.partialorder %v1420_v35, 0.0 }
  0xfa   : > { %v914_v46 = vmul.f32 %v1422_v36, %v902_v33  ;;  %v903_v56 = vadd.f32 -0.28449672, %v891_v47  ;;  %v893_v1 = vmul.f32 %v1443_v8, %v881_v51  ;;  %v870_v13 = vmul.f32 %v1459_v39, %v858_v58 }
  0xfb   : > { %v916_v50 = vmul.f32 %v1426_v41, %v904_v40  ;;  %v1477_v7 = vpop.eup %1238  ;;  %v860_v20 = vadd.f32 -1.4531521, %v848_v2  ;;  %v970_v47 = vmul.f32 %v958_v14, %v802_v43  ;;  %v789_v35 = vsel %vm777_vm8, 1.0, %v1294_v61 }
  0xfc   : > { %v926_v55 = vadd.f32 0.2548296, %v914_v46  ;;  %v915_v11 = vmul.f32 %v1434_v53, %v903_v56  ;;  %v905_v19 = vadd.f32 -0.28449672, %v893_v1  ;;  %v847_v21 = vmul.f32 1.0614054, %v1477_v7  ;;  %v1241_v22 = vpop.eup %1240 }
  0xfd   : > { %v928_v63 = vadd.f32 0.2548296, %v916_v50  ;;  %v882_v29 = vadd.f32 1.4214138, %v870_v13  ;;  %v1243_v42 = vpop.eup %1242  ;;  %vm778_vm9 = vcmp.ge.f32.partialorder %v1452_v31, 0.0  ;;  %vm780_vm10 = vcmp.ge.f32.partialorder %v1467_v5, 0.0 }
  0xfe   : > { %v938_v10 = vmul.f32 %v1422_v36, %v926_v55  ;;  %v927_v28 = vadd.f32 0.2548296, %v915_v11  ;;  %v917_v34 = vmul.f32 %v1443_v8, %v905_v19  ;;  %v872_v36 = vmul.f32 %v1470_v54, %v860_v20  ;;  %v1488_v48 = vpop.eup %1244 }
  0xff   : > { %v940_v15 = vmul.f32 %v1426_v41, %v928_v63  ;;  %v859_v40 = vadd.f32 -1.4531521, %v847_v21  ;;  %v894_v41 = vmul.f32 %v1459_v39, %v882_v29  ;;  %v849_v58 = vmul.f32 1.0614054, %v1488_v48  ;;  %v1247_v63 = vpop.eup %1246 }
 0x100   : > { %v998_v27 = vmul.f32 %v1229_v32, %v938_v10  ;;  %v939_v46 = vmul.f32 %v1434_v53, %v927_v28  ;;  %v929_v32 = vadd.f32 0.2548296, %v917_v34  ;;  %v884_v51 = vadd.f32 1.4214138, %v872_v36  ;;  %v1249_v3 = vpop.eup %1248  ;;  %v731_v28 = vld [vmem:[%s1360_s29 + $0x48] sm:$0xff] }
 0x101   : > { %v1000_v33 = vmul.f32 %v1233_v45, %v940_v15  ;;  %v871_v45 = vmul.f32 %v1477_v7, %v859_v40  ;;  %v906_v56 = vadd.f32 -0.28449672, %v894_v41  ;;  %v861_v14 = vadd.f32 -1.4531521, %v849_v58  ;;  %v1504_v15 = vpop.eup %1250 }
 0x102   : > { %v1010_v44 = vsub.f32 1.0, %v998_v27  ;;  %v999_v55 = vmul.f32 %v1235_v49, %v939_v46  ;;  %v941_v1 = vmul.f32 %v1443_v8, %v929_v32  ;;  %v896_v43 = vmul.f32 %v1470_v54, %v884_v51 }
 0x103   : > { %v1012_v50 = vsub.f32 1.0, %v1000_v33  ;;  %v883_v2 = vadd.f32 1.4214138, %v871_v45  ;;  %v918_v13 = vmul.f32 %v1459_v39, %v906_v56  ;;  %v873_v27 = vmul.f32 %v1488_v48, %v861_v14 }
 0x104   : > { %v1022_v52 = vmul.f32 %v1010_v44, %v1382_v62  ;;  %v1011_v11 = vsub.f32 1.0, %v999_v55  ;;  %v908_v49 = vadd.f32 -0.28449672, %v896_v43  ;;  %v990_v51 = vmul.f32 1.442695, %v970_v47 }
 0x105   : > { %v1024_v53 = vmul.f32 %v1012_v50, %v1389_v4  ;;  %v1001_v4 = vmul.f32 %v1241_v22, %v941_v1  ;;  %v895_v8 = vmul.f32 %v1477_v7, %v883_v2  ;;  %v930_v21 = vadd.f32 0.2548296, %v918_v13 }
 0x106   : > { %v1034_v10 = vadd.f32 1.0, %v1022_v52  ;;  %v1023_v20 = vmul.f32 %v1011_v11, %v1408_v23  ;;  %v920_v34 = vmul.f32 %v1470_v54, %v908_v49  ;;  %1254 = vpow2.f32 %v990_v51 }
 0x107   : > { %v1036_v62 = vadd.f32 1.0, %v1024_v53  ;;  %v1013_v33 = vsub.f32 1.0, %v1001_v4  ;;  %v907_v22 = vadd.f32 -0.28449672, %v895_v8  ;;  %v942_v40 = vmul.f32 %v1459_v39, %v930_v21  ;;  %v1523_v39 = vpop.eup %1252 }
 0x108   : > { %v1046_v19 = vmul.f32 %v1034_v10, %v1376_v57  ;;  %v1035_v36 = vadd.f32 1.0, %v1023_v20  ;;  %v885_v57 = vadd.f32 1.4214138, %v873_v27  ;;  %v932_v44 = vadd.f32 0.2548296, %v920_v34 }
 0x109   : > { %v1048_v29 = vmul.f32 %v1036_v62, %v1384_v0  ;;  %v1025_v23 = vmul.f32 %v1013_v33, %v1416_v30  ;;  %v919_v46 = vmul.f32 %v1477_v7, %v907_v22  ;;  %v1519_v0 = vadd.f32 %v731_v28, %v1473_v60  ;;  %v719_v62 = vpop.f32.mrf.mxu1  ;;  %v733_v28 = vld [vmem:[%s1360_s29 + $0x58] sm:$0xff] }
 0x10a   : > { %1058 = vst [vmem:[%s1501_s6] sm:$0xff] %v1046_v19  ;;  %v1047_v41 = vmul.f32 %v1035_v36, %v1401_v17  ;;  %v1002_v50 = vmul.f32 %v1243_v42, %v942_v40  ;;  %v897_v32 = vmul.f32 %v1488_v48, %v885_v57  ;;  %v944_v52 = vmul.f32 %v1470_v54, %v932_v44 }
 0x10b   : > { %1060 = vst [vmem:[%s1501_s6 + $0x10] sm:$0xff] %v1048_v29  ;;  %v1037_v45 = vadd.f32 1.0, %v1025_v23  ;;  %v931_v55 = vadd.f32 0.2548296, %v919_v46  ;;  %v804_v30 = vand.u32 2147483647, %v1467_v5  ;;  %v720_v24 = vadd.f32 %v719_v62, %v1362_v16 }
 0x10c   : > { %1059 = vst [vmem:[%s1501_s6 + $0x8] sm:$0xff] %v1047_v41  ;;  %v1014_v56 = vsub.f32 1.0, %v1002_v50  ;;  %v788_v60 = vsel %vm776_vm6, 1.0, %v1294_v61  ;;  %v909_v17 = vadd.f32 -0.28449672, %v897_v32  ;;  %v1004_v58 = vmul.f32 %v1247_v63, %v944_v52 }
 0x10d   : > { %v850_v42 = vmul.f32 1.0614054, %v1523_v39  ;;  %v1049_v47 = vmul.f32 %v1037_v45, %v1403_v18  ;;  %v943_v53 = vmul.f32 %v1477_v7, %v931_v55  ;;  %v816_v1 = vmul.f32 0.3275911, %v804_v30 }
 0x10e   : > { %v1026_v54 = vmul.f32 %v1014_v56, %v1457_v38  ;;  %v921_v43 = vmul.f32 %v1488_v48, %v909_v17  ;;  %v1016_v10 = vsub.f32 1.0, %v1004_v58  ;;  %v1539_v13 = vmul.f32 0.70710677, %v1519_v0 }
 0x10f   : > { %v862_v2 = vadd.f32 -1.4531521, %v850_v42  ;;  %1061 = vst [vmem:[%s1501_s6 + $0x18] sm:$0xff] %v1049_v47  ;;  %v1003_v9 = vmul.f32 %v1249_v3, %v943_v53  ;;  %v828_v11 = vadd.f32 1.0, %v816_v1  ;;  %v787_v3 = vsel %vm775_vm7, 1.0, %v1294_v61 }
 0x110   : > { %v1038_v14 = vadd.f32 1.0, %v1026_v54  ;;  %v933_v18 = vadd.f32 0.2548296, %v921_v43  ;;  %v1028_v38 = vmul.f32 %v1016_v10, %v788_v60  ;;  %v752_v19 = vmul.f32 0.5, %v1378_v59 }
 0x111   : > { %v874_v7 = vmul.f32 %v1523_v39, %v862_v2  ;;  %v1015_v63 = vsub.f32 1.0, %v1003_v9  ;;  %1256 = vrcp.f32 %v828_v11  ;;  %v803_v27 = vand.u32 2147483647, %v1539_v13 }
 0x112   : > { %v1050_v4 = vmul.f32 %v1038_v14, %v1424_v37  ;;  %v945_v49 = vmul.f32 %v1488_v48, %v933_v18  ;;  %v1040_v20 = vadd.f32 1.0, %v1028_v38  ;;  %v751_v33 = vmul.f32 0.5, %v1397_v12 }
 0x113   : > { %v886_v8 = vadd.f32 1.4214138, %v874_v7  ;;  %v1027_v21 = vmul.f32 %v1015_v63, %v787_v3  ;;  %v815_v34 = vmul.f32 0.3275911, %v803_v27  ;;  %v1556_v40 = vadd.f32 %v733_v28, %v720_v24  ;;  %v1255_v56 = vpop.eup %1254 }
 0x114   : > { %1062 = vst [vmem:[%s1501_s6 + $0x20] sm:$0xff] %v1050_v4  ;;  %v1005_v37 = vmul.f32 %v1504_v15, %v945_v49  ;;  %v1052_v48 = vmul.f32 %v1040_v20, %v752_v19  ;;  %v960_v23 = vsub.f32 0.0, %v804_v30  ;;  %v753_v12 = vmul.f32 0.5, %v1413_v25 }
 0x115   : > { %v898_v29 = vmul.f32 %v1523_v39, %v886_v8  ;;  %v1039_v59 = vadd.f32 1.0, %v1027_v21  ;;  %v827_v15 = vadd.f32 1.0, %v815_v34  ;;  %v1562_v46 = vmul.f32 0.70710677, %v1556_v40 }
 0x116   : > { %v1017_v22 = vsub.f32 1.0, %v1005_v37  ;;  %1064 = vst [vmem:[%s1501_s6 + $0x30] sm:$0xff] %v1052_v48  ;;  %v972_v51 = vmul.f32 %v960_v23, %v804_v30  ;;  %v959_v53 = vsub.f32 0.0, %v803_v27  ;;  %v790_v1 = vsel %vm778_vm9, 1.0, %v1294_v61 }
 0x117   : > { %v910_v36 = vadd.f32 -0.28449672, %v898_v29  ;;  %v1051_v57 = vmul.f32 %v1039_v59, %v751_v33  ;;  %1258 = vrcp.f32 %v827_v15  ;;  %v805_v32 = vand.u32 2147483647, %v1562_v46 }
 0x118   : > { %v1029_v44 = vmul.f32 %v1017_v22, %v789_v35  ;;  %v994_v58 = vmul.f32 1.442695, %v972_v51  ;;  %v754_v2 = vmul.f32 0.5, %v1440_v6  ;;  %v792_v22 = vsel %vm780_vm10, 1.0, %v1294_v61 }
 0x119   : > { %v922_v16 = vmul.f32 %v1523_v39, %v910_v36  ;;  %1063 = vst [vmem:[%s1501_s6 + $0x28] sm:$0xff] %v1051_v57  ;;  %v817_v55 = vmul.f32 0.3275911, %v805_v32  ;;  %v961_v14 = vsub.f32 0.0, %v805_v32  ;;  %v756_v15 = vmul.f32 0.5, %v1448_v26 }
 0x11a   : > { %v1041_v41 = vadd.f32 1.0, %v1029_v44  ;;  %vm779_vm11 = vcmp.ge.f32.partialorder %v1539_v13, 0.0  ;;  %v755_v26 = vmul.f32 0.5, %v1519_v0  ;;  %vm781_vm12 = vcmp.ge.f32.partialorder %v1562_v46, 0.0 }
 0x11b   : > { %v934_v50 = vadd.f32 0.2548296, %v922_v16  ;;  %v829_v42 = vadd.f32 1.0, %v817_v55  ;;  %v973_v4 = vmul.f32 %v961_v14, %v805_v32 }
 0x11c   : > { %v1053_v45 = vmul.f32 %v1041_v41, %v753_v12 }
 0x11d   : > { %v946_v52 = vmul.f32 %v1523_v39, %v934_v50  ;;  %1260 = vrcp.f32 %v829_v42  ;;  %v971_v39 = vmul.f32 %v959_v53, %v803_v27  ;;  %v996_v6 = vmul.f32 1.442695, %v973_v4 }
 0x11e   : > { %v1257_v60 = vpop.eup %1256  ;;  %1065 = vst [vmem:[%s1501_s6 + $0x38] sm:$0xff] %v1053_v45  ;;  %1262 = vpow2.f32 %v994_v58  ;;  %v791_v45 = vsel %vm779_vm11, 1.0, %v1294_v61  ;;  %v793_v58 = vsel %vm781_vm12, 1.0, %v1294_v61 }
 0x11f   : > { %v1006_v17 = vmul.f32 %v1255_v56, %v946_v52  ;;  %v852_v47 = vmul.f32 1.0614054, %v1257_v60  ;;  %v992_v38 = vmul.f32 1.442695, %v971_v39 }
 0x121   : > { %v1018_v25 = vsub.f32 1.0, %v1006_v17  ;;  %v864_v30 = vadd.f32 -1.4531521, %v852_v47  ;;  %1264 = vpow2.f32 %v992_v38 }
 0x122   : > { %1266 = vpow2.f32 %v996_v6 }
 0x123   : > { %v1030_v54 = vmul.f32 %v1018_v25, %v790_v1  ;;  %v876_v43 = vmul.f32 %v1257_v60, %v864_v30  ;;  %v757_v25 = vmul.f32 0.5, %v1556_v40 }
 0x124   : > { %v1259_v31 = vpop.eup %1258 }
 0x125   : > { %v1042_v10 = vadd.f32 1.0, %v1030_v54  ;;  %v888_v9 = vadd.f32 1.4214138, %v876_v43  ;;  %v851_v7 = vmul.f32 1.0614054, %v1259_v31 }
 0x127   : > { %v1054_v11 = vmul.f32 %v1042_v10, %v754_v2  ;;  %v900_v18 = vmul.f32 %v1257_v60, %v888_v9  ;;  %v863_v62 = vadd.f32 -1.4531521, %v851_v7 }
 0x129   : > { %1066 = vst [vmem:[%s1501_s6 + $0x40] sm:$0xff] %v1054_v11  ;;  %v912_v63 = vadd.f32 -0.28449672, %v900_v18  ;;  %v875_v49 = vmul.f32 %v1259_v31, %v863_v62 }
 0x12a   : > { %v1261_v8 = vpop.eup %1260 }
 0x12b   : > { %v924_v3 = vmul.f32 %v1257_v60, %v912_v63  ;;  %v887_v20 = vadd.f32 1.4214138, %v875_v49  ;;  %v853_v21 = vmul.f32 1.0614054, %v1261_v8  ;;  %v1263_v37 = vpop.eup %1262 }
 0x12d   : > { %v936_v19 = vadd.f32 0.2548296, %v924_v3  ;;  %v899_v28 = vmul.f32 %v1259_v31, %v887_v20  ;;  %v865_v29 = vadd.f32 -1.4531521, %v853_v21 }
 0x12e   : > { %v1265_v12 = vpop.eup %1264 }
 0x12f   : > { %v948_v27 = vmul.f32 %v1257_v60, %v936_v19  ;;  %v911_v48 = vadd.f32 -0.28449672, %v899_v28  ;;  %v877_v33 = vmul.f32 %v1261_v8, %v865_v29  ;;  %v1267_v60 = vpop.eup %1266 }
 0x131   : > { %v1008_v24 = vmul.f32 %v1263_v37, %v948_v27  ;;  %v923_v34 = vmul.f32 %v1259_v31, %v911_v48  ;;  %v889_v36 = vadd.f32 1.4214138, %v877_v33 }
 0x133   : > { %v1020_v59 = vsub.f32 1.0, %v1008_v24  ;;  %v935_v35 = vadd.f32 0.2548296, %v923_v34  ;;  %v901_v23 = vmul.f32 %v1261_v8, %v889_v36 }
 0x135   : > { %v1032_v57 = vmul.f32 %v1020_v59, %v792_v22  ;;  %v947_v16 = vmul.f32 %v1259_v31, %v935_v35  ;;  %v913_v41 = vadd.f32 -0.28449672, %v901_v23 }
 0x137   : > { %v1044_v44 = vadd.f32 1.0, %v1032_v57  ;;  %v1007_v50 = vmul.f32 %v1265_v12, %v947_v16  ;;  %v925_v32 = vmul.f32 %v1261_v8, %v913_v41 }
 0x139   : > { %v1056_v5 = vmul.f32 %v1044_v44, %v756_v15  ;;  %v1019_v51 = vsub.f32 1.0, %v1007_v50  ;;  %v937_v52 = vadd.f32 0.2548296, %v925_v32 }
 0x13b   : > { %1068 = vst [vmem:[%s1501_s6 + $0x50] sm:$0xff] %v1056_v5  ;;  %v1031_v55 = vmul.f32 %v1019_v51, %v791_v45  ;;  %v949_v56 = vmul.f32 %v1261_v8, %v937_v52 }
 0x13d   : > { %v1043_v17 = vadd.f32 1.0, %v1031_v55  ;;  %v1009_v42 = vmul.f32 %v1267_v60, %v949_v56 }
 0x13f   : > { %v1055_v47 = vmul.f32 %v1043_v17, %v755_v26  ;;  %v1021_v13 = vsub.f32 1.0, %v1009_v42 }
 0x141   : > { %1067 = vst [vmem:[%s1501_s6 + $0x48] sm:$0xff] %v1055_v47  ;;  %v1033_v53 = vmul.f32 %v1021_v13, %v793_v58 }
 0x143   : > { %v1045_v1 = vadd.f32 1.0, %v1033_v53 }
 0x145   : > { %v1057_v30 = vmul.f32 %v1045_v1, %v757_v25 }
 0x147   : > { %1069 = vst [vmem:[%s1501_s6 + $0x58] sm:$0xff] %v1057_v30 }
 0x148 PF: > { %s14_s17 = sadd.s32 1, %s1290_s17   ;;  %s1599_s15 = smov %s1286_s16 }
 0x149   : > { %p11_p5 = scmp.ge.s32.totalorder %s14_s17, 4   ;;  %s1600_s16 = smov %s1602_s18 }
 0x14b   :  { %13 = sbr.rel (!%p11_p5) target bundleno = 2 (0x2), region = 69 }

// kernel: fno3d_forward.18
= control target key start
LH: loop header
LB: loop body
LE: loop exit
PB: predicated region body
PF: predicated region fallthrough
CT: control target
= control target key end

     0   :  { %s958_s15 = smov 0   ;;  %s960_s16 = smov 0   ;;  %s1039_s0 = inlined_call_operand.vmem [shape: f32[2,8,1536], index: 0, kind: input, shape index: {}]   ;;  %s1040_s1 = inlined_call_operand.vmem [shape: f32[8,8], index: 1, kind: input, shape index: {}]   ;;  %s1041_s2 = inlined_call_operand.vmem [shape: f32[8,1], index: 2, kind: input, shape index: {}]   ;;  %s1042_s3 = inlined_call_operand.vmem [shape: f32[2,8,1536], index: 3, kind: input, shape index: {}]   ;;  %s1043_s4 = inlined_call_operand.vmem [shape: f32[2,8,1536], index: 4, kind: output, shape index: {}]  }
   0x1   :  { %s962_s17 = smov 0  }
   0x2 LB: > { %s26_s18 = sadd.s32 1, %s925_s16  ;;  %p867_p0 = scmp.ge.s32.totalorder %s929_s17, 1  ;;  %s929_s17 = sphi %s962_s17, %s14_s17   ;;  %s925_s16 = sphi %s960_s16, %s1045_s16   ;;  %s921_s15 = sphi %s958_s15, %s1044_s15  }
   0x3   : > { %p28_p1 = scmp.ge.s32.totalorder %s26_s18, 2  ;;  %p200_p2 = scmp.lt.s32.totalorder %s929_s17, 3 }
   0x5   : > { %s1047_s18 = smov (%p28_p1, %s26_s18), 0  ;;  %p201_p3 = pnand %p867_p0, %p200_p2 }
   0x6   : > { %p244_p4 = scmp.lt.s32.totalorder (!%p201_p3), %s921_s15, 1 }
   0x7   : > { %204 = sbr.rel (%p201_p3) target bundleno = 228 (0xe4), region = 36 }
   0xc   : > { %v286_v0 = vld [vmem:[%s1041_s2] sm:$0xff]  ;;  %v931_v1 = vmov 0.0   ;;  %s1049_s15 = smov (!%p244_p4, %s921_s15), 1  ;;  %v932_v2 = vmov 0   ;;  %vm292_vm0 = vcmask 64512  }
   0xd   : > { %360 = vmatprep.mubr.f32.mxu0 %v931_v1  ;;  %431 = vmatprep.mubr.f32.mxu1 %v931_v1  ;;  %s979_s21 = smul.u32 96, %s1049_s15  ;;  %v273_v3 = vld [vmem:[%s1040_s1] sm:$0xff] }
   0xe   : > { %906 = vset.pattern.permute.xlu0 %v932_v2 }
   0xf   : > { %289 = vperm.xlu0 %906, %v286_v0   ;;  %s251_s24 = scalar_lea.vmem %s1039_s0, %s979_s21  ;;  %s998_s29 = scalar_lea.vmem %s1042_s3, %s979_s21 }
  0x10   : > { %v275_v4 = vld [vmem:[%s251_s24 + $0x8] sm:$0xff]  ;;  %v277_v5 = vld [vmem:[%s251_s24 + $0x18] sm:$0xff]  ;;  %v274_v6 = vld [vmem:[%s251_s24] sm:$0xff]  ;;  %s1006_s6 = scalar_lea.vmem %s1043_s4, %s979_s21 }
  0x11   : > { %326 = vmatprep.subr.mxu0 %v275_v4  ;;  %397 = vmatprep.subr.mxu1 %v277_v5  ;;  %v276_v7 = vld [vmem:[%s251_s24 + $0x10] sm:$0xff]  ;;  %v279_v8 = vld [vmem:[%s251_s24 + $0x28] sm:$0xff]  ;;  %v281_v9 = vld [vmem:[%s251_s24 + $0x38] sm:$0xff] }
  0x12   : > { %327 = vmatpush1.msra.mxu0 %v274_v6  ;;  %398 = vmatpush1.msra.mxu1 %v276_v7  ;;  %v278_v10 = vld [vmem:[%s251_s24 + $0x20] sm:$0xff]  ;;  %v280_v11 = vld [vmem:[%s251_s24 + $0x30] sm:$0xff]  ;;  %v283_v12 = vld [vmem:[%s251_s24 + $0x48] sm:$0xff] }
  0x13   : > { %871 = vmatmul.mubr.msk.f32.vlgmr.msra.gmra.mxu0 %vm292_vm0, %v273_v3  ;;  %872 = vmatmul.mubr.msk.f32.vlgmr.msra.gmra.mxu1 %vm292_vm0, %v273_v3  ;;  %v285_v13 = vld [vmem:[%s251_s24 + $0x58] sm:$0xff]  ;;  %v282_v14 = vld [vmem:[%s251_s24 + $0x40] sm:$0xff]  ;;  %v284_v15 = vld [vmem:[%s251_s24 + $0x50] sm:$0xff] }
  0x14   : > { %468 = vmatprep.subr.mxu0 %v279_v8  ;;  %539 = vmatprep.subr.mxu1 %v281_v9  ;;  %v722_v19 = vld [vmem:[%s998_s29] sm:$0xff]  ;;  %v724_v20 = vld [vmem:[%s998_s29 + $0x10] sm:$0xff]  ;;  %v723_v24 = vld [vmem:[%s998_s29 + $0x8] sm:$0xff] }
  0x15   : > { %469 = vmatpush1.msra.mxu0 %v278_v10  ;;  %540 = vmatpush1.msra.mxu1 %v280_v11  ;;  %v725_v26 = vld [vmem:[%s998_s29 + $0x18] sm:$0xff]  ;;  %v726_v32 = vld [vmem:[%s998_s29 + $0x20] sm:$0xff]  ;;  %v728_v34 = vld [vmem:[%s998_s29 + $0x30] sm:$0xff] }
  0x16   : > { %502 = vmatprep.mubr.f32.mxu0 %v931_v1  ;;  %573 = vmatprep.mubr.f32.mxu1 %v931_v1  ;;  %v727_v40 = vld [vmem:[%s998_s29 + $0x28] sm:$0xff]  ;;  %v729_v42 = vld [vmem:[%s998_s29 + $0x38] sm:$0xff]  ;;  %v730_v48 = vld [vmem:[%s998_s29 + $0x40] sm:$0xff] }
  0x17   : > { %873 = vmatmul.mubr.msk.f32.vlgmr.msra.gmra.mxu0 %vm292_vm0, %v273_v3  ;;  %874 = vmatmul.mubr.msk.f32.vlgmr.msra.gmra.mxu1 %vm292_vm0, %v273_v3  ;;  %v732_v50 = vld [vmem:[%s998_s29 + $0x50] sm:$0xff]  ;;  %v731_v56 = vld [vmem:[%s998_s29 + $0x48] sm:$0xff]  ;;  %v733_v58 = vld [vmem:[%s998_s29 + $0x58] sm:$0xff] }
  0x18   : > { %610 = vmatprep.subr.mxu0 %v283_v12  ;;  %681 = vmatprep.subr.mxu1 %v285_v13 }
  0x19   : > { %611 = vmatpush1.msra.mxu0 %v282_v14  ;;  %682 = vmatpush1.msra.mxu1 %v284_v15 }
  0x1a   : > { %644 = vmatprep.mubr.f32.mxu0 %v931_v1  ;;  %715 = vmatprep.mubr.f32.mxu1 %v931_v1 }
  0x1b   : > { %875 = vmatmul.mubr.msk.f32.vlgmr.msra.gmra.mxu0 %vm292_vm0, %v273_v3  ;;  %876 = vmatmul.mubr.msk.f32.vlgmr.msra.gmra.mxu1 %vm292_vm0, %v273_v3 }
  0x8a   : > { %v290_v16 = vpop.permute.xlu0 %289 }
  0xd3   : > { %v362_v17 = vpop.f32.mrf.mxu0  ;;  %v433_v18 = vpop.f32.mrf.mxu1 }
  0xd4   : > { %v363_v21 = vadd.f32 %v362_v17, %v290_v16  ;;  %v434_v22 = vadd.f32 %v433_v18, %v290_v16 }
  0xd5   : > { %v364_v23 = vpop.f32.mrf.mxu0  ;;  %v435_v25 = vpop.f32.mrf.mxu1 }
  0xd6   : > { %v734_v27 = vadd.f32 %v722_v19, %v363_v21  ;;  %v736_v28 = vadd.f32 %v724_v20, %v434_v22  ;;  %v365_v29 = vadd.f32 %v364_v23, %v290_v16  ;;  %v436_v30 = vadd.f32 %v435_v25, %v290_v16 }
  0xd7   : > { %v504_v31 = vpop.f32.mrf.mxu0  ;;  %v575_v33 = vpop.f32.mrf.mxu1 }
  0xd8   : > { %746 = vst [vmem:[%s1006_s6] sm:$0xff] %v734_v27  ;;  %748 = vst [vmem:[%s1006_s6 + $0x10] sm:$0xff] %v736_v28  ;;  %v735_v35 = vadd.f32 %v723_v24, %v365_v29  ;;  %v737_v36 = vadd.f32 %v725_v26, %v436_v30  ;;  %v505_v37 = vadd.f32 %v504_v31, %v290_v16 }
  0xd9   : > { %v576_v38 = vadd.f32 %v575_v33, %v290_v16  ;;  %v506_v39 = vpop.f32.mrf.mxu0  ;;  %v577_v41 = vpop.f32.mrf.mxu1 }
  0xda   : > { %747 = vst [vmem:[%s1006_s6 + $0x8] sm:$0xff] %v735_v35  ;;  %749 = vst [vmem:[%s1006_s6 + $0x18] sm:$0xff] %v737_v36  ;;  %v738_v43 = vadd.f32 %v726_v32, %v505_v37  ;;  %v507_v45 = vadd.f32 %v506_v39, %v290_v16  ;;  %v578_v46 = vadd.f32 %v577_v41, %v290_v16 }
  0xdb   : > { %v740_v44 = vadd.f32 %v728_v34, %v576_v38  ;;  %v646_v47 = vpop.f32.mrf.mxu0  ;;  %v717_v49 = vpop.f32.mrf.mxu1 }
  0xdc   : > { %750 = vst [vmem:[%s1006_s6 + $0x20] sm:$0xff] %v738_v43  ;;  %v739_v51 = vadd.f32 %v727_v40, %v507_v45  ;;  %v741_v52 = vadd.f32 %v729_v42, %v578_v46  ;;  %v647_v53 = vadd.f32 %v646_v47, %v290_v16  ;;  %v718_v54 = vadd.f32 %v717_v49, %v290_v16 }
  0xdd   : > { %752 = vst [vmem:[%s1006_s6 + $0x30] sm:$0xff] %v740_v44  ;;  %v648_v55 = vpop.f32.mrf.mxu0  ;;  %v719_v57 = vpop.f32.mrf.mxu1 }
  0xde   : > { %751 = vst [vmem:[%s1006_s6 + $0x28] sm:$0xff] %v739_v51  ;;  %753 = vst [vmem:[%s1006_s6 + $0x38] sm:$0xff] %v741_v52  ;;  %v742_v59 = vadd.f32 %v730_v48, %v647_v53  ;;  %v744_v60 = vadd.f32 %v732_v50, %v718_v54  ;;  %v649_v61 = vadd.f32 %v648_v55, %v290_v16 }
  0xdf   : > { %v720_v62 = vadd.f32 %v719_v57, %v290_v16 }
  0xe0   : > { %754 = vst [vmem:[%s1006_s6 + $0x40] sm:$0xff] %v742_v59  ;;  %756 = vst [vmem:[%s1006_s6 + $0x50] sm:$0xff] %v744_v60  ;;  %v743_v63 = vadd.f32 %v731_v56, %v649_v61 }
  0xe1   : > { %v745_v0 = vadd.f32 %v733_v58, %v720_v62 }
  0xe2   : > { %755 = vst [vmem:[%s1006_s6 + $0x48] sm:$0xff] %v743_v63 }
  0xe3   : > { %757 = vst [vmem:[%s1006_s6 + $0x58] sm:$0xff] %v745_v0 }
  0xe4 PF: > { %s14_s17 = sadd.s32 1, %s929_s17   ;;  %s1044_s15 = smov %s925_s16 }
  0xe5   : > { %p11_p5 = scmp.ge.s32.totalorder %s14_s17, 4   ;;  %s1045_s16 = smov %s1047_s18 }
  0xe7   :  { %13 = sbr.rel (!%p11_p5) target bundleno = 2 (0x2), region = 69 }

// kernel: fno3d_forward.19
= control target key start
LH: loop header
LB: loop body
LE: loop exit
PB: predicated region body
PF: predicated region fallthrough
CT: control target
= control target key end

     0   :  { %s3073_s20 = smov 0   ;;  %s3075_s21 = smov 0   ;;  %s4639_s0 = inlined_call_operand.vmem [shape: f32[2,8,512], index: 0, kind: input, shape index: {}]   ;;  %s4640_s1 = inlined_call_operand.vmem [shape: f32[128,8], index: 1, kind: input, shape index: {}]   ;;  %s4641_s2 = inlined_call_operand.vmem [shape: f32[128,1], index: 2, kind: input, shape index: {}]   ;;  %s4642_s3 = inlined_call_operand.vmem [shape: f32[1,128], index: 3, kind: input, shape index: {}]   ;;  %s4643_s4 = inlined_call_operand.<no memory space> [shape: f32[1,1], index: 4, kind: input, shape index: {}]   ;;  %s4644_s5 = inlined_call_operand.vmem [shape: f32[2,1,512], index: 5, kind: output, shape index: {}]  }
   0x1   :  { %v10_v0 = vstv %s4643_s4  ;;  %s3077_s22 = smov 0  }
   0x2   :  { %11 = vst [vmem:[#allocation2] sm:$0x1] %v10_v0 }
   0x3 LB: > { %s29_s4 = sadd.s32 1, %s3030_s21  ;;  %p2687_p0 = scmp.ge.s32.totalorder %s3034_s22, 1  ;;  %s3034_s22 = sphi %s3077_s22, %s17_s22   ;;  %s3030_s21 = sphi %s3075_s21, %s4954_s21   ;;  %s3026_s20 = sphi %s3073_s20, %s4953_s20  }
   0x4   : > { %p31_p1 = scmp.ge.s32.totalorder %s29_s4, 2  ;;  %p210_p2 = scmp.lt.s32.totalorder %s3034_s22, 3 }
   0x6   : > { %s4956_s4 = smov (%p31_p1, %s29_s4), 0  ;;  %p211_p3 = pnand %p2687_p0, %p210_p2 }
   0x8   : > { %214 = sbr.rel (%p211_p3) target bundleno = 863 (0x35f), region = 40 }
   0xd   : > { %p246_p4 = scmp.lt.s32.totalorder %s3026_s20, 1  ;;  %v3036_v1 = vmov 0.0   ;;  %v3037_v2 = vmov 0   ;;  %v297_v3 = vld [vmem:[%s4641_s2 + $0x68] sm:$0xff]  ;;  %v299_v4 = vld [vmem:[%s4641_s2 + $0x78] sm:$0xff]  ;;  %v264_v5 = vld [vmem:[%s4640_s1] sm:$0xff] }
   0xe   : > { %493 = vmatprep.mubr.f32.mxu0 %v3036_v1  ;;  %654 = vmatprep.mubr.f32.mxu1 %v3036_v1  ;;  %vm380_vm0 = vcmask 64512   ;;  %v296_v10 = vld [vmem:[%s4641_s2 + $0x60] sm:$0xff]  ;;  %v298_v11 = vld [vmem:[%s4641_s2 + $0x70] sm:$0xff]  ;;  %v265_v12 = vld [vmem:[%s4640_s1 + $0x8] sm:$0xff] }
   0xf   : > { %s4958_s20 = smov (!%p246_p4, %s3026_s20), 1  ;;  %2755 = vset.pattern.permute.xlu1 %v3037_v2  ;;  %2754 = vset.pattern.permute.xlu0 %v3037_v2  ;;  %v294_v13 = vld [vmem:[%s4641_s2 + $0x50] sm:$0xff]  ;;  %v295_v14 = vld [vmem:[%s4641_s2 + $0x58] sm:$0xff]  ;;  %v292_v16 = vld [vmem:[%s4641_s2 + $0x40] sm:$0xff] }
  0x10   : > { %s2725_s25 = sshll.u32 %s4958_s20, 5  ;;  %367 = vperm.xlu1 %2755, %v297_v3   ;;  %377 = vperm.xlu0 %2754, %v299_v4   ;;  %v266_v15 = vld [vmem:[%s4640_s1 + $0x10] sm:$0xff]  ;;  %v293_v17 = vld [vmem:[%s4641_s2 + $0x48] sm:$0xff]  ;;  %v267_v18 = vld [vmem:[%s4640_s1 + $0x18] sm:$0xff]  ;;  %s2690_s27 = sshll.u32 %s4958_s20, 2 }
  0x11   : > { %s253_s30 = scalar_lea.vmem %s4639_s0, %s2725_s25  ;;  %v290_v19 = vld [vmem:[%s4641_s2 + $0x30] sm:$0xff]  ;;  %v291_v20 = vld [vmem:[%s4641_s2 + $0x38] sm:$0xff]  ;;  %v268_v21 = vld [vmem:[%s4640_s1 + $0x20] sm:$0xff] }
  0x12   : > { %v281_v6 = vld [vmem:[%s253_s30 + $0x8] sm:$0xff]  ;;  %v283_v7 = vld [vmem:[%s253_s30 + $0x18] sm:$0xff]  ;;  %v280_v8 = vld [vmem:[%s253_s30] sm:$0xff] }
  0x13   : > { %459 = vmatprep.subr.mxu0 %v281_v6  ;;  %620 = vmatprep.subr.mxu1 %v283_v7  ;;  %v282_v9 = vld [vmem:[%s253_s30 + $0x10] sm:$0xff]  ;;  %v288_v22 = vld [vmem:[%s4641_s2 + $0x20] sm:$0xff]  ;;  %v289_v23 = vld [vmem:[%s4641_s2 + $0x28] sm:$0xff]  ;;  %s262_s30 = scalar_lea.vmem %s4644_s5, %s2690_s27 }
  0x14   : > { %460 = vmatpush1.msra.mxu0 %v280_v8  ;;  %621 = vmatpush1.msra.mxu1 %v282_v9  ;;  %v269_v24 = vld [vmem:[%s4640_s1 + $0x28] sm:$0xff]  ;;  %v286_v25 = vld [vmem:[%s4641_s2 + $0x10] sm:$0xff]  ;;  %v287_v26 = vld [vmem:[%s4641_s2 + $0x18] sm:$0xff] }
  0x15   : > { %2691 = vmatmul.mubr.msk.f32.vlgmr.msra.gmra.mxu0 %vm380_vm0, %v264_v5  ;;  %2707 = vmatmul.mubr.msk.f32.vlgmr.msra.gmra.mxu1 %vm380_vm0, %v264_v5  ;;  %v270_v27 = vld [vmem:[%s4640_s1 + $0x30] sm:$0xff]  ;;  %v284_v28 = vld [vmem:[%s4641_s2] sm:$0xff]  ;;  %v285_v29 = vld [vmem:[%s4641_s2 + $0x8] sm:$0xff] }
  0x16   : > { %499 = vmatprep.mubr.f32.mxu0 %v3036_v1  ;;  %660 = vmatprep.mubr.f32.mxu1 %v3036_v1  ;;  %v271_v30 = vld [vmem:[%s4640_s1 + $0x38] sm:$0xff]  ;;  %v2416_v31 = vld [vmem:[#allocation2] sm:$0x1]  ;;  %v273_v33 = vld [vmem:[%s4640_s1 + $0x48] sm:$0xff] }
  0x17   : > { %362 = vperm.xlu1 %2755, %v296_v10   ;;  %372 = vperm.xlu0 %2754, %v298_v11   ;;  %v272_v32 = vld [vmem:[%s4640_s1 + $0x40] sm:$0xff]  ;;  %v274_v34 = vld [vmem:[%s4640_s1 + $0x50] sm:$0xff]  ;;  %v275_v35 = vld [vmem:[%s4640_s1 + $0x58] sm:$0xff] }
  0x18   : > { %v276_v36 = vld [vmem:[%s4640_s1 + $0x60] sm:$0xff]  ;;  %v277_v37 = vld [vmem:[%s4640_s1 + $0x68] sm:$0xff]  ;;  %v278_v38 = vld [vmem:[%s4640_s1 + $0x70] sm:$0xff] }
  0x19   : > { %2692 = vmatmul.mubr.msk.f32.gmra.mxu0 %vm380_vm0, %v265_v12  ;;  %2708 = vmatmul.mubr.msk.f32.gmra.mxu1 %vm380_vm0, %v265_v12  ;;  %v279_v39 = vld [vmem:[%s4640_s1 + $0x78] sm:$0xff] }
  0x1a   : > { %505 = vmatprep.mubr.f32.mxu0 %v3036_v1  ;;  %666 = vmatprep.mubr.f32.mxu1 %v3036_v1 }
  0x1b   : > { %352 = vperm.xlu1 %2755, %v294_v13   ;;  %357 = vperm.xlu0 %2754, %v295_v14  }
  0x1d   : > { %2693 = vmatmul.mubr.msk.f32.gmra.mxu0 %vm380_vm0, %v266_v15  ;;  %2709 = vmatmul.mubr.msk.f32.gmra.mxu1 %vm380_vm0, %v266_v15 }
  0x1e   : > { %511 = vmatprep.mubr.f32.mxu0 %v3036_v1  ;;  %672 = vmatprep.mubr.f32.mxu1 %v3036_v1 }
  0x1f   : > { %342 = vperm.xlu1 %2755, %v292_v16   ;;  %347 = vperm.xlu0 %2754, %v293_v17  }
  0x21   : > { %2694 = vmatmul.mubr.msk.f32.gmra.mxu0 %vm380_vm0, %v267_v18  ;;  %2710 = vmatmul.mubr.msk.f32.gmra.mxu1 %vm380_vm0, %v267_v18 }
  0x22   : > { %517 = vmatprep.mubr.f32.mxu0 %v3036_v1  ;;  %678 = vmatprep.mubr.f32.mxu1 %v3036_v1 }
  0x23   : > { %332 = vperm.xlu1 %2755, %v290_v19   ;;  %337 = vperm.xlu0 %2754, %v291_v20  }
  0x25   : > { %2695 = vmatmul.mubr.msk.f32.gmra.mxu0 %vm380_vm0, %v268_v21  ;;  %2711 = vmatmul.mubr.msk.f32.gmra.mxu1 %vm380_vm0, %v268_v21 }
  0x26   : > { %523 = vmatprep.mubr.f32.mxu0 %v3036_v1  ;;  %684 = vmatprep.mubr.f32.mxu1 %v3036_v1 }
  0x27   : > { %322 = vperm.xlu1 %2755, %v288_v22   ;;  %327 = vperm.xlu0 %2754, %v289_v23  }
  0x29   : > { %2696 = vmatmul.mubr.msk.f32.gmra.mxu0 %vm380_vm0, %v269_v24  ;;  %2712 = vmatmul.mubr.msk.f32.gmra.mxu1 %vm380_vm0, %v269_v24 }
  0x2a   : > { %529 = vmatprep.mubr.f32.mxu0 %v3036_v1  ;;  %690 = vmatprep.mubr.f32.mxu1 %v3036_v1 }
  0x2b   : > { %312 = vperm.xlu1 %2755, %v286_v25   ;;  %317 = vperm.xlu0 %2754, %v287_v26  }
  0x2d   : > { %2697 = vmatmul.mubr.msk.f32.gmra.mxu0 %vm380_vm0, %v270_v27  ;;  %2713 = vmatmul.mubr.msk.f32.gmra.mxu1 %vm380_vm0, %v270_v27 }
  0x2e   : > { %535 = vmatprep.mubr.f32.mxu0 %v3036_v1  ;;  %696 = vmatprep.mubr.f32.mxu1 %v3036_v1 }
  0x2f   : > { %302 = vperm.xlu1 %2755, %v284_v28   ;;  %307 = vperm.xlu0 %2754, %v285_v29  }
  0x31   : > { %2698 = vmatmul.mubr.msk.f32.gmra.mxu0 %vm380_vm0, %v271_v30  ;;  %2714 = vmatmul.mubr.msk.f32.gmra.mxu1 %vm380_vm0, %v271_v30  ;;  %v4645_v30 = vmov -1.0  }
  0x32   : > { %541 = vmatprep.mubr.f32.mxu0 %v3036_v1  ;;  %702 = vmatprep.mubr.f32.mxu1 %v3036_v1 }
  0x33   : > { %2419 = vperm.xlu0 %2754, %v2416_v31  }
  0x35   : > { %2699 = vmatmul.mubr.msk.f32.gmra.mxu0 %vm380_vm0, %v272_v32  ;;  %2715 = vmatmul.mubr.msk.f32.gmra.mxu1 %vm380_vm0, %v272_v32 }
  0x36   : > { %547 = vmatprep.mubr.f32.mxu0 %v3036_v1  ;;  %708 = vmatprep.mubr.f32.mxu1 %v3036_v1 }
  0x39   : > { %2700 = vmatmul.mubr.msk.f32.gmra.mxu0 %vm380_vm0, %v273_v33  ;;  %2716 = vmatmul.mubr.msk.f32.gmra.mxu1 %vm380_vm0, %v273_v33 }
  0x3a   : > { %553 = vmatprep.mubr.f32.mxu0 %v3036_v1  ;;  %714 = vmatprep.mubr.f32.mxu1 %v3036_v1 }
  0x3d   : > { %2701 = vmatmul.mubr.msk.f32.gmra.mxu0 %vm380_vm0, %v274_v34  ;;  %2717 = vmatmul.mubr.msk.f32.gmra.mxu1 %vm380_vm0, %v274_v34 }
  0x3e   : > { %559 = vmatprep.mubr.f32.mxu0 %v3036_v1  ;;  %720 = vmatprep.mubr.f32.mxu1 %v3036_v1 }
  0x41   : > { %2702 = vmatmul.mubr.msk.f32.gmra.mxu0 %vm380_vm0, %v275_v35  ;;  %2718 = vmatmul.mubr.msk.f32.gmra.mxu1 %vm380_vm0, %v275_v35 }
  0x42   : > { %565 = vmatprep.mubr.f32.mxu0 %v3036_v1  ;;  %726 = vmatprep.mubr.f32.mxu1 %v3036_v1 }
  0x45   : > { %2703 = vmatmul.mubr.msk.f32.gmra.mxu0 %vm380_vm0, %v276_v36  ;;  %2719 = vmatmul.mubr.msk.f32.gmra.mxu1 %vm380_vm0, %v276_v36 }
  0x46   : > { %571 = vmatprep.mubr.f32.mxu0 %v3036_v1  ;;  %732 = vmatprep.mubr.f32.mxu1 %v3036_v1 }
  0x49   : > { %2704 = vmatmul.mubr.msk.f32.gmra.mxu0 %vm380_vm0, %v277_v37  ;;  %2720 = vmatmul.mubr.msk.f32.gmra.mxu1 %vm380_vm0, %v277_v37 }
  0x4a   : > { %577 = vmatprep.mubr.f32.mxu0 %v3036_v1  ;;  %738 = vmatprep.mubr.f32.mxu1 %v3036_v1 }
  0x4d   : > { %2705 = vmatmul.mubr.msk.f32.gmra.mxu0 %vm380_vm0, %v278_v38  ;;  %2721 = vmatmul.mubr.msk.f32.gmra.mxu1 %vm380_vm0, %v278_v38 }
  0x4e   : > { %583 = vmatprep.mubr.f32.mxu0 %v3036_v1  ;;  %744 = vmatprep.mubr.f32.mxu1 %v3036_v1 }
  0x51   : > { %2706 = vmatmul.mubr.msk.f32.gmra.mxu0 %vm380_vm0, %v279_v39  ;;  %2722 = vmatmul.mubr.msk.f32.gmra.mxu1 %vm380_vm0, %v279_v39 }
  0x52   : > { %2490 = vmatprep.mubr.f32.mxu0 %v3036_v1  ;;  %2561 = vmatprep.mubr.f32.mxu1 %v3036_v1 }
  0x8b   : > { %v3259_v40 = vpop.permute.xlu1 %367  ;;  %v3263_v42 = vpop.permute.xlu0 %377 }
  0x92   : > { %v3261_v41 = vpop.permute.xlu1 %362  ;;  %v3267_v44 = vpop.permute.xlu0 %372 }
  0x96   : > { %v3265_v43 = vpop.permute.xlu1 %352  ;;  %v3271_v46 = vpop.permute.xlu0 %357 }
  0x9a   : > { %v3269_v45 = vpop.permute.xlu1 %342  ;;  %v3275_v48 = vpop.permute.xlu0 %347 }
  0x9e   : > { %v3273_v47 = vpop.permute.xlu1 %332  ;;  %v3279_v50 = vpop.permute.xlu0 %337 }
  0xa2   : > { %v3277_v49 = vpop.permute.xlu1 %322  ;;  %v3283_v52 = vpop.permute.xlu0 %327 }
  0xa6   : > { %v3281_v51 = vpop.permute.xlu1 %312  ;;  %v3289_v58 = vpop.permute.xlu0 %317 }
  0xaa   : > { %v303_v53 = vpop.permute.xlu1 %302  ;;  %v308_v6 = vpop.permute.xlu0 %307 }
  0xd5   : > { %v495_v54 = vpop.f32.mrf.mxu0  ;;  %v656_v55 = vpop.f32.mrf.mxu1 }
  0xd6   : > { %v3285_v56 = vadd.f32 %v495_v54, %v303_v53  ;;  %v3287_v57 = vadd.f32 %v656_v55, %v303_v53 }
  0xd7   : > { %v497_v61 = vpop.f32.mrf.mxu0  ;;  %v658_v1 = vpop.f32.mrf.mxu1 }
  0xd8   : > { %4682 = vst [vmem:[#allocation3_spill] sm:$0xff] %v3285_v56  ;;  %4683 = vst [vmem:[#allocation4_spill] sm:$0xff] %v3287_v57  ;;  %v815_v59 = vmul.f32 0.70710677, %v3285_v56  ;;  %v817_v60 = vmul.f32 0.70710677, %v3287_v57  ;;  %v3293_v0 = vadd.f32 %v497_v61, %v303_v53  ;;  %v3296_v10 = vadd.f32 %v658_v1, %v303_v53 }
  0xd9   : > { %v501_v8 = vpop.f32.mrf.mxu0  ;;  %v662_v9 = vpop.f32.mrf.mxu1  ;;  %v4697_v57 = vmov -1.0  }
  0xda   : > { %v1007_v62 = vand.u32 2147483647, %v815_v59  ;;  %v1009_v63 = vand.u32 2147483647, %v817_v60  ;;  %4684 = vst [vmem:[#allocation5_spill] sm:$0xff] %v3293_v0  ;;  %4685 = vst [vmem:[#allocation6_spill] sm:$0xff] %v3296_v10  ;;  %v3298_v11 = vadd.f32 %v501_v8, %v308_v6  ;;  %v3300_v12 = vadd.f32 %v662_v9, %v308_v6 }
  0xdb   : > { %v816_v7 = vmul.f32 0.70710677, %v3293_v0  ;;  %v3303_v14 = vmul.f32 0.70710677, %v3296_v10  ;;  %v503_v20 = vpop.f32.mrf.mxu0  ;;  %vm879_vm1 = vcmp.ge.f32.partialorder %v815_v59, 0.0  ;;  %vm881_vm2 = vcmp.ge.f32.partialorder %v817_v60, 0.0  ;;  %v664_v34 = vpop.f32.mrf.mxu1 }
  0xdc   : > { %v1071_v2 = vmul.f32 0.3275911, %v1007_v62  ;;  %v1073_v3 = vmul.f32 0.3275911, %v1009_v63  ;;  %4686 = vst [vmem:[#allocation7_spill] sm:$0xff] %v3298_v11  ;;  %4687 = vst [vmem:[#allocation8_spill] sm:$0xff] %v3300_v12  ;;  %v3320_v33 = vadd.f32 %v503_v20, %v308_v6 }
  0xdd   : > { %v1008_v13 = vand.u32 2147483647, %v816_v7  ;;  %4688 = vst [vmem:[#allocation9_spill] sm:$0xff] %v3303_v14  ;;  %v3306_v15 = vmul.f32 0.70710677, %v3298_v11  ;;  %v1839_v16 = vsub.f32 0.0, %v1007_v62  ;;  %v507_v29 = vpop.f32.mrf.mxu0 }
  0xde   : > { %v1135_v4 = vadd.f32 1.0, %v1071_v2  ;;  %v1137_v5 = vadd.f32 1.0, %v1073_v3  ;;  %v3309_v17 = vmul.f32 0.70710677, %v3300_v12  ;;  %v1841_v18 = vsub.f32 0.0, %v1009_v63  ;;  %4690 = vst [vmem:[#allocation11_spill] sm:$0xff] %v3320_v33  ;;  %v668_v3 = vpop.f32.mrf.mxu1 }
  0xdf   : > { %v1011_v19 = vand.u32 2147483647, %v3306_v15  ;;  %v1840_v21 = vsub.f32 0.0, %v1008_v13  ;;  %v1010_v22 = vand.u32 2147483647, %v3303_v14  ;;  %v1903_v25 = vmul.f32 %v1839_v16, %v1007_v62 }
  0xe0   : > { %2756 = vrcp.f32 %v1135_v4  ;;  %v3314_v24 = vand.u32 2147483647, %v3309_v17  ;;  %v1905_v26 = vmul.f32 %v1841_v18, %v1009_v63  ;;  %vm880_vm3 = vcmp.ge.f32.partialorder %v816_v7, 0.0 }
  0xe1   : > { %2758 = vrcp.f32 %v1137_v5  ;;  %v1075_v23 = vmul.f32 0.3275911, %v1011_v19  ;;  %v3318_v31 = vsel %vm879_vm1, 1.0, %v4645_v30  ;;  %v1072_v32 = vmul.f32 0.3275911, %v1008_v13 }
  0xe2   : > { %v1077_v28 = vmul.f32 0.3275911, %v3314_v24  ;;  %4689 = vst [vmem:[#allocation10_spill] sm:$0xff] %v3318_v31  ;;  %v1904_v35 = vmul.f32 %v1840_v21, %v1008_v13  ;;  %v1842_v36 = vsub.f32 0.0, %v1010_v22  ;;  %v1967_v39 = vmul.f32 1.442695, %v1903_v25 }
  0xe3   : > { %v1139_v27 = vadd.f32 1.0, %v1075_v23  ;;  %v3326_v53 = vsel %vm881_vm2, 1.0, %v4645_v30  ;;  %v3330_v54 = vsel %vm880_vm3, 1.0, %v4645_v30  ;;  %v3333_v55 = vadd.f32 %v507_v29, %v3281_v51 }
  0xe4   : > { %v1141_v37 = vadd.f32 1.0, %v1077_v28  ;;  %4691 = vst [vmem:[#allocation12_spill] sm:$0xff] %v3326_v53  ;;  %4692 = vst [vmem:[#allocation13_spill] sm:$0xff] %v3330_v54  ;;  %v1971_v62 = vmul.f32 1.442695, %v1905_v26  ;;  %v3342_v2 = vadd.f32 %v664_v34, %v308_v6  ;;  %v1136_v5 = vadd.f32 1.0, %v1072_v32 }
  0xe5   : > { %2760 = vrcp.f32 %v1139_v27  ;;  %v1074_v63 = vmul.f32 0.3275911, %v1010_v22  ;;  %v3340_v60 = vmul.f32 0.70710677, %v3320_v33  ;;  %v1969_v7 = vmul.f32 1.442695, %v1904_v35 }
  0xe6   : > { %2762 = vrcp.f32 %v1141_v37  ;;  %4693 = vst [vmem:[#allocation14_spill] sm:$0xff] %v3342_v2  ;;  %v1906_v8 = vmul.f32 %v1842_v36, %v1010_v22  ;;  %v1843_v13 = vsub.f32 0.0, %v1011_v19  ;;  %v3345_v16 = vmul.f32 0.70710677, %v3333_v55 }
  0xe7   : > { %2764 = vpow2.f32 %v1967_v39  ;;  %v1138_v20 = vadd.f32 1.0, %v1074_v63  ;;  %v3349_v21 = vadd.f32 %v668_v3, %v3281_v51  ;;  %v1012_v23 = vand.u32 2147483647, %v3340_v60 }
  0xe8   : > { %2766 = vpow2.f32 %v1971_v62  ;;  %v3354_v25 = vmul.f32 0.70710677, %v3342_v2  ;;  %v3357_v22 = vand.u32 2147483647, %v3345_v16  ;;  %v1973_v27 = vmul.f32 1.442695, %v1906_v8 }
  0xe9   : > { %2768 = vrcp.f32 %v1136_v5  ;;  %v1845_v28 = vsub.f32 0.0, %v3314_v24  ;;  %vm883_vm4 = vcmp.ge.f32.partialorder %v3306_v15, 0.0  ;;  %v1907_v29 = vmul.f32 %v1843_v13, %v1011_v19 }
  0xea   : > { %4694 = vst [vmem:[#allocation15_spill] sm:$0xff] %v3354_v25  ;;  %2770 = vpow2.f32 %v1969_v7  ;;  %v1079_v32 = vmul.f32 0.3275911, %v3357_v22  ;;  %vm885_vm5 = vcmp.ge.f32.partialorder %v3309_v17, 0.0  ;;  %v3365_v36 = vmul.f32 0.70710677, %v3349_v21 }
  0xeb   : > { %2772 = vrcp.f32 %v1138_v20  ;;  %v1844_v37 = vsub.f32 0.0, %v1012_v23  ;;  %v1014_v39 = vand.u32 2147483647, %v3354_v25  ;;  %v1909_v62 = vmul.f32 %v1845_v28, %v3314_v24 }
  0xec   : > { %2774 = vpow2.f32 %v1973_v27  ;;  %v1076_v63 = vmul.f32 0.3275911, %v1012_v23  ;;  %v1017_v19 = vand.u32 2147483647, %v3365_v36  ;;  %v3375_v17 = vsel %vm883_vm4, 1.0, %v4645_v30 }
  0xed   : > { %v3322_v38 = vpop.eup %2756  ;;  %4695 = vst [vmem:[#allocation16_spill] sm:$0xff] %v3375_v17  ;;  %v3378_v5 = vsel %vm885_vm5, 1.0, %v4645_v30  ;;  %vm884_vm6 = vcmp.ge.f32.partialorder %v3340_v60, 0.0  ;;  %v1908_v13 = vmul.f32 %v1844_v37, %v1012_v23  ;;  %v670_v37 = vpop.f32.mrf.mxu1  ;;  %vm887_vm7 = vcmp.ge.f32.partialorder %v3345_v16, 0.0 }
  0xee   : > { %v3335_v59 = vpop.eup %2758  ;;  %v1263_v61 = vmul.f32 1.0614054, %v3322_v38  ;;  %4696 = vst [vmem:[#allocation17_spill] sm:$0xff] %v3378_v5  ;;  %v1140_v27 = vadd.f32 1.0, %v1076_v63  ;;  %v3395_v10 = vsel %vm884_vm6, 1.0, %v4697_v57  ;;  %v1849_v56 = vsub.f32 0.0, %v1017_v19 }
  0xef   : > { %v1265_v1 = vmul.f32 1.0614054, %v3335_v59  ;;  %4698 = vst [vmem:[#allocation18_spill] sm:$0xff] %v3395_v10  ;;  %vm889_vm8 = vcmp.ge.f32.partialorder %v3365_v36, 0.0  ;;  %v3421_v16 = vmul.f32 0.5, %v3349_v21 }
  0xf0   : > { %v1327_v4 = vadd.f32 -1.4531521, %v1263_v61  ;;  %v1143_v61 = vadd.f32 1.0, %v1079_v32  ;;  %v1078_v32 = vmul.f32 0.3275911, %v1014_v39 }
  0xf1   : > { %v1329_v9 = vadd.f32 -1.4531521, %v1265_v1  ;;  %v509_v1 = vpop.f32.mrf.mxu0  ;;  %4704 = vst [vmem:[#allocation24_spill] sm:$0xff] %v3421_v16 }
  0xf2   : > { %v1391_v18 = vmul.f32 %v3322_v38, %v1327_v4  ;;  %v3370_v3 = vpop.eup %2760  ;;  %v1975_v4 = vmul.f32 1.442695, %v1907_v29  ;;  %2776 = vrcp.f32 %v1143_v61  ;;  %v510_v20 = vadd.f32 %v509_v1, %v3281_v51 }
  0xf3   : > { %v1393_v6 = vmul.f32 %v3335_v59, %v1329_v9  ;;  %v1267_v24 = vmul.f32 1.0614054, %v3370_v3  ;;  %v1081_v9 = vmul.f32 0.3275911, %v1017_v19  ;;  %v3384_v15 = vpop.eup %2762 }
  0xf4   : > { %v1455_v26 = vadd.f32 1.4214138, %v1391_v18  ;;  %v1846_v18 = vsub.f32 0.0, %v1014_v39  ;;  %2778 = vpow2.f32 %v1975_v4  ;;  %v1269_v29 = vmul.f32 1.0614054, %v3384_v15 }
  0xf5   : > { %v1457_v35 = vadd.f32 1.4214138, %v1393_v6  ;;  %v1331_v6 = vadd.f32 -1.4531521, %v1267_v24  ;;  %v1145_v28 = vadd.f32 1.0, %v1081_v9  ;;  %v3429_v36 = vmul.f32 0.5, %v510_v20 }
  0xf6   : > { %v1519_v34 = vmul.f32 %v3322_v38, %v1455_v26  ;;  %v1979_v26 = vmul.f32 1.442695, %v1909_v62  ;;  %v1333_v24 = vadd.f32 -1.4531521, %v1269_v29  ;;  %v1977_v62 = vmul.f32 1.442695, %v1908_v13 }
  0xf7   : > { %v1521_v8 = vmul.f32 %v3335_v59, %v1457_v35  ;;  %v2765_v35 = vpop.eup %2764  ;;  %v1395_v23 = vmul.f32 %v3370_v3, %v1331_v6  ;;  %2780 = vrcp.f32 %v1145_v28  ;;  %v1910_v63 = vmul.f32 %v1846_v18, %v1014_v39  ;;  %4705 = vst [vmem:[#allocation25_spill] sm:$0xff] %v3429_v36 }
  0xf8   : > { %v1583_v7 = vadd.f32 -0.28449672, %v1519_v34  ;;  %v1847_v34 = vsub.f32 0.0, %v3357_v22  ;;  %v3390_v1 = vpop.eup %2766  ;;  %v824_v9 = vmul.f32 0.70710677, %v510_v20  ;;  %2782 = vpow2.f32 %v1979_v26 }
  0xf9   : > { %v1585_v30 = vadd.f32 -0.28449672, %v1521_v8  ;;  %v1459_v4 = vadd.f32 1.4214138, %v1395_v23  ;;  %v1397_v8 = vmul.f32 %v3384_v15, %v1333_v24  ;;  %2784 = vrcp.f32 %v1140_v27 }
  0xfa   : > { %v1647_v61 = vmul.f32 %v3322_v38, %v1583_v7  ;;  %v3397_v7 = vpop.eup %2768  ;;  %v1142_v6 = vadd.f32 1.0, %v1078_v32  ;;  %v3401_v28 = vadd.f32 %v670_v37, %v3281_v51  ;;  %v1911_v60 = vmul.f32 %v1847_v34, %v3357_v22 }
  0xfb   : > { %4699 = vst [vmem:[#allocation19_spill] sm:$0xff] %v3397_v7  ;;  %v3403_v13 = vpop.eup %2770  ;;  %v1649_v18 = vmul.f32 %v3335_v59, %v1585_v30  ;;  %2786 = vpow2.f32 %v1977_v62  ;;  %v1981_v26 = vmul.f32 1.442695, %v1910_v63  ;;  %v3409_v29 = vmul.f32 0.5, %v3333_v55 }
  0xfc   : > { %4700 = vst [vmem:[#allocation20_spill] sm:$0xff] %v3401_v28  ;;  %4701 = vst [vmem:[#allocation21_spill] sm:$0xff] %v3403_v13  ;;  %v1711_v39 = vadd.f32 0.2548296, %v1647_v61  ;;  %v1016_v23 = vand.u32 2147483647, %v824_v9  ;;  %v3411_v27 = vpop.eup %2772  ;;  %v1523_v51 = vmul.f32 %v3370_v3, %v1459_v4  ;;  %v1913_v61 = vmul.f32 %v1849_v56, %v1017_v19  ;;  %v513_v56 = vpop.f32.mrf.mxu0 }
  0xfd   : > { %4702 = vst [vmem:[#allocation22_spill] sm:$0xff] %v3411_v27  ;;  %v1461_v32 = vadd.f32 1.4214138, %v1397_v8  ;;  %v3415_v37 = vpop.eup %2774  ;;  %2788 = vrcp.f32 %v1142_v6  ;;  %v3418_v30 = vsel %vm887_vm7, 1.0, %v4697_v57  ;;  %v3424_v55 = vmul.f32 0.70710677, %v3401_v28  ;;  %v674_v4 = vpop.f32.mrf.mxu1 }
  0xfe   : > { %4703 = vst [vmem:[#allocation23_spill] sm:$0xff] %v3415_v37  ;;  %v1775_v34 = vmul.f32 %v3322_v38, %v1711_v39  ;;  %v1713_v24 = vadd.f32 0.2548296, %v1649_v18  ;;  %v1983_v62 = vmul.f32 1.442695, %v1911_v60  ;;  %2790 = vpow2.f32 %v1981_v26 }
  0xff   : > { %v3426_v22 = vpop.eup %2776  ;;  %v3433_v63 = vsel %vm889_vm8, 1.0, %v4697_v57  ;;  %v1080_v21 = vmul.f32 0.3275911, %v1016_v23  ;;  %v1587_v8 = vadd.f32 -0.28449672, %v1523_v51  ;;  %v1525_v6 = vmul.f32 %v3384_v15, %v1461_v32 }
 0x100   : > { %v1271_v19 = vmul.f32 1.0614054, %v3426_v22  ;;  %v1987_v12 = vmul.f32 1.442695, %v1913_v61  ;;  %vm888_vm9 = vcmp.ge.f32.partialorder %v824_v9, 0.0  ;;  %v1848_v38 = vsub.f32 0.0, %v1016_v23 }
 0x101   : > { %v1018_v39 = vand.u32 2147483647, %v3424_v55  ;;  %v3438_v20 = vadd.f32 %v513_v56, %v3289_v58  ;;  %v3440_v18 = vpop.eup %2778  ;;  %v3442_v60 = vmul.f32 %v2765_v35, %v1775_v34  ;;  %v1777_v26 = vmul.f32 %v3335_v59, %v1713_v24 }
 0x102   : > { %v1335_v0 = vadd.f32 -1.4531521, %v1271_v19  ;;  %2792 = vpow2.f32 %v1983_v62  ;;  %v3446_v51 = vadd.f32 %v674_v4, %v3289_v58  ;;  %v3452_v61 = vsel %vm888_vm9, 1.0, %v4697_v57 }
 0x103   : > { %4706 = vst [vmem:[#allocation26_spill] sm:$0xff] %v3442_v60  ;;  %4707 = vst [vmem:[#allocation27_spill] sm:$0xff] %v3452_v61  ;;  %v1144_v19 = vadd.f32 1.0, %v1080_v21  ;;  %v3455_v56 = vmul.f32 0.70710677, %v3438_v20  ;;  %v1651_v35 = vmul.f32 %v3370_v3, %v1587_v8  ;;  %2794 = vpow2.f32 %v1987_v12 }
 0x104   : > { %v3448_v32 = vpop.eup %2780  ;;  %v1399_v9 = vmul.f32 %v3426_v22, %v1335_v0  ;;  %v1589_v34 = vadd.f32 -0.28449672, %v1525_v6  ;;  %v1912_v4 = vmul.f32 %v1848_v38, %v1016_v23  ;;  %v1850_v2 = vsub.f32 0.0, %v1018_v39  ;;  %v515_v23 = vpop.f32.mrf.mxu0 }
 0x105   : > { %v1273_v59 = vmul.f32 1.0614054, %v3448_v32  ;;  %v3459_v24 = vpop.eup %2782  ;;  %v1019_v0 = vand.u32 2147483647, %v3455_v56  ;;  %v3466_v37 = vmul.f32 %v3390_v1, %v1777_v26  ;;  %v3469_v8 = vmul.f32 0.70710677, %v3446_v51 }
 0x106   : > { %v1463_v62 = vadd.f32 1.4214138, %v1399_v9  ;;  %v3462_v53 = vpop.eup %2784  ;;  %2796 = vrcp.f32 %v1144_v19  ;;  %v1082_v6 = vmul.f32 0.3275911, %v1018_v39  ;;  %v1715_v10 = vadd.f32 0.2548296, %v1651_v35  ;;  %v519_v28 = vpop.f32.mrf.mxu0 }
 0x107   : > { %4708 = vst [vmem:[#allocation28_spill] sm:$0xff] %v3462_v53  ;;  %4709 = vst [vmem:[#allocation29_spill] sm:$0xff] %v3466_v37  ;;  %v1337_v54 = vadd.f32 -1.4531521, %v1273_v59  ;;  %v1083_v9 = vmul.f32 0.3275911, %v1019_v0  ;;  %v1653_v33 = vmul.f32 %v3384_v15, %v1589_v34  ;;  %v1914_v11 = vmul.f32 %v1850_v2, %v1018_v39 }
 0x108   : > { %v1527_v12 = vmul.f32 %v3426_v22, %v1463_v62  ;;  %v3472_v38 = vpop.eup %2786  ;;  %v1021_v1 = vand.u32 2147483647, %v3469_v8  ;;  %v1985_v59 = vmul.f32 1.442695, %v1912_v4  ;;  %v1851_v19 = vsub.f32 0.0, %v1019_v0 }
 0x109   : > { %4710 = vst [vmem:[#allocation30_spill] sm:$0xff] %v3472_v38  ;;  %v1401_v21 = vmul.f32 %v3448_v32, %v1337_v54  ;;  %v1147_v16 = vadd.f32 1.0, %v1083_v9  ;;  %v516_v31 = vadd.f32 %v515_v23, %v3289_v58  ;;  %vm890_vm10 = vcmp.ge.f32.partialorder %v3424_v55, 0.0 }
 0x10a   : > { %v1591_v26 = vadd.f32 -0.28449672, %v1527_v12  ;;  %v3477_v5 = vpop.eup %2788  ;;  %v1085_v60 = vmul.f32 0.3275911, %v1021_v1  ;;  %v1146_v35 = vadd.f32 1.0, %v1082_v6  ;;  %v1779_v34 = vmul.f32 %v3370_v3, %v1715_v10  ;;  %v676_v12 = vpop.f32.mrf.mxu1 }
 0x10b   : > { %4711 = vst [vmem:[#allocation31_spill] sm:$0xff] %v3477_v5  ;;  %v1465_v62 = vadd.f32 1.4214138, %v1401_v21  ;;  %2798 = vrcp.f32 %v1147_v16  ;;  %v3482_v54 = vpop.eup %2790  ;;  %v1717_v4 = vadd.f32 0.2548296, %v1653_v33  ;;  %v1853_v17 = vsub.f32 0.0, %v1021_v1 }
 0x10c   : > { %v1655_v13 = vmul.f32 %v3426_v22, %v1591_v26  ;;  %4712 = vst [vmem:[#allocation32_spill] sm:$0xff] %v3482_v54  ;;  %v1149_v39 = vadd.f32 1.0, %v1085_v60  ;;  %2800 = vpow2.f32 %v1985_v59  ;;  %v1989_v9 = vmul.f32 1.442695, %v1914_v11 }
 0x10d   : > { %v1529_v2 = vmul.f32 %v3448_v32, %v1465_v62  ;;  %v1915_v38 = vmul.f32 %v1851_v19, %v1019_v0  ;;  %v828_v26 = vmul.f32 0.70710677, %v516_v31  ;;  %v3490_v10 = vsel %vm890_vm10, 1.0, %v4697_v57 }
 0x10e   : > { %v1719_v21 = vadd.f32 0.2548296, %v1655_v13  ;;  %2802 = vrcp.f32 %v1149_v39  ;;  %4713 = vst [vmem:[#allocation33_spill] sm:$0xff] %v3490_v10  ;;  %v677_v33 = vadd.f32 %v676_v12, %v3289_v58  ;;  %v3494_v3 = vmul.f32 %v3440_v18, %v1779_v34 }
 0x10f   : > { %v1593_v23 = vadd.f32 -0.28449672, %v1529_v2  ;;  %v2793_v6 = vpop.eup %2792  ;;  %2804 = vrcp.f32 %v1146_v35  ;;  %v1781_v11 = vmul.f32 %v3384_v15, %v1717_v4  ;;  %v1020_v60 = vand.u32 2147483647, %v828_v26 }
 0x110   : > { %v1783_v16 = vmul.f32 %v3426_v22, %v1719_v21  ;;  %4714 = vst [vmem:[#allocation34_spill] sm:$0xff] %v3494_v3  ;;  %v2795_v0 = vpop.eup %2794  ;;  %vm891_vm11 = vcmp.ge.f32.partialorder %v3455_v56, 0.0  ;;  %v1917_v22 = vmul.f32 %v1853_v17, %v1021_v1  ;;  %v520_v55 = vadd.f32 %v519_v28, %v3277_v49 }
 0x111   : > { %v1657_v13 = vmul.f32 %v3448_v32, %v1593_v23  ;;  %2806 = vpow2.f32 %v1989_v9  ;;  %v3501_v62 = vmul.f32 0.5, %v3438_v20  ;;  %v1991_v58 = vmul.f32 1.442695, %v1915_v38  ;;  %v680_v38 = vpop.f32.mrf.mxu1 }
 0x112   : > { %v2103_v59 = vmul.f32 %v2793_v6, %v1783_v16  ;;  %v830_v19 = vmul.f32 0.70710677, %v677_v33  ;;  %v3504_v35 = vmul.f32 0.5, %v3446_v51  ;;  %vm893_vm12 = vcmp.ge.f32.partialorder %v3469_v8, 0.0 }
 0x113   : > { %v1721_v18 = vadd.f32 0.2548296, %v1657_v13  ;;  %v1084_v15 = vmul.f32 0.3275911, %v1020_v60  ;;  %v3507_v34 = vpop.eup %2796  ;;  %v3511_v17 = vmul.f32 %v3459_v24, %v1781_v11  ;;  %v3514_v28 = vsel %vm891_vm11, 1.0, %v4697_v57  ;;  %v521_v13 = vpop.f32.mrf.mxu0 }
 0x114   : > { %4715 = vst [vmem:[#allocation35_spill] sm:$0xff] %v3504_v35  ;;  %4716 = vst [vmem:[#allocation36_spill] sm:$0xff] %v3507_v34  ;;  %v1852_v20 = vsub.f32 0.0, %v1020_v60  ;;  %v2167_v1 = vsub.f32 1.0, %v2103_v59  ;;  %v1995_v4 = vmul.f32 1.442695, %v1917_v22  ;;  %2808 = vpow2.f32 %v1991_v58 }
 0x115   : > { %4717 = vst [vmem:[#allocation37_spill] sm:$0xff] %v3511_v17  ;;  %vm892_vm13 = vcmp.ge.f32.partialorder %v828_v26, 0.0  ;;  %v831_v51 = vmul.f32 0.70710677, %v520_v55  ;;  %v3517_v8 = vsel %vm893_vm12, 1.0, %v4697_v57  ;;  %v3519_v2 = vmul.f32 0.5, %v516_v31  ;;  %v525_v10 = vpop.f32.mrf.mxu0 }
 0x116   : > { %v1022_v39 = vand.u32 2147483647, %v830_v19  ;;  %v1785_v12 = vmul.f32 %v3448_v32, %v1721_v18  ;;  %v1148_v24 = vadd.f32 1.0, %v1084_v15  ;;  %vm894_vm14 = vcmp.ge.f32.partialorder %v830_v19, 0.0 }
 0x117   : > { %4718 = vst [vmem:[#allocation38_spill] sm:$0xff] %v3519_v2  ;;  %v3523_v21 = vadd.f32 %v680_v38, %v3277_v49  ;;  %v3528_v23 = vsel %vm892_vm13, 1.0, %v4697_v57  ;;  %v1916_v26 = vmul.f32 %v1852_v20, %v1020_v60  ;;  %v3530_v6 = vmul.f32 0.5, %v677_v33 }
 0x118   : > { %v3525_v9 = vpop.eup %2798  ;;  %4719 = vst [vmem:[#allocation39_spill] sm:$0xff] %v3528_v23  ;;  %v1023_v16 = vand.u32 2147483647, %v831_v51  ;;  %v2231_v31 = vmul.f32 %v2167_v1, %v3418_v30  ;;  %2810 = vpow2.f32 %v1995_v4  ;;  %v3534_v32 = vmul.f32 0.5, %v520_v55 }
 0x119   : > { %4720 = vst [vmem:[#allocation40_spill] sm:$0xff] %v3530_v6  ;;  %v1275_v11 = vmul.f32 1.0614054, %v3525_v9  ;;  %v3536_v59 = vpop.eup %2800  ;;  %v3539_v22 = vsel %vm894_vm14, 1.0, %v4697_v57  ;;  %v1086_v58 = vmul.f32 0.3275911, %v1022_v39  ;;  %v2105_v33 = vmul.f32 %v2795_v0, %v1785_v12  ;;  %v682_v0 = vpop.f32.mrf.mxu1 }
 0x11a   : > { %4721 = vst [vmem:[#allocation41_spill] sm:$0xff] %v3536_v59  ;;  %4722 = vst [vmem:[#allocation42_spill] sm:$0xff] %v3539_v22  ;;  %v1854_v19 = vsub.f32 0.0, %v1022_v39  ;;  %v1087_v18 = vmul.f32 0.3275911, %v1023_v16  ;;  %2812 = vrcp.f32 %v1148_v24  ;;  %v522_v4 = vadd.f32 %v521_v13, %v3277_v49 }
 0x11b   : > { %v3541_v60 = vpop.eup %2802  ;;  %v1339_v15 = vadd.f32 -1.4531521, %v1275_v11  ;;  %v3544_v30 = vmul.f32 0.70710677, %v3523_v21  ;;  %v1993_v38 = vmul.f32 1.442695, %v1916_v26 }
 0x11c   : > { %v3546_v20 = vpop.eup %2804  ;;  %v1277_v55 = vmul.f32 1.0614054, %v3541_v60  ;;  %v1151_v1 = vadd.f32 1.0, %v1087_v18  ;;  %v2295_v56 = vadd.f32 1.0, %v2231_v31  ;;  %v1855_v3 = vsub.f32 0.0, %v1023_v16 }
 0x11d   : > { %4723 = vst [vmem:[#allocation43_spill] sm:$0xff] %v3546_v20  ;;  %v1403_v54 = vmul.f32 %v3525_v9, %v1339_v15  ;;  %v1025_v37 = vand.u32 2147483647, %v3544_v30  ;;  %v1150_v24 = vadd.f32 1.0, %v1086_v58  ;;  %v1918_v11 = vmul.f32 %v1854_v19, %v1022_v39 }
 0x11e   : > { %v1341_v12 = vadd.f32 -1.4531521, %v1277_v55  ;;  %2814 = vrcp.f32 %v1151_v1  ;;  %v3552_v36 = vpop.eup %2806  ;;  %vm895_vm15 = vcmp.ge.f32.partialorder %v831_v51, 0.0  ;;  %v2169_v35 = vsub.f32 1.0, %v2105_v33 }
 0x11f   : > { %4724 = vst [vmem:[#allocation44_spill] sm:$0xff] %v3552_v36  ;;  %v1467_v17 = vadd.f32 1.4214138, %v1403_v54  ;;  %v1089_v26 = vmul.f32 0.3275911, %v1025_v37  ;;  %v1857_v18 = vsub.f32 0.0, %v1025_v37  ;;  %v683_v15 = vadd.f32 %v682_v0, %v3277_v49 }
 0x120   : > { %v1405_v31 = vmul.f32 %v3541_v60, %v1341_v12  ;;  %v832_v13 = vmul.f32 0.70710677, %v522_v4  ;;  %v1919_v6 = vmul.f32 %v1855_v3, %v1023_v16  ;;  %v526_v39 = vadd.f32 %v525_v10, %v3283_v52 }
 0x121   : > { %v1531_v14 = vmul.f32 %v3525_v9, %v1467_v17  ;;  %v1153_v55 = vadd.f32 1.0, %v1089_v26  ;;  %2816 = vpow2.f32 %v1993_v38  ;;  %v3559_v19 = vsel %vm895_vm15, 1.0, %v4697_v57  ;;  %v2809_v51 = vpop.eup %2808 }
 0x122   : > { %v1469_v58 = vadd.f32 1.4214138, %v1405_v31  ;;  %v1921_v54 = vmul.f32 %v1857_v18, %v1025_v37  ;;  %v3562_v33 = vmul.f32 %v2295_v56, %v3409_v29  ;;  %v1024_v12 = vand.u32 2147483647, %v832_v13  ;;  %v686_v18 = vpop.f32.mrf.mxu1 }
 0x123   : > { %v1595_v1 = vadd.f32 -0.28449672, %v1531_v14  ;;  %2818 = vrcp.f32 %v1153_v55  ;;  %v1997_v3 = vmul.f32 1.442695, %v1918_v11  ;;  %v834_v17 = vmul.f32 0.70710677, %v683_v15 }
 0x124   : > { %4725 = vst [vmem:[#allocation45_spill] sm:$0xff] %v3562_v33  ;;  %v1533_v49 = vmul.f32 %v3541_v60, %v1469_v58  ;;  %2820 = vrcp.f32 %v1150_v24  ;;  %v3566_v10 = vmul.f32 %v2169_v35, %v3433_v63  ;;  %v1999_v38 = vmul.f32 1.442695, %v1919_v6  ;;  %v527_v58 = vpop.f32.mrf.mxu0  ;;  %v688_v23 = vpop.f32.mrf.mxu1 }
 0x125   : > { %v1659_v16 = vmul.f32 %v3525_v9, %v1595_v1  ;;  %v835_v0 = vmul.f32 0.70710677, %v526_v39  ;;  %v2811_v37 = vpop.eup %2810  ;;  %v3570_v29 = vmul.f32 0.5, %v3523_v21  ;;  %vm897_vm0 = vcmp.ge.f32.partialorder %v3544_v30, 0.0 }
 0x126   : > { %4726 = vst [vmem:[#allocation46_spill] sm:$0xff] %v3566_v10  ;;  %v1597_v26 = vadd.f32 -0.28449672, %v1533_v49  ;;  %v2003_v14 = vmul.f32 1.442695, %v1921_v54  ;;  %vm896_vm1 = vcmp.ge.f32.partialorder %v832_v13, 0.0  ;;  %2822 = vpow2.f32 %v1997_v3 }
 0x127   : > { %v1723_v56 = vadd.f32 0.2548296, %v1659_v16  ;;  %v1088_v24 = vmul.f32 0.3275911, %v1024_v12  ;;  %v1856_v11 = vsub.f32 0.0, %v1024_v12  ;;  %v3573_v31 = vpop.eup %2812  ;;  %v3576_v35 = vmul.f32 0.5, %v522_v4 }
 0x128   : > { %4727 = vst [vmem:[#allocation47_spill] sm:$0xff] %v3573_v31  ;;  %v1661_v63 = vmul.f32 %v3541_v60, %v1597_v26  ;;  %v1026_v6 = vand.u32 2147483647, %v834_v17  ;;  %2824 = vpow2.f32 %v1999_v38  ;;  %v3580_v21 = vsel %vm897_vm0, 1.0, %v4697_v57 }
 0x129   : > { %4728 = vst [vmem:[#allocation48_spill] sm:$0xff] %v3576_v35  ;;  %v1787_v55 = vmul.f32 %v3525_v9, %v1723_v56  ;;  %v1027_v30 = vand.u32 2147483647, %v835_v0  ;;  %v3583_v54 = vsel %vm896_vm1, 1.0, %v4697_v57  ;;  %v3585_v1 = vmul.f32 0.5, %v683_v15 }
 0x12a   : > { %v1725_v13 = vadd.f32 0.2548296, %v1661_v63  ;;  %4729 = vst [vmem:[#allocation49_spill] sm:$0xff] %v3583_v54  ;;  %v687_v49 = vadd.f32 %v686_v18, %v3283_v52  ;;  %2826 = vpow2.f32 %v2003_v14  ;;  %v1152_v4 = vadd.f32 1.0, %v1088_v24 }
 0x12b   : > { %4730 = vst [vmem:[#allocation50_spill] sm:$0xff] %v3585_v1  ;;  %v3588_v3 = vpop.eup %2814  ;;  %v1920_v16 = vmul.f32 %v1856_v11, %v1024_v12  ;;  %v1091_v9 = vmul.f32 0.3275911, %v1027_v30  ;;  %vm898_vm2 = vcmp.ge.f32.partialorder %v834_v17, 0.0  ;;  %v1090_v26 = vmul.f32 0.3275911, %v1026_v6 }
 0x12c   : > { %v1279_v38 = vmul.f32 1.0614054, %v3588_v3  ;;  %v3592_v56 = vadd.f32 %v527_v58, %v3283_v52  ;;  %v2107_v63 = vmul.f32 %v2809_v51, %v1787_v55  ;;  %v1858_v33 = vsub.f32 0.0, %v1026_v6 }
 0x12d   : > { %v3594_v10 = vmul.f32 0.5, %v526_v39  ;;  %v1155_v15 = vadd.f32 1.0, %v1091_v9  ;;  %v1789_v18 = vmul.f32 %v3541_v60, %v1725_v13  ;;  %v1859_v36 = vsub.f32 0.0, %v1027_v30 }
 0x12e   : > { %v1343_v2 = vadd.f32 -1.4531521, %v1279_v38  ;;  %v837_v14 = vmul.f32 0.70710677, %v687_v49  ;;  %v3597_v24 = vpop.eup %2816  ;;  %2828 = vrcp.f32 %v1152_v4  ;;  %v2001_v12 = vmul.f32 1.442695, %v1920_v16 }
 0x12f   : > { %4731 = vst [vmem:[#allocation51_spill] sm:$0xff] %v3597_v24  ;;  %v3600_v17 = vsel %vm898_vm2, 1.0, %v4697_v57  ;;  %vm899_vm3 = vcmp.ge.f32.partialorder %v835_v0, 0.0  ;;  %v1154_v39 = vadd.f32 1.0, %v1090_v26  ;;  %2830 = vrcp.f32 %v1155_v15 }
 0x130   : > { %4732 = vst [vmem:[#allocation52_spill] sm:$0xff] %v3600_v17  ;;  %v3602_v11 = vpop.eup %2818  ;;  %v1407_v51 = vmul.f32 %v3588_v3, %v1343_v2  ;;  %v3606_v55 = vmul.f32 0.70710677, %v3592_v56  ;;  %v2171_v58 = vsub.f32 1.0, %v2107_v63  ;;  %v1922_v4 = vmul.f32 %v1858_v33, %v1026_v6 }
 0x131   : > { %v3608_v60 = vpop.eup %2820  ;;  %v1281_v13 = vmul.f32 1.0614054, %v3602_v11  ;;  %v1029_v16 = vand.u32 2147483647, %v837_v14  ;;  %v2109_v9 = vmul.f32 %v2811_v37, %v1789_v18  ;;  %v3612_v0 = vsel %vm899_vm3, 1.0, %v4697_v57 }
 0x132   : > { %4733 = vst [vmem:[#allocation53_spill] sm:$0xff] %v3608_v60  ;;  %v1471_v38 = vadd.f32 1.4214138, %v1407_v51  ;;  %v1923_v61 = vmul.f32 %v1859_v36, %v1027_v30  ;;  %2832 = vpow2.f32 %v2001_v12  ;;  %v3615_v22 = vmul.f32 0.5, %v687_v49  ;;  %v531_v30 = vpop.f32.mrf.mxu0 }
 0x133   : > { %v1345_v25 = vadd.f32 -1.4531521, %v1281_v13  ;;  %v1093_v2 = vmul.f32 0.3275911, %v1029_v16  ;;  %v1861_v26 = vsub.f32 0.0, %v1029_v16  ;;  %2834 = vrcp.f32 %v1154_v39  ;;  %v3618_v33 = vpop.eup %2822 }
 0x134   : > { %v1535_v15 = vmul.f32 %v3588_v3, %v1471_v38  ;;  %v1028_v63 = vand.u32 2147483647, %v3606_v55  ;;  %4734 = vst [vmem:[#allocation54_spill] sm:$0xff] %v3618_v33  ;;  %v2235_v37 = vmul.f32 %v2171_v58, %v3514_v28  ;;  %v2005_v18 = vmul.f32 1.442695, %v1922_v4 }
 0x135   : > { %v1409_v6 = vmul.f32 %v3602_v11, %v1345_v25  ;;  %v1157_v36 = vadd.f32 1.0, %v1093_v2  ;;  %v2825_v12 = vpop.eup %2824  ;;  %v2173_v51 = vsub.f32 1.0, %v2109_v9  ;;  %v2007_v59 = vmul.f32 1.442695, %v1923_v61 }
 0x136   : > { %v1599_v13 = vadd.f32 -0.28449672, %v1535_v15  ;;  %v1925_v38 = vmul.f32 %v1861_v26, %v1029_v16  ;;  %v1860_v49 = vsub.f32 0.0, %v1028_v63  ;;  %v689_v24 = vadd.f32 %v688_v23, %v3283_v52  ;;  %v692_v52 = vpop.f32.mrf.mxu1 }
 0x137   : > { %v1473_v39 = vadd.f32 1.4214138, %v1409_v6  ;;  %2836 = vrcp.f32 %v1157_v36  ;;  %v2827_v27 = vpop.eup %2826  ;;  %vm901_vm4 = vcmp.ge.f32.partialorder %v837_v14, 0.0  ;;  %v1092_v28 = vmul.f32 0.3275911, %v1028_v63 }
 0x138   : > { %v1663_v33 = vmul.f32 %v3588_v3, %v1599_v13  ;;  %v532_v25 = vadd.f32 %v531_v30, %v3273_v47  ;;  %v2299_v58 = vadd.f32 1.0, %v2235_v37  ;;  %2838 = vpow2.f32 %v2005_v18 }
 0x139   : > { %v1537_v4 = vmul.f32 %v3602_v11, %v1473_v39  ;;  %v838_v9 = vmul.f32 0.70710677, %v689_v24  ;;  %v2237_v61 = vmul.f32 %v2173_v51, %v3517_v8  ;;  %2840 = vpow2.f32 %v2007_v59 }
 0x13a   : > { %v1727_v16 = vadd.f32 0.2548296, %v1663_v33  ;;  %v3628_v2 = vmul.f32 0.5, %v3592_v56  ;;  %v3631_v26 = vsel %vm901_vm4, 1.0, %v4697_v57  ;;  %v2011_v14 = vmul.f32 1.442695, %v1925_v38 }
 0x13b   : > { %v1601_v23 = vadd.f32 -0.28449672, %v1537_v4  ;;  %v1924_v15 = vmul.f32 %v1860_v49, %v1028_v63  ;;  %v3633_v6 = vpop.eup %2828  ;;  %vm900_vm5 = vcmp.ge.f32.partialorder %v3606_v55, 0.0  ;;  %v1156_v18 = vadd.f32 1.0, %v1092_v28 }
 0x13c   : > { %4735 = vst [vmem:[#allocation55_spill] sm:$0xff] %v3628_v2  ;;  %4736 = vst [vmem:[#allocation56_spill] sm:$0xff] %v3633_v6  ;;  %v1791_v37 = vmul.f32 %v3588_v3, %v1727_v16  ;;  %v3637_v8 = vmul.f32 0.70710677, %v532_v25  ;;  %v3639_v59 = vpop.eup %2830  ;;  %v3642_v56 = vmul.f32 %v2299_v58, %v3501_v62  ;;  %v1030_v36 = vand.u32 2147483647, %v838_v9 }
 0x13d   : > { %v1665_v33 = vmul.f32 %v3602_v11, %v1601_v23  ;;  %v693_v30 = vadd.f32 %v692_v52, %v3273_v47  ;;  %v3646_v63 = vadd.f32 1.0, %v2237_v61  ;;  %v1283_v3 = vmul.f32 1.0614054, %v3639_v59 }
 0x13e   : > { %4737 = vst [vmem:[#allocation57_spill] sm:$0xff] %v3642_v56  ;;  %v2111_v51 = vmul.f32 %v2825_v12, %v1791_v37  ;;  %v1031_v55 = vand.u32 2147483647, %v3637_v8  ;;  %2842 = vpow2.f32 %v2011_v14  ;;  %v3651_v38 = vsel %vm900_vm5, 1.0, %v4697_v57 }
 0x13f   : > { %4738 = vst [vmem:[#allocation58_spill] sm:$0xff] %v3646_v63  ;;  %v1729_v13 = vadd.f32 0.2548296, %v1665_v33  ;;  %4739 = vst [vmem:[#allocation59_spill] sm:$0xff] %v3651_v38  ;;  %v2009_v39 = vmul.f32 1.442695, %v1924_v15  ;;  %v3653_v62 = vpop.eup %2832  ;;  %2844 = vrcp.f32 %v1156_v18 }
 0x140   : > { %4740 = vst [vmem:[#allocation60_spill] sm:$0xff] %v3653_v62  ;;  %v1347_v49 = vadd.f32 -1.4531521, %v1283_v3  ;;  %v3655_v28 = vmul.f32 0.5, %v689_v24  ;;  %v1095_v58 = vmul.f32 0.3275911, %v1031_v55  ;;  %v3657_v4 = vpop.eup %2834 }
 0x141   : > { %4742 = vst [vmem:[#allocation62_spill] sm:$0xff] %v3657_v4  ;;  %v1793_v12 = vmul.f32 %v3602_v11, %v1729_v13  ;;  %vm902_vm6 = vcmp.ge.f32.partialorder %v838_v9, 0.0  ;;  %v1862_v61 = vsub.f32 0.0, %v1030_v36  ;;  %v841_v16 = vmul.f32 0.70710677, %v693_v30  ;;  %v533_v9 = vpop.f32.mrf.mxu0 }
 0x142   : > { %4741 = vst [vmem:[#allocation61_spill] sm:$0xff] %v3655_v28  ;;  %v2175_v52 = vsub.f32 1.0, %v2111_v51  ;;  %v1411_v23 = vmul.f32 %v3639_v59, %v1347_v49  ;;  %v1159_v14 = vadd.f32 1.0, %v1095_v58  ;;  %v1863_v37 = vsub.f32 0.0, %v1031_v55 }
 0x143   : > { %v2113_v15 = vmul.f32 %v2827_v27, %v1793_v12  ;;  %2846 = vpow2.f32 %v2009_v39  ;;  %v3661_v33 = vmul.f32 0.5, %v532_v25  ;;  %v1033_v18 = vand.u32 2147483647, %v841_v16  ;;  %v694_v27 = vpop.f32.mrf.mxu1 }
 0x144   : > { %v3663_v24 = vpop.eup %2836  ;;  %v1475_v3 = vadd.f32 1.4214138, %v1411_v23  ;;  %v3666_v56 = vsel %vm902_vm6, 1.0, %v4697_v57  ;;  %v1094_v11 = vmul.f32 0.3275911, %v1030_v36  ;;  %2848 = vrcp.f32 %v1159_v14 }
 0x145   : > { %4743 = vst [vmem:[#allocation63_spill] sm:$0xff] %v3666_v56  ;;  %v1285_v51 = vmul.f32 1.0614054, %v3663_v24  ;;  %v1926_v13 = vmul.f32 %v1862_v61, %v1030_v36  ;;  %v3669_v49 = vmul.f32 0.5, %v693_v30  ;;  %v1097_v58 = vmul.f32 0.3275911, %v1033_v18  ;;  %v3671_v39 = vpop.eup %2838 }
 0x146   : > { %4744 = vst [vmem:[#allocation64_spill] sm:$0xff] %v3671_v39  ;;  %v2239_v25 = vmul.f32 %v2175_v52, %v3559_v19  ;;  %v2177_v12 = vsub.f32 1.0, %v2113_v15  ;;  %v1539_v23 = vmul.f32 %v3639_v59, %v1475_v3  ;;  %v1927_v63 = vmul.f32 %v1863_v37, %v1031_v55  ;;  %v2841_v1 = vpop.eup %2840  ;;  %v537_v15 = vpop.f32.mrf.mxu0 }
 0x147   : > { %v1349_v7 = vadd.f32 -1.4531521, %v1285_v51  ;;  %v1161_v5 = vadd.f32 1.0, %v1097_v58  ;;  %v1865_v14 = vsub.f32 0.0, %v1033_v18  ;;  %v534_v53 = vadd.f32 %v533_v9, %v3273_v47 }
 0x148   : > { %v1603_v17 = vadd.f32 -0.28449672, %v1539_v23  ;;  %v1158_v36 = vadd.f32 1.0, %v1094_v11  ;;  %vm903_vm7 = vcmp.ge.f32.partialorder %v3637_v8, 0.0  ;;  %v695_v30 = vadd.f32 %v694_v27, %v3273_v47  ;;  %v698_v27 = vpop.f32.mrf.mxu1 }
 0x149   : > { %v1413_v61 = vmul.f32 %v3663_v24, %v1349_v7  ;;  %v2013_v35 = vmul.f32 1.442695, %v1926_v13  ;;  %vm905_vm8 = vcmp.ge.f32.partialorder %v841_v16, 0.0  ;;  %2850 = vrcp.f32 %v1161_v5 }
 0x14a   : > { %v2303_v19 = vadd.f32 1.0, %v2239_v25  ;;  %v1667_v55 = vmul.f32 %v3639_v59, %v1603_v17  ;;  %v2015_v52 = vmul.f32 1.442695, %v1927_v63  ;;  %v840_v37 = vmul.f32 0.70710677, %v534_v53 }
 0x14b   : > { %v2241_v3 = vmul.f32 %v2177_v12, %v3580_v21  ;;  %v1477_v9 = vadd.f32 1.4214138, %v1413_v61  ;;  %v1929_v51 = vmul.f32 %v1865_v14, %v1033_v18  ;;  %v842_v11 = vmul.f32 0.70710677, %v695_v30  ;;  %v2843_v58 = vpop.eup %2842 }
 0x14c   : > { %v1731_v23 = vadd.f32 0.2548296, %v1667_v55  ;;  %2852 = vrcp.f32 %v1158_v36  ;;  %v3684_v47 = vsel %vm903_vm7, 1.0, %v4697_v57  ;;  %v1032_v5 = vand.u32 2147483647, %v840_v37  ;;  %v3686_v7 = vpop.eup %2844 }
 0x14d   : > { %4745 = vst [vmem:[#allocation65_spill] sm:$0xff] %v3686_v7  ;;  %v1541_v17 = vmul.f32 %v3663_v24, %v1477_v9  ;;  %2854 = vpow2.f32 %v2013_v35  ;;  %v3691_v21 = vsel %vm905_vm8, 1.0, %v4697_v57  ;;  %v538_v63 = vadd.f32 %v537_v15, %v3279_v50 }
 0x14e   : > { %v3695_v18 = vmul.f32 %v2303_v19, %v3534_v32  ;;  %v1795_v13 = vmul.f32 %v3639_v59, %v1731_v23  ;;  %2856 = vpow2.f32 %v2015_v52  ;;  %v1034_v8 = vand.u32 2147483647, %v842_v11 }
 0x14f   : > { %v2305_v25 = vadd.f32 1.0, %v2241_v3  ;;  %v1605_v12 = vadd.f32 -0.28449672, %v1541_v17  ;;  %v2019_v14 = vmul.f32 1.442695, %v1929_v51  ;;  %v3698_v36 = vmul.f32 0.5, %v534_v53 }
 0x150   : > { %4746 = vst [vmem:[#allocation66_spill] sm:$0xff] %v3695_v18  ;;  %v3700_v35 = vpop.eup %2846  ;;  %vm904_vm9 = vcmp.ge.f32.partialorder %v840_v37, 0.0  ;;  %v1096_v16 = vmul.f32 0.3275911, %v1032_v5  ;;  %v3702_v61 = vmul.f32 0.5, %v695_v30  ;;  %vm906_vm10 = vcmp.ge.f32.partialorder %v842_v11, 0.0 }
 0x151   : > { %4747 = vst [vmem:[#allocation67_spill] sm:$0xff] %v3698_v36  ;;  %4748 = vst [vmem:[#allocation68_spill] sm:$0xff] %v3700_v35  ;;  %v3704_v55 = vpop.eup %2848  ;;  %v1669_v32 = vmul.f32 %v3663_v24, %v1605_v12  ;;  %v1864_v59 = vsub.f32 0.0, %v1032_v5  ;;  %v3707_v19 = vmul.f32 0.70710677, %v538_v63  ;;  %v699_v52 = vadd.f32 %v698_v27, %v3279_v50 }
 0x152   : > { %4749 = vst [vmem:[#allocation69_spill] sm:$0xff] %v3702_v61  ;;  %v2115_v15 = vmul.f32 %v2841_v1, %v1795_v13  ;;  %v1287_v53 = vmul.f32 1.0614054, %v3704_v55  ;;  %v1098_v3 = vmul.f32 0.3275911, %v1034_v8  ;;  %v1866_v9 = vsub.f32 0.0, %v1034_v8 }
 0x153   : > { %v3712_v51 = vmul.f32 %v2305_v25, %v3570_v29  ;;  %v1733_v30 = vadd.f32 0.2548296, %v1669_v32  ;;  %2858 = vpow2.f32 %v2019_v14  ;;  %v3714_v23 = vmul.f32 0.5, %v538_v63 }
 0x154   : > { %v1351_v17 = vadd.f32 -1.4531521, %v1287_v53  ;;  %v3718_v12 = vsel %vm904_vm9, 1.0, %v4697_v57  ;;  %v1160_v18 = vadd.f32 1.0, %v1096_v16  ;;  %v3722_v1 = vsel %vm906_vm10, 1.0, %v4697_v57 }
 0x155   : > { %4750 = vst [vmem:[#allocation70_spill] sm:$0xff] %v3712_v51  ;;  %4751 = vst [vmem:[#allocation71_spill] sm:$0xff] %v3718_v12  ;;  %v1797_v13 = vmul.f32 %v3663_v24, %v1733_v30  ;;  %v1928_v27 = vmul.f32 %v1864_v59, %v1032_v5  ;;  %v1035_v29 = vand.u32 2147483647, %v3707_v19  ;;  %v3726_v25 = vmul.f32 0.70710677, %v699_v52  ;;  %v539_v51 = vpop.f32.mrf.mxu0  ;;  %v700_v30 = vpop.f32.mrf.mxu1 }
 0x156   : > { %4752 = vst [vmem:[#allocation72_spill] sm:$0xff] %v3722_v1  ;;  %v3728_v14 = vpop.eup %2850  ;;  %v2179_v63 = vsub.f32 1.0, %v2115_v15  ;;  %v1415_v32 = vmul.f32 %v3704_v55, %v1351_v17  ;;  %v1162_v37 = vadd.f32 1.0, %v1098_v3  ;;  %v1930_v53 = vmul.f32 %v1866_v9, %v1034_v8 }
 0x157   : > { %v2117_v16 = vmul.f32 %v2843_v58, %v1797_v13  ;;  %v1289_v11 = vmul.f32 1.0614054, %v3728_v14  ;;  %v1099_v28 = vmul.f32 0.3275911, %v1035_v29  ;;  %v3732_v2 = vmul.f32 0.5, %v699_v52 }
 0x158   : > { %v1479_v24 = vadd.f32 1.4214138, %v1415_v32  ;;  %2860 = vrcp.f32 %v1160_v18  ;;  %v1867_v5 = vsub.f32 0.0, %v1035_v29  ;;  %v1037_v59 = vand.u32 2147483647, %v3726_v25 }
 0x159   : > { %v3735_v39 = vpop.eup %2852  ;;  %v1353_v15 = vadd.f32 -1.4531521, %v1289_v11  ;;  %v2017_v54 = vmul.f32 1.442695, %v1928_v27  ;;  %v1163_v17 = vadd.f32 1.0, %v1099_v28  ;;  %v540_v8 = vadd.f32 %v539_v51, %v3279_v50 }
 0x15a   : > { %4753 = vst [vmem:[#allocation73_spill] sm:$0xff] %v3735_v39  ;;  %v3738_v3 = vpop.eup %2854  ;;  %v2243_v58 = vmul.f32 %v2179_v63, %v3612_v0  ;;  %v1543_v52 = vmul.f32 %v3704_v55, %v1479_v24  ;;  %2862 = vrcp.f32 %v1162_v37  ;;  %v1101_v9 = vmul.f32 0.3275911, %v1037_v59  ;;  %v543_v37 = vpop.f32.mrf.mxu0 }
 0x15b   : > { %4754 = vst [vmem:[#allocation74_spill] sm:$0xff] %v3738_v3  ;;  %v2857_v18 = vpop.eup %2856  ;;  %v2181_v13 = vsub.f32 1.0, %v2117_v16  ;;  %v1417_v32 = vmul.f32 %v3728_v14, %v1353_v15  ;;  %2864 = vrcp.f32 %v1163_v17  ;;  %v701_v56 = vadd.f32 %v700_v30, %v3279_v50 }
 0x15c   : > { %v1607_v11 = vadd.f32 -0.28449672, %v1543_v52  ;;  %v1931_v27 = vmul.f32 %v1867_v5, %v1035_v29  ;;  %v1165_v28 = vadd.f32 1.0, %v1101_v9  ;;  %v1869_v20 = vsub.f32 0.0, %v1037_v59 }
 0x15d   : > { %v1481_v51 = vadd.f32 1.4214138, %v1417_v32  ;;  %2866 = vpow2.f32 %v2017_v54  ;;  %v2021_v38 = vmul.f32 1.442695, %v1930_v53  ;;  %v844_v61 = vmul.f32 0.70710677, %v540_v8  ;;  %v704_v32 = vpop.f32.mrf.mxu1 }
 0x15e   : > { %v2307_v0 = vadd.f32 1.0, %v2243_v58  ;;  %v1671_v63 = vmul.f32 %v3704_v55, %v1607_v11  ;;  %vm907_vm11 = vcmp.ge.f32.partialorder %v3707_v19, 0.0  ;;  %2868 = vrcp.f32 %v1165_v28 }
 0x15f   : > { %v2245_v16 = vmul.f32 %v2181_v13, %v3631_v26  ;;  %v1545_v24 = vmul.f32 %v3728_v14, %v1481_v51  ;;  %vm909_vm12 = vcmp.ge.f32.partialorder %v3726_v25, 0.0  ;;  %v1036_v50 = vand.u32 2147483647, %v844_v61 }
 0x160   : > { %v2859_v29 = vpop.eup %2858  ;;  %v1735_v5 = vadd.f32 0.2548296, %v1671_v63  ;;  %v2023_v30 = vmul.f32 1.442695, %v1931_v27  ;;  %v1933_v54 = vmul.f32 %v1869_v20, %v1037_v59  ;;  %v846_v53 = vmul.f32 0.70710677, %v701_v56 }
 0x161   : > { %v1609_v15 = vadd.f32 -0.28449672, %v1545_v24  ;;  %2870 = vpow2.f32 %v2021_v38  ;;  %v3750_v17 = vsel %vm907_vm11, 1.0, %v4697_v57  ;;  %v544_v19 = vadd.f32 %v543_v37, %v3269_v45 }
 0x162   : > { %v3754_v58 = vmul.f32 %v2307_v0, %v3594_v10  ;;  %v1799_v26 = vmul.f32 %v3704_v55, %v1735_v5  ;;  %v1100_v52 = vmul.f32 0.3275911, %v1036_v50  ;;  %v1868_v9 = vsub.f32 0.0, %v1036_v50 }
 0x163   : > { %v1673_v13 = vmul.f32 %v3728_v14, %v1609_v15  ;;  %v3761_v20 = vsel %vm909_vm12, 1.0, %v4697_v57  ;;  %v3763_v38 = vmul.f32 0.5, %v540_v8  ;;  %v1038_v59 = vand.u32 2147483647, %v846_v53 }
 0x164   : > { %4755 = vst [vmem:[#allocation75_spill] sm:$0xff] %v3754_v58  ;;  %v2309_v11 = vadd.f32 1.0, %v2245_v16  ;;  %2872 = vpow2.f32 %v2023_v30  ;;  %v2027_v27 = vmul.f32 1.442695, %v1933_v54  ;;  %v3765_v10 = vmul.f32 0.5, %v701_v56 }
 0x165   : > { %4756 = vst [vmem:[#allocation76_spill] sm:$0xff] %v3763_v38  ;;  %v3767_v28 = vpop.eup %2860  ;;  %v1737_v55 = vadd.f32 0.2548296, %v1673_v13  ;;  %vm908_vm13 = vcmp.ge.f32.partialorder %v844_v61, 0.0  ;;  %vm910_vm14 = vcmp.ge.f32.partialorder %v846_v53, 0.0  ;;  %v2119_v0 = vmul.f32 %v2857_v18, %v1799_v26  ;;  %v545_v26 = vpop.f32.mrf.mxu0 }
 0x166   : > { %4757 = vst [vmem:[#allocation77_spill] sm:$0xff] %v3765_v10  ;;  %4758 = vst [vmem:[#allocation78_spill] sm:$0xff] %v3767_v28  ;;  %v3769_v51 = vmul.f32 0.70710677, %v544_v19  ;;  %v1164_v25 = vadd.f32 1.0, %v1100_v52  ;;  %v1932_v63 = vmul.f32 %v1868_v9, %v1036_v50  ;;  %v705_v8 = vadd.f32 %v704_v32, %v3269_v45 }
 0x167   : > { %v3772_v37 = vpop.eup %2862  ;;  %v1801_v16 = vmul.f32 %v3728_v14, %v1737_v55  ;;  %v1102_v24 = vmul.f32 0.3275911, %v1038_v59  ;;  %v1870_v5 = vsub.f32 0.0, %v1038_v59  ;;  %v3779_v61 = vmul.f32 %v2309_v11, %v3615_v22 }
 0x168   : > { %4759 = vst [vmem:[#allocation79_spill] sm:$0xff] %v3772_v37  ;;  %v1039_v56 = vand.u32 2147483647, %v3769_v51  ;;  %v3776_v30 = vpop.eup %2864  ;;  %2874 = vpow2.f32 %v2027_v27  ;;  %v3782_v18 = vsel %vm908_vm13, 1.0, %v4697_v57  ;;  %v3785_v50 = vsel %vm910_vm14, 1.0, %v4697_v57 }
 0x169   : > { %4760 = vst [vmem:[#allocation80_spill] sm:$0xff] %v3779_v61  ;;  %4761 = vst [vmem:[#allocation81_spill] sm:$0xff] %v3782_v18  ;;  %v2121_v54 = vmul.f32 %v2859_v29, %v1801_v16  ;;  %v1291_v53 = vmul.f32 1.0614054, %v3776_v30  ;;  %v3788_v14 = vmul.f32 0.5, %v544_v19  ;;  %v2183_v9 = vsub.f32 1.0, %v2119_v0 }
 0x16a   : > { %4762 = vst [vmem:[#allocation82_spill] sm:$0xff] %v3785_v50  ;;  %v1103_v15 = vmul.f32 0.3275911, %v1039_v56  ;;  %v3790_v52 = vpop.eup %2866  ;;  %2876 = vrcp.f32 %v1164_v25  ;;  %v2025_v22 = vmul.f32 1.442695, %v1932_v63  ;;  %v1166_v27 = vadd.f32 1.0, %v1102_v24  ;;  %v706_v24 = vpop.f32.mrf.mxu1 }
 0x16b   : > { %4763 = vst [vmem:[#allocation83_spill] sm:$0xff] %v3790_v52  ;;  %v849_v13 = vmul.f32 0.70710677, %v705_v8  ;;  %v3792_v32 = vpop.eup %2868  ;;  %v1355_v11 = vadd.f32 -1.4531521, %v1291_v53  ;;  %v1934_v55 = vmul.f32 %v1870_v5, %v1038_v59  ;;  %v1871_v16 = vsub.f32 0.0, %v1039_v56 }
 0x16c   : > { %v1167_v61 = vadd.f32 1.0, %v1103_v15  ;;  %v1293_v29 = vmul.f32 1.0614054, %v3792_v32  ;;  %v546_v19 = vadd.f32 %v545_v26, %v3269_v45  ;;  %v2185_v62 = vsub.f32 1.0, %v2121_v54  ;;  %v549_v26 = vpop.f32.mrf.mxu0 }
 0x16d   : > { %v1041_v58 = vand.u32 2147483647, %v849_v13  ;;  %v1419_v3 = vmul.f32 %v3776_v30, %v1355_v11  ;;  %v3797_v0 = vmul.f32 0.5, %v705_v8  ;;  %v2247_v63 = vmul.f32 %v2183_v9, %v3684_v47 }
 0x16e   : > { %2878 = vrcp.f32 %v1167_v61  ;;  %v3799_v25 = vpop.eup %2870  ;;  %v1357_v53 = vadd.f32 -1.4531521, %v1293_v29  ;;  %vm911_vm15 = vcmp.ge.f32.partialorder %v3769_v51, 0.0  ;;  %v1935_v11 = vmul.f32 %v1871_v16, %v1039_v56 }
 0x16f   : > { %4764 = vst [vmem:[#allocation84_spill] sm:$0xff] %v3799_v25  ;;  %2880 = vpow2.f32 %v2025_v22  ;;  %v1105_v59 = vmul.f32 0.3275911, %v1041_v58  ;;  %v1483_v5 = vadd.f32 1.4214138, %v1419_v3  ;;  %v1873_v15 = vsub.f32 0.0, %v1041_v58 }
 0x170   : > { %2882 = vrcp.f32 %v1166_v27  ;;  %v1421_v54 = vmul.f32 %v3792_v32, %v1357_v53  ;;  %v848_v8 = vmul.f32 0.70710677, %v546_v19  ;;  %v2249_v34 = vmul.f32 %v2185_v62, %v3691_v21 }
 0x171   : > { %v1169_v61 = vadd.f32 1.0, %v1105_v59  ;;  %v2873_v35 = vpop.eup %2872  ;;  %v1547_v47 = vmul.f32 %v3776_v30, %v1483_v5  ;;  %v2029_v9 = vmul.f32 1.442695, %v1934_v55  ;;  %v707_v22 = vadd.f32 %v706_v24, %v3269_v45 }
 0x172   : > { %v2311_v29 = vadd.f32 1.0, %v2247_v63  ;;  %v1485_v3 = vadd.f32 1.4214138, %v1421_v54  ;;  %v3808_v27 = vadd.f32 %v549_v26, %v3275_v48  ;;  %v3813_v56 = vsel %vm911_vm15, 1.0, %v4697_v57 }
 0x173   : > { %2884 = vrcp.f32 %v1169_v61  ;;  %v1611_v60 = vadd.f32 -0.28449672, %v1547_v47  ;;  %v1937_v16 = vmul.f32 %v1873_v15, %v1041_v58  ;;  %v1040_v53 = vand.u32 2147483647, %v848_v8 }
 0x174   : > { %v1549_v62 = vmul.f32 %v3792_v32, %v1485_v3  ;;  %v2031_v21 = vmul.f32 1.442695, %v1935_v11  ;;  %vm913_vm0 = vcmp.ge.f32.partialorder %v849_v13, 0.0  ;;  %v850_v55 = vmul.f32 0.70710677, %v707_v22 }
 0x175   : > { %v2875_v45 = vpop.eup %2874  ;;  %v2313_v63 = vadd.f32 1.0, %v2249_v34  ;;  %v1675_v59 = vmul.f32 %v3776_v30, %v1611_v60  ;;  %2886 = vpow2.f32 %v2029_v9  ;;  %v1104_v24 = vmul.f32 0.3275911, %v1040_v53  ;;  %v710_v34 = vpop.f32.mrf.mxu1 }
 0x176   : > { %v3818_v5 = vmul.f32 %v2311_v29, %v3661_v33  ;;  %v1613_v26 = vadd.f32 -0.28449672, %v1549_v62  ;;  %vm912_vm1 = vcmp.ge.f32.partialorder %v848_v8, 0.0  ;;  %v851_v51 = vmul.f32 0.70710677, %v3808_v27 }
 0x177   : > { %v3821_v58 = vpop.eup %2876  ;;  %v1739_v15 = vadd.f32 0.2548296, %v1675_v59  ;;  %v3824_v54 = vsel %vm913_vm0, 1.0, %v4697_v57  ;;  %v2035_v13 = vmul.f32 1.442695, %v1937_v16  ;;  %v1872_v11 = vsub.f32 0.0, %v1040_v53 }
 0x178   : > { %4765 = vst [vmem:[#allocation85_spill] sm:$0xff] %v3818_v5  ;;  %4766 = vst [vmem:[#allocation86_spill] sm:$0xff] %v3821_v58  ;;  %v1677_v60 = vmul.f32 %v3792_v32, %v1613_v26  ;;  %2888 = vpow2.f32 %v2031_v21  ;;  %v3827_v61 = vmul.f32 0.5, %v546_v19  ;;  %v1042_v33 = vand.u32 2147483647, %v850_v55 }
 0x179   : > { %v3830_v47 = vmul.f32 %v2313_v63, %v3669_v49  ;;  %v1803_v8 = vmul.f32 %v3776_v30, %v1739_v15  ;;  %v3834_v9 = vsel %vm912_vm1, 1.0, %v4697_v57  ;;  %v1168_v29 = vadd.f32 1.0, %v1104_v24  ;;  %v551_v30 = vpop.f32.mrf.mxu0 }
 0x17a   : > { %4767 = vst [vmem:[#allocation87_spill] sm:$0xff] %v3827_v61  ;;  %4769 = vst [vmem:[#allocation89_spill] sm:$0xff] %v3834_v9  ;;  %v1741_v16 = vadd.f32 0.2548296, %v1677_v60  ;;  %v3838_v62 = vmul.f32 0.5, %v707_v22  ;;  %v711_v21 = vadd.f32 %v710_v34, %v3275_v48  ;;  %2890 = vpow2.f32 %v2035_v13 }
 0x17b   : > { %4768 = vst [vmem:[#allocation88_spill] sm:$0xff] %v3830_v47  ;;  %v3836_v3 = vpop.eup %2878  ;;  %v1043_v59 = vand.u32 2147483647, %v851_v51  ;;  %v2123_v26 = vmul.f32 %v2873_v35, %v1803_v8  ;;  %v1936_v63 = vmul.f32 %v1872_v11, %v1040_v53  ;;  %vm914_vm2 = vcmp.ge.f32.partialorder %v850_v55, 0.0  ;;  %v712_v55 = vpop.f32.mrf.mxu1 }
 0x17c   : > { %4770 = vst [vmem:[#allocation90_spill] sm:$0xff] %v3838_v62  ;;  %v3841_v19 = vpop.eup %2880  ;;  %v1295_v49 = vmul.f32 1.0614054, %v3836_v3  ;;  %v1805_v24 = vmul.f32 %v3792_v32, %v1741_v16  ;;  %v1106_v47 = vmul.f32 0.3275911, %v1042_v33  ;;  %2892 = vrcp.f32 %v1168_v29 }
 0x17d   : > { %4771 = vst [vmem:[#allocation91_spill] sm:$0xff] %v3841_v19  ;;  %v3844_v15 = vpop.eup %2882  ;;  %v1107_v60 = vmul.f32 0.3275911, %v1043_v59  ;;  %v1874_v5 = vsub.f32 0.0, %v1042_v33  ;;  %vm915_vm3 = vcmp.ge.f32.partialorder %v851_v51, 0.0  ;;  %v552_v35 = vadd.f32 %v551_v30, %v3275_v48 }
 0x17e   : > { %4772 = vst [vmem:[#allocation92_spill] sm:$0xff] %v3844_v15  ;;  %v1359_v22 = vadd.f32 -1.4531521, %v1295_v49  ;;  %v2125_v34 = vmul.f32 %v2875_v45, %v1805_v24  ;;  %v853_v1 = vmul.f32 0.70710677, %v711_v21  ;;  %v2187_v53 = vsub.f32 1.0, %v2123_v26 }
 0x17f   : > { %v1171_v31 = vadd.f32 1.0, %v1107_v60  ;;  %v2033_v11 = vmul.f32 1.442695, %v1936_v63  ;;  %v1875_v36 = vsub.f32 0.0, %v1043_v59  ;;  %v3854_v16 = vsel %vm914_vm2, 1.0, %v4697_v57 }
 0x180   : > { %v3848_v8 = vpop.eup %2884  ;;  %v1423_v13 = vmul.f32 %v3836_v3, %v1359_v22  ;;  %4773 = vst [vmem:[#allocation93_spill] sm:$0xff] %v3854_v16  ;;  %v3857_v29 = vmul.f32 0.5, %v3808_v27  ;;  %v2189_v45 = vsub.f32 1.0, %v2125_v34  ;;  %v1170_v30 = vadd.f32 1.0, %v1106_v47 }
 0x181   : > { %v1297_v32 = vmul.f32 1.0614054, %v3848_v8  ;;  %2894 = vrcp.f32 %v1171_v31  ;;  %v3861_v26 = vsel %vm915_vm3, 1.0, %v4697_v57  ;;  %v1938_v60 = vmul.f32 %v1874_v5, %v1042_v33 }
 0x182   : > { %v1487_v49 = vadd.f32 1.4214138, %v1423_v13  ;;  %v3863_v24 = vpop.eup %2886  ;;  %v1045_v22 = vand.u32 2147483647, %v853_v1  ;;  %v852_v10 = vmul.f32 0.70710677, %v552_v35  ;;  %v2251_v38 = vmul.f32 %v2187_v53, %v3750_v17 }
 0x183   : > { %4774 = vst [vmem:[#allocation94_spill] sm:$0xff] %v3863_v24  ;;  %v1361_v63 = vadd.f32 -1.4531521, %v1297_v32  ;;  %2896 = vpow2.f32 %v2033_v11  ;;  %v1939_v31 = vmul.f32 %v1875_v36, %v1043_v59  ;;  %v3868_v47 = vmul.f32 0.5, %v711_v21 }
 0x184   : > { %v1551_v27 = vmul.f32 %v3836_v3, %v1487_v49  ;;  %v1109_v51 = vmul.f32 0.3275911, %v1045_v22  ;;  %v1877_v13 = vsub.f32 0.0, %v1045_v22  ;;  %2898 = vrcp.f32 %v1170_v30  ;;  %v555_v49 = vpop.f32.mrf.mxu0 }
 0x185   : > { %v1425_v34 = vmul.f32 %v3848_v8, %v1361_v63  ;;  %v2889_v25 = vpop.eup %2888  ;;  %v1044_v32 = vand.u32 2147483647, %v852_v10  ;;  %v713_v5 = vadd.f32 %v712_v55, %v3275_v48  ;;  %v2253_v33 = vmul.f32 %v2189_v45, %v3761_v20 }
 0x186   : > { %v1615_v12 = vadd.f32 -0.28449672, %v1551_v27  ;;  %v2037_v17 = vmul.f32 1.442695, %v1938_v60  ;;  %v1173_v53 = vadd.f32 1.0, %v1109_v51  ;;  %v2315_v11 = vadd.f32 1.0, %v2251_v38 }
 0x187   : > { %v1489_v50 = vadd.f32 1.4214138, %v1425_v34  ;;  %v2039_v59 = vmul.f32 1.442695, %v1939_v31  ;;  %vm917_vm4 = vcmp.ge.f32.partialorder %v853_v1, 0.0  ;;  %v2891_v21 = vpop.eup %2890  ;;  %v1941_v27 = vmul.f32 %v1877_v13, %v1045_v22  ;;  %v716_v22 = vpop.f32.mrf.mxu1 }
 0x188   : > { %v1679_v36 = vmul.f32 %v3836_v3, %v1615_v12  ;;  %2900 = vrcp.f32 %v1173_v53  ;;  %v1876_v30 = vsub.f32 0.0, %v1044_v32  ;;  %v1108_v52 = vmul.f32 0.3275911, %v1044_v32 }
 0x189   : > { %v1553_v63 = vmul.f32 %v3848_v8, %v1489_v50  ;;  %v854_v48 = vmul.f32 0.70710677, %v713_v5  ;;  %v556_v20 = vadd.f32 %v555_v49, %v3265_v43  ;;  %v3875_v45 = vpop.eup %2892  ;;  %v2317_v60 = vadd.f32 1.0, %v2253_v33 }
 0x18a   : > { %v1743_v18 = vadd.f32 0.2548296, %v1679_v36  ;;  %4775 = vst [vmem:[#allocation95_spill] sm:$0xff] %v3875_v45  ;;  %2902 = vpow2.f32 %v2037_v17  ;;  %v3878_v12 = vsel %vm917_vm4, 1.0, %v4697_v57  ;;  %v3881_v1 = vmul.f32 %v2315_v11, %v3714_v23 }
 0x18b   : > { %v1617_v55 = vadd.f32 -0.28449672, %v1553_v63  ;;  %2904 = vpow2.f32 %v2039_v59  ;;  %v3884_v50 = vmul.f32 0.5, %v552_v35  ;;  %v2043_v34 = vmul.f32 1.442695, %v1941_v27  ;;  %v557_v59 = vpop.f32.mrf.mxu0 }
 0x18c   : > { %4776 = vst [vmem:[#allocation96_spill] sm:$0xff] %v3881_v1  ;;  %v1807_v38 = vmul.f32 %v3836_v3, %v1743_v18  ;;  %vm916_vm5 = vcmp.ge.f32.partialorder %v852_v10, 0.0  ;;  %v1940_v51 = vmul.f32 %v1876_v30, %v1044_v32  ;;  %v1172_v33 = vadd.f32 1.0, %v1108_v52 }
 0x18d   : > { %4777 = vst [vmem:[#allocation97_spill] sm:$0xff] %v3884_v50  ;;  %v1681_v31 = vmul.f32 %v3848_v8, %v1617_v55  ;;  %v3889_v17 = vmul.f32 0.5, %v713_v5  ;;  %v1046_v53 = vand.u32 2147483647, %v854_v48  ;;  %v3891_v49 = vmul.f32 0.70710677, %v556_v20  ;;  %v561_v62 = vpop.f32.mrf.mxu0 }
 0x18e   : > { %v3887_v13 = vpop.eup %2894  ;;  %v3894_v23 = vmul.f32 %v2317_v60, %v3732_v2  ;;  %v717_v35 = vadd.f32 %v716_v22, %v3265_v43  ;;  %v2127_v11 = vmul.f32 %v2889_v25, %v1807_v38  ;;  %v3899_v10 = vsel %vm916_vm5, 1.0, %v4697_v57 }
 0x18f   : > { %4778 = vst [vmem:[#allocation98_spill] sm:$0xff] %v3889_v17  ;;  %v1745_v18 = vadd.f32 0.2548296, %v1681_v31  ;;  %v1299_v3 = vmul.f32 1.0614054, %v3887_v13  ;;  %4780 = vst [vmem:[#allocation100_spill] sm:$0xff] %v3899_v10  ;;  %2906 = vpow2.f32 %v2043_v34  ;;  %v3914_v34 = vadd.f32 %v557_v59, %v3265_v43 }
 0x190   : > { %4779 = vst [vmem:[#allocation99_spill] sm:$0xff] %v3894_v23  ;;  %vm918_vm6 = vcmp.ge.f32.partialorder %v854_v48, 0.0  ;;  %v1047_v52 = vand.u32 2147483647, %v3891_v49  ;;  %v3902_v32 = vpop.eup %2896  ;;  %v2041_v2 = vmul.f32 1.442695, %v1940_v51  ;;  %2908 = vrcp.f32 %v1172_v33 }
 0x191   : > { %4781 = vst [vmem:[#allocation101_spill] sm:$0xff] %v3902_v32  ;;  %v1809_v5 = vmul.f32 %v3848_v8, %v1745_v18  ;;  %v1363_v36 = vadd.f32 -1.4531521, %v1299_v3  ;;  %v1110_v63 = vmul.f32 0.3275911, %v1046_v53  ;;  %v1878_v27 = vsub.f32 0.0, %v1046_v53  ;;  %v3905_v60 = vpop.eup %2898 }
 0x192   : > { %v1111_v30 = vmul.f32 0.3275911, %v1047_v52  ;;  %4782 = vst [vmem:[#allocation102_spill] sm:$0xff] %v3905_v60  ;;  %v3909_v48 = vsel %vm918_vm6, 1.0, %v4697_v57  ;;  %v3911_v38 = vmul.f32 0.70710677, %v717_v35  ;;  %2910 = vpow2.f32 %v2041_v2 }
 0x193   : > { %v2129_v25 = vmul.f32 %v2891_v21, %v1809_v5  ;;  %v1427_v55 = vmul.f32 %v3887_v13, %v1363_v36  ;;  %4783 = vst [vmem:[#allocation103_spill] sm:$0xff] %v3909_v48  ;;  %v2191_v22 = vsub.f32 1.0, %v2127_v11  ;;  %v1879_v31 = vsub.f32 0.0, %v1047_v52 }
 0x194   : > { %v1175_v8 = vadd.f32 1.0, %v1111_v30  ;;  %v3916_v33 = vmul.f32 0.5, %v556_v20  ;;  %v1049_v18 = vand.u32 2147483647, %v3911_v38  ;;  %v1174_v5 = vadd.f32 1.0, %v1110_v63  ;;  %v718_v30 = vpop.f32.mrf.mxu1 }
 0x195   : > { %v1491_v51 = vadd.f32 1.4214138, %v1427_v55  ;;  %v3919_v21 = vpop.eup %2900  ;;  %v2193_v3 = vsub.f32 1.0, %v2129_v25  ;;  %v1942_v36 = vmul.f32 %v1878_v27, %v1046_v53  ;;  %vm919_vm7 = vcmp.ge.f32.partialorder %v3891_v49, 0.0 }
 0x196   : > { %2912 = vrcp.f32 %v1175_v8  ;;  %v1301_v11 = vmul.f32 1.0614054, %v3919_v21  ;;  %v1113_v59 = vmul.f32 0.3275911, %v1049_v18  ;;  %v2255_v20 = vmul.f32 %v2191_v22, %v3813_v56 }
 0x197   : > { %v1555_v23 = vmul.f32 %v3887_v13, %v1491_v51  ;;  %v3924_v55 = vpop.eup %2902  ;;  %v1943_v2 = vmul.f32 %v1879_v31, %v1047_v52  ;;  %v1881_v1 = vsub.f32 0.0, %v1049_v18  ;;  %v856_v24 = vmul.f32 0.70710677, %v3914_v34 }
 0x198   : > { %4784 = vst [vmem:[#allocation104_spill] sm:$0xff] %v3924_v55  ;;  %v2905_v25 = vpop.eup %2904  ;;  %v1365_v53 = vadd.f32 -1.4531521, %v1301_v11  ;;  %v3928_v27 = vmul.f32 0.5, %v717_v35  ;;  %v1177_v8 = vadd.f32 1.0, %v1113_v59  ;;  %v2257_v51 = vmul.f32 %v2193_v3, %v3824_v54 }
 0x199   : > { %v1619_v63 = vadd.f32 -0.28449672, %v1555_v23  ;;  %2914 = vrcp.f32 %v1174_v5  ;;  %v1048_v19 = vand.u32 2147483647, %v856_v24  ;;  %v719_v4 = vadd.f32 %v718_v30, %v3265_v43 }
 0x19a   : > { %v1429_v56 = vmul.f32 %v3919_v21, %v1365_v53  ;;  %v2045_v52 = vmul.f32 1.442695, %v1942_v36  ;;  %2916 = vrcp.f32 %v1177_v8  ;;  %v2319_v22 = vadd.f32 1.0, %v2255_v20  ;;  %v722_v8 = vpop.f32.mrf.mxu1 }
 0x19b   : > { %v1683_v6 = vmul.f32 %v3887_v13, %v1619_v63  ;;  %v3937_v23 = vsel %vm919_vm7, 1.0, %v4697_v57  ;;  %v2047_v35 = vmul.f32 1.442695, %v1943_v2  ;;  %v1945_v31 = vmul.f32 %v1881_v1, %v1049_v18 }
 0x19c   : > { %v1493_v3 = vadd.f32 1.4214138, %v1429_v56  ;;  %v1112_v5 = vmul.f32 0.3275911, %v1048_v19  ;;  %v562_v43 = vadd.f32 %v561_v62, %v3271_v46  ;;  %v3940_v11 = vpop.eup %2906  ;;  %v2321_v59 = vadd.f32 1.0, %v2257_v51 }
 0x19d   : > { %v1747_v54 = vadd.f32 0.2548296, %v1683_v6  ;;  %vm921_vm8 = vcmp.ge.f32.partialorder %v3911_v38, 0.0  ;;  %v1880_v36 = vsub.f32 0.0, %v1048_v19  ;;  %v858_v30 = vmul.f32 0.70710677, %v719_v4  ;;  %v3943_v20 = vpop.eup %2908 }
 0x19e   : > { %4785 = vst [vmem:[#allocation105_spill] sm:$0xff] %v3943_v20  ;;  %v1557_v63 = vmul.f32 %v3919_v21, %v1493_v3  ;;  %vm920_vm9 = vcmp.ge.f32.partialorder %v856_v24, 0.0  ;;  %v859_v1 = vmul.f32 0.70710677, %v562_v43  ;;  %v3948_v6 = vmul.f32 %v2319_v22, %v3788_v14 }
 0x19f   : > { %v1811_v49 = vmul.f32 %v3887_v13, %v1747_v54  ;;  %2918 = vpow2.f32 %v2045_v52  ;;  %v2051_v62 = vmul.f32 1.442695, %v1945_v31  ;;  %v1050_v18 = vand.u32 2147483647, %v858_v30  ;;  %v3953_v51 = vpop.eup %2910 }
 0x1a0   : > { %4786 = vst [vmem:[#allocation106_spill] sm:$0xff] %v3948_v6  ;;  %v1621_v2 = vadd.f32 -0.28449672, %v1557_v63  ;;  %2920 = vpow2.f32 %v2047_v35  ;;  %v3951_v38 = vsel %vm921_vm8, 1.0, %v4697_v57  ;;  %v1176_v53 = vadd.f32 1.0, %v1112_v5  ;;  %4787 = vst [vmem:[#allocation107_spill] sm:$0xff] %v3953_v51 }
 0x1a1   : > { %v3956_v13 = vmul.f32 %v2321_v59, %v3797_v0  ;;  %v3959_v24 = vmul.f32 0.5, %v3914_v34  ;;  %v3962_v14 = vsel %vm920_vm9, 1.0, %v4697_v57  ;;  %v1944_v56 = vmul.f32 %v1880_v36, %v1048_v19  ;;  %v563_v34 = vpop.f32.mrf.mxu0 }
 0x1a2   : > { %4790 = vst [vmem:[#allocation110_spill] sm:$0xff] %v3962_v14  ;;  %v2131_v22 = vmul.f32 %v2905_v25, %v1811_v49  ;;  %v1685_v35 = vmul.f32 %v3919_v21, %v1621_v2  ;;  %v1114_v31 = vmul.f32 0.3275911, %v1050_v18  ;;  %v1051_v54 = vand.u32 2147483647, %v859_v1 }
 0x1a3   : > { %4788 = vst [vmem:[#allocation108_spill] sm:$0xff] %v3956_v13  ;;  %4789 = vst [vmem:[#allocation109_spill] sm:$0xff] %v3959_v24  ;;  %v3964_v52 = vpop.eup %2912  ;;  %2922 = vpow2.f32 %v2051_v62  ;;  %v3968_v5 = vmul.f32 0.5, %v719_v4  ;;  %v723_v0 = vadd.f32 %v722_v8, %v3271_v46  ;;  %v1882_v63 = vsub.f32 0.0, %v1050_v18 }
 0x1a4   : > { %v1303_v3 = vmul.f32 1.0614054, %v3964_v52  ;;  %v1749_v59 = vadd.f32 0.2548296, %v1685_v35  ;;  %2924 = vrcp.f32 %v1176_v53  ;;  %v1115_v13 = vmul.f32 0.3275911, %v1051_v54 }
 0x1a5   : > { %4791 = vst [vmem:[#allocation111_spill] sm:$0xff] %v3968_v5  ;;  %v2049_v36 = vmul.f32 1.442695, %v1944_v56  ;;  %vm922_vm10 = vcmp.ge.f32.partialorder %v858_v30, 0.0  ;;  %vm923_vm11 = vcmp.ge.f32.partialorder %v859_v1, 0.0  ;;  %v2195_v49 = vsub.f32 1.0, %v2131_v22 }
 0x1a6   : > { %v1367_v19 = vadd.f32 -1.4531521, %v1303_v3  ;;  %v3971_v25 = vpop.eup %2914  ;;  %v1178_v2 = vadd.f32 1.0, %v1114_v31  ;;  %v1179_v6 = vadd.f32 1.0, %v1115_v13  ;;  %v564_v62 = vadd.f32 %v563_v34, %v3271_v46 }
 0x1a7   : > { %4792 = vst [vmem:[#allocation112_spill] sm:$0xff] %v3971_v25  ;;  %v3974_v4 = vpop.eup %2916  ;;  %v1813_v8 = vmul.f32 %v3919_v21, %v1749_v59  ;;  %v1883_v53 = vsub.f32 0.0, %v1051_v54  ;;  %v861_v39 = vmul.f32 0.70710677, %v723_v0  ;;  %v1946_v56 = vmul.f32 %v1882_v63, %v1050_v18  ;;  %v724_v59 = vpop.f32.mrf.mxu1 }
 0x1a8   : > { %v1431_v35 = vmul.f32 %v3964_v52, %v1367_v19  ;;  %v1305_v3 = vmul.f32 1.0614054, %v3974_v4  ;;  %v3979_v7 = vmul.f32 0.5, %v562_v43  ;;  %2926 = vrcp.f32 %v1179_v6  ;;  %v567_v19 = vpop.f32.mrf.mxu0 }
 0x1a9   : > { %2928 = vpow2.f32 %v2049_v36  ;;  %v3983_v13 = vsel %vm922_vm10, 1.0, %v4697_v57  ;;  %v3987_v22 = vsel %vm923_vm11, 1.0, %v4697_v57  ;;  %v2259_v21 = vmul.f32 %v2195_v49, %v3861_v26 }
 0x1aa   : > { %v1495_v16 = vadd.f32 1.4214138, %v1431_v35  ;;  %4793 = vst [vmem:[#allocation113_spill] sm:$0xff] %v3983_v13  ;;  %v1369_v31 = vadd.f32 -1.4531521, %v1305_v3  ;;  %2930 = vrcp.f32 %v1178_v2  ;;  %v2133_v43 = vmul.f32 %v3940_v11, %v1813_v8 }
 0x1ab   : > { %v1053_v34 = vand.u32 2147483647, %v861_v39  ;;  %v1947_v18 = vmul.f32 %v1883_v53, %v1051_v54  ;;  %v860_v63 = vmul.f32 0.70710677, %v564_v62  ;;  %v2053_v1 = vmul.f32 1.442695, %v1946_v56 }
 0x1ac   : > { %v1559_v6 = vmul.f32 %v3964_v52, %v1495_v16  ;;  %v3992_v30 = vpop.eup %2918  ;;  %v1433_v36 = vmul.f32 %v3974_v4, %v1369_v31  ;;  %v3995_v49 = vmul.f32 0.5, %v723_v0  ;;  %v725_v3 = vadd.f32 %v724_v59, %v3271_v46 }
 0x1ad   : > { %4794 = vst [vmem:[#allocation114_spill] sm:$0xff] %v3992_v30  ;;  %v1117_v35 = vmul.f32 0.3275911, %v1053_v34  ;;  %v1885_v61 = vsub.f32 0.0, %v1053_v34  ;;  %v2921_v17 = vpop.eup %2920  ;;  %v1052_v2 = vand.u32 2147483647, %v860_v63  ;;  %v568_v54 = vadd.f32 %v567_v19, %v3261_v41 }
 0x1ae   : > { %v1623_v26 = vadd.f32 -0.28449672, %v1559_v6  ;;  %v2323_v11 = vadd.f32 1.0, %v2259_v21  ;;  %v1497_v8 = vadd.f32 1.4214138, %v1433_v36  ;;  %v2197_v53 = vsub.f32 1.0, %v2133_v43 }
 0x1af   : > { %v1181_v16 = vadd.f32 1.0, %v1117_v35  ;;  %v2055_v55 = vmul.f32 1.442695, %v1947_v18  ;;  %v1949_v31 = vmul.f32 %v1885_v61, %v1053_v34  ;;  %vm925_vm12 = vcmp.ge.f32.partialorder %v861_v39, 0.0  ;;  %v728_v35 = vpop.f32.mrf.mxu1 }
 0x1b0   : > { %v1687_v50 = vmul.f32 %v3964_v52, %v1623_v26  ;;  %v2923_v56 = vpop.eup %2922  ;;  %v1561_v9 = vmul.f32 %v3974_v4, %v1497_v8  ;;  %v1116_v0 = vmul.f32 0.3275911, %v1052_v2  ;;  %v1884_v46 = vsub.f32 0.0, %v1052_v2 }
 0x1b1   : > { %2932 = vrcp.f32 %v1181_v16  ;;  %v4001_v6 = vpop.eup %2924  ;;  %v862_v21 = vmul.f32 0.70710677, %v725_v3  ;;  %v4004_v59 = vmul.f32 %v2323_v11, %v3857_v29  ;;  %v4006_v19 = vmul.f32 0.5, %v564_v62 }
 0x1b2   : > { %v1751_v48 = vadd.f32 0.2548296, %v1687_v50  ;;  %2934 = vpow2.f32 %v2053_v1  ;;  %v1625_v43 = vadd.f32 -0.28449672, %v1561_v9  ;;  %v863_v18 = vmul.f32 0.70710677, %v568_v54 }
 0x1b3   : > { %4795 = vst [vmem:[#allocation115_spill] sm:$0xff] %v4004_v59  ;;  %4796 = vst [vmem:[#allocation116_spill] sm:$0xff] %v4006_v19  ;;  %v2261_v61 = vmul.f32 %v2197_v53, %v3878_v12  ;;  %v4011_v39 = vsel %vm925_vm12, 1.0, %v4697_v57  ;;  %v2059_v36 = vmul.f32 1.442695, %v1949_v31  ;;  %vm924_vm13 = vcmp.ge.f32.partialorder %v860_v63, 0.0 }
 0x1b4   : > { %v1815_v34 = vmul.f32 %v3964_v52, %v1751_v48  ;;  %v1689_v50 = vmul.f32 %v3974_v4, %v1625_v43  ;;  %v1180_v1 = vadd.f32 1.0, %v1116_v0  ;;  %v1054_v26 = vand.u32 2147483647, %v862_v21 }
 0x1b5   : > { %v4014_v29 = vpop.eup %2926  ;;  %2936 = vpow2.f32 %v2055_v55  ;;  %v1948_v62 = vmul.f32 %v1884_v46, %v1052_v2  ;;  %v1055_v11 = vand.u32 2147483647, %v863_v18  ;;  %v4019_v52 = vmul.f32 0.5, %v725_v3 }
 0x1b6   : > { %v2135_v9 = vmul.f32 %v2921_v17, %v1815_v34  ;;  %v4016_v8 = vpop.eup %2928  ;;  %v1753_v12 = vadd.f32 0.2548296, %v1689_v50  ;;  %v1307_v48 = vmul.f32 1.0614054, %v4014_v29  ;;  %v729_v16 = vadd.f32 %v728_v35, %v3261_v41 }
 0x1b7   : > { %4797 = vst [vmem:[#allocation117_spill] sm:$0xff] %v4016_v8  ;;  %4798 = vst [vmem:[#allocation118_spill] sm:$0xff] %v4019_v52  ;;  %v4022_v53 = vpop.eup %2930  ;;  %v2325_v31 = vadd.f32 1.0, %v2261_v61  ;;  %2938 = vpow2.f32 %v2059_v36  ;;  %v4026_v0 = vsel %vm924_vm13, 1.0, %v4697_v57  ;;  %v1119_v17 = vmul.f32 0.3275911, %v1055_v11  ;;  %v569_v36 = vpop.f32.mrf.mxu0 }
 0x1b8   : > { %4799 = vst [vmem:[#allocation119_spill] sm:$0xff] %v4026_v0  ;;  %v1817_v55 = vmul.f32 %v3974_v4, %v1753_v12  ;;  %v1371_v2 = vadd.f32 -1.4531521, %v1307_v48  ;;  %2940 = vrcp.f32 %v1180_v1  ;;  %v1118_v46 = vmul.f32 0.3275911, %v1054_v26 }
 0x1b9   : > { %v2199_v43 = vsub.f32 1.0, %v2135_v9  ;;  %v2057_v34 = vmul.f32 1.442695, %v1948_v62  ;;  %vm926_vm14 = vcmp.ge.f32.partialorder %v862_v21, 0.0  ;;  %v1183_v3 = vadd.f32 1.0, %v1119_v17 }
 0x1ba   : > { %v2137_v50 = vmul.f32 %v2923_v56, %v1817_v55  ;;  %v1435_v35 = vmul.f32 %v4014_v29, %v1371_v2  ;;  %v1886_v59 = vsub.f32 0.0, %v1054_v26  ;;  %v865_v61 = vmul.f32 0.70710677, %v729_v16  ;;  %v730_v2 = vpop.f32.mrf.mxu1 }
 0x1bb   : > { %v4031_v63 = vmul.f32 %v2325_v31, %v3868_v47  ;;  %v4033_v37 = vmul.f32 0.5, %v568_v54  ;;  %2942 = vrcp.f32 %v1183_v3  ;;  %v1887_v4 = vsub.f32 0.0, %v1055_v11 }
 0x1bc   : > { %v1499_v12 = vadd.f32 1.4214138, %v1435_v35  ;;  %v1182_v1 = vadd.f32 1.0, %v1118_v46  ;;  %vm927_vm15 = vcmp.ge.f32.partialorder %v863_v18, 0.0  ;;  %v1057_v9 = vand.u32 2147483647, %v865_v61 }
 0x1bd   : > { %4800 = vst [vmem:[#allocation120_spill] sm:$0xff] %v4031_v63  ;;  %v2201_v48 = vsub.f32 1.0, %v2137_v50  ;;  %2944 = vpow2.f32 %v2057_v34  ;;  %v4039_v56 = vsel %vm926_vm14, 1.0, %v4697_v57  ;;  %v570_v17 = vadd.f32 %v569_v36, %v3261_v41 }
 0x1be   : > { %v4035_v62 = vpop.eup %2932  ;;  %4801 = vst [vmem:[#allocation121_spill] sm:$0xff] %v4039_v56  ;;  %v2263_v54 = vmul.f32 %v2199_v43, %v3937_v23  ;;  %v1563_v31 = vmul.f32 %v4014_v29, %v1499_v12  ;;  %v1950_v18 = vmul.f32 %v1886_v59, %v1054_v26  ;;  %v4048_v46 = vsel %vm927_vm15, 1.0, %v4697_v57  ;;  %v573_v12 = vpop.f32.mrf.mxu0 }
 0x1bf   : > { %v4042_v47 = vpop.eup %2934  ;;  %v1309_v55 = vmul.f32 1.0614054, %v4035_v62  ;;  %v1951_v34 = vmul.f32 %v1887_v4, %v1055_v11  ;;  %v1121_v3 = vmul.f32 0.3275911, %v1057_v9  ;;  %v864_v21 = vmul.f32 0.70710677, %v570_v17 }
 0x1c0   : > { %4802 = vst [vmem:[#allocation122_spill] sm:$0xff] %v4042_v47  ;;  %v1627_v50 = vadd.f32 -0.28449672, %v1563_v31  ;;  %2946 = vrcp.f32 %v1182_v1  ;;  %v1889_v36 = vsub.f32 0.0, %v1057_v9  ;;  %v2265_v63 = vmul.f32 %v2201_v48, %v3951_v38 }
 0x1c1   : > { %v1373_v35 = vadd.f32 -1.4531521, %v1309_v55  ;;  %v1185_v10 = vadd.f32 1.0, %v1121_v3  ;;  %v1056_v23 = vand.u32 2147483647, %v864_v21  ;;  %v731_v43 = vadd.f32 %v730_v2, %v3261_v41 }
 0x1c2   : > { %v2937_v5 = vpop.eup %2936  ;;  %v2327_v59 = vadd.f32 1.0, %v2263_v54  ;;  %v1691_v26 = vmul.f32 %v4014_v29, %v1627_v50  ;;  %v2061_v11 = vmul.f32 1.442695, %v1950_v18  ;;  %v2063_v4 = vmul.f32 1.442695, %v1951_v34 }
 0x1c3   : > { %v1437_v32 = vmul.f32 %v4035_v62, %v1373_v35  ;;  %v4054_v30 = vmul.f32 0.5, %v729_v16  ;;  %vm929_vm0 = vcmp.ge.f32.partialorder %v865_v61, 0.0  ;;  %2948 = vrcp.f32 %v1185_v10 }
 0x1c4   : > { %v2939_v1 = vpop.eup %2938  ;;  %v1755_v31 = vadd.f32 0.2548296, %v1691_v26  ;;  %v1953_v48 = vmul.f32 %v1889_v36, %v1057_v9  ;;  %v574_v55 = vadd.f32 %v573_v12, %v3259_v40  ;;  %v2329_v2 = vadd.f32 1.0, %v2265_v63 }
 0x1c5   : > { %v1501_v38 = vadd.f32 1.4214138, %v1437_v32  ;;  %v4057_v41 = vpop.eup %2940  ;;  %v1120_v54 = vmul.f32 0.3275911, %v1056_v23  ;;  %v1888_v3 = vsub.f32 0.0, %v1056_v23  ;;  %v4060_v35 = vmul.f32 %v2327_v59, %v3916_v33  ;;  %v734_v33 = vpop.f32.mrf.mxu1 }
 0x1c6   : > { %v866_v50 = vmul.f32 0.70710677, %v731_v43  ;;  %2950 = vpow2.f32 %v2061_v11  ;;  %v867_v18 = vmul.f32 0.70710677, %v574_v55  ;;  %v1819_v10 = vmul.f32 %v4014_v29, %v1755_v31 }
 0x1c7   : > { %4803 = vst [vmem:[#allocation123_spill] sm:$0xff] %v4060_v35  ;;  %v1565_v16 = vmul.f32 %v4035_v62, %v1501_v38  ;;  %v4066_v32 = vsel %vm929_vm0, 1.0, %v4697_v57  ;;  %vm928_vm1 = vcmp.ge.f32.partialorder %v864_v21, 0.0  ;;  %2952 = vpow2.f32 %v2063_v4 }
 0x1c8   : > { %v1058_v9 = vand.u32 2147483647, %v866_v50  ;;  %v4068_v34 = vpop.eup %2942  ;;  %v2067_v36 = vmul.f32 1.442695, %v1953_v48  ;;  %v4070_v12 = vmul.f32 0.5, %v570_v17  ;;  %v4073_v59 = vmul.f32 %v2329_v2, %v3928_v27 }
 0x1c9   : > { %v1629_v63 = vadd.f32 -0.28449672, %v1565_v16  ;;  %v1311_v26 = vmul.f32 1.0614054, %v4068_v34  ;;  %v1184_v29 = vadd.f32 1.0, %v1120_v54  ;;  %v1952_v11 = vmul.f32 %v1888_v3, %v1056_v23 }
 0x1ca   : > { %4804 = vst [vmem:[#allocation124_spill] sm:$0xff] %v4070_v12  ;;  %4805 = vst [vmem:[#allocation125_spill] sm:$0xff] %v4073_v59  ;;  %v4076_v61 = vpop.eup %2944  ;;  %v4080_v31 = vsel %vm928_vm1, 1.0, %v4697_v57  ;;  %v4082_v38 = vmul.f32 0.5, %v731_v43  ;;  %v1059_v4 = vand.u32 2147483647, %v867_v18  ;;  %v2139_v17 = vmul.f32 %v2937_v5, %v1819_v10  ;;  %v575_v43 = vpop.f32.mrf.mxu0 }
 0x1cb   : > { %4806 = vst [vmem:[#allocation126_spill] sm:$0xff] %v4076_v61  ;;  %v1693_v21 = vmul.f32 %v4035_v62, %v1629_v63  ;;  %v1375_v48 = vadd.f32 -1.4531521, %v1311_v26  ;;  %v1890_v16 = vsub.f32 0.0, %v1058_v9  ;;  %v735_v27 = vadd.f32 %v734_v33, %v3259_v40 }
 0x1cc   : > { %4807 = vst [vmem:[#allocation127_spill] sm:$0xff] %v4082_v38  ;;  %2954 = vpow2.f32 %v2067_v36  ;;  %v4085_v59 = vmul.f32 0.5, %v574_v55  ;;  %v1123_v23 = vmul.f32 0.3275911, %v1059_v4  ;;  %v2065_v63 = vmul.f32 1.442695, %v1952_v11 }
 0x1cd   : > { %v1757_v2 = vadd.f32 0.2548296, %v1693_v21  ;;  %v4087_v54 = vpop.eup %2946  ;;  %v1439_v3 = vmul.f32 %v4068_v34, %v1375_v48  ;;  %2956 = vrcp.f32 %v1184_v29  ;;  %vm930_vm2 = vcmp.ge.f32.partialorder %v866_v50, 0.0 }
 0x1ce   : > { %v1122_v5 = vmul.f32 0.3275911, %v1058_v9  ;;  %vm931_vm3 = vcmp.ge.f32.partialorder %v867_v18, 0.0  ;;  %v1187_v10 = vadd.f32 1.0, %v1123_v23  ;;  %v2203_v26 = vsub.f32 1.0, %v2139_v17  ;;  %v736_v17 = vpop.f32.mrf.mxu1 }
 0x1cf   : > { %v1821_v35 = vmul.f32 %v4035_v62, %v1757_v2  ;;  %v1503_v33 = vadd.f32 1.4214138, %v1439_v3  ;;  %v1954_v21 = vmul.f32 %v1890_v16, %v1058_v9  ;;  %v869_v36 = vmul.f32 0.70710677, %v735_v27 }
 0x1d0   : > { %v4091_v55 = vpop.eup %2948  ;;  %2958 = vrcp.f32 %v1187_v10  ;;  %v1891_v28 = vsub.f32 0.0, %v1059_v4  ;;  %v576_v48 = vadd.f32 %v575_v43, %v3259_v40  ;;  %v4098_v62 = vsel %vm930_vm2, 1.0, %v4697_v57 }
 0x1d1   : > { %v2141_v51 = vmul.f32 %v2939_v1, %v1821_v35  ;;  %v1567_v29 = vmul.f32 %v4068_v34, %v1503_v33  ;;  %v1313_v11 = vmul.f32 1.0614054, %v4091_v55  ;;  %4808 = vst [vmem:[#allocation128_spill] sm:$0xff] %v4098_v62  ;;  %v1061_v2 = vand.u32 2147483647, %v869_v36  ;;  %v579_v33 = vpop.f32.mrf.mxu0 }
 0x1d2   : > { %2960 = vpow2.f32 %v2065_v63  ;;  %v1186_v9 = vadd.f32 1.0, %v1122_v5  ;;  %v4102_v1 = vsel %vm931_vm3, 1.0, %v4697_v57  ;;  %v2267_v16 = vmul.f32 %v2203_v26, %v3987_v22 }
 0x1d3   : > { %v2205_v23 = vsub.f32 1.0, %v2141_v51  ;;  %v4104_v35 = vpop.eup %2950  ;;  %v1631_v3 = vadd.f32 -0.28449672, %v1567_v29  ;;  %v1377_v43 = vadd.f32 -1.4531521, %v1313_v11  ;;  %v1955_v15 = vmul.f32 %v1891_v28, %v1059_v4 }
 0x1d4   : > { %4809 = vst [vmem:[#allocation129_spill] sm:$0xff] %v4104_v35  ;;  %v1125_v10 = vmul.f32 0.3275911, %v1061_v2  ;;  %v2069_v50 = vmul.f32 1.442695, %v1954_v21  ;;  %v737_v13 = vadd.f32 %v736_v17, %v3259_v40  ;;  %v2953_v51 = vpop.eup %2952  ;;  %v1893_v24 = vsub.f32 0.0, %v1061_v2 }
 0x1d5   : > { %v868_v58 = vmul.f32 0.70710677, %v576_v48  ;;  %v1695_v63 = vmul.f32 %v4068_v34, %v1631_v3  ;;  %v1441_v18 = vmul.f32 %v4091_v55, %v1377_v43  ;;  %v2269_v52 = vmul.f32 %v2205_v23, %v4011_v39 }
 0x1d6   : > { %v1189_v5 = vadd.f32 1.0, %v1125_v10  ;;  %2962 = vrcp.f32 %v1186_v9  ;;  %v580_v26 = vadd.f32 %v579_v33, %v3267_v44  ;;  %v2331_v29 = vadd.f32 1.0, %v2267_v16 }
 0x1d7   : > { %v1060_v22 = vand.u32 2147483647, %v868_v58  ;;  %v1759_v11 = vadd.f32 0.2548296, %v1695_v63  ;;  %v1505_v21 = vadd.f32 1.4214138, %v1441_v18  ;;  %v1957_v43 = vmul.f32 %v1893_v24, %v1061_v2  ;;  %v740_v18 = vpop.f32.mrf.mxu1 }
 0x1d8   : > { %2964 = vrcp.f32 %v1189_v5  ;;  %v2071_v28 = vmul.f32 1.442695, %v1955_v15  ;;  %v4112_v40 = vmul.f32 0.5, %v735_v27  ;;  %vm933_vm4 = vcmp.ge.f32.partialorder %v869_v36, 0.0 }
 0x1d9   : > { %2966 = vpow2.f32 %v2069_v50  ;;  %v2955_v4 = vpop.eup %2954  ;;  %v1823_v17 = vmul.f32 %v4068_v34, %v1759_v11  ;;  %v1569_v3 = vmul.f32 %v4091_v55, %v1505_v21  ;;  %v870_v39 = vmul.f32 0.70710677, %v737_v13 }
 0x1da   : > { %v4116_v23 = vpop.eup %2956  ;;  %v2333_v9 = vadd.f32 1.0, %v2269_v52  ;;  %vm932_vm5 = vcmp.ge.f32.partialorder %v868_v58, 0.0  ;;  %v1892_v16 = vsub.f32 0.0, %v1060_v22  ;;  %v871_v10 = vmul.f32 0.70710677, %v580_v26 }
 0x1db   : > { %v4119_v33 = vmul.f32 %v2331_v29, %v3979_v7  ;;  %v2143_v15 = vmul.f32 %v2953_v51, %v1823_v17  ;;  %v1633_v27 = vadd.f32 -0.28449672, %v1569_v3  ;;  %v1062_v50 = vand.u32 2147483647, %v870_v39 }
 0x1dc   : > { %2968 = vpow2.f32 %v2071_v28  ;;  %v4123_v34 = vsel %vm933_vm4, 1.0, %v4697_v57  ;;  %v4125_v63 = vmul.f32 0.5, %v576_v48  ;;  %v4127_v24 = vmul.f32 0.5, %v737_v13 }
 0x1dd   : > { %4810 = vst [vmem:[#allocation130_spill] sm:$0xff] %v4119_v33  ;;  %v4129_v2 = vpop.eup %2958  ;;  %v1697_v58 = vmul.f32 %v4091_v55, %v1633_v27  ;;  %v2075_v52 = vmul.f32 1.442695, %v1957_v43  ;;  %v4133_v7 = vsel %vm932_vm5, 1.0, %v4697_v57  ;;  %v1124_v51 = vmul.f32 0.3275911, %v1060_v22 }
 0x1de   : > { %v4136_v5 = vmul.f32 %v2333_v9, %v3995_v49  ;;  %v1315_v36 = vmul.f32 1.0614054, %v4129_v2  ;;  %v1956_v29 = vmul.f32 %v1892_v16, %v1060_v22  ;;  %v1063_v48 = vand.u32 2147483647, %v871_v10  ;;  %v581_v9 = vpop.f32.mrf.mxu0 }
 0x1df   : > { %v4139_v11 = vpop.eup %2960  ;;  %v2207_v13 = vsub.f32 1.0, %v2143_v15  ;;  %v1761_v21 = vadd.f32 0.2548296, %v1697_v58  ;;  %v1126_v28 = vmul.f32 0.3275911, %v1062_v50  ;;  %v4141_v17 = vmul.f32 0.5, %v580_v26 }
 0x1e0   : > { %4811 = vst [vmem:[#allocation131_spill] sm:$0xff] %v4136_v5  ;;  %v1379_v3 = vadd.f32 -1.4531521, %v1315_v36  ;;  %v1894_v43 = vsub.f32 0.0, %v1062_v50  ;;  %v1127_v27 = vmul.f32 0.3275911, %v1063_v48  ;;  %v741_v33 = vadd.f32 %v740_v18, %v3267_v44 }
 0x1e1   : > { %v1825_v19 = vmul.f32 %v4091_v55, %v1761_v21  ;;  %2970 = vpow2.f32 %v2075_v52  ;;  %v1188_v49 = vadd.f32 1.0, %v1124_v51  ;;  %vm934_vm6 = vcmp.ge.f32.partialorder %v870_v39, 0.0 }
 0x1e2   : > { %v1443_v22 = vmul.f32 %v4129_v2, %v1379_v3  ;;  %v2073_v16 = vmul.f32 1.442695, %v1956_v29  ;;  %v1191_v5 = vadd.f32 1.0, %v1127_v27  ;;  %v1895_v15 = vsub.f32 0.0, %v1063_v48 }
 0x1e3   : > { %v4146_v58 = vpop.eup %2962  ;;  %v2271_v26 = vmul.f32 %v2207_v13, %v4048_v46  ;;  %v1190_v36 = vadd.f32 1.0, %v1126_v28  ;;  %vm935_vm7 = vcmp.ge.f32.partialorder %v871_v10, 0.0  ;;  %v873_v47 = vmul.f32 0.70710677, %v741_v33  ;;  %v742_v28 = vpop.f32.mrf.mxu1 }
 0x1e4   : > { %v1507_v18 = vadd.f32 1.4214138, %v1443_v22  ;;  %v1958_v55 = vmul.f32 %v1894_v43, %v1062_v50  ;;  %2972 = vrcp.f32 %v1191_v5  ;;  %v582_v52 = vadd.f32 %v581_v9, %v3267_v44  ;;  %v585_v22 = vpop.f32.mrf.mxu0 }
 0x1e5   : > { %v4149_v14 = vpop.eup %2964  ;;  %v2145_v21 = vmul.f32 %v2955_v4, %v1825_v19  ;;  %2974 = vrcp.f32 %v1188_v49  ;;  %v1065_v3 = vand.u32 2147483647, %v873_v47  ;;  %v4158_v46 = vsel %vm934_vm6, 1.0, %v4697_v57 }
 0x1e6   : > { %v4152_v51 = vpop.eup %2966  ;;  %v1317_v29 = vmul.f32 1.0614054, %v4149_v14  ;;  %v1571_v27 = vmul.f32 %v4129_v2, %v1507_v18  ;;  %2976 = vpow2.f32 %v2073_v16  ;;  %v1959_v13 = vmul.f32 %v1895_v15, %v1063_v48 }
 0x1e7   : > { %v2335_v50 = vadd.f32 1.0, %v2271_v26  ;;  %v4162_v43 = vsel %vm935_vm7, 1.0, %v4697_v57  ;;  %v1129_v19 = vmul.f32 0.3275911, %v1065_v3  ;;  %2978 = vrcp.f32 %v1190_v36 }
 0x1e8   : > { %v1381_v5 = vadd.f32 -1.4531521, %v1317_v29  ;;  %v1635_v4 = vadd.f32 -0.28449672, %v1571_v27  ;;  %v2077_v49 = vmul.f32 1.442695, %v1958_v55  ;;  %v743_v48 = vadd.f32 %v742_v28, %v3267_v44 }
 0x1e9   : > { %v4164_v9 = vmul.f32 0.70710677, %v582_v52  ;;  %v2969_v16 = vpop.eup %2968  ;;  %v2209_v18 = vsub.f32 1.0, %v2145_v21  ;;  %v1193_v56 = vadd.f32 1.0, %v1129_v19  ;;  %v2079_v26 = vmul.f32 1.442695, %v1959_v13  ;;  %v746_v19 = vpop.f32.mrf.mxu1 }
 0x1ea   : > { %v1445_v39 = vmul.f32 %v4149_v14, %v1381_v5  ;;  %v1699_v15 = vmul.f32 %v4129_v2, %v1635_v4  ;;  %v1897_v10 = vsub.f32 0.0, %v1065_v3  ;;  %vm937_vm8 = vcmp.ge.f32.partialorder %v873_v47, 0.0 }
 0x1eb   : > { %v1064_v29 = vand.u32 2147483647, %v4164_v9  ;;  %2980 = vrcp.f32 %v1193_v56  ;;  %v4171_v36 = vadd.f32 %v585_v22, %v3263_v42  ;;  %v4174_v55 = vmul.f32 %v2335_v50, %v4033_v37 }
 0x1ec   : > { %v1509_v0 = vadd.f32 1.4214138, %v1445_v39  ;;  %v1763_v21 = vadd.f32 0.2548296, %v1699_v15  ;;  %v4176_v27 = vmul.f32 0.5, %v741_v33  ;;  %v2273_v44 = vmul.f32 %v2209_v18, %v4066_v32 }
 0x1ed   : > { %4812 = vst [vmem:[#allocation132_spill] sm:$0xff] %v4174_v55  ;;  %v1128_v5 = vmul.f32 0.3275911, %v1064_v29  ;;  %2982 = vpow2.f32 %v2077_v49  ;;  %v4180_v28 = vmul.f32 0.70710677, %v743_v48  ;;  %v4184_v4 = vsel %vm937_vm8, 1.0, %v4697_v57 }
 0x1ee   : > { %v1573_v13 = vmul.f32 %v4149_v14, %v1509_v0  ;;  %v2971_v47 = vpop.eup %2970  ;;  %v1827_v56 = vmul.f32 %v4129_v2, %v1763_v21  ;;  %v1961_v37 = vmul.f32 %v1897_v10, %v1065_v3  ;;  %2984 = vpow2.f32 %v2079_v26 }
 0x1ef   : > { %v1192_v50 = vadd.f32 1.0, %v1128_v5  ;;  %v1066_v33 = vand.u32 2147483647, %v4180_v28  ;;  %v4188_v32 = vmul.f32 0.70710677, %v4171_v36  ;;  %v4190_v49 = vmul.f32 0.5, %v582_v52 }
 0x1f0   : > { %v1637_v22 = vadd.f32 -0.28449672, %v1573_v13  ;;  %v2147_v0 = vmul.f32 %v2969_v16, %v1827_v56  ;;  %v1896_v18 = vsub.f32 0.0, %v1064_v29  ;;  %v4193_v39 = vadd.f32 %v746_v19, %v3263_v42 }
 0x1f1   : > { %v4195_v2 = vpop.eup %2972  ;;  %v2337_v15 = vadd.f32 1.0, %v2273_v44  ;;  %2986 = vrcp.f32 %v1192_v50  ;;  %v1130_v10 = vmul.f32 0.3275911, %v1066_v33  ;;  %v2083_v5 = vmul.f32 1.442695, %v1961_v37 }
 0x1f2   : > { %v1701_v3 = vmul.f32 %v4149_v14, %v1637_v22  ;;  %v4198_v26 = vpop.eup %2974  ;;  %v1319_v21 = vmul.f32 1.0614054, %v4195_v2  ;;  %vm936_vm9 = vcmp.ge.f32.partialorder %v4164_v9, 0.0  ;;  %v4202_v52 = vmul.f32 0.5, %v743_v48 }
 0x1f3   : > { %v4204_v16 = vpop.eup %2976  ;;  %v1194_v19 = vadd.f32 1.0, %v1130_v10  ;;  %v1898_v56 = vsub.f32 0.0, %v1066_v33  ;;  %v1067_v44 = vand.u32 2147483647, %v4188_v32  ;;  %v2211_v8 = vsub.f32 1.0, %v2147_v0 }
 0x1f4   : > { %v1765_v13 = vadd.f32 0.2548296, %v1701_v3  ;;  %v1383_v22 = vadd.f32 -1.4531521, %v1319_v21  ;;  %v1960_v50 = vmul.f32 %v1896_v18, %v1064_v29  ;;  %v877_v55 = vmul.f32 0.70710677, %v4193_v39  ;;  %v4208_v35 = vpop.eup %2978 }
 0x1f5   : > { %v4211_v37 = vmul.f32 %v2337_v15, %v4054_v30  ;;  %2988 = vrcp.f32 %v1194_v19  ;;  %v1131_v61 = vmul.f32 0.3275911, %v1067_v44  ;;  %v4218_v0 = vsel %vm936_vm9, 1.0, %v4697_v57 }
 0x1f6   : > { %v1829_v48 = vmul.f32 %v4149_v14, %v1765_v13  ;;  %v1447_v3 = vmul.f32 %v4195_v2, %v1383_v22  ;;  %2990 = vpow2.f32 %v2083_v5  ;;  %v1899_v29 = vsub.f32 0.0, %v1067_v44 }
 0x1f7   : > { %4813 = vst [vmem:[#allocation133_spill] sm:$0xff] %v4211_v37  ;;  %vm938_vm10 = vcmp.ge.f32.partialorder %v4180_v28, 0.0  ;;  %v1962_v10 = vmul.f32 %v1898_v56, %v1066_v33  ;;  %v1195_v21 = vadd.f32 1.0, %v1131_v61  ;;  %v2275_v14 = vmul.f32 %v2211_v8, %v4102_v1 }
 0x1f8   : > { %v2149_v18 = vmul.f32 %v2971_v47, %v1829_v48  ;;  %v4221_v30 = vpop.eup %2980  ;;  %v1511_v15 = vadd.f32 1.4214138, %v1447_v3  ;;  %v2081_v13 = vmul.f32 1.442695, %v1960_v50  ;;  %v1069_v19 = vand.u32 2147483647, %v877_v55 }
 0x1f9   : > { %v1321_v5 = vmul.f32 1.0614054, %v4221_v30  ;;  %2992 = vrcp.f32 %v1195_v21  ;;  %v1963_v9 = vmul.f32 %v1899_v29, %v1067_v44  ;;  %v4229_v48 = vmul.f32 0.5, %v4171_v36 }
 0x1fa   : > { %v2213_v22 = vsub.f32 1.0, %v2149_v18  ;;  %v4225_v37 = vpop.eup %2982  ;;  %v1575_v47 = vmul.f32 %v4195_v2, %v1511_v15  ;;  %v1133_v61 = vmul.f32 0.3275911, %v1069_v19  ;;  %v1901_v33 = vsub.f32 0.0, %v1069_v19  ;;  %v587_v15 = vpop.f32.mrf.mxu0 }
 0x1fb   : > { %v1385_v8 = vadd.f32 -1.4531521, %v1321_v5  ;;  %v2085_v1 = vmul.f32 1.442695, %v1962_v10  ;;  %vm939_vm11 = vcmp.ge.f32.partialorder %v4188_v32, 0.0  ;;  %v2985_v50 = vpop.eup %2984  ;;  %2994 = vpow2.f32 %v2081_v13 }
 0x1fc   : > { %v2277_v56 = vmul.f32 %v2213_v22, %v4123_v34  ;;  %v1639_v3 = vadd.f32 -0.28449672, %v1575_v47  ;;  %v4236_v44 = vsel %vm938_vm10, 1.0, %v4697_v57  ;;  %v1197_v29 = vadd.f32 1.0, %v1133_v61  ;;  %v748_v34 = vpop.f32.mrf.mxu1 }
 0x1fd   : > { %v2339_v18 = vadd.f32 1.0, %v2275_v14  ;;  %v1449_v36 = vmul.f32 %v4221_v30, %v1385_v8  ;;  %v2087_v21 = vmul.f32 1.442695, %v1963_v9  ;;  %vm941_vm12 = vcmp.ge.f32.partialorder %v877_v55, 0.0 }
 0x1fe   : > { %v4239_v22 = vpop.eup %2986  ;;  %v1703_v32 = vmul.f32 %v4195_v2, %v1639_v3  ;;  %v4243_v10 = vsel %vm939_vm11, 1.0, %v4697_v57  ;;  %2996 = vrcp.f32 %v1197_v29  ;;  %v1965_v13 = vmul.f32 %v1901_v33, %v1069_v19 }
 0x1ff   : > { %v2341_v28 = vadd.f32 1.0, %v2277_v56  ;;  %v1513_v5 = vadd.f32 1.4214138, %v1449_v36  ;;  %2998 = vpow2.f32 %v2085_v1  ;;  %v4246_v14 = vmul.f32 0.5, %v4193_v39 }
 0x200   : > { %v1767_v47 = vadd.f32 0.2548296, %v1703_v32  ;;  %v4249_v55 = vsel %vm941_vm12, 1.0, %v4697_v57  ;;  %v588_v9 = vadd.f32 %v587_v15, %v3263_v42  ;;  %v749_v61 = vadd.f32 %v748_v34, %v3263_v42 }
 0x201   : > { %v4254_v8 = vmul.f32 %v2339_v18, %v4085_v59  ;;  %v1577_v3 = vmul.f32 %v4221_v30, %v1513_v5  ;;  %3000 = vpow2.f32 %v2087_v21  ;;  %v1320_v19 = vmul.f32 1.0614054, %v4239_v22 }
 0x202   : > { %v4258_v33 = vpop.eup %2988  ;;  %v1831_v39 = vmul.f32 %v4195_v2, %v1767_v47  ;;  %v2091_v56 = vmul.f32 1.442695, %v1965_v13  ;;  %v876_v1 = vmul.f32 0.70710677, %v588_v9  ;;  %v1316_v29 = vmul.f32 1.0614054, %v4198_v26 }
 0x203   : > { %4814 = vst [vmem:[#allocation134_spill] sm:$0xff] %v4254_v8  ;;  %v2991_v36 = vpop.eup %2990  ;;  %v4263_v15 = vmul.f32 %v2341_v28, %v4112_v40  ;;  %v1641_v42 = vadd.f32 -0.28449672, %v1577_v3  ;;  %v878_v59 = vmul.f32 0.70710677, %v749_v61  ;;  %v4265_v32 = vmul.f32 0.5, %v588_v9 }
 0x204   : > { %v1384_v18 = vadd.f32 -1.4531521, %v1320_v19  ;;  %v2151_v34 = vmul.f32 %v2985_v50, %v1831_v39  ;;  %vm940_vm13 = vcmp.ge.f32.partialorder %v876_v1, 0.0  ;;  %v1068_v21 = vand.u32 2147483647, %v876_v1 }
 0x205   : > { %4815 = vst [vmem:[#allocation135_spill] sm:$0xff] %v4263_v15  ;;  %v1705_v5 = vmul.f32 %v4221_v30, %v1641_v42  ;;  %v4268_v60 = vmul.f32 0.5, %v749_v61  ;;  %v1070_v2 = vand.u32 2147483647, %v878_v59  ;;  %v1322_v13 = vmul.f32 1.0614054, %v4258_v33 }
 0x206   : > { %v4271_v47 = vpop.eup %2992  ;;  %v2215_v8 = vsub.f32 1.0, %v2151_v34  ;;  %v4274_v40 = vsel %vm940_vm13, 1.0, %v4697_v57  ;;  %v1132_v28 = vmul.f32 0.3275911, %v1068_v21  ;;  %v1900_v3 = vsub.f32 0.0, %v1068_v21 }
 0x207   : > { %4816 = vst [vmem:[#allocation136_spill] sm:$0xff] %v4268_v60  ;;  %v1769_v50 = vadd.f32 0.2548296, %v1705_v5  ;;  %v1323_v9 = vmul.f32 1.0614054, %v4271_v47  ;;  %v1448_v39 = vmul.f32 %v4239_v22, %v1384_v18  ;;  %v1902_v15 = vsub.f32 0.0, %v1070_v2 }
 0x208   : > { %v1134_v19 = vmul.f32 0.3275911, %v1070_v2  ;;  %v2279_v61 = vmul.f32 %v2215_v8, %v4162_v43  ;;  %v1196_v1 = vadd.f32 1.0, %v1132_v28  ;;  %v1964_v42 = vmul.f32 %v1900_v3, %v1068_v21  ;;  %v2995_v38 = vpop.eup %2994 }
 0x209   : > { %v1833_v45 = vmul.f32 %v4221_v30, %v1769_v50  ;;  %v1387_v34 = vadd.f32 -1.4531521, %v1323_v9  ;;  %v1512_v20 = vadd.f32 1.4214138, %v1448_v39  ;;  %vm942_vm14 = vcmp.ge.f32.partialorder %v878_v59, 0.0 }
 0x20a   : > { %v1198_v25 = vadd.f32 1.0, %v1134_v19  ;;  %v2343_v62 = vadd.f32 1.0, %v2279_v61  ;;  %3002 = vrcp.f32 %v1196_v1  ;;  %v1966_v5 = vmul.f32 %v1902_v15, %v1070_v2 }
 0x20b   : > { %v4280_v12 = vpop.eup %2996  ;;  %v2153_v60 = vmul.f32 %v2991_v36, %v1833_v45  ;;  %v1451_v18 = vmul.f32 %v4271_v47, %v1387_v34  ;;  %v1576_v43 = vmul.f32 %v4239_v22, %v1512_v20  ;;  %v2089_v30 = vmul.f32 1.442695, %v1964_v42 }
 0x20c   : > { %3004 = vrcp.f32 %v1198_v25  ;;  %v4284_v8 = vpop.eup %2998  ;;  %v1325_v21 = vmul.f32 1.0614054, %v4280_v12  ;;  %v2093_v28 = vmul.f32 1.442695, %v1966_v5  ;;  %v4288_v59 = vsel %vm942_vm14, 1.0, %v4697_v57 }
 0x20d   : > { %3006 = vpow2.f32 %v2091_v56  ;;  %v2217_v3 = vsub.f32 1.0, %v2153_v60  ;;  %v1515_v50 = vadd.f32 1.4214138, %v1451_v18  ;;  %v1640_v15 = vadd.f32 -0.28449672, %v1576_v43 }
 0x20e   : > { %v3001_v2 = vpop.eup %3000  ;;  %v4291_v45 = vmul.f32 %v2343_v62, %v4141_v17  ;;  %v1389_v25 = vadd.f32 -1.4531521, %v1325_v21  ;;  %v1386_v36 = vadd.f32 -1.4531521, %v1322_v13  ;;  %v1380_v20 = vadd.f32 -1.4531521, %v1316_v29 }
 0x20f   : > { %v2281_v9 = vmul.f32 %v2217_v3, %v4184_v4  ;;  %v1579_v19 = vmul.f32 %v4271_v47, %v1515_v50  ;;  %v1704_v56 = vmul.f32 %v4239_v22, %v1640_v15  ;;  %v1318_v60 = vmul.f32 1.0614054, %v4208_v35 }
 0x210   : > { %v1453_v39 = vmul.f32 %v4280_v12, %v1389_v25  ;;  %v1450_v61 = vmul.f32 %v4258_v33, %v1386_v36  ;;  %v1444_v1 = vmul.f32 %v4198_v26, %v1380_v20  ;;  %v1312_v62 = vmul.f32 1.0614054, %v4116_v23 }
 0x211   : > { %v2345_v17 = vadd.f32 1.0, %v2281_v9  ;;  %v1643_v42 = vadd.f32 -0.28449672, %v1579_v19  ;;  %3008 = vpow2.f32 %v2089_v30  ;;  %v1768_v29 = vadd.f32 0.2548296, %v1704_v56 }
 0x212   : > { %v1517_v13 = vadd.f32 1.4214138, %v1453_v39  ;;  %3010 = vpow2.f32 %v2093_v28  ;;  %v1514_v4 = vadd.f32 1.4214138, %v1450_v61  ;;  %v1508_v34 = vadd.f32 1.4214138, %v1444_v1 }
 0x213   : > { %v4302_v5 = vmul.f32 %v2345_v17, %v4176_v27  ;;  %v1707_v18 = vmul.f32 %v4271_v47, %v1643_v42  ;;  %v1832_v43 = vmul.f32 %v4239_v22, %v1768_v29  ;;  %v1382_v21 = vadd.f32 -1.4531521, %v1318_v60 }
 0x214   : > { %v1581_v3 = vmul.f32 %v4280_v12, %v1517_v13  ;;  %v1578_v50 = vmul.f32 %v4258_v33, %v1514_v4  ;;  %v1572_v15 = vmul.f32 %v4198_v26, %v1508_v34  ;;  %v1376_v30 = vadd.f32 -1.4531521, %v1312_v62 }
 0x215   : > { %v1771_v25 = vadd.f32 0.2548296, %v1707_v18  ;;  %v2152_v36 = vmul.f32 %v2995_v38, %v1832_v43  ;;  %v1446_v28 = vmul.f32 %v4208_v35, %v1382_v21  ;;  %v1314_v20 = vmul.f32 1.0614054, %v4146_v58 }
 0x216   : > { %v1645_v27 = vadd.f32 -0.28449672, %v1581_v3  ;;  %v1642_v9 = vadd.f32 -0.28449672, %v1578_v50  ;;  %v1636_v19 = vadd.f32 -0.28449672, %v1572_v15  ;;  %v1440_v56 = vmul.f32 %v4116_v23, %v1376_v30 }
 0x217   : > { %v4312_v22 = vpop.eup %3002  ;;  %v1835_v60 = vmul.f32 %v4271_v47, %v1771_v25  ;;  %v2216_v39 = vsub.f32 1.0, %v2152_v36  ;;  %v1510_v61 = vadd.f32 1.4214138, %v1446_v28  ;;  %v1378_v1 = vadd.f32 -1.4531521, %v1314_v20 }
 0x218   : > { %v1709_v38 = vmul.f32 %v4280_v12, %v1645_v27  ;;  %v1324_v62 = vmul.f32 1.0614054, %v4312_v22  ;;  %v1706_v42 = vmul.f32 %v4258_v33, %v1642_v9  ;;  %v1700_v29 = vmul.f32 %v4198_v26, %v1636_v19 }
 0x219   : > { %v4315_v17 = vpop.eup %3004  ;;  %v2155_v4 = vmul.f32 %v3001_v2, %v1835_v60  ;;  %v2280_v18 = vmul.f32 %v2216_v39, %v4218_v0  ;;  %v1574_v47 = vmul.f32 %v4208_v35, %v1510_v61  ;;  %v1442_v50 = vmul.f32 %v4146_v58, %v1378_v1 }
 0x21a   : > { %v3007_v13 = vpop.eup %3006  ;;  %v1326_v34 = vmul.f32 1.0614054, %v4315_v17  ;;  %v1773_v43 = vadd.f32 0.2548296, %v1709_v38  ;;  %v1388_v21 = vadd.f32 -1.4531521, %v1324_v62 }
 0x21b   : > { %v1770_v3 = vadd.f32 0.2548296, %v1706_v42  ;;  %v2219_v15 = vsub.f32 1.0, %v2155_v4  ;;  %v2344_v25 = vadd.f32 1.0, %v2280_v18  ;;  %v1764_v36 = vadd.f32 0.2548296, %v1700_v29 }
 0x21c   : > { %v1390_v30 = vadd.f32 -1.4531521, %v1326_v34  ;;  %v1837_v28 = vmul.f32 %v4280_v12, %v1773_v43  ;;  %v1452_v20 = vmul.f32 %v4312_v22, %v1388_v21  ;;  %v1638_v27 = vadd.f32 -0.28449672, %v1574_v47 }
 0x21d   : > { %v1834_v2 = vmul.f32 %v4258_v33, %v1770_v3  ;;  %v2283_v0 = vmul.f32 %v2219_v15, %v4243_v10  ;;  %v4331_v19 = vmul.f32 %v2344_v25, %v4190_v49  ;;  %v1828_v60 = vmul.f32 %v4198_v26, %v1764_v36 }
 0x21e   : > { %v1454_v9 = vmul.f32 %v4315_v17, %v1390_v30  ;;  %v3009_v39 = vpop.eup %3008  ;;  %v2157_v61 = vmul.f32 %v3007_v13, %v1837_v28  ;;  %v1516_v1 = vadd.f32 1.4214138, %v1452_v20  ;;  %v1702_v12 = vmul.f32 %v4208_v35, %v1638_v27 }
 0x21f   : > { %v2154_v38 = vmul.f32 %v4284_v8, %v1834_v2  ;;  %v3011_v62 = vpop.eup %3010  ;;  %v2347_v42 = vadd.f32 1.0, %v2283_v0  ;;  %v2148_v29 = vmul.f32 %v4204_v16, %v1828_v60  ;;  %v1504_v10 = vadd.f32 1.4214138, %v1440_v56 }
 0x220   : > { %v1518_v33 = vadd.f32 1.4214138, %v1454_v9  ;;  %v2221_v4 = vsub.f32 1.0, %v2157_v61  ;;  %v1580_v34 = vmul.f32 %v4312_v22, %v1516_v1  ;;  %v1766_v18 = vadd.f32 0.2548296, %v1702_v12 }
 0x221   : > { %v2218_v49 = vsub.f32 1.0, %v2154_v38  ;;  %v4339_v26 = vmul.f32 %v2347_v42, %v4229_v48  ;;  %v2212_v47 = vsub.f32 1.0, %v2148_v29  ;;  %v1568_v8 = vmul.f32 %v4116_v23, %v1504_v10 }
 0x222   : > { %v1582_v13 = vmul.f32 %v4315_v17, %v1518_v33  ;;  %v2285_v43 = vmul.f32 %v2221_v4, %v4249_v55  ;;  %v1644_v21 = vadd.f32 -0.28449672, %v1580_v34  ;;  %v1830_v16 = vmul.f32 %v4208_v35, %v1766_v18 }
 0x223   : > { %v2282_v3 = vmul.f32 %v2218_v49, %v4236_v44  ;;  %v2276_v15 = vmul.f32 %v2212_v47, %v4133_v7  ;;  %v1632_v30 = vadd.f32 -0.28449672, %v1568_v8  ;;  %v1506_v25 = vadd.f32 1.4214138, %v1442_v50 }
 0x224   : > { %v1646_v56 = vadd.f32 -0.28449672, %v1582_v13  ;;  %v2349_v36 = vadd.f32 1.0, %v2285_v43  ;;  %v1708_v48 = vmul.f32 %v4312_v22, %v1644_v21  ;;  %v2150_v20 = vmul.f32 %v4225_v37, %v1830_v16 }
 0x225   : > { %v2346_v28 = vadd.f32 1.0, %v2282_v3  ;;  %v2340_v27 = vadd.f32 1.0, %v2276_v15  ;;  %v1696_v55 = vmul.f32 %v4116_v23, %v1632_v30  ;;  %v1570_v44 = vmul.f32 %v4146_v58, %v1506_v25 }
 0x226   : > { %v1710_v2 = vmul.f32 %v4315_v17, %v1646_v56  ;;  %v4353_v35 = vmul.f32 %v2349_v36, %v4246_v14  ;;  %v1772_v0 = vadd.f32 0.2548296, %v1708_v48  ;;  %v2214_v50 = vsub.f32 1.0, %v2150_v20 }
 0x227   : > { %v4356_v7 = vmul.f32 %v2346_v28, %v4202_v52  ;;  %v4359_v60 = vmul.f32 %v2340_v27, %v4125_v63  ;;  %v1760_v37 = vadd.f32 0.2548296, %v1696_v55  ;;  %v1634_v61 = vadd.f32 -0.28449672, %v1570_v44  ;;  %v4817_v44 = vld [vmem:[#allocation136_spill] sm:$0xff] }
 0x228   : > { %v1774_v9 = vadd.f32 0.2548296, %v1710_v2  ;;  %v1836_v1 = vmul.f32 %v4312_v22, %v1772_v0  ;;  %v2278_v38 = vmul.f32 %v2214_v50, %v4158_v46  ;;  %v1308_v12 = vmul.f32 1.0614054, %v4057_v41  ;;  %v4818_v0 = vld [vmem:[#allocation124_spill] sm:$0xff] }
 0x229   : > { %v1310_v14 = vmul.f32 1.0614054, %v4087_v54  ;;  %v1824_v52 = vmul.f32 %v4116_v23, %v1760_v37  ;;  %v1698_v33 = vmul.f32 %v4146_v58, %v1634_v61  ;;  %v1304_v29 = vmul.f32 1.0614054, %v4001_v6 }
 0x22a   : > { %v1838_v42 = vmul.f32 %v4315_v17, %v1774_v9  ;;  %v2156_v63 = vmul.f32 %v3009_v39, %v1836_v1  ;;  %v2342_v10 = vadd.f32 1.0, %v2278_v38  ;;  %v1372_v4 = vadd.f32 -1.4531521, %v1308_v12  ;;  %v4819_v9 = vld [vmem:[#allocation128_spill] sm:$0xff] }
 0x22b   : > { %v1374_v34 = vadd.f32 -1.4531521, %v1310_v14  ;;  %v2144_v22 = vmul.f32 %v4139_v11, %v1824_v52  ;;  %v1762_v46 = vadd.f32 0.2548296, %v1698_v33  ;;  %v1368_v18 = vadd.f32 -1.4531521, %v1304_v29 }
 0x22c   : > { %v2158_v49 = vmul.f32 %v3011_v62, %v1838_v42  ;;  %v2220_v13 = vsub.f32 1.0, %v2156_v63  ;;  %v2406_v47 = vmul.f32 %v2342_v10, %v4127_v24  ;;  %v1436_v17 = vmul.f32 %v4057_v41, %v1372_v4  ;;  %v4820_v14 = vld [vmem:[#allocation105_spill] sm:$0xff]  ;;  %v4821_v33 = vld [vmem:[#allocation112_spill] sm:$0xff]  ;;  %v4822_v63 = vld [vmem:[#allocation95_spill] sm:$0xff] }
 0x22d   : > { %v1438_v23 = vmul.f32 %v4087_v54, %v1374_v34  ;;  %v2208_v43 = vsub.f32 1.0, %v2144_v22  ;;  %v1826_v21 = vmul.f32 %v4146_v58, %v1762_v46  ;;  %v1432_v39 = vmul.f32 %v4001_v6, %v1368_v18 }
 0x22e   : > { %v2222_v8 = vsub.f32 1.0, %v2158_v49  ;;  %v2284_v3 = vmul.f32 %v2220_v13, %v4274_v40  ;;  %v1500_v62 = vadd.f32 1.4214138, %v1436_v17  ;;  %v1306_v11 = vmul.f32 1.0614054, %v4022_v53 }
 0x22f   : > { %v1502_v16 = vadd.f32 1.4214138, %v1438_v23  ;;  %v2272_v24 = vmul.f32 %v2208_v43, %v4080_v31  ;;  %v2146_v15 = vmul.f32 %v4152_v51, %v1826_v21  ;;  %v1496_v30 = vadd.f32 1.4214138, %v1432_v39  ;;  %v4825_v39 = vld [vmem:[#allocation102_spill] sm:$0xff] }
 0x230   : > { %v2286_v56 = vmul.f32 %v2222_v8, %v4288_v59  ;;  %v2348_v25 = vadd.f32 1.0, %v2284_v3  ;;  %v1564_v36 = vmul.f32 %v4057_v41, %v1500_v62  ;;  %v1370_v48 = vadd.f32 -1.4531521, %v1306_v11  ;;  %v4826_v3 = vld [vmem:[#allocation135_spill] sm:$0xff]  ;;  %v4829_v11 = vld [vmem:[#allocation132_spill] sm:$0xff] }
 0x231   : > { %v1566_v58 = vmul.f32 %v4087_v54, %v1502_v16  ;;  %v2336_v20 = vadd.f32 1.0, %v2272_v24  ;;  %v2210_v40 = vsub.f32 1.0, %v2146_v15  ;;  %v1560_v2 = vmul.f32 %v4001_v6, %v1496_v30 }
 0x232   : > { %v2350_v28 = vadd.f32 1.0, %v2286_v56  ;;  %v2412_v27 = vmul.f32 %v2348_v25, %v4265_v32  ;;  %v1628_v55 = vadd.f32 -0.28449672, %v1564_v36  ;;  %v1434_v31 = vmul.f32 %v4022_v53, %v1370_v48  ;;  %v4831_v25 = vld [vmem:[#allocation133_spill] sm:$0xff] }
 0x233   : > { %v1630_v59 = vadd.f32 -0.28449672, %v1566_v58  ;;  %v2400_v50 = vmul.f32 %v2336_v20, %v4818_v0  ;;  %v2274_v37 = vmul.f32 %v2210_v40, %v4819_v9  ;;  %v1624_v61 = vadd.f32 -0.28449672, %v1560_v2 }
 0x234   : > { %v2414_v51 = vmul.f32 %v2350_v28, %v4817_v44  ;;  %2426 = vmatprep.subr.mxu0 %v2412_v27  ;;  %v1692_v1 = vmul.f32 %v4057_v41, %v1628_v55  ;;  %v1498_v12 = vadd.f32 1.4214138, %v1434_v31  ;;  %v1300_v42 = vmul.f32 1.0614054, %v4820_v14  ;;  %v4832_v55 = vld [vmem:[#allocation119_spill] sm:$0xff]  ;;  %v4833_v31 = vld [vmem:[#allocation121_spill] sm:$0xff] }
 0x235   : > { %v1694_v38 = vmul.f32 %v4087_v54, %v1630_v59  ;;  %2427 = vmatpush1.msra.mxu0 %v4339_v26  ;;  %v2338_v32 = vadd.f32 1.0, %v2274_v37  ;;  %v1688_v52 = vmul.f32 %v4001_v6, %v1624_v61  ;;  %v1302_v29 = vmul.f32 1.0614054, %v4821_v33  ;;  %v4823_v26 = vld [vmem:[#allocation127_spill] sm:$0xff] }
 0x236   : > { %2497 = vmatprep.subr.mxu1 %v2414_v51  ;;  %v1296_v10 = vmul.f32 1.0614054, %v4822_v63  ;;  %2428 = vmatprep.subr.mxu0 %v4331_v19  ;;  %v1756_v4 = vadd.f32 0.2548296, %v1692_v1  ;;  %v1562_v49 = vmul.f32 %v4022_v53, %v1498_v12  ;;  %v1364_v22 = vadd.f32 -1.4531521, %v1300_v42 }
 0x237   : > { %2498 = vmatpush1.msra.mxu1 %v4353_v35  ;;  %v1758_v34 = vadd.f32 0.2548296, %v1694_v38  ;;  %2429 = vmatpush1.msra.mxu0 %v4291_v45  ;;  %v2402_v46 = vmul.f32 %v2338_v32, %v4823_v26  ;;  %v1752_v18 = vadd.f32 0.2548296, %v1688_v52  ;;  %v1366_v13 = vadd.f32 -1.4531521, %v1302_v29 }
 0x238   : > { %2499 = vmatprep.subr.mxu1 %v4356_v7  ;;  %v1360_v17 = vadd.f32 -1.4531521, %v1296_v10  ;;  %2430 = vmatprep.subr.mxu0 %v4359_v60  ;;  %v1820_v19 = vmul.f32 %v4057_v41, %v1756_v4  ;;  %v1626_v23 = vadd.f32 -0.28449672, %v1562_v49  ;;  %v1428_v8 = vmul.f32 %v4820_v14, %v1364_v22  ;;  %v4824_v7 = vld [vmem:[#allocation134_spill] sm:$0xff] }
 0x239   : > { %2500 = vmatpush1.msra.mxu1 %v4302_v5  ;;  %v1822_v35 = vmul.f32 %v4087_v54, %v1758_v34  ;;  %2431 = vmatpush1.msra.mxu0 %v4824_v7  ;;  %v1816_v45 = vmul.f32 %v4001_v6, %v1752_v18  ;;  %v1430_v43 = vmul.f32 %v4821_v33, %v1366_v13  ;;  %v1298_v5 = vmul.f32 1.0614054, %v4825_v39  ;;  %v4827_v41 = vld [vmem:[#allocation126_spill] sm:$0xff]  ;;  %v4828_v54 = vld [vmem:[#allocation129_spill] sm:$0xff] }
 0x23a   : > { %2501 = vmatprep.subr.mxu1 %v2406_v47  ;;  %v1424_v21 = vmul.f32 %v4822_v63, %v1360_v17  ;;  %2432 = vmatprep.subr.mxu0 %v2400_v50  ;;  %v2140_v60 = vmul.f32 %v4827_v41, %v1820_v19  ;;  %v1690_v16 = vmul.f32 %v4022_v53, %v1626_v23  ;;  %v1492_v47 = vadd.f32 1.4214138, %v1428_v8  ;;  %v4830_v6 = vld [vmem:[#allocation117_spill] sm:$0xff]  ;;  %v4834_v50 = vld [vmem:[#allocation110_spill] sm:$0xff] }
 0x23b   : > { %2502 = vmatpush1.msra.mxu1 %v4826_v3  ;;  %v2142_v62 = vmul.f32 %v4828_v54, %v1822_v35  ;;  %2433 = vmatpush1.msra.mxu0 %v4829_v11  ;;  %v2136_v56 = vmul.f32 %v4830_v6, %v1816_v45  ;;  %v1494_v24 = vadd.f32 1.4214138, %v1430_v43  ;;  %v1362_v30 = vadd.f32 -1.4531521, %v1298_v5  ;;  %v4835_v42 = vld [vmem:[#allocation122_spill] sm:$0xff]  ;;  %v4838_v13 = vld [vmem:[#allocation109_spill] sm:$0xff] }
 0x23c   : > { %2503 = vmatprep.subr.mxu1 %v2402_v46  ;;  %v1488_v15 = vadd.f32 1.4214138, %v1424_v21  ;;  %v2204_v36 = vsub.f32 1.0, %v2140_v60  ;;  %v1754_v48 = vadd.f32 0.2548296, %v1690_v16  ;;  %v1556_v28 = vmul.f32 %v4820_v14, %v1492_v47  ;;  %v4837_v22 = vld [vmem:[#allocation118_spill] sm:$0xff] }
 0x23d   : > { %2504 = vmatpush1.msra.mxu1 %v4831_v25  ;;  %v2206_v58 = vsub.f32 1.0, %v2142_v62  ;;  %v2200_v20 = vsub.f32 1.0, %v2136_v56  ;;  %v1558_v40 = vmul.f32 %v4821_v33, %v1494_v24  ;;  %v1426_v27 = vmul.f32 %v4825_v39, %v1362_v30  ;;  %v4839_v8 = vld [vmem:[#allocation113_spill] sm:$0xff]  ;;  %v4840_v43 = vld [vmem:[#allocation86_spill] sm:$0xff]  ;;  %v4841_v5 = vld [vmem:[#allocation92_spill] sm:$0xff] }
 0x23e   : > { %v1552_v2 = vmul.f32 %v4822_v63, %v1488_v15  ;;  %v2268_v59 = vmul.f32 %v2204_v36, %v4832_v55  ;;  %v1818_v51 = vmul.f32 %v4022_v53, %v1754_v48  ;;  %v1620_v0 = vadd.f32 -0.28449672, %v1556_v28  ;;  %v4836_v53 = vld [vmem:[#allocation116_spill] sm:$0xff]  ;;  %v4842_v41 = vld [vmem:[#allocation130_spill] sm:$0xff]  ;;  %v4843_v60 = vld [vmem:[#allocation131_spill] sm:$0xff] }
 0x23f   : > { %v2270_v44 = vmul.f32 %v2206_v58, %v4833_v31  ;;  %v2264_v9 = vmul.f32 %v2200_v20, %v4834_v50  ;;  %v1622_v37 = vadd.f32 -0.28449672, %v1558_v40  ;;  %v1490_v1 = vadd.f32 1.4214138, %v1426_v27  ;;  %v4844_v47 = vld [vmem:[#allocation78_spill] sm:$0xff]  ;;  %v4845_v56 = vld [vmem:[#allocation107_spill] sm:$0xff] }
 0x240   : > { %v1616_v61 = vadd.f32 -0.28449672, %v1552_v2  ;;  %v2332_v38 = vadd.f32 1.0, %v2268_v59  ;;  %v2138_v32 = vmul.f32 %v4835_v42, %v1818_v51  ;;  %v1684_v52 = vmul.f32 %v4820_v14, %v1620_v0  ;;  %v4846_v30 = vld [vmem:[#allocation123_spill] sm:$0xff]  ;;  %v4847_v25 = vld [vmem:[#allocation114_spill] sm:$0xff]  ;;  %v4848_v58 = vld [vmem:[#allocation101_spill] sm:$0xff] }
 0x241   : > { %v2334_v12 = vadd.f32 1.0, %v2270_v44  ;;  %v2328_v29 = vadd.f32 1.0, %v2264_v9  ;;  %v1686_v10 = vmul.f32 %v4821_v33, %v1622_v37  ;;  %v1554_v34 = vmul.f32 %v4825_v39, %v1490_v1  ;;  %v4849_v20 = vld [vmem:[#allocation111_spill] sm:$0xff]  ;;  %v4850_v51 = vld [vmem:[#allocation100_spill] sm:$0xff]  ;;  %v4852_v1 = vld [vmem:[#allocation125_spill] sm:$0xff] }
 0x242   : > { %v1680_v4 = vmul.f32 %v4822_v63, %v1616_v61  ;;  %v2396_v49 = vmul.f32 %v2332_v38, %v4836_v53  ;;  %v2202_v46 = vsub.f32 1.0, %v2138_v32  ;;  %v1748_v18 = vadd.f32 0.2548296, %v1684_v52  ;;  %v4851_v37 = vld [vmem:[#allocation79_spill] sm:$0xff]  ;;  %v4854_v42 = vld [vmem:[#allocation89_spill] sm:$0xff]  ;;  %v4855_v52 = vld [vmem:[#allocation104_spill] sm:$0xff] }
 0x243   : > { %v2398_v26 = vmul.f32 %v2334_v12, %v4837_v22  ;;  %v2392_v17 = vmul.f32 %v2328_v29, %v4838_v13  ;;  %v1750_v19 = vadd.f32 0.2548296, %v1686_v10  ;;  %v1618_v23 = vadd.f32 -0.28449672, %v1554_v34  ;;  %v4853_v38 = vld [vmem:[#allocation103_spill] sm:$0xff] }
 0x244   : > { %v1744_v35 = vadd.f32 0.2548296, %v1680_v4  ;;  %2434 = vmatprep.subr.mxu0 %v2396_v49  ;;  %v2266_v7 = vmul.f32 %v2202_v46, %v4839_v8  ;;  %v1812_v45 = vmul.f32 %v4820_v14, %v1748_v18  ;;  %v1292_v21 = vmul.f32 1.0614054, %v4840_v43  ;;  %v4856_v18 = vld [vmem:[#allocation97_spill] sm:$0xff] }
 0x245   : > { %2505 = vmatprep.subr.mxu1 %v2398_v26  ;;  %v1294_v3 = vmul.f32 1.0614054, %v4841_v5  ;;  %2435 = vmatpush1.msra.mxu0 %v4842_v41  ;;  %v1814_v54 = vmul.f32 %v4821_v33, %v1750_v19  ;;  %v1682_v16 = vmul.f32 %v4825_v39, %v1618_v23  ;;  %v1288_v11 = vmul.f32 1.0614054, %v4844_v47  ;;  %v4857_v23 = vld [vmem:[#allocation98_spill] sm:$0xff] }
 0x246   : > { %2506 = vmatpush1.msra.mxu1 %v4843_v60  ;;  %v1808_v62 = vmul.f32 %v4822_v63, %v1744_v35  ;;  %2436 = vmatprep.subr.mxu0 %v2392_v17  ;;  %v2330_v6 = vadd.f32 1.0, %v2266_v7  ;;  %v2132_v14 = vmul.f32 %v4845_v56, %v1812_v45  ;;  %v1356_v24 = vadd.f32 -1.4531521, %v1292_v21  ;;  %v4858_v7 = vld [vmem:[#allocation87_spill] sm:$0xff]  ;;  %v4859_v21 = vld [vmem:[#allocation93_spill] sm:$0xff] }
 0x247   : > { %v1358_v15 = vadd.f32 -1.4531521, %v1294_v3  ;;  %2437 = vmatpush1.msra.mxu0 %v4846_v30  ;;  %v2134_v36 = vmul.f32 %v4847_v25, %v1814_v54  ;;  %v1746_v28 = vadd.f32 0.2548296, %v1682_v16  ;;  %v1352_v33 = vadd.f32 -1.4531521, %v1288_v11 }
 0x248   : > { %v2128_v48 = vmul.f32 %v4848_v58, %v1808_v62  ;;  %v2394_v63 = vmul.f32 %v2330_v6, %v4849_v20  ;;  %v2196_v40 = vsub.f32 1.0, %v2132_v14  ;;  %v1420_v2 = vmul.f32 %v4840_v43, %v1356_v24  ;;  %v4860_v16 = vld [vmem:[#allocation65_spill] sm:$0xff]  ;;  %v4861_v6 = vld [vmem:[#allocation115_spill] sm:$0xff]  ;;  %v4863_v30 = vld [vmem:[#allocation56_spill] sm:$0xff] }
 0x249   : > { %v1422_v27 = vmul.f32 %v4841_v5, %v1358_v15  ;;  %v2198_v55 = vsub.f32 1.0, %v2134_v36  ;;  %v1810_v31 = vmul.f32 %v4825_v39, %v1746_v28  ;;  %v1416_v44 = vmul.f32 %v4844_v47, %v1352_v33  ;;  %v4862_v24 = vld [vmem:[#allocation73_spill] sm:$0xff]  ;;  %v4864_v36 = vld [vmem:[#allocation120_spill] sm:$0xff]  ;;  %v4865_v20 = vld [vmem:[#allocation90_spill] sm:$0xff] }
 0x24a   : > { %v2192_v59 = vsub.f32 1.0, %v2128_v48  ;;  %2507 = vmatprep.subr.mxu1 %v2394_v63  ;;  %v2260_v0 = vmul.f32 %v2196_v40, %v4850_v51  ;;  %v1484_v50 = vadd.f32 1.4214138, %v1420_v2  ;;  %v1290_v61 = vmul.f32 1.0614054, %v4851_v37  ;;  %v4866_v40 = vld [vmem:[#allocation106_spill] sm:$0xff] }
 0x24b   : > { %v1486_v9 = vadd.f32 1.4214138, %v1422_v27  ;;  %2508 = vmatpush1.msra.mxu1 %v4852_v1  ;;  %v2262_v12 = vmul.f32 %v2198_v55, %v4853_v38  ;;  %v2130_v29 = vmul.f32 %v4855_v52, %v1810_v31  ;;  %v1480_v10 = vadd.f32 1.4214138, %v1416_v44  ;;  %v4868_v38 = vld [vmem:[#allocation108_spill] sm:$0xff] }
 0x24c   : > { %v2256_v32 = vmul.f32 %v2192_v59, %v4854_v42  ;;  %v2324_v4 = vadd.f32 1.0, %v2260_v0  ;;  %v1548_v39 = vmul.f32 %v4840_v43, %v1484_v50  ;;  %v1354_v53 = vadd.f32 -1.4531521, %v1290_v61  ;;  %v4867_v61 = vld [vmem:[#allocation62_spill] sm:$0xff] }
 0x24d   : > { %v1550_v34 = vmul.f32 %v4841_v5, %v1486_v9  ;;  %v2326_v49 = vadd.f32 1.0, %v2262_v12  ;;  %v2194_v26 = vsub.f32 1.0, %v2130_v29  ;;  %v1544_v46 = vmul.f32 %v4844_v47, %v1480_v10  ;;  %v4869_v12 = vld [vmem:[#allocation91_spill] sm:$0xff] }
 0x24e   : > { %v2320_v22 = vadd.f32 1.0, %v2256_v32  ;;  %v2388_v13 = vmul.f32 %v2324_v4, %v4856_v18  ;;  %v1612_v17 = vadd.f32 -0.28449672, %v1548_v39  ;;  %v1418_v35 = vmul.f32 %v4851_v37, %v1354_v53  ;;  %v4870_v32 = vld [vmem:[#allocation94_spill] sm:$0xff]  ;;  %v4871_v29 = vld [vmem:[#allocation83_spill] sm:$0xff] }
 0x24f   : > { %v1614_v19 = vadd.f32 -0.28449672, %v1550_v34  ;;  %v2390_v8 = vmul.f32 %v2326_v49, %v4857_v23  ;;  %v2258_v3 = vmul.f32 %v2194_v26, %v4859_v21  ;;  %v1608_v41 = vadd.f32 -0.28449672, %v1544_v46 }
 0x250   : > { %v2384_v45 = vmul.f32 %v2320_v22, %v4858_v7  ;;  %2438 = vmatprep.subr.mxu0 %v2388_v13  ;;  %v1676_v60 = vmul.f32 %v4840_v43, %v1612_v17  ;;  %v1482_v62 = vadd.f32 1.4214138, %v1418_v35  ;;  %v1284_v11 = vmul.f32 1.0614054, %v4860_v16  ;;  %v4872_v17 = vld [vmem:[#allocation81_spill] sm:$0xff]  ;;  %v4873_v35 = vld [vmem:[#allocation82_spill] sm:$0xff] }
 0x251   : > { %v1678_v54 = vmul.f32 %v4841_v5, %v1614_v19  ;;  %2509 = vmatprep.subr.mxu1 %v2390_v8  ;;  %2439 = vmatpush1.msra.mxu0 %v4861_v6  ;;  %v2322_v56 = vadd.f32 1.0, %v2258_v3  ;;  %v1672_v14 = vmul.f32 %v4844_v47, %v1608_v41  ;;  %v1286_v15 = vmul.f32 1.0614054, %v4862_v24 }
 0x252   : > { %v1280_v25 = vmul.f32 1.0614054, %v4863_v30  ;;  %2510 = vmatpush1.msra.mxu1 %v4864_v36  ;;  %2440 = vmatprep.subr.mxu0 %v2384_v45  ;;  %v1740_v58 = vadd.f32 0.2548296, %v1676_v60  ;;  %v1546_v28 = vmul.f32 %v4851_v37, %v1482_v62  ;;  %v1348_v33 = vadd.f32 -1.4531521, %v1284_v11 }
 0x253   : > { %v1742_v48 = vadd.f32 0.2548296, %v1678_v54  ;;  %v2386_v63 = vmul.f32 %v2322_v56, %v4865_v20  ;;  %2441 = vmatpush1.msra.mxu0 %v4866_v40  ;;  %v1736_v2 = vadd.f32 0.2548296, %v1672_v14  ;;  %v1350_v27 = vadd.f32 -1.4531521, %v1286_v15 }
 0x254   : > { %v1344_v55 = vadd.f32 -1.4531521, %v1280_v25  ;;  %v1804_v59 = vmul.f32 %v4840_v43, %v1740_v58  ;;  %v1610_v44 = vadd.f32 -0.28449672, %v1546_v28  ;;  %v1412_v51 = vmul.f32 %v4860_v16, %v1348_v33  ;;  %v4874_v45 = vld [vmem:[#allocation71_spill] sm:$0xff]  ;;  %v4875_v11 = vld [vmem:[#allocation84_spill] sm:$0xff] }
 0x255   : > { %v1806_v31 = vmul.f32 %v4841_v5, %v1742_v48  ;;  %2511 = vmatprep.subr.mxu1 %v2386_v63  ;;  %v1800_v0 = vmul.f32 %v4844_v47, %v1736_v2  ;;  %v1414_v50 = vmul.f32 %v4862_v24, %v1350_v27  ;;  %v1282_v1 = vmul.f32 1.0614054, %v4867_v61  ;;  %v4877_v48 = vld [vmem:[#allocation77_spill] sm:$0xff]  ;;  %v4878_v63 = vld [vmem:[#allocation67_spill] sm:$0xff] }
 0x256   : > { %v1408_v9 = vmul.f32 %v4863_v30, %v1344_v55  ;;  %2512 = vmatpush1.msra.mxu1 %v4868_v38  ;;  %v2124_v42 = vmul.f32 %v4869_v12, %v1804_v59  ;;  %v1674_v5 = vmul.f32 %v4851_v37, %v1610_v44  ;;  %v1476_v52 = vadd.f32 1.4214138, %v1412_v51  ;;  %v4879_v59 = vld [vmem:[#allocation72_spill] sm:$0xff]  ;;  %v4880_v51 = vld [vmem:[#allocation47_spill] sm:$0xff] }
 0x257   : > { %v2126_v43 = vmul.f32 %v4870_v32, %v1806_v31  ;;  %v2120_v10 = vmul.f32 %v4871_v29, %v1800_v0  ;;  %v1478_v4 = vadd.f32 1.4214138, %v1414_v50  ;;  %v1346_v47 = vadd.f32 -1.4531521, %v1282_v1  ;;  %v4881_v50 = vld [vmem:[#allocation53_spill] sm:$0xff]  ;;  %v4882_v1 = vld [vmem:[#allocation96_spill] sm:$0xff] }
 0x258   : > { %v1472_v39 = vadd.f32 1.4214138, %v1408_v9  ;;  %v2188_v34 = vsub.f32 1.0, %v2124_v42  ;;  %v1738_v49 = vadd.f32 0.2548296, %v1674_v5  ;;  %v1540_v22 = vmul.f32 %v4860_v16, %v1476_v52  ;;  %v4883_v38 = vld [vmem:[#allocation99_spill] sm:$0xff] }
 0x259   : > { %v2190_v53 = vsub.f32 1.0, %v2126_v43  ;;  %v2184_v26 = vsub.f32 1.0, %v2120_v10  ;;  %v1542_v46 = vmul.f32 %v4862_v24, %v1478_v4  ;;  %v1410_v13 = vmul.f32 %v4867_v61, %v1346_v47  ;;  %v4884_v43 = vld [vmem:[#allocation36_spill] sm:$0xff]  ;;  %v4887_v47 = vld [vmem:[#allocation74_spill] sm:$0xff] }
 0x25a   : > { %v1536_v18 = vmul.f32 %v4863_v30, %v1472_v39  ;;  %v2252_v19 = vmul.f32 %v2188_v34, %v4872_v17  ;;  %v1802_v8 = vmul.f32 %v4851_v37, %v1738_v49  ;;  %v1604_v7 = vadd.f32 -0.28449672, %v1540_v22  ;;  %v4876_v37 = vld [vmem:[#allocation76_spill] sm:$0xff]  ;;  %v4886_v39 = vld [vmem:[#allocation85_spill] sm:$0xff] }
 0x25b   : > { %v2254_v23 = vmul.f32 %v2190_v53, %v4873_v35  ;;  %v2248_v21 = vmul.f32 %v2184_v26, %v4874_v45  ;;  %v1606_v3 = vadd.f32 -0.28449672, %v1542_v46  ;;  %v1474_v60 = vadd.f32 1.4214138, %v1410_v13  ;;  %v4885_v29 = vld [vmem:[#allocation68_spill] sm:$0xff]  ;;  %v4889_v26 = vld [vmem:[#allocation69_spill] sm:$0xff] }
 0x25c   : > { %v1600_v41 = vadd.f32 -0.28449672, %v1536_v18  ;;  %v2316_v54 = vadd.f32 1.0, %v2252_v19  ;;  %v2122_v6 = vmul.f32 %v4875_v11, %v1802_v8  ;;  %v1668_v56 = vmul.f32 %v4860_v16, %v1604_v7  ;;  %v4888_v53 = vld [vmem:[#allocation60_spill] sm:$0xff]  ;;  %v4890_v8 = vld [vmem:[#allocation59_spill] sm:$0xff]  ;;  %v4894_v11 = vld [vmem:[#allocation49_spill] sm:$0xff] }
 0x25d   : > { %v2318_v62 = vadd.f32 1.0, %v2254_v23  ;;  %v2312_v14 = vadd.f32 1.0, %v2248_v21  ;;  %v1670_v15 = vmul.f32 %v4862_v24, %v1606_v3  ;;  %v1538_v36 = vmul.f32 %v4867_v61, %v1474_v60  ;;  %v4891_v3 = vld [vmem:[#allocation43_spill] sm:$0xff]  ;;  %v4892_v60 = vld [vmem:[#allocation88_spill] sm:$0xff] }
 0x25e   : > { %v1664_v25 = vmul.f32 %v4863_v30, %v1600_v41  ;;  %v2380_v58 = vmul.f32 %v2316_v54, %v4876_v37  ;;  %v2186_v33 = vsub.f32 1.0, %v2122_v6  ;;  %v1732_v20 = vadd.f32 0.2548296, %v1668_v56  ;;  %v4893_v54 = vld [vmem:[#allocation63_spill] sm:$0xff]  ;;  %v4895_v56 = vld [vmem:[#allocation64_spill] sm:$0xff] }
 0x25f   : > { %v2382_v28 = vmul.f32 %v2318_v62, %v4877_v48  ;;  %v2376_v40 = vmul.f32 %v2312_v14, %v4878_v63  ;;  %v1734_v2 = vadd.f32 0.2548296, %v1670_v15  ;;  %v1602_v55 = vadd.f32 -0.28449672, %v1538_v36 }
 0x260   : > { %v1728_v27 = vadd.f32 0.2548296, %v1664_v25  ;;  %2442 = vmatprep.subr.mxu0 %v2380_v58  ;;  %v2250_v31 = vmul.f32 %v2186_v33, %v4879_v59  ;;  %v1796_v44 = vmul.f32 %v4860_v16, %v1732_v20  ;;  %v1276_v0 = vmul.f32 1.0614054, %v4880_v51  ;;  %v4896_v20 = vld [vmem:[#allocation55_spill] sm:$0xff] }
 0x261   : > { %2513 = vmatprep.subr.mxu1 %v2382_v28  ;;  %v1278_v9 = vmul.f32 1.0614054, %v4881_v50  ;;  %2443 = vmatpush1.msra.mxu0 %v4882_v1  ;;  %v1798_v12 = vmul.f32 %v4862_v24, %v1734_v2  ;;  %v1666_v32 = vmul.f32 %v4867_v61, %v1602_v55  ;;  %v1272_v5 = vmul.f32 1.0614054, %v4884_v43  ;;  %v4897_v55 = vld [vmem:[#allocation61_spill] sm:$0xff] }
 0x262   : > { %2514 = vmatpush1.msra.mxu1 %v4883_v38  ;;  %v1792_v42 = vmul.f32 %v4863_v30, %v1728_v27  ;;  %2444 = vmatprep.subr.mxu0 %v2376_v40  ;;  %v2314_v52 = vadd.f32 1.0, %v2250_v31  ;;  %v2116_v16 = vmul.f32 %v4885_v29, %v1796_v44  ;;  %v1340_v10 = vadd.f32 -1.4531521, %v1276_v0  ;;  %v4898_v31 = vld [vmem:[#allocation48_spill] sm:$0xff] }
 0x263   : > { %v1342_v4 = vadd.f32 -1.4531521, %v1278_v9  ;;  %2445 = vmatpush1.msra.mxu0 %v4886_v39  ;;  %v2118_v34 = vmul.f32 %v4887_v47, %v1798_v12  ;;  %v1730_v22 = vadd.f32 0.2548296, %v1666_v32  ;;  %v1336_v24 = vadd.f32 -1.4531521, %v1272_v5 }
 0x264   : > { %v2112_v49 = vmul.f32 %v4888_v53, %v1792_v42  ;;  %v2378_v30 = vmul.f32 %v2314_v52, %v4889_v26  ;;  %v2180_v46 = vsub.f32 1.0, %v2116_v16  ;;  %v1404_v18 = vmul.f32 %v4880_v51, %v1340_v10  ;;  %v4899_v0 = vld [vmem:[#allocation52_spill] sm:$0xff]  ;;  %v4901_v52 = vld [vmem:[#allocation75_spill] sm:$0xff]  ;;  %v4905_v26 = vld [vmem:[#allocation50_spill] sm:$0xff] }
 0x265   : > { %v1406_v13 = vmul.f32 %v4881_v50, %v1342_v4  ;;  %v2182_v17 = vsub.f32 1.0, %v2118_v34  ;;  %v1794_v35 = vmul.f32 %v4867_v61, %v1730_v22  ;;  %v1400_v23 = vmul.f32 %v4884_v43, %v1336_v24  ;;  %v4900_v32 = vld [vmem:[#allocation28_spill] sm:$0xff]  ;;  %v4902_v10 = vld [vmem:[#allocation31_spill] sm:$0xff] }
 0x266   : > { %v2176_v19 = vsub.f32 1.0, %v2112_v49  ;;  %2515 = vmatprep.subr.mxu1 %v2378_v30  ;;  %v2244_v7 = vmul.f32 %v2180_v46, %v4890_v8  ;;  %v1468_v45 = vadd.f32 1.4214138, %v1404_v18  ;;  %v1274_v41 = vmul.f32 1.0614054, %v4891_v3  ;;  %v4903_v39 = vld [vmem:[#allocation19_spill] sm:$0xff] }
 0x267   : > { %v1470_v21 = vadd.f32 1.4214138, %v1406_v13  ;;  %2516 = vmatpush1.msra.mxu1 %v4892_v60  ;;  %v2246_v62 = vmul.f32 %v2182_v17, %v4893_v54  ;;  %v2114_v14 = vmul.f32 %v4895_v56, %v1794_v35  ;;  %v1464_v15 = vadd.f32 1.4214138, %v1400_v23  ;;  %v4904_v34 = vld [vmem:[#allocation80_spill] sm:$0xff]  ;;  %v4906_v46 = vld [vmem:[#allocation66_spill] sm:$0xff] }
 0x268   : > { %v2240_v6 = vmul.f32 %v2176_v19, %v4894_v11  ;;  %v2308_v25 = vadd.f32 1.0, %v2244_v7  ;;  %v1532_v61 = vmul.f32 %v4880_v51, %v1468_v45  ;;  %v1338_v37 = vadd.f32 -1.4531521, %v1274_v41  ;;  %v4907_v41 = vld [vmem:[#allocation22_spill] sm:$0xff] }
 0x269   : > { %v1534_v36 = vmul.f32 %v4881_v50, %v1470_v21  ;;  %v2310_v58 = vadd.f32 1.0, %v2246_v62  ;;  %v2178_v28 = vsub.f32 1.0, %v2114_v14  ;;  %v1528_v33 = vmul.f32 %v4884_v43, %v1464_v15  ;;  %v4908_v54 = vld [vmem:[#allocation70_spill] sm:$0xff]  ;;  %v4909_v62 = vld [vmem:[#allocation51_spill] sm:$0xff]  ;;  %v4911_v14 = vld [vmem:[#allocation41_spill] sm:$0xff] }
 0x26a   : > { %v2304_v48 = vadd.f32 1.0, %v2240_v6  ;;  %v2372_v63 = vmul.f32 %v2308_v25, %v4896_v20  ;;  %v1596_v40 = vadd.f32 -0.28449672, %v1532_v61  ;;  %v1402_v27 = vmul.f32 %v4891_v3, %v1338_v37  ;;  %v4910_v6 = vld [vmem:[#allocation54_spill] sm:$0xff] }
 0x26b   : > { %v1598_v2 = vadd.f32 -0.28449672, %v1534_v36  ;;  %v2374_v59 = vmul.f32 %v2310_v58, %v4897_v55  ;;  %v2242_v9 = vmul.f32 %v2178_v28, %v4899_v0  ;;  %v1592_v1 = vadd.f32 -0.28449672, %v1528_v33  ;;  %v4915_v0 = vld [vmem:[#allocation27_spill] sm:$0xff] }
 0x26c   : > { %v2368_v44 = vmul.f32 %v2304_v48, %v4898_v31  ;;  %2446 = vmatprep.subr.mxu0 %v2372_v63  ;;  %v1660_v38 = vmul.f32 %v4880_v51, %v1596_v40  ;;  %v1466_v42 = vadd.f32 1.4214138, %v1402_v27  ;;  %v1268_v5 = vmul.f32 1.0614054, %v4900_v32  ;;  %v4912_v40 = vld [vmem:[#allocation39_spill] sm:$0xff]  ;;  %v4913_v27 = vld [vmem:[#allocation42_spill] sm:$0xff] }
 0x26d   : > { %v1662_v12 = vmul.f32 %v4881_v50, %v1598_v2  ;;  %2517 = vmatprep.subr.mxu1 %v2374_v59  ;;  %2447 = vmatpush1.msra.mxu0 %v4901_v52  ;;  %v2306_v29 = vadd.f32 1.0, %v2242_v9  ;;  %v1656_v16 = vmul.f32 %v4884_v43, %v1592_v1  ;;  %v1270_v4 = vmul.f32 1.0614054, %v4902_v10  ;;  %v4916_v52 = vld [vmem:[#allocation44_spill] sm:$0xff] }
 0x26e   : > { %v1264_v47 = vmul.f32 1.0614054, %v4903_v39  ;;  %2518 = vmatpush1.msra.mxu1 %v4904_v34  ;;  %2448 = vmatprep.subr.mxu0 %v2368_v44  ;;  %v1724_v53 = vadd.f32 0.2548296, %v1660_v38  ;;  %v1530_v22 = vmul.f32 %v4891_v3, %v1466_v42  ;;  %v1332_v24 = vadd.f32 -1.4531521, %v1268_v5 }
 0x26f   : > { %v1726_v49 = vadd.f32 0.2548296, %v1662_v12  ;;  %v2370_v30 = vmul.f32 %v2306_v29, %v4905_v26  ;;  %2449 = vmatpush1.msra.mxu0 %v4906_v46  ;;  %v1720_v18 = vadd.f32 0.2548296, %v1656_v16  ;;  %v1334_v13 = vadd.f32 -1.4531521, %v1270_v4 }
 0x270   : > { %v1328_v17 = vadd.f32 -1.4531521, %v1264_v47  ;;  %v1788_v19 = vmul.f32 %v4880_v51, %v1724_v53  ;;  %v1594_v23 = vadd.f32 -0.28449672, %v1530_v22  ;;  %v1396_v8 = vmul.f32 %v4900_v32, %v1332_v24  ;;  %v4914_v44 = vld [vmem:[#allocation15_spill] sm:$0xff]  ;;  %v4917_v53 = vld [vmem:[#allocation38_spill] sm:$0xff] }
 0x271   : > { %v1790_v35 = vmul.f32 %v4881_v50, %v1726_v49  ;;  %2519 = vmatprep.subr.mxu1 %v2370_v30  ;;  %v1784_v7 = vmul.f32 %v4884_v43, %v1720_v18  ;;  %v1398_v45 = vmul.f32 %v4902_v10, %v1334_v13  ;;  %v1266_v60 = vmul.f32 1.0614054, %v4907_v41  ;;  %v4918_v22 = vld [vmem:[#allocation40_spill] sm:$0xff]  ;;  %v4919_v46 = vld [vmem:[#allocation9_spill] sm:$0xff]  ;;  %v4920_v18 = vld [vmem:[#allocation35_spill] sm:$0xff] }
 0x272   : > { %v1392_v21 = vmul.f32 %v4903_v39, %v1328_v17  ;;  %2520 = vmatpush1.msra.mxu1 %v4908_v54  ;;  %v2108_v11 = vmul.f32 %v4909_v62, %v1788_v19  ;;  %v1658_v50 = vmul.f32 %v4891_v3, %v1594_v23  ;;  %v1460_v56 = vadd.f32 1.4214138, %v1396_v8  ;;  %v4921_v13 = vld [vmem:[#allocation58_spill] sm:$0xff]  ;;  %v4922_v8 = vld [vmem:[#allocation37_spill] sm:$0xff] }
 0x273   : > { %v2110_v51 = vmul.f32 %v4910_v6, %v1790_v35  ;;  %v2104_v15 = vmul.f32 %v4911_v14, %v1784_v7  ;;  %v1462_v25 = vadd.f32 1.4214138, %v1398_v45  ;;  %v1330_v43 = vadd.f32 -1.4531521, %v1266_v60  ;;  %v4923_v45 = vld [vmem:[#allocation25_spill] sm:$0xff] }
 0x274   : > { %v1456_v61 = vadd.f32 1.4214138, %v1392_v21  ;;  %v2172_v36 = vsub.f32 1.0, %v2108_v11  ;;  %v1722_v58 = vadd.f32 0.2548296, %v1658_v50  ;;  %v1524_v48 = vmul.f32 %v4900_v32, %v1460_v56  ;;  %v4924_v60 = vld [vmem:[#allocation33_spill] sm:$0xff] }
 0x275   : > { %v2174_v37 = vsub.f32 1.0, %v2110_v51  ;;  %v2168_v28 = vsub.f32 1.0, %v2104_v15  ;;  %v1526_v33 = vmul.f32 %v4902_v10, %v1462_v25  ;;  %v1394_v63 = vmul.f32 %v4907_v41, %v1330_v43  ;;  %v4925_v11 = vld [vmem:[#allocation46_spill] sm:$0xff]  ;;  %v4926_v51 = vld [vmem:[#allocation57_spill] sm:$0xff] }
 0x276   : > { %v1520_v20 = vmul.f32 %v4903_v39, %v1456_v61  ;;  %v2236_v2 = vmul.f32 %v2172_v36, %v4912_v40  ;;  %v1786_v59 = vmul.f32 %v4891_v3, %v1722_v58  ;;  %v1588_v31 = vadd.f32 -0.28449672, %v1524_v48  ;;  %v4927_v15 = vld [vmem:[#allocation29_spill] sm:$0xff]  ;;  %v4928_v61 = vld [vmem:[#allocation20_spill] sm:$0xff]  ;;  %v4931_v48 = vld [vmem:[#allocation34_spill] sm:$0xff] }
 0x277   : > { %v2238_v55 = vmul.f32 %v2174_v37, %v4913_v27  ;;  %vm886_vm15 = vcmp.ge.f32.partialorder %v4914_v44, 0.0  ;;  %v2232_v9 = vmul.f32 %v2168_v28, %v4915_v0  ;;  %v1590_v1 = vadd.f32 -0.28449672, %v1526_v33  ;;  %v4929_v37 = vld [vmem:[#allocation30_spill] sm:$0xff]  ;;  %v4935_v40 = vld [vmem:[#allocation21_spill] sm:$0xff] }
 0x278   : > { %v1584_v38 = vadd.f32 -0.28449672, %v1520_v20  ;;  %v1458_v12 = vadd.f32 1.4214138, %v1394_v63  ;;  %v2300_v42 = vadd.f32 1.0, %v2236_v2  ;;  %v2106_v29 = vmul.f32 %v4916_v52, %v1786_v59  ;;  %v4933_v20 = vld [vmem:[#allocation45_spill] sm:$0xff] }
 0x279   : > { %v2302_v5 = vadd.f32 1.0, %v2238_v55  ;;  %v1652_v16 = vmul.f32 %v4900_v32, %v1588_v31  ;;  %v2296_v4 = vadd.f32 1.0, %v2232_v9  ;;  %v1654_v47 = vmul.f32 %v4902_v10, %v1590_v1  ;;  %v4934_v63 = vld [vmem:[#allocation32_spill] sm:$0xff]  ;;  %v4936_v27 = vld [vmem:[#allocation10_spill] sm:$0xff]  ;;  %v4939_v0 = vld [vmem:[#allocation17_spill] sm:$0xff] }
 0x27a   : > { %v1648_v34 = vmul.f32 %v4903_v39, %v1584_v38  ;;  %v1522_v3 = vmul.f32 %v4907_v41, %v1458_v12  ;;  %v2364_v49 = vmul.f32 %v2300_v42, %v4917_v53  ;;  %v2170_v26 = vsub.f32 1.0, %v2106_v29  ;;  %v4937_v55 = vld [vmem:[#allocation26_spill] sm:$0xff]  ;;  %v4940_v12 = vld [vmem:[#allocation24_spill] sm:$0xff] }
 0x27b   : > { %v2366_v24 = vmul.f32 %v2302_v5, %v4918_v22  ;;  %v1716_v30 = vadd.f32 0.2548296, %v1652_v16  ;;  %vm882_vm0 = vcmp.ge.f32.partialorder %v4919_v46, 0.0  ;;  %v2365_v17 = vmul.f32 %v4921_v13, %v4920_v18  ;;  %v4941_v16 = vld [vmem:[#allocation7_spill] sm:$0xff]  ;;  %v4943_v53 = vld [vmem:[#allocation18_spill] sm:$0xff]  ;;  %v4952_v46 = vld [vmem:[#allocation4_spill] sm:$0xff] }
 0x27c   : > { %v1718_v19 = vadd.f32 0.2548296, %v1654_v47  ;;  %v1712_v35 = vadd.f32 0.2548296, %v1648_v34  ;;  %v1586_v23 = vadd.f32 -0.28449672, %v1522_v3  ;;  %2450 = vmatprep.subr.mxu0 %v2364_v49  ;;  %v2360_v21 = vmul.f32 %v2296_v4, %v4923_v45 }
 0x27d   : > { %v2165_v7 = vsub.f32 1.0, %v4922_v8  ;;  %2521 = vmatprep.subr.mxu1 %v2366_v24  ;;  %v2234_v54 = vmul.f32 %v2170_v26, %v4924_v60  ;;  %v1780_v62 = vmul.f32 %v4900_v32, %v1716_v30  ;;  %v2297_v6 = vadd.f32 1.0, %v4925_v11  ;;  %2451 = vmatpush1.msra.mxu0 %v4926_v51  ;;  %v4930_v32 = vld [vmem:[#allocation16_spill] sm:$0xff]  ;;  %v4942_v47 = vld [vmem:[#allocation11_spill] sm:$0xff]  ;;  %v4944_v26 = vld [vmem:[#allocation13_spill] sm:$0xff] }
 0x27e   : > { %2522 = vmatpush1.msra.mxu1 %v2365_v17  ;;  %v1782_v50 = vmul.f32 %v4902_v10, %v1718_v19  ;;  %v1776_v56 = vmul.f32 %v4903_v39, %v1712_v35  ;;  %v1650_v14 = vmul.f32 %v4907_v41, %v1586_v23  ;;  %v2161_v25 = vsub.f32 1.0, %v4927_v15  ;;  %2452 = vmatprep.subr.mxu0 %v2360_v21  ;;  %v4945_v18 = vld [vmem:[#allocation23_spill] sm:$0xff]  ;;  %v4946_v17 = vld [vmem:[#allocation12_spill] sm:$0xff]  ;;  %v4947_v35 = vld [vmem:[#allocation14_spill] sm:$0xff] }
 0x27f   : > { %v762_v43 = vmul.f32 0.5, %v4928_v61  ;;  %v2298_v36 = vadd.f32 1.0, %v2234_v54  ;;  %v2100_v58 = vmul.f32 %v4929_v37, %v1780_v62  ;;  %v4932_v28 = vsub.f32 1.0, %v4931_v48  ;;  %2453 = vmatpush1.msra.mxu0 %v4933_v20  ;;  %v4948_v60 = vld [vmem:[#allocation5_spill] sm:$0xff]  ;;  %v4949_v11 = vld [vmem:[#allocation8_spill] sm:$0xff] }
 0x280   : > { %v2102_v10 = vmul.f32 %v4934_v63, %v1782_v50  ;;  %v2096_v39 = vmul.f32 %v4935_v40, %v1776_v56  ;;  %v1714_v2 = vadd.f32 0.2548296, %v1650_v14  ;;  %v4938_v59 = vsub.f32 1.0, %v4937_v55  ;;  %v4950_v50 = vld [vmem:[#allocation3_spill] sm:$0xff] }
 0x281   : > { %v2227_v33 = vmul.f32 %v4932_v28, %v4930_v32  ;;  %v2229_v9 = vmul.f32 %v2165_v7, %v4939_v0  ;;  %v2362_v1 = vmul.f32 %v2298_v36, %v762_v43  ;;  %v2164_v38 = vsub.f32 1.0, %v2100_v58  ;;  %v4951_v58 = vld [vmem:[#allocation6_spill] sm:$0xff] }
 0x282   : > { %v2223_v31 = vmul.f32 %v4938_v59, %v4936_v27  ;;  %v2361_v42 = vmul.f32 %v2297_v6, %v4940_v12  ;;  %v2166_v5 = vsub.f32 1.0, %v2102_v10  ;;  %v2160_v52 = vsub.f32 1.0, %v2096_v39  ;;  %v2420_v27 = vpop.permute.xlu0 %2419 }
 0x283   : > { %v1778_v29 = vmul.f32 %v4907_v41, %v1714_v2  ;;  %v755_v4 = vmul.f32 0.5, %v4941_v16  ;;  %v756_v34 = vmul.f32 0.5, %v4942_v47  ;;  %v950_v3 = vsel %vm886_vm15, 1.0, %v4697_v57  ;;  %2523 = vmatprep.subr.mxu1 %v2362_v1 }
 0x284   : > { %v2228_v49 = vmul.f32 %v2164_v38, %v4943_v53  ;;  %v2291_v22 = vadd.f32 1.0, %v2227_v33  ;;  %2524 = vmatpush1.msra.mxu1 %v2361_v42  ;;  %v2230_v24 = vmul.f32 %v2166_v5, %v950_v3  ;;  %v2224_v30 = vmul.f32 %v2160_v52, %v4944_v26 }
 0x285   : > { %v2098_v13 = vmul.f32 %v4945_v18, %v1778_v29  ;;  %v2225_v41 = vmul.f32 %v2161_v25, %v4946_v17  ;;  %v2293_v19 = vadd.f32 1.0, %v2229_v9  ;;  %v758_v23 = vmul.f32 0.5, %v4947_v35 }
 0x286   : > { %v2292_v8 = vadd.f32 1.0, %v2228_v49  ;;  %v2287_v7 = vadd.f32 1.0, %v2223_v31  ;;  %v2294_v45 = vadd.f32 1.0, %v2230_v24  ;;  %v2288_v44 = vadd.f32 1.0, %v2224_v30 }
 0x287   : > { %v2162_v21 = vsub.f32 1.0, %v2098_v13  ;;  %v752_v54 = vmul.f32 0.5, %v4948_v60  ;;  %v946_v62 = vsel %vm882_vm0, 1.0, %v4697_v57  ;;  %v757_v6 = vmul.f32 0.5, %v4949_v11  ;;  %v2415_v57 = vld [vmem:[%s4642_s3] sm:$0x1] }
 0x288   : > { %v2356_v51 = vmul.f32 %v2292_v8, %v756_v34  ;;  %v751_v56 = vmul.f32 0.5, %v4950_v50  ;;  %v2355_v14 = vmul.f32 %v2291_v22, %v755_v4  ;;  %v2358_v15 = vmul.f32 %v2294_v45, %v758_v23 }
 0x289   : > { %v2226_v25 = vmul.f32 %v2162_v21, %v946_v62  ;;  %v2289_v61 = vadd.f32 1.0, %v2225_v41  ;;  %v2357_v43 = vmul.f32 %v2293_v19, %v757_v6  ;;  %v2352_v36 = vmul.f32 %v2288_v44, %v752_v54 }
 0x28a   : > { %2454 = vmatprep.subr.mxu0 %v2356_v51  ;;  %v2351_v37 = vmul.f32 %v2287_v7, %v751_v56  ;;  %v754_v32 = vmul.f32 0.5, %v4951_v58  ;;  %2525 = vmatprep.subr.mxu1 %v2358_v15  ;;  %v753_v28 = vmul.f32 0.5, %v4952_v46  ;;  %v2422_v63 = vlaneseq }
 0x28b   : > { %2455 = vmatpush1.msra.mxu0 %v2355_v14  ;;  %v2290_v48 = vadd.f32 1.0, %v2226_v25  ;;  %2526 = vmatpush1.msra.mxu1 %v2357_v43  ;;  %v3039_v40 = vmov 1966171168  }
 0x28c   : > { %2456 = vmatprep.subr.mxu0 %v2352_v36  ;;  %v2353_v20 = vmul.f32 %v2289_v61, %v753_v28  ;;  %v2423_v10 = vshrl.u32 %v2422_v63, 7  ;;  %v2575_v39 = vunpack.c.l.s4 %v3039_v40  ;;  %vm2599_vm1 = vcmp.lt.s32.totalorder %v2422_v63, 512 }
 0x28d   : > { %v2354_v33 = vmul.f32 %v2290_v48, %v754_v32  ;;  %2457 = vmatpush1.msra.mxu0 %v2351_v37 }
 0x28e   : > { %2491 = vmatmul.mubr.f32.vlgmr.msra.gmra.mxu0 %v2415_v57  ;;  %v2424_v2 = vsub.s32 0, %v2423_v10  ;;  %v2576_v55 = vunpack.c.0.s8 %v2575_v39 }
 0x28f   : > { %2527 = vmatprep.subr.mxu1 %v2354_v33 }
 0x290   : > { %2528 = vmatpush1.msra.mxu1 %v2353_v20  ;;  %v2425_v31 = vrot.slane %v2420_v27, %v2424_v2  ;;  %v2579_v12 = vsub.s32 %v2576_v55, %v2423_v10 }
 0x291   : > { %2562 = vmatmul.mubr.f32.vlgmr.msra.gmra.mxu1 %v2415_v57 }
 0x34e   : > { %v2492_v59 = vpop.f32.mrf.mxu0 }
 0x34f   : > { %v2493_v9 = vadd.f32 %v2492_v59, %v2425_v31 }
 0x350   : > { %v2494_v0 = vpop.f32.mrf.mxu0 }
 0x351   : > { %v2563_v1 = vpop.f32.mrf.mxu1  ;;  %v2495_v38 = vadd.f32 %v2494_v0, %v2425_v31 }
 0x352   : > { %v2564_v52 = vadd.f32 %v2563_v1, %v2425_v31 }
 0x353   : > { %v2572_v42 = vcombine.low %v2493_v9, %v2495_v38  ;;  %v2565_v5 = vpop.f32.mrf.mxu1 }
 0x354   : > { %v2566_v29 = vadd.f32 %v2565_v5, %v2425_v31 }
 0x355   : > { %v2580_v16 = vrot.slane %v2572_v42, %v2579_v12 }
 0x356   : > { %v2573_v4 = vcombine.low %v2564_v52, %v2566_v29 }
 0x358   : > { %v2587_v47 = vrot.slane %v2573_v4, %v2579_v12 }
 0x35a   : > { %v2588_v34 = vcombine.low %v2580_v16, %v2587_v47 }
 0x35c   : > { %v2595_v3 = vrot.slane %v2588_v34, %v2579_v12 }
 0x35e   : > { %2601 = vst.msk [vmem:[%s262_s30] sm:$0xf] %vm2599_vm1, %v2595_v3 }
 0x35f PF: > { %s17_s22 = sadd.s32 1, %s3034_s22   ;;  %s4953_s20 = smov %s3030_s21 }
 0x360   : > { %p14_p5 = scmp.ge.s32.totalorder %s17_s22, 4   ;;  %s4954_s21 = smov %s4956_s4 }
 0x362   :  { %16 = sbr.rel (!%p14_p5) target bundleno = 3 (0x3), region = 70 }

</bundles_post_ra>
